<compile_context>
chip_gen: v5e
topology: v5e:2x2
jax: 0.10.0
libtpu: 0.0.40
codegen_flags: <defaults>
</compile_context>

<pallas_src>
import functools

import jax
import jax.numpy as jnp
from jax.experimental import pallas as pl
from jax.experimental.pallas import tpu as pltpu

NGF = 16
DILATIONS = (1, 3, 9, 1, 3, 9, 1, 3, 9)
BN_EPS = 1e-5
LEAKY_SLOPE = 0.2
MXU_DTYPE = jnp.bfloat16   # set to jnp.float32 for bit-closer f32 parity


def net_kernel(pos_ref, x_ref, w0_ref, bn_g_ref, bn_b_ref,
               rbw1_ref, rbw2_ref, rbb2_ref, wf_ref, o_ref, *, L):
    NL = x_ref.shape[-1]
    inv_nl = 1.0 / NL
    pos = pos_ref[...]                     # (1, N*L) int32: position t within sample
    mxu_dt = rbw1_ref.dtype

    def batch_norm(h, g, b):
        # training-mode BN, two-pass (numerically safe) biased variance.
        mean = jnp.sum(h, axis=-1, keepdims=True) * inv_nl          # (C, 1)
        c = h - mean
        var = jnp.sum(c * c, axis=-1, keepdims=True) * inv_nl       # (C, 1)
        return c * (jax.lax.rsqrt(var + BN_EPS) * g) + b

    def leaky_relu(h):
        # slope in (0,1) => max(h, slope*h) == LeakyReLU(h)
        return jnp.maximum(h, LEAKY_SLOPE * h)

    def taps(h, d):
        """Left/right taps of a ks=3 dilation-d conv under ReflectionPad1d(d).

        Main path: lane rolls by +/-d (XLU).  Boundary lanes (t < d for the
        left tap, t >= L-d for the right tap) simultaneously fix the
        cross-sample bleed of the whole-axis roll and apply the reflection:
        left tap at t needs h[d-t]  -> roll shift 2t-d
        right tap at t needs h[2L-2-d-t] -> roll shift 2(t-L)+2+d
        All fix values are read from the *original* rolled copies (dict).
        """
        rolls = {}

        def roll(s):
            s = s % NL
            if s not in rolls:
                rolls[s] = pltpu.roll(h, s, 1)
            return rolls[s]

        left, right = roll(d), roll(-d)
        for k in range(d):
            left = jnp.where(pos == k, roll(2 * k - d), left)
            right = jnp.where(pos == (L - d + k), roll(2 * k + 2 - d), right)
        return left, right

    # ---- stem: ReflectionPad1d(1) -> Conv1d(1->16,k3,no bias) -> BN -> LReLU
    x = x_ref[...]                                          # (1, N*L) f32
    xl, xr = taps(x, 1)
    w0 = w0_ref[...]                                        # (16, 3) f32
    # 1 input channel: three (16,1)*(1,NL) broadcast-MACs on the VPU.
    h = w0[:, 0:1] * xl + w0[:, 1:2] * x + w0[:, 2:3] * xr  # (16, N*L)
    h = leaky_relu(batch_norm(h, bn_g_ref[0], bn_b_ref[0]))

    # ---- 9 residual blocks (statically unrolled; dilations are static) ----
    for i, d in enumerate(DILATIONS):
        hl, hr = taps(h, d)
        # dilated k=3 conv as three accumulating (16,16)@(16,NL) MXU dots
        y = jnp.dot(rbw1_ref[i, 0], hl.astype(mxu_dt),
                    preferred_element_type=jnp.float32)
        y = y + jnp.dot(rbw1_ref[i, 1], h.astype(mxu_dt),
                        preferred_element_type=jnp.float32)
        y = y + jnp.dot(rbw1_ref[i, 2], hr.astype(mxu_dt),
                        preferred_element_type=jnp.float32)
        y = leaky_relu(batch_norm(y, bn_g_ref[i + 1], bn_b_ref[i + 1]))
        # 1x1 conv (with bias) + residual
        y = jnp.dot(rbw2_ref[i], y.astype(mxu_dt),
                    preferred_element_type=jnp.float32) + rbb2_ref[i]
        h = h + y

    # ---- final Conv1d(16 -> 1, k1, no bias): (1,16)@(16,NL) dot ----
    o_ref[...] = jnp.dot(wf_ref[...], h.astype(mxu_dt),
                         preferred_element_type=jnp.float32).astype(o_ref.dtype)


def init_params(key):
    """Deterministic init matching the module: conv/BN weights ~ N(1,0.02), biases 0.

    Weight layouts (to load real PyTorch weights instead):
      w0   (16, 3)         = stem_conv.weight[:, 0, :]                       (f32)
      rbw1 (9, 3, 16, 16)  = per block i, tap k: dilated_conv.weight[:, :, k] (MXU_DTYPE)
      rbw2 (9, 16, 16)     = conv1x1.weight[:, :, 0]   (MXU_DTYPE)
      rbb2 (9, 16, 1)      = conv1x1.bias[:, None]     (f32)
      wf   (1, 16)         = final_conv.weight[:, :, 0] (MXU_DTYPE)
    """
    ks = jax.random.split(key, 5)
    w0 = 1.0 + 0.02 * jax.random.normal(ks[0], (NGF, 3), jnp.float32)
    bn_g = 1.0 + 0.02 * jax.random.normal(ks[1], (10, NGF, 1), jnp.float32)
    bn_b = jnp.zeros((10, NGF, 1), jnp.float32)
    rbw1 = (1.0 + 0.02 * jax.random.normal(ks[2], (9, 3, NGF, NGF), jnp.float32)
            ).astype(MXU_DTYPE)
    rbw2 = (1.0 + 0.02 * jax.random.normal(ks[3], (9, NGF, NGF), jnp.float32)
            ).astype(MXU_DTYPE)
    rbb2 = jnp.zeros((9, NGF, 1), jnp.float32)
    wf = (1.0 + 0.02 * jax.random.normal(ks[4], (1, NGF), jnp.float32)
          ).astype(MXU_DTYPE)
    return (w0, bn_g, bn_b, rbw1, rbw2, rbb2, wf)


@jax.jit
def net_forward(x, pos, params):
    w0, bn_g, bn_b, rbw1, rbw2, rbb2, wf = params
    N, _, L = x.shape
    NL = N * L
    assert NL % 128 == 0, "N*L must be a multiple of 128 (lane-dense layout)"
    assert L > max(DILATIONS), "ReflectionPad1d requires L > max dilation"
    # (N,1,L) -> (1, N*L): pure row-major reflatten; sample n owns lanes [nL,(n+1)L)
    x_flat = x.reshape(1, NL)
    out_flat = pl.pallas_call(
        functools.partial(net_kernel, L=L),
        out_shape=jax.ShapeDtypeStruct((1, NL), jnp.float32),
        in_specs=[pl.BlockSpec(memory_space=pltpu.MemorySpace.VMEM)] * 9,
        out_specs=pl.BlockSpec(memory_space=pltpu.MemorySpace.VMEM),
        compiler_params=pltpu.CompilerParams(
            vmem_limit_bytes=32 * 1024 * 1024),
    )(pos, x_flat, w0, bn_g, bn_b, rbw1, rbw2, rbb2, wf)
    return out_flat.reshape(N, 1, L)


if __name__ == "__main__":
    key = jax.random.PRNGKey(0)
    kx, kp = jax.random.split(key)
    N, L = 2, 128                      # (batch, 1 channel, length) for Conv1d
    x = jax.random.normal(kx, (N, 1, L), jnp.float32)
    params = init_params(kp)
    # per-lane within-sample position index (int32), shape (1, N*L)
    pos = jnp.tile(jnp.arange(L, dtype=jnp.int32), N).reshape(1, N * L)

    out = net_forward(x, pos, params)
    jax.block_until_ready(out)

    assert out.shape == (N, 1, L), out.shape
    assert bool(jnp.all(jnp.isfinite(out)))
    print("KERNEL_OK")
</pallas_src>

<mosaic_0001>
module attributes {stable_mosaic.version = 11 : i64} {
  func.func @net_kernel(%arg0: memref<1x256xi32, #tpu.memory_space<vmem>>, %arg1: memref<1x256xf32, #tpu.memory_space<vmem>>, %arg2: memref<16x3xf32, #tpu.memory_space<vmem>>, %arg3: memref<10x16x1xf32, #tpu.memory_space<vmem>>, %arg4: memref<10x16x1xf32, #tpu.memory_space<vmem>>, %arg5: memref<9x3x16x16xbf16, #tpu.memory_space<vmem>>, %arg6: memref<9x16x16xbf16, #tpu.memory_space<vmem>>, %arg7: memref<9x16x1xf32, #tpu.memory_space<vmem>>, %arg8: memref<1x16xbf16, #tpu.memory_space<vmem>>, %arg9: memref<1x256xf32, #tpu.memory_space<vmem>>) attributes {dimension_semantics = [], scalar_prefetch = 0 : i64, scratch_operands = 0 : i64, tpu.core_type = #tpu.core_type<tc>} {
    %c0 = arith.constant 0 : index
    %c0_0 = arith.constant 0 : index
    %0 = vector.load %arg0[%c0, %c0_0] : memref<1x256xi32, #tpu.memory_space<vmem>>, vector<1x256xi32>
    %c0_1 = arith.constant 0 : index
    %c0_2 = arith.constant 0 : index
    %1 = vector.load %arg1[%c0_1, %c0_2] : memref<1x256xf32, #tpu.memory_space<vmem>>, vector<1x256xf32>
    %c1_i32 = arith.constant 1 : i32
    %2 = tpu.dynamic_rotate %1 by %c1_i32 dim 1 : vector<1x256xf32>, i32 -> vector<1x256xf32>
    %c255_i32 = arith.constant 255 : i32
    %3 = tpu.dynamic_rotate %1 by %c255_i32 dim 1 : vector<1x256xf32>, i32 -> vector<1x256xf32>
    %c0_i32 = arith.constant 0 : i32
    %4 = vector.broadcast %c0_i32 : i32 to vector<1x256xi32>
    %5 = arith.cmpi eq, %0, %4 : vector<1x256xi32>
    %6 = arith.select %5, %3, %2 : vector<1x256xi1>, vector<1x256xf32>
    %c127_i32 = arith.constant 127 : i32
    %7 = vector.broadcast %c127_i32 : i32 to vector<1x256xi32>
    %8 = arith.cmpi eq, %0, %7 : vector<1x256xi32>
    %9 = arith.select %8, %2, %3 : vector<1x256xi1>, vector<1x256xf32>
    %c0_3 = arith.constant 0 : index
    %c0_4 = arith.constant 0 : index
    %10 = vector.load %arg2[%c0_3, %c0_4] : memref<16x3xf32, #tpu.memory_space<vmem>>, vector<16x3xf32>
    %11 = vector.extract_strided_slice %10 {offsets = [0, 0], sizes = [16, 1], strides = [1, 1]} : vector<16x3xf32> to vector<16x1xf32>
    %12 = vector.broadcast %11 : vector<16x1xf32> to vector<16x256xf32>
    %13 = vector.broadcast %6 : vector<1x256xf32> to vector<16x256xf32>
    %14 = arith.mulf %12, %13 : vector<16x256xf32>
    %15 = vector.extract_strided_slice %10 {offsets = [0, 1], sizes = [16, 1], strides = [1, 1]} : vector<16x3xf32> to vector<16x1xf32>
    %16 = vector.broadcast %15 : vector<16x1xf32> to vector<16x256xf32>
    %17 = vector.broadcast %1 : vector<1x256xf32> to vector<16x256xf32>
    %18 = arith.mulf %16, %17 : vector<16x256xf32>
    %19 = arith.addf %14, %18 : vector<16x256xf32>
    %20 = vector.extract_strided_slice %10 {offsets = [0, 2], sizes = [16, 1], strides = [1, 1]} : vector<16x3xf32> to vector<16x1xf32>
    %21 = vector.broadcast %20 : vector<16x1xf32> to vector<16x256xf32>
    %22 = vector.broadcast %9 : vector<1x256xf32> to vector<16x256xf32>
    %23 = arith.mulf %21, %22 : vector<16x256xf32>
    %24 = arith.addf %19, %23 : vector<16x256xf32>
    %c0_5 = arith.constant 0 : index
    %c0_6 = arith.constant 0 : index
    %c0_7 = arith.constant 0 : index
    %25 = vector.load %arg3[%c0_5, %c0_6, %c0_7] : memref<10x16x1xf32, #tpu.memory_space<vmem>>, vector<1x16x1xf32>
    %26 = vector.shape_cast %25 : vector<1x16x1xf32> to vector<16x1xf32>
    %c0_8 = arith.constant 0 : index
    %c0_9 = arith.constant 0 : index
    %c0_10 = arith.constant 0 : index
    %27 = vector.load %arg4[%c0_8, %c0_9, %c0_10] : memref<10x16x1xf32, #tpu.memory_space<vmem>>, vector<1x16x1xf32>
    %28 = vector.shape_cast %27 : vector<1x16x1xf32> to vector<16x1xf32>
    %cst = arith.constant dense<0.000000e+00> : vector<16xf32>
    %29 = vector.multi_reduction <add>, %24, %cst [1] : vector<16x256xf32> to vector<16xf32>
    %30 = vector.shape_cast %29 : vector<16xf32> to vector<16x1xf32>
    %cst_11 = arith.constant 3.906250e-03 : f32
    %31 = vector.broadcast %cst_11 : f32 to vector<16x1xf32>
    %32 = arith.mulf %30, %31 : vector<16x1xf32>
    %33 = vector.broadcast %32 : vector<16x1xf32> to vector<16x256xf32>
    %34 = arith.subf %24, %33 : vector<16x256xf32>
    %35 = arith.mulf %34, %34 : vector<16x256xf32>
    %cst_12 = arith.constant dense<0.000000e+00> : vector<16xf32>
    %36 = vector.multi_reduction <add>, %35, %cst_12 [1] : vector<16x256xf32> to vector<16xf32>
    %37 = vector.shape_cast %36 : vector<16xf32> to vector<16x1xf32>
    %cst_13 = arith.constant 3.906250e-03 : f32
    %38 = vector.broadcast %cst_13 : f32 to vector<16x1xf32>
    %39 = arith.mulf %37, %38 : vector<16x1xf32>
    %cst_14 = arith.constant 9.99999974E-6 : f32
    %40 = vector.broadcast %cst_14 : f32 to vector<16x1xf32>
    %41 = arith.addf %39, %40 : vector<16x1xf32>
    %42 = math.rsqrt %41 : vector<16x1xf32>
    %43 = arith.mulf %42, %26 : vector<16x1xf32>
    %44 = vector.broadcast %43 : vector<16x1xf32> to vector<16x256xf32>
    %45 = arith.mulf %34, %44 : vector<16x256xf32>
    %46 = vector.broadcast %28 : vector<16x1xf32> to vector<16x256xf32>
    %47 = arith.addf %45, %46 : vector<16x256xf32>
    %cst_15 = arith.constant 2.000000e-01 : f32
    %48 = vector.broadcast %cst_15 : f32 to vector<16x256xf32>
    %49 = arith.mulf %48, %47 : vector<16x256xf32>
    %50 = arith.maximumf %47, %49 : vector<16x256xf32>
    %c1_i32_16 = arith.constant 1 : i32
    %51 = tpu.dynamic_rotate %50 by %c1_i32_16 dim 1 : vector<16x256xf32>, i32 -> vector<16x256xf32>
    %c255_i32_17 = arith.constant 255 : i32
    %52 = tpu.dynamic_rotate %50 by %c255_i32_17 dim 1 : vector<16x256xf32>, i32 -> vector<16x256xf32>
    %c0_i32_18 = arith.constant 0 : i32
    %53 = vector.broadcast %c0_i32_18 : i32 to vector<1x256xi32>
    %54 = arith.cmpi eq, %0, %53 : vector<1x256xi32>
    %55 = vector.shape_cast %54 : vector<1x256xi1> to vector<1x256xi1>
    %56 = vector.broadcast %55 : vector<1x256xi1> to vector<16x256xi1>
    %57 = arith.select %56, %52, %51 : vector<16x256xi1>, vector<16x256xf32>
    %c127_i32_19 = arith.constant 127 : i32
    %58 = vector.broadcast %c127_i32_19 : i32 to vector<1x256xi32>
    %59 = arith.cmpi eq, %0, %58 : vector<1x256xi32>
    %60 = vector.shape_cast %59 : vector<1x256xi1> to vector<1x256xi1>
    %61 = vector.broadcast %60 : vector<1x256xi1> to vector<16x256xi1>
    %62 = arith.select %61, %51, %52 : vector<16x256xi1>, vector<16x256xf32>
    %c0_20 = arith.constant 0 : index
    %c0_21 = arith.constant 0 : index
    %c0_22 = arith.constant 0 : index
    %c0_23 = arith.constant 0 : index
    %63 = vector.load %arg5[%c0_20, %c0_21, %c0_22, %c0_23] : memref<9x3x16x16xbf16, #tpu.memory_space<vmem>>, vector<1x1x16x16xbf16>
    %64 = vector.shape_cast %63 : vector<1x1x16x16xbf16> to vector<16x16xbf16>
    %65 = arith.truncf %57 : vector<16x256xf32> to vector<16x256xbf16>
    %cst_24 = arith.constant dense<0.000000e+00> : vector<16x256xf32>
    %66 = tpu.matmul %64, %65, %cst_24 {dimension_numbers = #tpu.dot_dimension_numbers<[1], [0], [0], [1], [0, 0, 1, 1], [], []>} : vector<16x16xbf16>, vector<16x256xbf16>, vector<16x256xf32> -> vector<16x256xf32>
    %c0_25 = arith.constant 0 : index
    %c1 = arith.constant 1 : index
    %c0_26 = arith.constant 0 : index
    %c0_27 = arith.constant 0 : index
    %67 = vector.load %arg5[%c0_25, %c1, %c0_26, %c0_27] : memref<9x3x16x16xbf16, #tpu.memory_space<vmem>>, vector<1x1x16x16xbf16>
    %68 = vector.shape_cast %67 : vector<1x1x16x16xbf16> to vector<16x16xbf16>
    %69 = arith.truncf %50 : vector<16x256xf32> to vector<16x256xbf16>
    %cst_28 = arith.constant dense<0.000000e+00> : vector<16x256xf32>
    %70 = tpu.matmul %68, %69, %cst_28 {dimension_numbers = #tpu.dot_dimension_numbers<[1], [0], [0], [1], [0, 0, 1, 1], [], []>} : vector<16x16xbf16>, vector<16x256xbf16>, vector<16x256xf32> -> vector<16x256xf32>
    %71 = arith.addf %66, %70 : vector<16x256xf32>
    %c0_29 = arith.constant 0 : index
    %c2 = arith.constant 2 : index
    %c0_30 = arith.constant 0 : index
    %c0_31 = arith.constant 0 : index
    %72 = vector.load %arg5[%c0_29, %c2, %c0_30, %c0_31] : memref<9x3x16x16xbf16, #tpu.memory_space<vmem>>, vector<1x1x16x16xbf16>
    %73 = vector.shape_cast %72 : vector<1x1x16x16xbf16> to vector<16x16xbf16>
    %74 = arith.truncf %62 : vector<16x256xf32> to vector<16x256xbf16>
    %cst_32 = arith.constant dense<0.000000e+00> : vector<16x256xf32>
    %75 = tpu.matmul %73, %74, %cst_32 {dimension_numbers = #tpu.dot_dimension_numbers<[1], [0], [0], [1], [0, 0, 1, 1], [], []>} : vector<16x16xbf16>, vector<16x256xbf16>, vector<16x256xf32> -> vector<16x256xf32>
    %76 = arith.addf %71, %75 : vector<16x256xf32>
    %c1_33 = arith.constant 1 : index
    %c0_34 = arith.constant 0 : index
    %c0_35 = arith.constant 0 : index
    %77 = vector.load %arg3[%c1_33, %c0_34, %c0_35] : memref<10x16x1xf32, #tpu.memory_space<vmem>>, vector<1x16x1xf32>
    %78 = vector.shape_cast %77 : vector<1x16x1xf32> to vector<16x1xf32>
    %c1_36 = arith.constant 1 : index
    %c0_37 = arith.constant 0 : index
    %c0_38 = arith.constant 0 : index
    %79 = vector.load %arg4[%c1_36, %c0_37, %c0_38] : memref<10x16x1xf32, #tpu.memory_space<vmem>>, vector<1x16x1xf32>
    %80 = vector.shape_cast %79 : vector<1x16x1xf32> to vector<16x1xf32>
    %cst_39 = arith.constant dense<0.000000e+00> : vector<16xf32>
    %81 = vector.multi_reduction <add>, %76, %cst_39 [1] : vector<16x256xf32> to vector<16xf32>
    %82 = vector.shape_cast %81 : vector<16xf32> to vector<16x1xf32>
    %cst_40 = arith.constant 3.906250e-03 : f32
    %83 = vector.broadcast %cst_40 : f32 to vector<16x1xf32>
    %84 = arith.mulf %82, %83 : vector<16x1xf32>
    %85 = vector.broadcast %84 : vector<16x1xf32> to vector<16x256xf32>
    %86 = arith.subf %76, %85 : vector<16x256xf32>
    %87 = arith.mulf %86, %86 : vector<16x256xf32>
    %cst_41 = arith.constant dense<0.000000e+00> : vector<16xf32>
    %88 = vector.multi_reduction <add>, %87, %cst_41 [1] : vector<16x256xf32> to vector<16xf32>
    %89 = vector.shape_cast %88 : vector<16xf32> to vector<16x1xf32>
    %cst_42 = arith.constant 3.906250e-03 : f32
    %90 = vector.broadcast %cst_42 : f32 to vector<16x1xf32>
    %91 = arith.mulf %89, %90 : vector<16x1xf32>
    %cst_43 = arith.constant 9.99999974E-6 : f32
    %92 = vector.broadcast %cst_43 : f32 to vector<16x1xf32>
    %93 = arith.addf %91, %92 : vector<16x1xf32>
    %94 = math.rsqrt %93 : vector<16x1xf32>
    %95 = arith.mulf %94, %78 : vector<16x1xf32>
    %96 = vector.broadcast %95 : vector<16x1xf32> to vector<16x256xf32>
    %97 = arith.mulf %86, %96 : vector<16x256xf32>
    %98 = vector.broadcast %80 : vector<16x1xf32> to vector<16x256xf32>
    %99 = arith.addf %97, %98 : vector<16x256xf32>
    %cst_44 = arith.constant 2.000000e-01 : f32
    %100 = vector.broadcast %cst_44 : f32 to vector<16x256xf32>
    %101 = arith.mulf %100, %99 : vector<16x256xf32>
    %102 = arith.maximumf %99, %101 : vector<16x256xf32>
    %c0_45 = arith.constant 0 : index
    %c0_46 = arith.constant 0 : index
    %c0_47 = arith.constant 0 : index
    %103 = vector.load %arg6[%c0_45, %c0_46, %c0_47] : memref<9x16x16xbf16, #tpu.memory_space<vmem>>, vector<1x16x16xbf16>
    %104 = vector.shape_cast %103 : vector<1x16x16xbf16> to vector<16x16xbf16>
    %105 = arith.truncf %102 : vector<16x256xf32> to vector<16x256xbf16>
    %cst_48 = arith.constant dense<0.000000e+00> : vector<16x256xf32>
    %106 = tpu.matmul %104, %105, %cst_48 {dimension_numbers = #tpu.dot_dimension_numbers<[1], [0], [0], [1], [0, 0, 1, 1], [], []>} : vector<16x16xbf16>, vector<16x256xbf16>, vector<16x256xf32> -> vector<16x256xf32>
    %c0_49 = arith.constant 0 : index
    %c0_50 = arith.constant 0 : index
    %c0_51 = arith.constant 0 : index
    %107 = vector.load %arg7[%c0_49, %c0_50, %c0_51] : memref<9x16x1xf32, #tpu.memory_space<vmem>>, vector<1x16x1xf32>
    %108 = vector.shape_cast %107 : vector<1x16x1xf32> to vector<16x1xf32>
    %109 = vector.broadcast %108 : vector<16x1xf32> to vector<16x256xf32>
    %110 = arith.addf %106, %109 : vector<16x256xf32>
    %111 = arith.addf %50, %110 : vector<16x256xf32>
    %c3_i32 = arith.constant 3 : i32
    %112 = tpu.dynamic_rotate %111 by %c3_i32 dim 1 : vector<16x256xf32>, i32 -> vector<16x256xf32>
    %c253_i32 = arith.constant 253 : i32
    %113 = tpu.dynamic_rotate %111 by %c253_i32 dim 1 : vector<16x256xf32>, i32 -> vector<16x256xf32>
    %c0_i32_52 = arith.constant 0 : i32
    %114 = vector.broadcast %c0_i32_52 : i32 to vector<1x256xi32>
    %115 = arith.cmpi eq, %0, %114 : vector<1x256xi32>
    %116 = vector.shape_cast %115 : vector<1x256xi1> to vector<1x256xi1>
    %117 = vector.broadcast %116 : vector<1x256xi1> to vector<16x256xi1>
    %118 = arith.select %117, %113, %112 : vector<16x256xi1>, vector<16x256xf32>
    %c125_i32 = arith.constant 125 : i32
    %119 = vector.broadcast %c125_i32 : i32 to vector<1x256xi32>
    %120 = arith.cmpi eq, %0, %119 : vector<1x256xi32>
    %c255_i32_53 = arith.constant 255 : i32
    %121 = tpu.dynamic_rotate %111 by %c255_i32_53 dim 1 : vector<16x256xf32>, i32 -> vector<16x256xf32>
    %122 = vector.shape_cast %120 : vector<1x256xi1> to vector<1x256xi1>
    %123 = vector.broadcast %122 : vector<1x256xi1> to vector<16x256xi1>
    %124 = arith.select %123, %121, %113 : vector<16x256xi1>, vector<16x256xf32>
    %c1_i32_54 = arith.constant 1 : i32
    %125 = vector.broadcast %c1_i32_54 : i32 to vector<1x256xi32>
    %126 = arith.cmpi eq, %0, %125 : vector<1x256xi32>
    %127 = vector.shape_cast %126 : vector<1x256xi1> to vector<1x256xi1>
    %128 = vector.broadcast %127 : vector<1x256xi1> to vector<16x256xi1>
    %129 = arith.select %128, %121, %118 : vector<16x256xi1>, vector<16x256xf32>
    %c126_i32 = arith.constant 126 : i32
    %130 = vector.broadcast %c126_i32 : i32 to vector<1x256xi32>
    %131 = arith.cmpi eq, %0, %130 : vector<1x256xi32>
    %c1_i32_55 = arith.constant 1 : i32
    %132 = tpu.dynamic_rotate %111 by %c1_i32_55 dim 1 : vector<16x256xf32>, i32 -> vector<16x256xf32>
    %133 = vector.shape_cast %131 : vector<1x256xi1> to vector<1x256xi1>
    %134 = vector.broadcast %133 : vector<1x256xi1> to vector<16x256xi1>
    %135 = arith.select %134, %132, %124 : vector<16x256xi1>, vector<16x256xf32>
    %c2_i32 = arith.constant 2 : i32
    %136 = vector.broadcast %c2_i32 : i32 to vector<1x256xi32>
    %137 = arith.cmpi eq, %0, %136 : vector<1x256xi32>
    %138 = vector.shape_cast %137 : vector<1x256xi1> to vector<1x256xi1>
    %139 = vector.broadcast %138 : vector<1x256xi1> to vector<16x256xi1>
    %140 = arith.select %139, %132, %129 : vector<16x256xi1>, vector<16x256xf32>
    %c127_i32_56 = arith.constant 127 : i32
    %141 = vector.broadcast %c127_i32_56 : i32 to vector<1x256xi32>
    %142 = arith.cmpi eq, %0, %141 : vector<1x256xi32>
    %143 = vector.shape_cast %142 : vector<1x256xi1> to vector<1x256xi1>
    %144 = vector.broadcast %143 : vector<1x256xi1> to vector<16x256xi1>
    %145 = arith.select %144, %112, %135 : vector<16x256xi1>, vector<16x256xf32>
    %c1_57 = arith.constant 1 : index
    %c0_58 = arith.constant 0 : index
    %c0_59 = arith.constant 0 : index
    %c0_60 = arith.constant 0 : index
    %146 = vector.load %arg5[%c1_57, %c0_58, %c0_59, %c0_60] : memref<9x3x16x16xbf16, #tpu.memory_space<vmem>>, vector<1x1x16x16xbf16>
    %147 = vector.shape_cast %146 : vector<1x1x16x16xbf16> to vector<16x16xbf16>
    %148 = arith.truncf %140 : vector<16x256xf32> to vector<16x256xbf16>
    %cst_61 = arith.constant dense<0.000000e+00> : vector<16x256xf32>
    %149 = tpu.matmul %147, %148, %cst_61 {dimension_numbers = #tpu.dot_dimension_numbers<[1], [0], [0], [1], [0, 0, 1, 1], [], []>} : vector<16x16xbf16>, vector<16x256xbf16>, vector<16x256xf32> -> vector<16x256xf32>
    %c1_62 = arith.constant 1 : index
    %c1_63 = arith.constant 1 : index
    %c0_64 = arith.constant 0 : index
    %c0_65 = arith.constant 0 : index
    %150 = vector.load %arg5[%c1_62, %c1_63, %c0_64, %c0_65] : memref<9x3x16x16xbf16, #tpu.memory_space<vmem>>, vector<1x1x16x16xbf16>
    %151 = vector.shape_cast %150 : vector<1x1x16x16xbf16> to vector<16x16xbf16>
    %152 = arith.truncf %111 : vector<16x256xf32> to vector<16x256xbf16>
    %cst_66 = arith.constant dense<0.000000e+00> : vector<16x256xf32>
    %153 = tpu.matmul %151, %152, %cst_66 {dimension_numbers = #tpu.dot_dimension_numbers<[1], [0], [0], [1], [0, 0, 1, 1], [], []>} : vector<16x16xbf16>, vector<16x256xbf16>, vector<16x256xf32> -> vector<16x256xf32>
    %154 = arith.addf %149, %153 : vector<16x256xf32>
    %c1_67 = arith.constant 1 : index
    %c2_68 = arith.constant 2 : index
    %c0_69 = arith.constant 0 : index
    %c0_70 = arith.constant 0 : index
    %155 = vector.load %arg5[%c1_67, %c2_68, %c0_69, %c0_70] : memref<9x3x16x16xbf16, #tpu.memory_space<vmem>>, vector<1x1x16x16xbf16>
    %156 = vector.shape_cast %155 : vector<1x1x16x16xbf16> to vector<16x16xbf16>
    %157 = arith.truncf %145 : vector<16x256xf32> to vector<16x256xbf16>
    %cst_71 = arith.constant dense<0.000000e+00> : vector<16x256xf32>
    %158 = tpu.matmul %156, %157, %cst_71 {dimension_numbers = #tpu.dot_dimension_numbers<[1], [0], [0], [1], [0, 0, 1, 1], [], []>} : vector<16x16xbf16>, vector<16x256xbf16>, vector<16x256xf32> -> vector<16x256xf32>
    %159 = arith.addf %154, %158 : vector<16x256xf32>
    %c2_72 = arith.constant 2 : index
    %c0_73 = arith.constant 0 : index
    %c0_74 = arith.constant 0 : index
    %160 = vector.load %arg3[%c2_72, %c0_73, %c0_74] : memref<10x16x1xf32, #tpu.memory_space<vmem>>, vector<1x16x1xf32>
    %161 = vector.shape_cast %160 : vector<1x16x1xf32> to vector<16x1xf32>
    %c2_75 = arith.constant 2 : index
    %c0_76 = arith.constant 0 : index
    %c0_77 = arith.constant 0 : index
    %162 = vector.load %arg4[%c2_75, %c0_76, %c0_77] : memref<10x16x1xf32, #tpu.memory_space<vmem>>, vector<1x16x1xf32>
    %163 = vector.shape_cast %162 : vector<1x16x1xf32> to vector<16x1xf32>
    %cst_78 = arith.constant dense<0.000000e+00> : vector<16xf32>
    %164 = vector.multi_reduction <add>, %159, %cst_78 [1] : vector<16x256xf32> to vector<16xf32>
    %165 = vector.shape_cast %164 : vector<16xf32> to vector<16x1xf32>
    %cst_79 = arith.constant 3.906250e-03 : f32
    %166 = vector.broadcast %cst_79 : f32 to vector<16x1xf32>
    %167 = arith.mulf %165, %166 : vector<16x1xf32>
    %168 = vector.broadcast %167 : vector<16x1xf32> to vector<16x256xf32>
    %169 = arith.subf %159, %168 : vector<16x256xf32>
    %170 = arith.mulf %169, %169 : vector<16x256xf32>
    %cst_80 = arith.constant dense<0.000000e+00> : vector<16xf32>
    %171 = vector.multi_reduction <add>, %170, %cst_80 [1] : vector<16x256xf32> to vector<16xf32>
    %172 = vector.shape_cast %171 : vector<16xf32> to vector<16x1xf32>
    %cst_81 = arith.constant 3.906250e-03 : f32
    %173 = vector.broadcast %cst_81 : f32 to vector<16x1xf32>
    %174 = arith.mulf %172, %173 : vector<16x1xf32>
    %cst_82 = arith.constant 9.99999974E-6 : f32
    %175 = vector.broadcast %cst_82 : f32 to vector<16x1xf32>
    %176 = arith.addf %174, %175 : vector<16x1xf32>
    %177 = math.rsqrt %176 : vector<16x1xf32>
    %178 = arith.mulf %177, %161 : vector<16x1xf32>
    %179 = vector.broadcast %178 : vector<16x1xf32> to vector<16x256xf32>
    %180 = arith.mulf %169, %179 : vector<16x256xf32>
    %181 = vector.broadcast %163 : vector<16x1xf32> to vector<16x256xf32>
    %182 = arith.addf %180, %181 : vector<16x256xf32>
    %cst_83 = arith.constant 2.000000e-01 : f32
    %183 = vector.broadcast %cst_83 : f32 to vector<16x256xf32>
    %184 = arith.mulf %183, %182 : vector<16x256xf32>
    %185 = arith.maximumf %182, %184 : vector<16x256xf32>
    %c1_84 = arith.constant 1 : index
    %c0_85 = arith.constant 0 : index
    %c0_86 = arith.constant 0 : index
    %186 = vector.load %arg6[%c1_84, %c0_85, %c0_86] : memref<9x16x16xbf16, #tpu.memory_space<vmem>>, vector<1x16x16xbf16>
    %187 = vector.shape_cast %186 : vector<1x16x16xbf16> to vector<16x16xbf16>
    %188 = arith.truncf %185 : vector<16x256xf32> to vector<16x256xbf16>
    %cst_87 = arith.constant dense<0.000000e+00> : vector<16x256xf32>
    %189 = tpu.matmul %187, %188, %cst_87 {dimension_numbers = #tpu.dot_dimension_numbers<[1], [0], [0], [1], [0, 0, 1, 1], [], []>} : vector<16x16xbf16>, vector<16x256xbf16>, vector<16x256xf32> -> vector<16x256xf32>
    %c1_88 = arith.constant 1 : index
    %c0_89 = arith.constant 0 : index
    %c0_90 = arith.constant 0 : index
    %190 = vector.load %arg7[%c1_88, %c0_89, %c0_90] : memref<9x16x1xf32, #tpu.memory_space<vmem>>, vector<1x16x1xf32>
    %191 = vector.shape_cast %190 : vector<1x16x1xf32> to vector<16x1xf32>
    %192 = vector.broadcast %191 : vector<16x1xf32> to vector<16x256xf32>
    %193 = arith.addf %189, %192 : vector<16x256xf32>
    %194 = arith.addf %111, %193 : vector<16x256xf32>
    %c9_i32 = arith.constant 9 : i32
    %195 = tpu.dynamic_rotate %194 by %c9_i32 dim 1 : vector<16x256xf32>, i32 -> vector<16x256xf32>
    %c247_i32 = arith.constant 247 : i32
    %196 = tpu.dynamic_rotate %194 by %c247_i32 dim 1 : vector<16x256xf32>, i32 -> vector<16x256xf32>
    %c0_i32_91 = arith.constant 0 : i32
    %197 = vector.broadcast %c0_i32_91 : i32 to vector<1x256xi32>
    %198 = arith.cmpi eq, %0, %197 : vector<1x256xi32>
    %199 = vector.shape_cast %198 : vector<1x256xi1> to vector<1x256xi1>
    %200 = vector.broadcast %199 : vector<1x256xi1> to vector<16x256xi1>
    %201 = arith.select %200, %196, %195 : vector<16x256xi1>, vector<16x256xf32>
    %c119_i32 = arith.constant 119 : i32
    %202 = vector.broadcast %c119_i32 : i32 to vector<1x256xi32>
    %203 = arith.cmpi eq, %0, %202 : vector<1x256xi32>
    %c249_i32 = arith.constant 249 : i32
    %204 = tpu.dynamic_rotate %194 by %c249_i32 dim 1 : vector<16x256xf32>, i32 -> vector<16x256xf32>
    %205 = vector.shape_cast %203 : vector<1x256xi1> to vector<1x256xi1>
    %206 = vector.broadcast %205 : vector<1x256xi1> to vector<16x256xi1>
    %207 = arith.select %206, %204, %196 : vector<16x256xi1>, vector<16x256xf32>
    %c1_i32_92 = arith.constant 1 : i32
    %208 = vector.broadcast %c1_i32_92 : i32 to vector<1x256xi32>
    %209 = arith.cmpi eq, %0, %208 : vector<1x256xi32>
    %210 = vector.shape_cast %209 : vector<1x256xi1> to vector<1x256xi1>
    %211 = vector.broadcast %210 : vector<1x256xi1> to vector<16x256xi1>
    %212 = arith.select %211, %204, %201 : vector<16x256xi1>, vector<16x256xf32>
    %c120_i32 = arith.constant 120 : i32
    %213 = vector.broadcast %c120_i32 : i32 to vector<1x256xi32>
    %214 = arith.cmpi eq, %0, %213 : vector<1x256xi32>
    %c251_i32 = arith.constant 251 : i32
    %215 = tpu.dynamic_rotate %194 by %c251_i32 dim 1 : vector<16x256xf32>, i32 -> vector<16x256xf32>
    %216 = vector.shape_cast %214 : vector<1x256xi1> to vector<1x256xi1>
    %217 = vector.broadcast %216 : vector<1x256xi1> to vector<16x256xi1>
    %218 = arith.select %217, %215, %207 : vector<16x256xi1>, vector<16x256xf32>
    %c2_i32_93 = arith.constant 2 : i32
    %219 = vector.broadcast %c2_i32_93 : i32 to vector<1x256xi32>
    %220 = arith.cmpi eq, %0, %219 : vector<1x256xi32>
    %221 = vector.shape_cast %220 : vector<1x256xi1> to vector<1x256xi1>
    %222 = vector.broadcast %221 : vector<1x256xi1> to vector<16x256xi1>
    %223 = arith.select %222, %215, %212 : vector<16x256xi1>, vector<16x256xf32>
    %c121_i32 = arith.constant 121 : i32
    %224 = vector.broadcast %c121_i32 : i32 to vector<1x256xi32>
    %225 = arith.cmpi eq, %0, %224 : vector<1x256xi32>
    %c253_i32_94 = arith.constant 253 : i32
    %226 = tpu.dynamic_rotate %194 by %c253_i32_94 dim 1 : vector<16x256xf32>, i32 -> vector<16x256xf32>
    %227 = vector.shape_cast %225 : vector<1x256xi1> to vector<1x256xi1>
    %228 = vector.broadcast %227 : vector<1x256xi1> to vector<16x256xi1>
    %229 = arith.select %228, %226, %218 : vector<16x256xi1>, vector<16x256xf32>
    %c3_i32_95 = arith.constant 3 : i32
    %230 = vector.broadcast %c3_i32_95 : i32 to vector<1x256xi32>
    %231 = arith.cmpi eq, %0, %230 : vector<1x256xi32>
    %232 = vector.shape_cast %231 : vector<1x256xi1> to vector<1x256xi1>
    %233 = vector.broadcast %232 : vector<1x256xi1> to vector<16x256xi1>
    %234 = arith.select %233, %226, %223 : vector<16x256xi1>, vector<16x256xf32>
    %c122_i32 = arith.constant 122 : i32
    %235 = vector.broadcast %c122_i32 : i32 to vector<1x256xi32>
    %236 = arith.cmpi eq, %0, %235 : vector<1x256xi32>
    %c255_i32_96 = arith.constant 255 : i32
    %237 = tpu.dynamic_rotate %194 by %c255_i32_96 dim 1 : vector<16x256xf32>, i32 -> vector<16x256xf32>
    %238 = vector.shape_cast %236 : vector<1x256xi1> to vector<1x256xi1>
    %239 = vector.broadcast %238 : vector<1x256xi1> to vector<16x256xi1>
    %240 = arith.select %239, %237, %229 : vector<16x256xi1>, vector<16x256xf32>
    %c4_i32 = arith.constant 4 : i32
    %241 = vector.broadcast %c4_i32 : i32 to vector<1x256xi32>
    %242 = arith.cmpi eq, %0, %241 : vector<1x256xi32>
    %243 = vector.shape_cast %242 : vector<1x256xi1> to vector<1x256xi1>
    %244 = vector.broadcast %243 : vector<1x256xi1> to vector<16x256xi1>
    %245 = arith.select %244, %237, %234 : vector<16x256xi1>, vector<16x256xf32>
    %c123_i32 = arith.constant 123 : i32
    %246 = vector.broadcast %c123_i32 : i32 to vector<1x256xi32>
    %247 = arith.cmpi eq, %0, %246 : vector<1x256xi32>
    %c1_i32_97 = arith.constant 1 : i32
    %248 = tpu.dynamic_rotate %194 by %c1_i32_97 dim 1 : vector<16x256xf32>, i32 -> vector<16x256xf32>
    %249 = vector.shape_cast %247 : vector<1x256xi1> to vector<1x256xi1>
    %250 = vector.broadcast %249 : vector<1x256xi1> to vector<16x256xi1>
    %251 = arith.select %250, %248, %240 : vector<16x256xi1>, vector<16x256xf32>
    %c5_i32 = arith.constant 5 : i32
    %252 = vector.broadcast %c5_i32 : i32 to vector<1x256xi32>
    %253 = arith.cmpi eq, %0, %252 : vector<1x256xi32>
    %254 = vector.shape_cast %253 : vector<1x256xi1> to vector<1x256xi1>
    %255 = vector.broadcast %254 : vector<1x256xi1> to vector<16x256xi1>
    %256 = arith.select %255, %248, %245 : vector<16x256xi1>, vector<16x256xf32>
    %c124_i32 = arith.constant 124 : i32
    %257 = vector.broadcast %c124_i32 : i32 to vector<1x256xi32>
    %258 = arith.cmpi eq, %0, %257 : vector<1x256xi32>
    %c3_i32_98 = arith.constant 3 : i32
    %259 = tpu.dynamic_rotate %194 by %c3_i32_98 dim 1 : vector<16x256xf32>, i32 -> vector<16x256xf32>
    %260 = vector.shape_cast %258 : vector<1x256xi1> to vector<1x256xi1>
    %261 = vector.broadcast %260 : vector<1x256xi1> to vector<16x256xi1>
    %262 = arith.select %261, %259, %251 : vector<16x256xi1>, vector<16x256xf32>
    %c6_i32 = arith.constant 6 : i32
    %263 = vector.broadcast %c6_i32 : i32 to vector<1x256xi32>
    %264 = arith.cmpi eq, %0, %263 : vector<1x256xi32>
    %265 = vector.shape_cast %264 : vector<1x256xi1> to vector<1x256xi1>
    %266 = vector.broadcast %265 : vector<1x256xi1> to vector<16x256xi1>
    %267 = arith.select %266, %259, %256 : vector<16x256xi1>, vector<16x256xf32>
    %c125_i32_99 = arith.constant 125 : i32
    %268 = vector.broadcast %c125_i32_99 : i32 to vector<1x256xi32>
    %269 = arith.cmpi eq, %0, %268 : vector<1x256xi32>
    %c5_i32_100 = arith.constant 5 : i32
    %270 = tpu.dynamic_rotate %194 by %c5_i32_100 dim 1 : vector<16x256xf32>, i32 -> vector<16x256xf32>
    %271 = vector.shape_cast %269 : vector<1x256xi1> to vector<1x256xi1>
    %272 = vector.broadcast %271 : vector<1x256xi1> to vector<16x256xi1>
    %273 = arith.select %272, %270, %262 : vector<16x256xi1>, vector<16x256xf32>
    %c7_i32 = arith.constant 7 : i32
    %274 = vector.broadcast %c7_i32 : i32 to vector<1x256xi32>
    %275 = arith.cmpi eq, %0, %274 : vector<1x256xi32>
    %276 = vector.shape_cast %275 : vector<1x256xi1> to vector<1x256xi1>
    %277 = vector.broadcast %276 : vector<1x256xi1> to vector<16x256xi1>
    %278 = arith.select %277, %270, %267 : vector<16x256xi1>, vector<16x256xf32>
    %c126_i32_101 = arith.constant 126 : i32
    %279 = vector.broadcast %c126_i32_101 : i32 to vector<1x256xi32>
    %280 = arith.cmpi eq, %0, %279 : vector<1x256xi32>
    %c7_i32_102 = arith.constant 7 : i32
    %281 = tpu.dynamic_rotate %194 by %c7_i32_102 dim 1 : vector<16x256xf32>, i32 -> vector<16x256xf32>
    %282 = vector.shape_cast %280 : vector<1x256xi1> to vector<1x256xi1>
    %283 = vector.broadcast %282 : vector<1x256xi1> to vector<16x256xi1>
    %284 = arith.select %283, %281, %273 : vector<16x256xi1>, vector<16x256xf32>
    %c8_i32 = arith.constant 8 : i32
    %285 = vector.broadcast %c8_i32 : i32 to vector<1x256xi32>
    %286 = arith.cmpi eq, %0, %285 : vector<1x256xi32>
    %287 = vector.shape_cast %286 : vector<1x256xi1> to vector<1x256xi1>
    %288 = vector.broadcast %287 : vector<1x256xi1> to vector<16x256xi1>
    %289 = arith.select %288, %281, %278 : vector<16x256xi1>, vector<16x256xf32>
    %c127_i32_103 = arith.constant 127 : i32
    %290 = vector.broadcast %c127_i32_103 : i32 to vector<1x256xi32>
    %291 = arith.cmpi eq, %0, %290 : vector<1x256xi32>
    %292 = vector.shape_cast %291 : vector<1x256xi1> to vector<1x256xi1>
    %293 = vector.broadcast %292 : vector<1x256xi1> to vector<16x256xi1>
    %294 = arith.select %293, %195, %284 : vector<16x256xi1>, vector<16x256xf32>
    %c2_104 = arith.constant 2 : index
    %c0_105 = arith.constant 0 : index
    %c0_106 = arith.constant 0 : index
    %c0_107 = arith.constant 0 : index
    %295 = vector.load %arg5[%c2_104, %c0_105, %c0_106, %c0_107] : memref<9x3x16x16xbf16, #tpu.memory_space<vmem>>, vector<1x1x16x16xbf16>
    %296 = vector.shape_cast %295 : vector<1x1x16x16xbf16> to vector<16x16xbf16>
    %297 = arith.truncf %289 : vector<16x256xf32> to vector<16x256xbf16>
    %cst_108 = arith.constant dense<0.000000e+00> : vector<16x256xf32>
    %298 = tpu.matmul %296, %297, %cst_108 {dimension_numbers = #tpu.dot_dimension_numbers<[1], [0], [0], [1], [0, 0, 1, 1], [], []>} : vector<16x16xbf16>, vector<16x256xbf16>, vector<16x256xf32> -> vector<16x256xf32>
    %c2_109 = arith.constant 2 : index
    %c1_110 = arith.constant 1 : index
    %c0_111 = arith.constant 0 : index
    %c0_112 = arith.constant 0 : index
    %299 = vector.load %arg5[%c2_109, %c1_110, %c0_111, %c0_112] : memref<9x3x16x16xbf16, #tpu.memory_space<vmem>>, vector<1x1x16x16xbf16>
    %300 = vector.shape_cast %299 : vector<1x1x16x16xbf16> to vector<16x16xbf16>
    %301 = arith.truncf %194 : vector<16x256xf32> to vector<16x256xbf16>
    %cst_113 = arith.constant dense<0.000000e+00> : vector<16x256xf32>
    %302 = tpu.matmul %300, %301, %cst_113 {dimension_numbers = #tpu.dot_dimension_numbers<[1], [0], [0], [1], [0, 0, 1, 1], [], []>} : vector<16x16xbf16>, vector<16x256xbf16>, vector<16x256xf32> -> vector<16x256xf32>
    %303 = arith.addf %298, %302 : vector<16x256xf32>
    %c2_114 = arith.constant 2 : index
    %c2_115 = arith.constant 2 : index
    %c0_116 = arith.constant 0 : index
    %c0_117 = arith.constant 0 : index
    %304 = vector.load %arg5[%c2_114, %c2_115, %c0_116, %c0_117] : memref<9x3x16x16xbf16, #tpu.memory_space<vmem>>, vector<1x1x16x16xbf16>
    %305 = vector.shape_cast %304 : vector<1x1x16x16xbf16> to vector<16x16xbf16>
    %306 = arith.truncf %294 : vector<16x256xf32> to vector<16x256xbf16>
    %cst_118 = arith.constant dense<0.000000e+00> : vector<16x256xf32>
    %307 = tpu.matmul %305, %306, %cst_118 {dimension_numbers = #tpu.dot_dimension_numbers<[1], [0], [0], [1], [0, 0, 1, 1], [], []>} : vector<16x16xbf16>, vector<16x256xbf16>, vector<16x256xf32> -> vector<16x256xf32>
    %308 = arith.addf %303, %307 : vector<16x256xf32>
    %c3 = arith.constant 3 : index
    %c0_119 = arith.constant 0 : index
    %c0_120 = arith.constant 0 : index
    %309 = vector.load %arg3[%c3, %c0_119, %c0_120] : memref<10x16x1xf32, #tpu.memory_space<vmem>>, vector<1x16x1xf32>
    %310 = vector.shape_cast %309 : vector<1x16x1xf32> to vector<16x1xf32>
    %c3_121 = arith.constant 3 : index
    %c0_122 = arith.constant 0 : index
    %c0_123 = arith.constant 0 : index
    %311 = vector.load %arg4[%c3_121, %c0_122, %c0_123] : memref<10x16x1xf32, #tpu.memory_space<vmem>>, vector<1x16x1xf32>
    %312 = vector.shape_cast %311 : vector<1x16x1xf32> to vector<16x1xf32>
    %cst_124 = arith.constant dense<0.000000e+00> : vector<16xf32>
    %313 = vector.multi_reduction <add>, %308, %cst_124 [1] : vector<16x256xf32> to vector<16xf32>
    %314 = vector.shape_cast %313 : vector<16xf32> to vector<16x1xf32>
    %cst_125 = arith.constant 3.906250e-03 : f32
    %315 = vector.broadcast %cst_125 : f32 to vector<16x1xf32>
    %316 = arith.mulf %314, %315 : vector<16x1xf32>
    %317 = vector.broadcast %316 : vector<16x1xf32> to vector<16x256xf32>
    %318 = arith.subf %308, %317 : vector<16x256xf32>
    %319 = arith.mulf %318, %318 : vector<16x256xf32>
    %cst_126 = arith.constant dense<0.000000e+00> : vector<16xf32>
    %320 = vector.multi_reduction <add>, %319, %cst_126 [1] : vector<16x256xf32> to vector<16xf32>
    %321 = vector.shape_cast %320 : vector<16xf32> to vector<16x1xf32>
    %cst_127 = arith.constant 3.906250e-03 : f32
    %322 = vector.broadcast %cst_127 : f32 to vector<16x1xf32>
    %323 = arith.mulf %321, %322 : vector<16x1xf32>
    %cst_128 = arith.constant 9.99999974E-6 : f32
    %324 = vector.broadcast %cst_128 : f32 to vector<16x1xf32>
    %325 = arith.addf %323, %324 : vector<16x1xf32>
    %326 = math.rsqrt %325 : vector<16x1xf32>
    %327 = arith.mulf %326, %310 : vector<16x1xf32>
    %328 = vector.broadcast %327 : vector<16x1xf32> to vector<16x256xf32>
    %329 = arith.mulf %318, %328 : vector<16x256xf32>
    %330 = vector.broadcast %312 : vector<16x1xf32> to vector<16x256xf32>
    %331 = arith.addf %329, %330 : vector<16x256xf32>
    %cst_129 = arith.constant 2.000000e-01 : f32
    %332 = vector.broadcast %cst_129 : f32 to vector<16x256xf32>
    %333 = arith.mulf %332, %331 : vector<16x256xf32>
    %334 = arith.maximumf %331, %333 : vector<16x256xf32>
    %c2_130 = arith.constant 2 : index
    %c0_131 = arith.constant 0 : index
    %c0_132 = arith.constant 0 : index
    %335 = vector.load %arg6[%c2_130, %c0_131, %c0_132] : memref<9x16x16xbf16, #tpu.memory_space<vmem>>, vector<1x16x16xbf16>
    %336 = vector.shape_cast %335 : vector<1x16x16xbf16> to vector<16x16xbf16>
    %337 = arith.truncf %334 : vector<16x256xf32> to vector<16x256xbf16>
    %cst_133 = arith.constant dense<0.000000e+00> : vector<16x256xf32>
    %338 = tpu.matmul %336, %337, %cst_133 {dimension_numbers = #tpu.dot_dimension_numbers<[1], [0], [0], [1], [0, 0, 1, 1], [], []>} : vector<16x16xbf16>, vector<16x256xbf16>, vector<16x256xf32> -> vector<16x256xf32>
    %c2_134 = arith.constant 2 : index
    %c0_135 = arith.constant 0 : index
    %c0_136 = arith.constant 0 : index
    %339 = vector.load %arg7[%c2_134, %c0_135, %c0_136] : memref<9x16x1xf32, #tpu.memory_space<vmem>>, vector<1x16x1xf32>
    %340 = vector.shape_cast %339 : vector<1x16x1xf32> to vector<16x1xf32>
    %341 = vector.broadcast %340 : vector<16x1xf32> to vector<16x256xf32>
    %342 = arith.addf %338, %341 : vector<16x256xf32>
    %343 = arith.addf %194, %342 : vector<16x256xf32>
    %c1_i32_137 = arith.constant 1 : i32
    %344 = tpu.dynamic_rotate %343 by %c1_i32_137 dim 1 : vector<16x256xf32>, i32 -> vector<16x256xf32>
    %c255_i32_138 = arith.constant 255 : i32
    %345 = tpu.dynamic_rotate %343 by %c255_i32_138 dim 1 : vector<16x256xf32>, i32 -> vector<16x256xf32>
    %c0_i32_139 = arith.constant 0 : i32
    %346 = vector.broadcast %c0_i32_139 : i32 to vector<1x256xi32>
    %347 = arith.cmpi eq, %0, %346 : vector<1x256xi32>
    %348 = vector.shape_cast %347 : vector<1x256xi1> to vector<1x256xi1>
    %349 = vector.broadcast %348 : vector<1x256xi1> to vector<16x256xi1>
    %350 = arith.select %349, %345, %344 : vector<16x256xi1>, vector<16x256xf32>
    %c127_i32_140 = arith.constant 127 : i32
    %351 = vector.broadcast %c127_i32_140 : i32 to vector<1x256xi32>
    %352 = arith.cmpi eq, %0, %351 : vector<1x256xi32>
    %353 = vector.shape_cast %352 : vector<1x256xi1> to vector<1x256xi1>
    %354 = vector.broadcast %353 : vector<1x256xi1> to vector<16x256xi1>
    %355 = arith.select %354, %344, %345 : vector<16x256xi1>, vector<16x256xf32>
    %c3_141 = arith.constant 3 : index
    %c0_142 = arith.constant 0 : index
    %c0_143 = arith.constant 0 : index
    %c0_144 = arith.constant 0 : index
    %356 = vector.load %arg5[%c3_141, %c0_142, %c0_143, %c0_144] : memref<9x3x16x16xbf16, #tpu.memory_space<vmem>>, vector<1x1x16x16xbf16>
    %357 = vector.shape_cast %356 : vector<1x1x16x16xbf16> to vector<16x16xbf16>
    %358 = arith.truncf %350 : vector<16x256xf32> to vector<16x256xbf16>
    %cst_145 = arith.constant dense<0.000000e+00> : vector<16x256xf32>
    %359 = tpu.matmul %357, %358, %cst_145 {dimension_numbers = #tpu.dot_dimension_numbers<[1], [0], [0], [1], [0, 0, 1, 1], [], []>} : vector<16x16xbf16>, vector<16x256xbf16>, vector<16x256xf32> -> vector<16x256xf32>
    %c3_146 = arith.constant 3 : index
    %c1_147 = arith.constant 1 : index
    %c0_148 = arith.constant 0 : index
    %c0_149 = arith.constant 0 : index
    %360 = vector.load %arg5[%c3_146, %c1_147, %c0_148, %c0_149] : memref<9x3x16x16xbf16, #tpu.memory_space<vmem>>, vector<1x1x16x16xbf16>
    %361 = vector.shape_cast %360 : vector<1x1x16x16xbf16> to vector<16x16xbf16>
    %362 = arith.truncf %343 : vector<16x256xf32> to vector<16x256xbf16>
    %cst_150 = arith.constant dense<0.000000e+00> : vector<16x256xf32>
    %363 = tpu.matmul %361, %362, %cst_150 {dimension_numbers = #tpu.dot_dimension_numbers<[1], [0], [0], [1], [0, 0, 1, 1], [], []>} : vector<16x16xbf16>, vector<16x256xbf16>, vector<16x256xf32> -> vector<16x256xf32>
    %364 = arith.addf %359, %363 : vector<16x256xf32>
    %c3_151 = arith.constant 3 : index
    %c2_152 = arith.constant 2 : index
    %c0_153 = arith.constant 0 : index
    %c0_154 = arith.constant 0 : index
    %365 = vector.load %arg5[%c3_151, %c2_152, %c0_153, %c0_154] : memref<9x3x16x16xbf16, #tpu.memory_space<vmem>>, vector<1x1x16x16xbf16>
    %366 = vector.shape_cast %365 : vector<1x1x16x16xbf16> to vector<16x16xbf16>
    %367 = arith.truncf %355 : vector<16x256xf32> to vector<16x256xbf16>
    %cst_155 = arith.constant dense<0.000000e+00> : vector<16x256xf32>
    %368 = tpu.matmul %366, %367, %cst_155 {dimension_numbers = #tpu.dot_dimension_numbers<[1], [0], [0], [1], [0, 0, 1, 1], [], []>} : vector<16x16xbf16>, vector<16x256xbf16>, vector<16x256xf32> -> vector<16x256xf32>
    %369 = arith.addf %364, %368 : vector<16x256xf32>
    %c4 = arith.constant 4 : index
    %c0_156 = arith.constant 0 : index
    %c0_157 = arith.constant 0 : index
    %370 = vector.load %arg3[%c4, %c0_156, %c0_157] : memref<10x16x1xf32, #tpu.memory_space<vmem>>, vector<1x16x1xf32>
    %371 = vector.shape_cast %370 : vector<1x16x1xf32> to vector<16x1xf32>
    %c4_158 = arith.constant 4 : index
    %c0_159 = arith.constant 0 : index
    %c0_160 = arith.constant 0 : index
    %372 = vector.load %arg4[%c4_158, %c0_159, %c0_160] : memref<10x16x1xf32, #tpu.memory_space<vmem>>, vector<1x16x1xf32>
    %373 = vector.shape_cast %372 : vector<1x16x1xf32> to vector<16x1xf32>
    %cst_161 = arith.constant dense<0.000000e+00> : vector<16xf32>
    %374 = vector.multi_reduction <add>, %369, %cst_161 [1] : vector<16x256xf32> to vector<16xf32>
    %375 = vector.shape_cast %374 : vector<16xf32> to vector<16x1xf32>
    %cst_162 = arith.constant 3.906250e-03 : f32
    %376 = vector.broadcast %cst_162 : f32 to vector<16x1xf32>
    %377 = arith.mulf %375, %376 : vector<16x1xf32>
    %378 = vector.broadcast %377 : vector<16x1xf32> to vector<16x256xf32>
    %379 = arith.subf %369, %378 : vector<16x256xf32>
    %380 = arith.mulf %379, %379 : vector<16x256xf32>
    %cst_163 = arith.constant dense<0.000000e+00> : vector<16xf32>
    %381 = vector.multi_reduction <add>, %380, %cst_163 [1] : vector<16x256xf32> to vector<16xf32>
    %382 = vector.shape_cast %381 : vector<16xf32> to vector<16x1xf32>
    %cst_164 = arith.constant 3.906250e-03 : f32
    %383 = vector.broadcast %cst_164 : f32 to vector<16x1xf32>
    %384 = arith.mulf %382, %383 : vector<16x1xf32>
    %cst_165 = arith.constant 9.99999974E-6 : f32
    %385 = vector.broadcast %cst_165 : f32 to vector<16x1xf32>
    %386 = arith.addf %384, %385 : vector<16x1xf32>
    %387 = math.rsqrt %386 : vector<16x1xf32>
    %388 = arith.mulf %387, %371 : vector<16x1xf32>
    %389 = vector.broadcast %388 : vector<16x1xf32> to vector<16x256xf32>
    %390 = arith.mulf %379, %389 : vector<16x256xf32>
    %391 = vector.broadcast %373 : vector<16x1xf32> to vector<16x256xf32>
    %392 = arith.addf %390, %391 : vector<16x256xf32>
    %cst_166 = arith.constant 2.000000e-01 : f32
    %393 = vector.broadcast %cst_166 : f32 to vector<16x256xf32>
    %394 = arith.mulf %393, %392 : vector<16x256xf32>
    %395 = arith.maximumf %392, %394 : vector<16x256xf32>
    %c3_167 = arith.constant 3 : index
    %c0_168 = arith.constant 0 : index
    %c0_169 = arith.constant 0 : index
    %396 = vector.load %arg6[%c3_167, %c0_168, %c0_169] : memref<9x16x16xbf16, #tpu.memory_space<vmem>>, vector<1x16x16xbf16>
    %397 = vector.shape_cast %396 : vector<1x16x16xbf16> to vector<16x16xbf16>
    %398 = arith.truncf %395 : vector<16x256xf32> to vector<16x256xbf16>
    %cst_170 = arith.constant dense<0.000000e+00> : vector<16x256xf32>
    %399 = tpu.matmul %397, %398, %cst_170 {dimension_numbers = #tpu.dot_dimension_numbers<[1], [0], [0], [1], [0, 0, 1, 1], [], []>} : vector<16x16xbf16>, vector<16x256xbf16>, vector<16x256xf32> -> vector<16x256xf32>
    %c3_171 = arith.constant 3 : index
    %c0_172 = arith.constant 0 : index
    %c0_173 = arith.constant 0 : index
    %400 = vector.load %arg7[%c3_171, %c0_172, %c0_173] : memref<9x16x1xf32, #tpu.memory_space<vmem>>, vector<1x16x1xf32>
    %401 = vector.shape_cast %400 : vector<1x16x1xf32> to vector<16x1xf32>
    %402 = vector.broadcast %401 : vector<16x1xf32> to vector<16x256xf32>
    %403 = arith.addf %399, %402 : vector<16x256xf32>
    %404 = arith.addf %343, %403 : vector<16x256xf32>
    %c3_i32_174 = arith.constant 3 : i32
    %405 = tpu.dynamic_rotate %404 by %c3_i32_174 dim 1 : vector<16x256xf32>, i32 -> vector<16x256xf32>
    %c253_i32_175 = arith.constant 253 : i32
    %406 = tpu.dynamic_rotate %404 by %c253_i32_175 dim 1 : vector<16x256xf32>, i32 -> vector<16x256xf32>
    %c0_i32_176 = arith.constant 0 : i32
    %407 = vector.broadcast %c0_i32_176 : i32 to vector<1x256xi32>
    %408 = arith.cmpi eq, %0, %407 : vector<1x256xi32>
    %409 = vector.shape_cast %408 : vector<1x256xi1> to vector<1x256xi1>
    %410 = vector.broadcast %409 : vector<1x256xi1> to vector<16x256xi1>
    %411 = arith.select %410, %406, %405 : vector<16x256xi1>, vector<16x256xf32>
    %c125_i32_177 = arith.constant 125 : i32
    %412 = vector.broadcast %c125_i32_177 : i32 to vector<1x256xi32>
    %413 = arith.cmpi eq, %0, %412 : vector<1x256xi32>
    %c255_i32_178 = arith.constant 255 : i32
    %414 = tpu.dynamic_rotate %404 by %c255_i32_178 dim 1 : vector<16x256xf32>, i32 -> vector<16x256xf32>
    %415 = vector.shape_cast %413 : vector<1x256xi1> to vector<1x256xi1>
    %416 = vector.broadcast %415 : vector<1x256xi1> to vector<16x256xi1>
    %417 = arith.select %416, %414, %406 : vector<16x256xi1>, vector<16x256xf32>
    %c1_i32_179 = arith.constant 1 : i32
    %418 = vector.broadcast %c1_i32_179 : i32 to vector<1x256xi32>
    %419 = arith.cmpi eq, %0, %418 : vector<1x256xi32>
    %420 = vector.shape_cast %419 : vector<1x256xi1> to vector<1x256xi1>
    %421 = vector.broadcast %420 : vector<1x256xi1> to vector<16x256xi1>
    %422 = arith.select %421, %414, %411 : vector<16x256xi1>, vector<16x256xf32>
    %c126_i32_180 = arith.constant 126 : i32
    %423 = vector.broadcast %c126_i32_180 : i32 to vector<1x256xi32>
    %424 = arith.cmpi eq, %0, %423 : vector<1x256xi32>
    %c1_i32_181 = arith.constant 1 : i32
    %425 = tpu.dynamic_rotate %404 by %c1_i32_181 dim 1 : vector<16x256xf32>, i32 -> vector<16x256xf32>
    %426 = vector.shape_cast %424 : vector<1x256xi1> to vector<1x256xi1>
    %427 = vector.broadcast %426 : vector<1x256xi1> to vector<16x256xi1>
    %428 = arith.select %427, %425, %417 : vector<16x256xi1>, vector<16x256xf32>
    %c2_i32_182 = arith.constant 2 : i32
    %429 = vector.broadcast %c2_i32_182 : i32 to vector<1x256xi32>
    %430 = arith.cmpi eq, %0, %429 : vector<1x256xi32>
    %431 = vector.shape_cast %430 : vector<1x256xi1> to vector<1x256xi1>
    %432 = vector.broadcast %431 : vector<1x256xi1> to vector<16x256xi1>
    %433 = arith.select %432, %425, %422 : vector<16x256xi1>, vector<16x256xf32>
    %c127_i32_183 = arith.constant 127 : i32
    %434 = vector.broadcast %c127_i32_183 : i32 to vector<1x256xi32>
    %435 = arith.cmpi eq, %0, %434 : vector<1x256xi32>
    %436 = vector.shape_cast %435 : vector<1x256xi1> to vector<1x256xi1>
    %437 = vector.broadcast %436 : vector<1x256xi1> to vector<16x256xi1>
    %438 = arith.select %437, %405, %428 : vector<16x256xi1>, vector<16x256xf32>
    %c4_184 = arith.constant 4 : index
    %c0_185 = arith.constant 0 : index
    %c0_186 = arith.constant 0 : index
    %c0_187 = arith.constant 0 : index
    %439 = vector.load %arg5[%c4_184, %c0_185, %c0_186, %c0_187] : memref<9x3x16x16xbf16, #tpu.memory_space<vmem>>, vector<1x1x16x16xbf16>
    %440 = vector.shape_cast %439 : vector<1x1x16x16xbf16> to vector<16x16xbf16>
    %441 = arith.truncf %433 : vector<16x256xf32> to vector<16x256xbf16>
    %cst_188 = arith.constant dense<0.000000e+00> : vector<16x256xf32>
    %442 = tpu.matmul %440, %441, %cst_188 {dimension_numbers = #tpu.dot_dimension_numbers<[1], [0], [0], [1], [0, 0, 1, 1], [], []>} : vector<16x16xbf16>, vector<16x256xbf16>, vector<16x256xf32> -> vector<16x256xf32>
    %c4_189 = arith.constant 4 : index
    %c1_190 = arith.constant 1 : index
    %c0_191 = arith.constant 0 : index
    %c0_192 = arith.constant 0 : index
    %443 = vector.load %arg5[%c4_189, %c1_190, %c0_191, %c0_192] : memref<9x3x16x16xbf16, #tpu.memory_space<vmem>>, vector<1x1x16x16xbf16>
    %444 = vector.shape_cast %443 : vector<1x1x16x16xbf16> to vector<16x16xbf16>
    %445 = arith.truncf %404 : vector<16x256xf32> to vector<16x256xbf16>
    %cst_193 = arith.constant dense<0.000000e+00> : vector<16x256xf32>
    %446 = tpu.matmul %444, %445, %cst_193 {dimension_numbers = #tpu.dot_dimension_numbers<[1], [0], [0], [1], [0, 0, 1, 1], [], []>} : vector<16x16xbf16>, vector<16x256xbf16>, vector<16x256xf32> -> vector<16x256xf32>
    %447 = arith.addf %442, %446 : vector<16x256xf32>
    %c4_194 = arith.constant 4 : index
    %c2_195 = arith.constant 2 : index
    %c0_196 = arith.constant 0 : index
    %c0_197 = arith.constant 0 : index
    %448 = vector.load %arg5[%c4_194, %c2_195, %c0_196, %c0_197] : memref<9x3x16x16xbf16, #tpu.memory_space<vmem>>, vector<1x1x16x16xbf16>
    %449 = vector.shape_cast %448 : vector<1x1x16x16xbf16> to vector<16x16xbf16>
    %450 = arith.truncf %438 : vector<16x256xf32> to vector<16x256xbf16>
    %cst_198 = arith.constant dense<0.000000e+00> : vector<16x256xf32>
    %451 = tpu.matmul %449, %450, %cst_198 {dimension_numbers = #tpu.dot_dimension_numbers<[1], [0], [0], [1], [0, 0, 1, 1], [], []>} : vector<16x16xbf16>, vector<16x256xbf16>, vector<16x256xf32> -> vector<16x256xf32>
    %452 = arith.addf %447, %451 : vector<16x256xf32>
    %c5 = arith.constant 5 : index
    %c0_199 = arith.constant 0 : index
    %c0_200 = arith.constant 0 : index
    %453 = vector.load %arg3[%c5, %c0_199, %c0_200] : memref<10x16x1xf32, #tpu.memory_space<vmem>>, vector<1x16x1xf32>
    %454 = vector.shape_cast %453 : vector<1x16x1xf32> to vector<16x1xf32>
    %c5_201 = arith.constant 5 : index
    %c0_202 = arith.constant 0 : index
    %c0_203 = arith.constant 0 : index
    %455 = vector.load %arg4[%c5_201, %c0_202, %c0_203] : memref<10x16x1xf32, #tpu.memory_space<vmem>>, vector<1x16x1xf32>
    %456 = vector.shape_cast %455 : vector<1x16x1xf32> to vector<16x1xf32>
    %cst_204 = arith.constant dense<0.000000e+00> : vector<16xf32>
    %457 = vector.multi_reduction <add>, %452, %cst_204 [1] : vector<16x256xf32> to vector<16xf32>
    %458 = vector.shape_cast %457 : vector<16xf32> to vector<16x1xf32>
    %cst_205 = arith.constant 3.906250e-03 : f32
    %459 = vector.broadcast %cst_205 : f32 to vector<16x1xf32>
    %460 = arith.mulf %458, %459 : vector<16x1xf32>
    %461 = vector.broadcast %460 : vector<16x1xf32> to vector<16x256xf32>
    %462 = arith.subf %452, %461 : vector<16x256xf32>
    %463 = arith.mulf %462, %462 : vector<16x256xf32>
    %cst_206 = arith.constant dense<0.000000e+00> : vector<16xf32>
    %464 = vector.multi_reduction <add>, %463, %cst_206 [1] : vector<16x256xf32> to vector<16xf32>
    %465 = vector.shape_cast %464 : vector<16xf32> to vector<16x1xf32>
    %cst_207 = arith.constant 3.906250e-03 : f32
    %466 = vector.broadcast %cst_207 : f32 to vector<16x1xf32>
    %467 = arith.mulf %465, %466 : vector<16x1xf32>
    %cst_208 = arith.constant 9.99999974E-6 : f32
    %468 = vector.broadcast %cst_208 : f32 to vector<16x1xf32>
    %469 = arith.addf %467, %468 : vector<16x1xf32>
    %470 = math.rsqrt %469 : vector<16x1xf32>
    %471 = arith.mulf %470, %454 : vector<16x1xf32>
    %472 = vector.broadcast %471 : vector<16x1xf32> to vector<16x256xf32>
    %473 = arith.mulf %462, %472 : vector<16x256xf32>
    %474 = vector.broadcast %456 : vector<16x1xf32> to vector<16x256xf32>
    %475 = arith.addf %473, %474 : vector<16x256xf32>
    %cst_209 = arith.constant 2.000000e-01 : f32
    %476 = vector.broadcast %cst_209 : f32 to vector<16x256xf32>
    %477 = arith.mulf %476, %475 : vector<16x256xf32>
    %478 = arith.maximumf %475, %477 : vector<16x256xf32>
    %c4_210 = arith.constant 4 : index
    %c0_211 = arith.constant 0 : index
    %c0_212 = arith.constant 0 : index
    %479 = vector.load %arg6[%c4_210, %c0_211, %c0_212] : memref<9x16x16xbf16, #tpu.memory_space<vmem>>, vector<1x16x16xbf16>
    %480 = vector.shape_cast %479 : vector<1x16x16xbf16> to vector<16x16xbf16>
    %481 = arith.truncf %478 : vector<16x256xf32> to vector<16x256xbf16>
    %cst_213 = arith.constant dense<0.000000e+00> : vector<16x256xf32>
    %482 = tpu.matmul %480, %481, %cst_213 {dimension_numbers = #tpu.dot_dimension_numbers<[1], [0], [0], [1], [0, 0, 1, 1], [], []>} : vector<16x16xbf16>, vector<16x256xbf16>, vector<16x256xf32> -> vector<16x256xf32>
    %c4_214 = arith.constant 4 : index
    %c0_215 = arith.constant 0 : index
    %c0_216 = arith.constant 0 : index
    %483 = vector.load %arg7[%c4_214, %c0_215, %c0_216] : memref<9x16x1xf32, #tpu.memory_space<vmem>>, vector<1x16x1xf32>
    %484 = vector.shape_cast %483 : vector<1x16x1xf32> to vector<16x1xf32>
    %485 = vector.broadcast %484 : vector<16x1xf32> to vector<16x256xf32>
    %486 = arith.addf %482, %485 : vector<16x256xf32>
    %487 = arith.addf %404, %486 : vector<16x256xf32>
    %c9_i32_217 = arith.constant 9 : i32
    %488 = tpu.dynamic_rotate %487 by %c9_i32_217 dim 1 : vector<16x256xf32>, i32 -> vector<16x256xf32>
    %c247_i32_218 = arith.constant 247 : i32
    %489 = tpu.dynamic_rotate %487 by %c247_i32_218 dim 1 : vector<16x256xf32>, i32 -> vector<16x256xf32>
    %c0_i32_219 = arith.constant 0 : i32
    %490 = vector.broadcast %c0_i32_219 : i32 to vector<1x256xi32>
    %491 = arith.cmpi eq, %0, %490 : vector<1x256xi32>
    %492 = vector.shape_cast %491 : vector<1x256xi1> to vector<1x256xi1>
    %493 = vector.broadcast %492 : vector<1x256xi1> to vector<16x256xi1>
    %494 = arith.select %493, %489, %488 : vector<16x256xi1>, vector<16x256xf32>
    %c119_i32_220 = arith.constant 119 : i32
    %495 = vector.broadcast %c119_i32_220 : i32 to vector<1x256xi32>
    %496 = arith.cmpi eq, %0, %495 : vector<1x256xi32>
    %c249_i32_221 = arith.constant 249 : i32
    %497 = tpu.dynamic_rotate %487 by %c249_i32_221 dim 1 : vector<16x256xf32>, i32 -> vector<16x256xf32>
    %498 = vector.shape_cast %496 : vector<1x256xi1> to vector<1x256xi1>
    %499 = vector.broadcast %498 : vector<1x256xi1> to vector<16x256xi1>
    %500 = arith.select %499, %497, %489 : vector<16x256xi1>, vector<16x256xf32>
    %c1_i32_222 = arith.constant 1 : i32
    %501 = vector.broadcast %c1_i32_222 : i32 to vector<1x256xi32>
    %502 = arith.cmpi eq, %0, %501 : vector<1x256xi32>
    %503 = vector.shape_cast %502 : vector<1x256xi1> to vector<1x256xi1>
    %504 = vector.broadcast %503 : vector<1x256xi1> to vector<16x256xi1>
    %505 = arith.select %504, %497, %494 : vector<16x256xi1>, vector<16x256xf32>
    %c120_i32_223 = arith.constant 120 : i32
    %506 = vector.broadcast %c120_i32_223 : i32 to vector<1x256xi32>
    %507 = arith.cmpi eq, %0, %506 : vector<1x256xi32>
    %c251_i32_224 = arith.constant 251 : i32
    %508 = tpu.dynamic_rotate %487 by %c251_i32_224 dim 1 : vector<16x256xf32>, i32 -> vector<16x256xf32>
    %509 = vector.shape_cast %507 : vector<1x256xi1> to vector<1x256xi1>
    %510 = vector.broadcast %509 : vector<1x256xi1> to vector<16x256xi1>
    %511 = arith.select %510, %508, %500 : vector<16x256xi1>, vector<16x256xf32>
    %c2_i32_225 = arith.constant 2 : i32
    %512 = vector.broadcast %c2_i32_225 : i32 to vector<1x256xi32>
    %513 = arith.cmpi eq, %0, %512 : vector<1x256xi32>
    %514 = vector.shape_cast %513 : vector<1x256xi1> to vector<1x256xi1>
    %515 = vector.broadcast %514 : vector<1x256xi1> to vector<16x256xi1>
    %516 = arith.select %515, %508, %505 : vector<16x256xi1>, vector<16x256xf32>
    %c121_i32_226 = arith.constant 121 : i32
    %517 = vector.broadcast %c121_i32_226 : i32 to vector<1x256xi32>
    %518 = arith.cmpi eq, %0, %517 : vector<1x256xi32>
    %c253_i32_227 = arith.constant 253 : i32
    %519 = tpu.dynamic_rotate %487 by %c253_i32_227 dim 1 : vector<16x256xf32>, i32 -> vector<16x256xf32>
    %520 = vector.shape_cast %518 : vector<1x256xi1> to vector<1x256xi1>
    %521 = vector.broadcast %520 : vector<1x256xi1> to vector<16x256xi1>
    %522 = arith.select %521, %519, %511 : vector<16x256xi1>, vector<16x256xf32>
    %c3_i32_228 = arith.constant 3 : i32
    %523 = vector.broadcast %c3_i32_228 : i32 to vector<1x256xi32>
    %524 = arith.cmpi eq, %0, %523 : vector<1x256xi32>
    %525 = vector.shape_cast %524 : vector<1x256xi1> to vector<1x256xi1>
    %526 = vector.broadcast %525 : vector<1x256xi1> to vector<16x256xi1>
    %527 = arith.select %526, %519, %516 : vector<16x256xi1>, vector<16x256xf32>
    %c122_i32_229 = arith.constant 122 : i32
    %528 = vector.broadcast %c122_i32_229 : i32 to vector<1x256xi32>
    %529 = arith.cmpi eq, %0, %528 : vector<1x256xi32>
    %c255_i32_230 = arith.constant 255 : i32
    %530 = tpu.dynamic_rotate %487 by %c255_i32_230 dim 1 : vector<16x256xf32>, i32 -> vector<16x256xf32>
    %531 = vector.shape_cast %529 : vector<1x256xi1> to vector<1x256xi1>
    %532 = vector.broadcast %531 : vector<1x256xi1> to vector<16x256xi1>
    %533 = arith.select %532, %530, %522 : vector<16x256xi1>, vector<16x256xf32>
    %c4_i32_231 = arith.constant 4 : i32
    %534 = vector.broadcast %c4_i32_231 : i32 to vector<1x256xi32>
    %535 = arith.cmpi eq, %0, %534 : vector<1x256xi32>
    %536 = vector.shape_cast %535 : vector<1x256xi1> to vector<1x256xi1>
    %537 = vector.broadcast %536 : vector<1x256xi1> to vector<16x256xi1>
    %538 = arith.select %537, %530, %527 : vector<16x256xi1>, vector<16x256xf32>
    %c123_i32_232 = arith.constant 123 : i32
    %539 = vector.broadcast %c123_i32_232 : i32 to vector<1x256xi32>
    %540 = arith.cmpi eq, %0, %539 : vector<1x256xi32>
    %c1_i32_233 = arith.constant 1 : i32
    %541 = tpu.dynamic_rotate %487 by %c1_i32_233 dim 1 : vector<16x256xf32>, i32 -> vector<16x256xf32>
    %542 = vector.shape_cast %540 : vector<1x256xi1> to vector<1x256xi1>
    %543 = vector.broadcast %542 : vector<1x256xi1> to vector<16x256xi1>
    %544 = arith.select %543, %541, %533 : vector<16x256xi1>, vector<16x256xf32>
    %c5_i32_234 = arith.constant 5 : i32
    %545 = vector.broadcast %c5_i32_234 : i32 to vector<1x256xi32>
    %546 = arith.cmpi eq, %0, %545 : vector<1x256xi32>
    %547 = vector.shape_cast %546 : vector<1x256xi1> to vector<1x256xi1>
    %548 = vector.broadcast %547 : vector<1x256xi1> to vector<16x256xi1>
    %549 = arith.select %548, %541, %538 : vector<16x256xi1>, vector<16x256xf32>
    %c124_i32_235 = arith.constant 124 : i32
    %550 = vector.broadcast %c124_i32_235 : i32 to vector<1x256xi32>
    %551 = arith.cmpi eq, %0, %550 : vector<1x256xi32>
    %c3_i32_236 = arith.constant 3 : i32
    %552 = tpu.dynamic_rotate %487 by %c3_i32_236 dim 1 : vector<16x256xf32>, i32 -> vector<16x256xf32>
    %553 = vector.shape_cast %551 : vector<1x256xi1> to vector<1x256xi1>
    %554 = vector.broadcast %553 : vector<1x256xi1> to vector<16x256xi1>
    %555 = arith.select %554, %552, %544 : vector<16x256xi1>, vector<16x256xf32>
    %c6_i32_237 = arith.constant 6 : i32
    %556 = vector.broadcast %c6_i32_237 : i32 to vector<1x256xi32>
    %557 = arith.cmpi eq, %0, %556 : vector<1x256xi32>
    %558 = vector.shape_cast %557 : vector<1x256xi1> to vector<1x256xi1>
    %559 = vector.broadcast %558 : vector<1x256xi1> to vector<16x256xi1>
    %560 = arith.select %559, %552, %549 : vector<16x256xi1>, vector<16x256xf32>
    %c125_i32_238 = arith.constant 125 : i32
    %561 = vector.broadcast %c125_i32_238 : i32 to vector<1x256xi32>
    %562 = arith.cmpi eq, %0, %561 : vector<1x256xi32>
    %c5_i32_239 = arith.constant 5 : i32
    %563 = tpu.dynamic_rotate %487 by %c5_i32_239 dim 1 : vector<16x256xf32>, i32 -> vector<16x256xf32>
    %564 = vector.shape_cast %562 : vector<1x256xi1> to vector<1x256xi1>
    %565 = vector.broadcast %564 : vector<1x256xi1> to vector<16x256xi1>
    %566 = arith.select %565, %563, %555 : vector<16x256xi1>, vector<16x256xf32>
    %c7_i32_240 = arith.constant 7 : i32
    %567 = vector.broadcast %c7_i32_240 : i32 to vector<1x256xi32>
    %568 = arith.cmpi eq, %0, %567 : vector<1x256xi32>
    %569 = vector.shape_cast %568 : vector<1x256xi1> to vector<1x256xi1>
    %570 = vector.broadcast %569 : vector<1x256xi1> to vector<16x256xi1>
    %571 = arith.select %570, %563, %560 : vector<16x256xi1>, vector<16x256xf32>
    %c126_i32_241 = arith.constant 126 : i32
    %572 = vector.broadcast %c126_i32_241 : i32 to vector<1x256xi32>
    %573 = arith.cmpi eq, %0, %572 : vector<1x256xi32>
    %c7_i32_242 = arith.constant 7 : i32
    %574 = tpu.dynamic_rotate %487 by %c7_i32_242 dim 1 : vector<16x256xf32>, i32 -> vector<16x256xf32>
    %575 = vector.shape_cast %573 : vector<1x256xi1> to vector<1x256xi1>
    %576 = vector.broadcast %575 : vector<1x256xi1> to vector<16x256xi1>
    %577 = arith.select %576, %574, %566 : vector<16x256xi1>, vector<16x256xf32>
    %c8_i32_243 = arith.constant 8 : i32
    %578 = vector.broadcast %c8_i32_243 : i32 to vector<1x256xi32>
    %579 = arith.cmpi eq, %0, %578 : vector<1x256xi32>
    %580 = vector.shape_cast %579 : vector<1x256xi1> to vector<1x256xi1>
    %581 = vector.broadcast %580 : vector<1x256xi1> to vector<16x256xi1>
    %582 = arith.select %581, %574, %571 : vector<16x256xi1>, vector<16x256xf32>
    %c127_i32_244 = arith.constant 127 : i32
    %583 = vector.broadcast %c127_i32_244 : i32 to vector<1x256xi32>
    %584 = arith.cmpi eq, %0, %583 : vector<1x256xi32>
    %585 = vector.shape_cast %584 : vector<1x256xi1> to vector<1x256xi1>
    %586 = vector.broadcast %585 : vector<1x256xi1> to vector<16x256xi1>
    %587 = arith.select %586, %488, %577 : vector<16x256xi1>, vector<16x256xf32>
    %c5_245 = arith.constant 5 : index
    %c0_246 = arith.constant 0 : index
    %c0_247 = arith.constant 0 : index
    %c0_248 = arith.constant 0 : index
    %588 = vector.load %arg5[%c5_245, %c0_246, %c0_247, %c0_248] : memref<9x3x16x16xbf16, #tpu.memory_space<vmem>>, vector<1x1x16x16xbf16>
    %589 = vector.shape_cast %588 : vector<1x1x16x16xbf16> to vector<16x16xbf16>
    %590 = arith.truncf %582 : vector<16x256xf32> to vector<16x256xbf16>
    %cst_249 = arith.constant dense<0.000000e+00> : vector<16x256xf32>
    %591 = tpu.matmul %589, %590, %cst_249 {dimension_numbers = #tpu.dot_dimension_numbers<[1], [0], [0], [1], [0, 0, 1, 1], [], []>} : vector<16x16xbf16>, vector<16x256xbf16>, vector<16x256xf32> -> vector<16x256xf32>
    %c5_250 = arith.constant 5 : index
    %c1_251 = arith.constant 1 : index
    %c0_252 = arith.constant 0 : index
    %c0_253 = arith.constant 0 : index
    %592 = vector.load %arg5[%c5_250, %c1_251, %c0_252, %c0_253] : memref<9x3x16x16xbf16, #tpu.memory_space<vmem>>, vector<1x1x16x16xbf16>
    %593 = vector.shape_cast %592 : vector<1x1x16x16xbf16> to vector<16x16xbf16>
    %594 = arith.truncf %487 : vector<16x256xf32> to vector<16x256xbf16>
    %cst_254 = arith.constant dense<0.000000e+00> : vector<16x256xf32>
    %595 = tpu.matmul %593, %594, %cst_254 {dimension_numbers = #tpu.dot_dimension_numbers<[1], [0], [0], [1], [0, 0, 1, 1], [], []>} : vector<16x16xbf16>, vector<16x256xbf16>, vector<16x256xf32> -> vector<16x256xf32>
    %596 = arith.addf %591, %595 : vector<16x256xf32>
    %c5_255 = arith.constant 5 : index
    %c2_256 = arith.constant 2 : index
    %c0_257 = arith.constant 0 : index
    %c0_258 = arith.constant 0 : index
    %597 = vector.load %arg5[%c5_255, %c2_256, %c0_257, %c0_258] : memref<9x3x16x16xbf16, #tpu.memory_space<vmem>>, vector<1x1x16x16xbf16>
    %598 = vector.shape_cast %597 : vector<1x1x16x16xbf16> to vector<16x16xbf16>
    %599 = arith.truncf %587 : vector<16x256xf32> to vector<16x256xbf16>
    %cst_259 = arith.constant dense<0.000000e+00> : vector<16x256xf32>
    %600 = tpu.matmul %598, %599, %cst_259 {dimension_numbers = #tpu.dot_dimension_numbers<[1], [0], [0], [1], [0, 0, 1, 1], [], []>} : vector<16x16xbf16>, vector<16x256xbf16>, vector<16x256xf32> -> vector<16x256xf32>
    %601 = arith.addf %596, %600 : vector<16x256xf32>
    %c6 = arith.constant 6 : index
    %c0_260 = arith.constant 0 : index
    %c0_261 = arith.constant 0 : index
    %602 = vector.load %arg3[%c6, %c0_260, %c0_261] : memref<10x16x1xf32, #tpu.memory_space<vmem>>, vector<1x16x1xf32>
    %603 = vector.shape_cast %602 : vector<1x16x1xf32> to vector<16x1xf32>
    %c6_262 = arith.constant 6 : index
    %c0_263 = arith.constant 0 : index
    %c0_264 = arith.constant 0 : index
    %604 = vector.load %arg4[%c6_262, %c0_263, %c0_264] : memref<10x16x1xf32, #tpu.memory_space<vmem>>, vector<1x16x1xf32>
    %605 = vector.shape_cast %604 : vector<1x16x1xf32> to vector<16x1xf32>
    %cst_265 = arith.constant dense<0.000000e+00> : vector<16xf32>
    %606 = vector.multi_reduction <add>, %601, %cst_265 [1] : vector<16x256xf32> to vector<16xf32>
    %607 = vector.shape_cast %606 : vector<16xf32> to vector<16x1xf32>
    %cst_266 = arith.constant 3.906250e-03 : f32
    %608 = vector.broadcast %cst_266 : f32 to vector<16x1xf32>
    %609 = arith.mulf %607, %608 : vector<16x1xf32>
    %610 = vector.broadcast %609 : vector<16x1xf32> to vector<16x256xf32>
    %611 = arith.subf %601, %610 : vector<16x256xf32>
    %612 = arith.mulf %611, %611 : vector<16x256xf32>
    %cst_267 = arith.constant dense<0.000000e+00> : vector<16xf32>
    %613 = vector.multi_reduction <add>, %612, %cst_267 [1] : vector<16x256xf32> to vector<16xf32>
    %614 = vector.shape_cast %613 : vector<16xf32> to vector<16x1xf32>
    %cst_268 = arith.constant 3.906250e-03 : f32
    %615 = vector.broadcast %cst_268 : f32 to vector<16x1xf32>
    %616 = arith.mulf %614, %615 : vector<16x1xf32>
    %cst_269 = arith.constant 9.99999974E-6 : f32
    %617 = vector.broadcast %cst_269 : f32 to vector<16x1xf32>
    %618 = arith.addf %616, %617 : vector<16x1xf32>
    %619 = math.rsqrt %618 : vector<16x1xf32>
    %620 = arith.mulf %619, %603 : vector<16x1xf32>
    %621 = vector.broadcast %620 : vector<16x1xf32> to vector<16x256xf32>
    %622 = arith.mulf %611, %621 : vector<16x256xf32>
    %623 = vector.broadcast %605 : vector<16x1xf32> to vector<16x256xf32>
    %624 = arith.addf %622, %623 : vector<16x256xf32>
    %cst_270 = arith.constant 2.000000e-01 : f32
    %625 = vector.broadcast %cst_270 : f32 to vector<16x256xf32>
    %626 = arith.mulf %625, %624 : vector<16x256xf32>
    %627 = arith.maximumf %624, %626 : vector<16x256xf32>
    %c5_271 = arith.constant 5 : index
    %c0_272 = arith.constant 0 : index
    %c0_273 = arith.constant 0 : index
    %628 = vector.load %arg6[%c5_271, %c0_272, %c0_273] : memref<9x16x16xbf16, #tpu.memory_space<vmem>>, vector<1x16x16xbf16>
    %629 = vector.shape_cast %628 : vector<1x16x16xbf16> to vector<16x16xbf16>
    %630 = arith.truncf %627 : vector<16x256xf32> to vector<16x256xbf16>
    %cst_274 = arith.constant dense<0.000000e+00> : vector<16x256xf32>
    %631 = tpu.matmul %629, %630, %cst_274 {dimension_numbers = #tpu.dot_dimension_numbers<[1], [0], [0], [1], [0, 0, 1, 1], [], []>} : vector<16x16xbf16>, vector<16x256xbf16>, vector<16x256xf32> -> vector<16x256xf32>
    %c5_275 = arith.constant 5 : index
    %c0_276 = arith.constant 0 : index
    %c0_277 = arith.constant 0 : index
    %632 = vector.load %arg7[%c5_275, %c0_276, %c0_277] : memref<9x16x1xf32, #tpu.memory_space<vmem>>, vector<1x16x1xf32>
    %633 = vector.shape_cast %632 : vector<1x16x1xf32> to vector<16x1xf32>
    %634 = vector.broadcast %633 : vector<16x1xf32> to vector<16x256xf32>
    %635 = arith.addf %631, %634 : vector<16x256xf32>
    %636 = arith.addf %487, %635 : vector<16x256xf32>
    %c1_i32_278 = arith.constant 1 : i32
    %637 = tpu.dynamic_rotate %636 by %c1_i32_278 dim 1 : vector<16x256xf32>, i32 -> vector<16x256xf32>
    %c255_i32_279 = arith.constant 255 : i32
    %638 = tpu.dynamic_rotate %636 by %c255_i32_279 dim 1 : vector<16x256xf32>, i32 -> vector<16x256xf32>
    %c0_i32_280 = arith.constant 0 : i32
    %639 = vector.broadcast %c0_i32_280 : i32 to vector<1x256xi32>
    %640 = arith.cmpi eq, %0, %639 : vector<1x256xi32>
    %641 = vector.shape_cast %640 : vector<1x256xi1> to vector<1x256xi1>
    %642 = vector.broadcast %641 : vector<1x256xi1> to vector<16x256xi1>
    %643 = arith.select %642, %638, %637 : vector<16x256xi1>, vector<16x256xf32>
    %c127_i32_281 = arith.constant 127 : i32
    %644 = vector.broadcast %c127_i32_281 : i32 to vector<1x256xi32>
    %645 = arith.cmpi eq, %0, %644 : vector<1x256xi32>
    %646 = vector.shape_cast %645 : vector<1x256xi1> to vector<1x256xi1>
    %647 = vector.broadcast %646 : vector<1x256xi1> to vector<16x256xi1>
    %648 = arith.select %647, %637, %638 : vector<16x256xi1>, vector<16x256xf32>
    %c6_282 = arith.constant 6 : index
    %c0_283 = arith.constant 0 : index
    %c0_284 = arith.constant 0 : index
    %c0_285 = arith.constant 0 : index
    %649 = vector.load %arg5[%c6_282, %c0_283, %c0_284, %c0_285] : memref<9x3x16x16xbf16, #tpu.memory_space<vmem>>, vector<1x1x16x16xbf16>
    %650 = vector.shape_cast %649 : vector<1x1x16x16xbf16> to vector<16x16xbf16>
    %651 = arith.truncf %643 : vector<16x256xf32> to vector<16x256xbf16>
    %cst_286 = arith.constant dense<0.000000e+00> : vector<16x256xf32>
    %652 = tpu.matmul %650, %651, %cst_286 {dimension_numbers = #tpu.dot_dimension_numbers<[1], [0], [0], [1], [0, 0, 1, 1], [], []>} : vector<16x16xbf16>, vector<16x256xbf16>, vector<16x256xf32> -> vector<16x256xf32>
    %c6_287 = arith.constant 6 : index
    %c1_288 = arith.constant 1 : index
    %c0_289 = arith.constant 0 : index
    %c0_290 = arith.constant 0 : index
    %653 = vector.load %arg5[%c6_287, %c1_288, %c0_289, %c0_290] : memref<9x3x16x16xbf16, #tpu.memory_space<vmem>>, vector<1x1x16x16xbf16>
    %654 = vector.shape_cast %653 : vector<1x1x16x16xbf16> to vector<16x16xbf16>
    %655 = arith.truncf %636 : vector<16x256xf32> to vector<16x256xbf16>
    %cst_291 = arith.constant dense<0.000000e+00> : vector<16x256xf32>
    %656 = tpu.matmul %654, %655, %cst_291 {dimension_numbers = #tpu.dot_dimension_numbers<[1], [0], [0], [1], [0, 0, 1, 1], [], []>} : vector<16x16xbf16>, vector<16x256xbf16>, vector<16x256xf32> -> vector<16x256xf32>
    %657 = arith.addf %652, %656 : vector<16x256xf32>
    %c6_292 = arith.constant 6 : index
    %c2_293 = arith.constant 2 : index
    %c0_294 = arith.constant 0 : index
    %c0_295 = arith.constant 0 : index
    %658 = vector.load %arg5[%c6_292, %c2_293, %c0_294, %c0_295] : memref<9x3x16x16xbf16, #tpu.memory_space<vmem>>, vector<1x1x16x16xbf16>
    %659 = vector.shape_cast %658 : vector<1x1x16x16xbf16> to vector<16x16xbf16>
    %660 = arith.truncf %648 : vector<16x256xf32> to vector<16x256xbf16>
    %cst_296 = arith.constant dense<0.000000e+00> : vector<16x256xf32>
    %661 = tpu.matmul %659, %660, %cst_296 {dimension_numbers = #tpu.dot_dimension_numbers<[1], [0], [0], [1], [0, 0, 1, 1], [], []>} : vector<16x16xbf16>, vector<16x256xbf16>, vector<16x256xf32> -> vector<16x256xf32>
    %662 = arith.addf %657, %661 : vector<16x256xf32>
    %c7 = arith.constant 7 : index
    %c0_297 = arith.constant 0 : index
    %c0_298 = arith.constant 0 : index
    %663 = vector.load %arg3[%c7, %c0_297, %c0_298] : memref<10x16x1xf32, #tpu.memory_space<vmem>>, vector<1x16x1xf32>
    %664 = vector.shape_cast %663 : vector<1x16x1xf32> to vector<16x1xf32>
    %c7_299 = arith.constant 7 : index
    %c0_300 = arith.constant 0 : index
    %c0_301 = arith.constant 0 : index
    %665 = vector.load %arg4[%c7_299, %c0_300, %c0_301] : memref<10x16x1xf32, #tpu.memory_space<vmem>>, vector<1x16x1xf32>
    %666 = vector.shape_cast %665 : vector<1x16x1xf32> to vector<16x1xf32>
    %cst_302 = arith.constant dense<0.000000e+00> : vector<16xf32>
    %667 = vector.multi_reduction <add>, %662, %cst_302 [1] : vector<16x256xf32> to vector<16xf32>
    %668 = vector.shape_cast %667 : vector<16xf32> to vector<16x1xf32>
    %cst_303 = arith.constant 3.906250e-03 : f32
    %669 = vector.broadcast %cst_303 : f32 to vector<16x1xf32>
    %670 = arith.mulf %668, %669 : vector<16x1xf32>
    %671 = vector.broadcast %670 : vector<16x1xf32> to vector<16x256xf32>
    %672 = arith.subf %662, %671 : vector<16x256xf32>
    %673 = arith.mulf %672, %672 : vector<16x256xf32>
    %cst_304 = arith.constant dense<0.000000e+00> : vector<16xf32>
    %674 = vector.multi_reduction <add>, %673, %cst_304 [1] : vector<16x256xf32> to vector<16xf32>
    %675 = vector.shape_cast %674 : vector<16xf32> to vector<16x1xf32>
    %cst_305 = arith.constant 3.906250e-03 : f32
    %676 = vector.broadcast %cst_305 : f32 to vector<16x1xf32>
    %677 = arith.mulf %675, %676 : vector<16x1xf32>
    %cst_306 = arith.constant 9.99999974E-6 : f32
    %678 = vector.broadcast %cst_306 : f32 to vector<16x1xf32>
    %679 = arith.addf %677, %678 : vector<16x1xf32>
    %680 = math.rsqrt %679 : vector<16x1xf32>
    %681 = arith.mulf %680, %664 : vector<16x1xf32>
    %682 = vector.broadcast %681 : vector<16x1xf32> to vector<16x256xf32>
    %683 = arith.mulf %672, %682 : vector<16x256xf32>
    %684 = vector.broadcast %666 : vector<16x1xf32> to vector<16x256xf32>
    %685 = arith.addf %683, %684 : vector<16x256xf32>
    %cst_307 = arith.constant 2.000000e-01 : f32
    %686 = vector.broadcast %cst_307 : f32 to vector<16x256xf32>
    %687 = arith.mulf %686, %685 : vector<16x256xf32>
    %688 = arith.maximumf %685, %687 : vector<16x256xf32>
    %c6_308 = arith.constant 6 : index
    %c0_309 = arith.constant 0 : index
    %c0_310 = arith.constant 0 : index
    %689 = vector.load %arg6[%c6_308, %c0_309, %c0_310] : memref<9x16x16xbf16, #tpu.memory_space<vmem>>, vector<1x16x16xbf16>
    %690 = vector.shape_cast %689 : vector<1x16x16xbf16> to vector<16x16xbf16>
    %691 = arith.truncf %688 : vector<16x256xf32> to vector<16x256xbf16>
    %cst_311 = arith.constant dense<0.000000e+00> : vector<16x256xf32>
    %692 = tpu.matmul %690, %691, %cst_311 {dimension_numbers = #tpu.dot_dimension_numbers<[1], [0], [0], [1], [0, 0, 1, 1], [], []>} : vector<16x16xbf16>, vector<16x256xbf16>, vector<16x256xf32> -> vector<16x256xf32>
    %c6_312 = arith.constant 6 : index
    %c0_313 = arith.constant 0 : index
    %c0_314 = arith.constant 0 : index
    %693 = vector.load %arg7[%c6_312, %c0_313, %c0_314] : memref<9x16x1xf32, #tpu.memory_space<vmem>>, vector<1x16x1xf32>
    %694 = vector.shape_cast %693 : vector<1x16x1xf32> to vector<16x1xf32>
    %695 = vector.broadcast %694 : vector<16x1xf32> to vector<16x256xf32>
    %696 = arith.addf %692, %695 : vector<16x256xf32>
    %697 = arith.addf %636, %696 : vector<16x256xf32>
    %c3_i32_315 = arith.constant 3 : i32
    %698 = tpu.dynamic_rotate %697 by %c3_i32_315 dim 1 : vector<16x256xf32>, i32 -> vector<16x256xf32>
    %c253_i32_316 = arith.constant 253 : i32
    %699 = tpu.dynamic_rotate %697 by %c253_i32_316 dim 1 : vector<16x256xf32>, i32 -> vector<16x256xf32>
    %c0_i32_317 = arith.constant 0 : i32
    %700 = vector.broadcast %c0_i32_317 : i32 to vector<1x256xi32>
    %701 = arith.cmpi eq, %0, %700 : vector<1x256xi32>
    %702 = vector.shape_cast %701 : vector<1x256xi1> to vector<1x256xi1>
    %703 = vector.broadcast %702 : vector<1x256xi1> to vector<16x256xi1>
    %704 = arith.select %703, %699, %698 : vector<16x256xi1>, vector<16x256xf32>
    %c125_i32_318 = arith.constant 125 : i32
    %705 = vector.broadcast %c125_i32_318 : i32 to vector<1x256xi32>
    %706 = arith.cmpi eq, %0, %705 : vector<1x256xi32>
    %c255_i32_319 = arith.constant 255 : i32
    %707 = tpu.dynamic_rotate %697 by %c255_i32_319 dim 1 : vector<16x256xf32>, i32 -> vector<16x256xf32>
    %708 = vector.shape_cast %706 : vector<1x256xi1> to vector<1x256xi1>
    %709 = vector.broadcast %708 : vector<1x256xi1> to vector<16x256xi1>
    %710 = arith.select %709, %707, %699 : vector<16x256xi1>, vector<16x256xf32>
    %c1_i32_320 = arith.constant 1 : i32
    %711 = vector.broadcast %c1_i32_320 : i32 to vector<1x256xi32>
    %712 = arith.cmpi eq, %0, %711 : vector<1x256xi32>
    %713 = vector.shape_cast %712 : vector<1x256xi1> to vector<1x256xi1>
    %714 = vector.broadcast %713 : vector<1x256xi1> to vector<16x256xi1>
    %715 = arith.select %714, %707, %704 : vector<16x256xi1>, vector<16x256xf32>
    %c126_i32_321 = arith.constant 126 : i32
    %716 = vector.broadcast %c126_i32_321 : i32 to vector<1x256xi32>
    %717 = arith.cmpi eq, %0, %716 : vector<1x256xi32>
    %c1_i32_322 = arith.constant 1 : i32
    %718 = tpu.dynamic_rotate %697 by %c1_i32_322 dim 1 : vector<16x256xf32>, i32 -> vector<16x256xf32>
    %719 = vector.shape_cast %717 : vector<1x256xi1> to vector<1x256xi1>
    %720 = vector.broadcast %719 : vector<1x256xi1> to vector<16x256xi1>
    %721 = arith.select %720, %718, %710 : vector<16x256xi1>, vector<16x256xf32>
    %c2_i32_323 = arith.constant 2 : i32
    %722 = vector.broadcast %c2_i32_323 : i32 to vector<1x256xi32>
    %723 = arith.cmpi eq, %0, %722 : vector<1x256xi32>
    %724 = vector.shape_cast %723 : vector<1x256xi1> to vector<1x256xi1>
    %725 = vector.broadcast %724 : vector<1x256xi1> to vector<16x256xi1>
    %726 = arith.select %725, %718, %715 : vector<16x256xi1>, vector<16x256xf32>
    %c127_i32_324 = arith.constant 127 : i32
    %727 = vector.broadcast %c127_i32_324 : i32 to vector<1x256xi32>
    %728 = arith.cmpi eq, %0, %727 : vector<1x256xi32>
    %729 = vector.shape_cast %728 : vector<1x256xi1> to vector<1x256xi1>
    %730 = vector.broadcast %729 : vector<1x256xi1> to vector<16x256xi1>
    %731 = arith.select %730, %698, %721 : vector<16x256xi1>, vector<16x256xf32>
    %c7_325 = arith.constant 7 : index
    %c0_326 = arith.constant 0 : index
    %c0_327 = arith.constant 0 : index
    %c0_328 = arith.constant 0 : index
    %732 = vector.load %arg5[%c7_325, %c0_326, %c0_327, %c0_328] : memref<9x3x16x16xbf16, #tpu.memory_space<vmem>>, vector<1x1x16x16xbf16>
    %733 = vector.shape_cast %732 : vector<1x1x16x16xbf16> to vector<16x16xbf16>
    %734 = arith.truncf %726 : vector<16x256xf32> to vector<16x256xbf16>
    %cst_329 = arith.constant dense<0.000000e+00> : vector<16x256xf32>
    %735 = tpu.matmul %733, %734, %cst_329 {dimension_numbers = #tpu.dot_dimension_numbers<[1], [0], [0], [1], [0, 0, 1, 1], [], []>} : vector<16x16xbf16>, vector<16x256xbf16>, vector<16x256xf32> -> vector<16x256xf32>
    %c7_330 = arith.constant 7 : index
    %c1_331 = arith.constant 1 : index
    %c0_332 = arith.constant 0 : index
    %c0_333 = arith.constant 0 : index
    %736 = vector.load %arg5[%c7_330, %c1_331, %c0_332, %c0_333] : memref<9x3x16x16xbf16, #tpu.memory_space<vmem>>, vector<1x1x16x16xbf16>
    %737 = vector.shape_cast %736 : vector<1x1x16x16xbf16> to vector<16x16xbf16>
    %738 = arith.truncf %697 : vector<16x256xf32> to vector<16x256xbf16>
    %cst_334 = arith.constant dense<0.000000e+00> : vector<16x256xf32>
    %739 = tpu.matmul %737, %738, %cst_334 {dimension_numbers = #tpu.dot_dimension_numbers<[1], [0], [0], [1], [0, 0, 1, 1], [], []>} : vector<16x16xbf16>, vector<16x256xbf16>, vector<16x256xf32> -> vector<16x256xf32>
    %740 = arith.addf %735, %739 : vector<16x256xf32>
    %c7_335 = arith.constant 7 : index
    %c2_336 = arith.constant 2 : index
    %c0_337 = arith.constant 0 : index
    %c0_338 = arith.constant 0 : index
    %741 = vector.load %arg5[%c7_335, %c2_336, %c0_337, %c0_338] : memref<9x3x16x16xbf16, #tpu.memory_space<vmem>>, vector<1x1x16x16xbf16>
    %742 = vector.shape_cast %741 : vector<1x1x16x16xbf16> to vector<16x16xbf16>
    %743 = arith.truncf %731 : vector<16x256xf32> to vector<16x256xbf16>
    %cst_339 = arith.constant dense<0.000000e+00> : vector<16x256xf32>
    %744 = tpu.matmul %742, %743, %cst_339 {dimension_numbers = #tpu.dot_dimension_numbers<[1], [0], [0], [1], [0, 0, 1, 1], [], []>} : vector<16x16xbf16>, vector<16x256xbf16>, vector<16x256xf32> -> vector<16x256xf32>
    %745 = arith.addf %740, %744 : vector<16x256xf32>
    %c8 = arith.constant 8 : index
    %c0_340 = arith.constant 0 : index
    %c0_341 = arith.constant 0 : index
    %746 = vector.load %arg3[%c8, %c0_340, %c0_341] : memref<10x16x1xf32, #tpu.memory_space<vmem>>, vector<1x16x1xf32>
    %747 = vector.shape_cast %746 : vector<1x16x1xf32> to vector<16x1xf32>
    %c8_342 = arith.constant 8 : index
    %c0_343 = arith.constant 0 : index
    %c0_344 = arith.constant 0 : index
    %748 = vector.load %arg4[%c8_342, %c0_343, %c0_344] : memref<10x16x1xf32, #tpu.memory_space<vmem>>, vector<1x16x1xf32>
    %749 = vector.shape_cast %748 : vector<1x16x1xf32> to vector<16x1xf32>
    %cst_345 = arith.constant dense<0.000000e+00> : vector<16xf32>
    %750 = vector.multi_reduction <add>, %745, %cst_345 [1] : vector<16x256xf32> to vector<16xf32>
    %751 = vector.shape_cast %750 : vector<16xf32> to vector<16x1xf32>
    %cst_346 = arith.constant 3.906250e-03 : f32
    %752 = vector.broadcast %cst_346 : f32 to vector<16x1xf32>
    %753 = arith.mulf %751, %752 : vector<16x1xf32>
    %754 = vector.broadcast %753 : vector<16x1xf32> to vector<16x256xf32>
    %755 = arith.subf %745, %754 : vector<16x256xf32>
    %756 = arith.mulf %755, %755 : vector<16x256xf32>
    %cst_347 = arith.constant dense<0.000000e+00> : vector<16xf32>
    %757 = vector.multi_reduction <add>, %756, %cst_347 [1] : vector<16x256xf32> to vector<16xf32>
    %758 = vector.shape_cast %757 : vector<16xf32> to vector<16x1xf32>
    %cst_348 = arith.constant 3.906250e-03 : f32
    %759 = vector.broadcast %cst_348 : f32 to vector<16x1xf32>
    %760 = arith.mulf %758, %759 : vector<16x1xf32>
    %cst_349 = arith.constant 9.99999974E-6 : f32
    %761 = vector.broadcast %cst_349 : f32 to vector<16x1xf32>
    %762 = arith.addf %760, %761 : vector<16x1xf32>
    %763 = math.rsqrt %762 : vector<16x1xf32>
    %764 = arith.mulf %763, %747 : vector<16x1xf32>
    %765 = vector.broadcast %764 : vector<16x1xf32> to vector<16x256xf32>
    %766 = arith.mulf %755, %765 : vector<16x256xf32>
    %767 = vector.broadcast %749 : vector<16x1xf32> to vector<16x256xf32>
    %768 = arith.addf %766, %767 : vector<16x256xf32>
    %cst_350 = arith.constant 2.000000e-01 : f32
    %769 = vector.broadcast %cst_350 : f32 to vector<16x256xf32>
    %770 = arith.mulf %769, %768 : vector<16x256xf32>
    %771 = arith.maximumf %768, %770 : vector<16x256xf32>
    %c7_351 = arith.constant 7 : index
    %c0_352 = arith.constant 0 : index
    %c0_353 = arith.constant 0 : index
    %772 = vector.load %arg6[%c7_351, %c0_352, %c0_353] : memref<9x16x16xbf16, #tpu.memory_space<vmem>>, vector<1x16x16xbf16>
    %773 = vector.shape_cast %772 : vector<1x16x16xbf16> to vector<16x16xbf16>
    %774 = arith.truncf %771 : vector<16x256xf32> to vector<16x256xbf16>
    %cst_354 = arith.constant dense<0.000000e+00> : vector<16x256xf32>
    %775 = tpu.matmul %773, %774, %cst_354 {dimension_numbers = #tpu.dot_dimension_numbers<[1], [0], [0], [1], [0, 0, 1, 1], [], []>} : vector<16x16xbf16>, vector<16x256xbf16>, vector<16x256xf32> -> vector<16x256xf32>
    %c7_355 = arith.constant 7 : index
    %c0_356 = arith.constant 0 : index
    %c0_357 = arith.constant 0 : index
    %776 = vector.load %arg7[%c7_355, %c0_356, %c0_357] : memref<9x16x1xf32, #tpu.memory_space<vmem>>, vector<1x16x1xf32>
    %777 = vector.shape_cast %776 : vector<1x16x1xf32> to vector<16x1xf32>
    %778 = vector.broadcast %777 : vector<16x1xf32> to vector<16x256xf32>
    %779 = arith.addf %775, %778 : vector<16x256xf32>
    %780 = arith.addf %697, %779 : vector<16x256xf32>
    %c9_i32_358 = arith.constant 9 : i32
    %781 = tpu.dynamic_rotate %780 by %c9_i32_358 dim 1 : vector<16x256xf32>, i32 -> vector<16x256xf32>
    %c247_i32_359 = arith.constant 247 : i32
    %782 = tpu.dynamic_rotate %780 by %c247_i32_359 dim 1 : vector<16x256xf32>, i32 -> vector<16x256xf32>
    %c0_i32_360 = arith.constant 0 : i32
    %783 = vector.broadcast %c0_i32_360 : i32 to vector<1x256xi32>
    %784 = arith.cmpi eq, %0, %783 : vector<1x256xi32>
    %785 = vector.shape_cast %784 : vector<1x256xi1> to vector<1x256xi1>
    %786 = vector.broadcast %785 : vector<1x256xi1> to vector<16x256xi1>
    %787 = arith.select %786, %782, %781 : vector<16x256xi1>, vector<16x256xf32>
    %c119_i32_361 = arith.constant 119 : i32
    %788 = vector.broadcast %c119_i32_361 : i32 to vector<1x256xi32>
    %789 = arith.cmpi eq, %0, %788 : vector<1x256xi32>
    %c249_i32_362 = arith.constant 249 : i32
    %790 = tpu.dynamic_rotate %780 by %c249_i32_362 dim 1 : vector<16x256xf32>, i32 -> vector<16x256xf32>
    %791 = vector.shape_cast %789 : vector<1x256xi1> to vector<1x256xi1>
    %792 = vector.broadcast %791 : vector<1x256xi1> to vector<16x256xi1>
    %793 = arith.select %792, %790, %782 : vector<16x256xi1>, vector<16x256xf32>
    %c1_i32_363 = arith.constant 1 : i32
    %794 = vector.broadcast %c1_i32_363 : i32 to vector<1x256xi32>
    %795 = arith.cmpi eq, %0, %794 : vector<1x256xi32>
    %796 = vector.shape_cast %795 : vector<1x256xi1> to vector<1x256xi1>
    %797 = vector.broadcast %796 : vector<1x256xi1> to vector<16x256xi1>
    %798 = arith.select %797, %790, %787 : vector<16x256xi1>, vector<16x256xf32>
    %c120_i32_364 = arith.constant 120 : i32
    %799 = vector.broadcast %c120_i32_364 : i32 to vector<1x256xi32>
    %800 = arith.cmpi eq, %0, %799 : vector<1x256xi32>
    %c251_i32_365 = arith.constant 251 : i32
    %801 = tpu.dynamic_rotate %780 by %c251_i32_365 dim 1 : vector<16x256xf32>, i32 -> vector<16x256xf32>
    %802 = vector.shape_cast %800 : vector<1x256xi1> to vector<1x256xi1>
    %803 = vector.broadcast %802 : vector<1x256xi1> to vector<16x256xi1>
    %804 = arith.select %803, %801, %793 : vector<16x256xi1>, vector<16x256xf32>
    %c2_i32_366 = arith.constant 2 : i32
    %805 = vector.broadcast %c2_i32_366 : i32 to vector<1x256xi32>
    %806 = arith.cmpi eq, %0, %805 : vector<1x256xi32>
    %807 = vector.shape_cast %806 : vector<1x256xi1> to vector<1x256xi1>
    %808 = vector.broadcast %807 : vector<1x256xi1> to vector<16x256xi1>
    %809 = arith.select %808, %801, %798 : vector<16x256xi1>, vector<16x256xf32>
    %c121_i32_367 = arith.constant 121 : i32
    %810 = vector.broadcast %c121_i32_367 : i32 to vector<1x256xi32>
    %811 = arith.cmpi eq, %0, %810 : vector<1x256xi32>
    %c253_i32_368 = arith.constant 253 : i32
    %812 = tpu.dynamic_rotate %780 by %c253_i32_368 dim 1 : vector<16x256xf32>, i32 -> vector<16x256xf32>
    %813 = vector.shape_cast %811 : vector<1x256xi1> to vector<1x256xi1>
    %814 = vector.broadcast %813 : vector<1x256xi1> to vector<16x256xi1>
    %815 = arith.select %814, %812, %804 : vector<16x256xi1>, vector<16x256xf32>
    %c3_i32_369 = arith.constant 3 : i32
    %816 = vector.broadcast %c3_i32_369 : i32 to vector<1x256xi32>
    %817 = arith.cmpi eq, %0, %816 : vector<1x256xi32>
    %818 = vector.shape_cast %817 : vector<1x256xi1> to vector<1x256xi1>
    %819 = vector.broadcast %818 : vector<1x256xi1> to vector<16x256xi1>
    %820 = arith.select %819, %812, %809 : vector<16x256xi1>, vector<16x256xf32>
    %c122_i32_370 = arith.constant 122 : i32
    %821 = vector.broadcast %c122_i32_370 : i32 to vector<1x256xi32>
    %822 = arith.cmpi eq, %0, %821 : vector<1x256xi32>
    %c255_i32_371 = arith.constant 255 : i32
    %823 = tpu.dynamic_rotate %780 by %c255_i32_371 dim 1 : vector<16x256xf32>, i32 -> vector<16x256xf32>
    %824 = vector.shape_cast %822 : vector<1x256xi1> to vector<1x256xi1>
    %825 = vector.broadcast %824 : vector<1x256xi1> to vector<16x256xi1>
    %826 = arith.select %825, %823, %815 : vector<16x256xi1>, vector<16x256xf32>
    %c4_i32_372 = arith.constant 4 : i32
    %827 = vector.broadcast %c4_i32_372 : i32 to vector<1x256xi32>
    %828 = arith.cmpi eq, %0, %827 : vector<1x256xi32>
    %829 = vector.shape_cast %828 : vector<1x256xi1> to vector<1x256xi1>
    %830 = vector.broadcast %829 : vector<1x256xi1> to vector<16x256xi1>
    %831 = arith.select %830, %823, %820 : vector<16x256xi1>, vector<16x256xf32>
    %c123_i32_373 = arith.constant 123 : i32
    %832 = vector.broadcast %c123_i32_373 : i32 to vector<1x256xi32>
    %833 = arith.cmpi eq, %0, %832 : vector<1x256xi32>
    %c1_i32_374 = arith.constant 1 : i32
    %834 = tpu.dynamic_rotate %780 by %c1_i32_374 dim 1 : vector<16x256xf32>, i32 -> vector<16x256xf32>
    %835 = vector.shape_cast %833 : vector<1x256xi1> to vector<1x256xi1>
    %836 = vector.broadcast %835 : vector<1x256xi1> to vector<16x256xi1>
    %837 = arith.select %836, %834, %826 : vector<16x256xi1>, vector<16x256xf32>
    %c5_i32_375 = arith.constant 5 : i32
    %838 = vector.broadcast %c5_i32_375 : i32 to vector<1x256xi32>
    %839 = arith.cmpi eq, %0, %838 : vector<1x256xi32>
    %840 = vector.shape_cast %839 : vector<1x256xi1> to vector<1x256xi1>
    %841 = vector.broadcast %840 : vector<1x256xi1> to vector<16x256xi1>
    %842 = arith.select %841, %834, %831 : vector<16x256xi1>, vector<16x256xf32>
    %c124_i32_376 = arith.constant 124 : i32
    %843 = vector.broadcast %c124_i32_376 : i32 to vector<1x256xi32>
    %844 = arith.cmpi eq, %0, %843 : vector<1x256xi32>
    %c3_i32_377 = arith.constant 3 : i32
    %845 = tpu.dynamic_rotate %780 by %c3_i32_377 dim 1 : vector<16x256xf32>, i32 -> vector<16x256xf32>
    %846 = vector.shape_cast %844 : vector<1x256xi1> to vector<1x256xi1>
    %847 = vector.broadcast %846 : vector<1x256xi1> to vector<16x256xi1>
    %848 = arith.select %847, %845, %837 : vector<16x256xi1>, vector<16x256xf32>
    %c6_i32_378 = arith.constant 6 : i32
    %849 = vector.broadcast %c6_i32_378 : i32 to vector<1x256xi32>
    %850 = arith.cmpi eq, %0, %849 : vector<1x256xi32>
    %851 = vector.shape_cast %850 : vector<1x256xi1> to vector<1x256xi1>
    %852 = vector.broadcast %851 : vector<1x256xi1> to vector<16x256xi1>
    %853 = arith.select %852, %845, %842 : vector<16x256xi1>, vector<16x256xf32>
    %c125_i32_379 = arith.constant 125 : i32
    %854 = vector.broadcast %c125_i32_379 : i32 to vector<1x256xi32>
    %855 = arith.cmpi eq, %0, %854 : vector<1x256xi32>
    %c5_i32_380 = arith.constant 5 : i32
    %856 = tpu.dynamic_rotate %780 by %c5_i32_380 dim 1 : vector<16x256xf32>, i32 -> vector<16x256xf32>
    %857 = vector.shape_cast %855 : vector<1x256xi1> to vector<1x256xi1>
    %858 = vector.broadcast %857 : vector<1x256xi1> to vector<16x256xi1>
    %859 = arith.select %858, %856, %848 : vector<16x256xi1>, vector<16x256xf32>
    %c7_i32_381 = arith.constant 7 : i32
    %860 = vector.broadcast %c7_i32_381 : i32 to vector<1x256xi32>
    %861 = arith.cmpi eq, %0, %860 : vector<1x256xi32>
    %862 = vector.shape_cast %861 : vector<1x256xi1> to vector<1x256xi1>
    %863 = vector.broadcast %862 : vector<1x256xi1> to vector<16x256xi1>
    %864 = arith.select %863, %856, %853 : vector<16x256xi1>, vector<16x256xf32>
    %c126_i32_382 = arith.constant 126 : i32
    %865 = vector.broadcast %c126_i32_382 : i32 to vector<1x256xi32>
    %866 = arith.cmpi eq, %0, %865 : vector<1x256xi32>
    %c7_i32_383 = arith.constant 7 : i32
    %867 = tpu.dynamic_rotate %780 by %c7_i32_383 dim 1 : vector<16x256xf32>, i32 -> vector<16x256xf32>
    %868 = vector.shape_cast %866 : vector<1x256xi1> to vector<1x256xi1>
    %869 = vector.broadcast %868 : vector<1x256xi1> to vector<16x256xi1>
    %870 = arith.select %869, %867, %859 : vector<16x256xi1>, vector<16x256xf32>
    %c8_i32_384 = arith.constant 8 : i32
    %871 = vector.broadcast %c8_i32_384 : i32 to vector<1x256xi32>
    %872 = arith.cmpi eq, %0, %871 : vector<1x256xi32>
    %873 = vector.shape_cast %872 : vector<1x256xi1> to vector<1x256xi1>
    %874 = vector.broadcast %873 : vector<1x256xi1> to vector<16x256xi1>
    %875 = arith.select %874, %867, %864 : vector<16x256xi1>, vector<16x256xf32>
    %c127_i32_385 = arith.constant 127 : i32
    %876 = vector.broadcast %c127_i32_385 : i32 to vector<1x256xi32>
    %877 = arith.cmpi eq, %0, %876 : vector<1x256xi32>
    %878 = vector.shape_cast %877 : vector<1x256xi1> to vector<1x256xi1>
    %879 = vector.broadcast %878 : vector<1x256xi1> to vector<16x256xi1>
    %880 = arith.select %879, %781, %870 : vector<16x256xi1>, vector<16x256xf32>
    %c8_386 = arith.constant 8 : index
    %c0_387 = arith.constant 0 : index
    %c0_388 = arith.constant 0 : index
    %c0_389 = arith.constant 0 : index
    %881 = vector.load %arg5[%c8_386, %c0_387, %c0_388, %c0_389] : memref<9x3x16x16xbf16, #tpu.memory_space<vmem>>, vector<1x1x16x16xbf16>
    %882 = vector.shape_cast %881 : vector<1x1x16x16xbf16> to vector<16x16xbf16>
    %883 = arith.truncf %875 : vector<16x256xf32> to vector<16x256xbf16>
    %cst_390 = arith.constant dense<0.000000e+00> : vector<16x256xf32>
    %884 = tpu.matmul %882, %883, %cst_390 {dimension_numbers = #tpu.dot_dimension_numbers<[1], [0], [0], [1], [0, 0, 1, 1], [], []>} : vector<16x16xbf16>, vector<16x256xbf16>, vector<16x256xf32> -> vector<16x256xf32>
    %c8_391 = arith.constant 8 : index
    %c1_392 = arith.constant 1 : index
    %c0_393 = arith.constant 0 : index
    %c0_394 = arith.constant 0 : index
    %885 = vector.load %arg5[%c8_391, %c1_392, %c0_393, %c0_394] : memref<9x3x16x16xbf16, #tpu.memory_space<vmem>>, vector<1x1x16x16xbf16>
    %886 = vector.shape_cast %885 : vector<1x1x16x16xbf16> to vector<16x16xbf16>
    %887 = arith.truncf %780 : vector<16x256xf32> to vector<16x256xbf16>
    %cst_395 = arith.constant dense<0.000000e+00> : vector<16x256xf32>
    %888 = tpu.matmul %886, %887, %cst_395 {dimension_numbers = #tpu.dot_dimension_numbers<[1], [0], [0], [1], [0, 0, 1, 1], [], []>} : vector<16x16xbf16>, vector<16x256xbf16>, vector<16x256xf32> -> vector<16x256xf32>
    %889 = arith.addf %884, %888 : vector<16x256xf32>
    %c8_396 = arith.constant 8 : index
    %c2_397 = arith.constant 2 : index
    %c0_398 = arith.constant 0 : index
    %c0_399 = arith.constant 0 : index
    %890 = vector.load %arg5[%c8_396, %c2_397, %c0_398, %c0_399] : memref<9x3x16x16xbf16, #tpu.memory_space<vmem>>, vector<1x1x16x16xbf16>
    %891 = vector.shape_cast %890 : vector<1x1x16x16xbf16> to vector<16x16xbf16>
    %892 = arith.truncf %880 : vector<16x256xf32> to vector<16x256xbf16>
    %cst_400 = arith.constant dense<0.000000e+00> : vector<16x256xf32>
    %893 = tpu.matmul %891, %892, %cst_400 {dimension_numbers = #tpu.dot_dimension_numbers<[1], [0], [0], [1], [0, 0, 1, 1], [], []>} : vector<16x16xbf16>, vector<16x256xbf16>, vector<16x256xf32> -> vector<16x256xf32>
    %894 = arith.addf %889, %893 : vector<16x256xf32>
    %c9 = arith.constant 9 : index
    %c0_401 = arith.constant 0 : index
    %c0_402 = arith.constant 0 : index
    %895 = vector.load %arg3[%c9, %c0_401, %c0_402] : memref<10x16x1xf32, #tpu.memory_space<vmem>>, vector<1x16x1xf32>
    %896 = vector.shape_cast %895 : vector<1x16x1xf32> to vector<16x1xf32>
    %c9_403 = arith.constant 9 : index
    %c0_404 = arith.constant 0 : index
    %c0_405 = arith.constant 0 : index
    %897 = vector.load %arg4[%c9_403, %c0_404, %c0_405] : memref<10x16x1xf32, #tpu.memory_space<vmem>>, vector<1x16x1xf32>
    %898 = vector.shape_cast %897 : vector<1x16x1xf32> to vector<16x1xf32>
    %cst_406 = arith.constant dense<0.000000e+00> : vector<16xf32>
    %899 = vector.multi_reduction <add>, %894, %cst_406 [1] : vector<16x256xf32> to vector<16xf32>
    %900 = vector.shape_cast %899 : vector<16xf32> to vector<16x1xf32>
    %cst_407 = arith.constant 3.906250e-03 : f32
    %901 = vector.broadcast %cst_407 : f32 to vector<16x1xf32>
    %902 = arith.mulf %900, %901 : vector<16x1xf32>
    %903 = vector.broadcast %902 : vector<16x1xf32> to vector<16x256xf32>
    %904 = arith.subf %894, %903 : vector<16x256xf32>
    %905 = arith.mulf %904, %904 : vector<16x256xf32>
    %cst_408 = arith.constant dense<0.000000e+00> : vector<16xf32>
    %906 = vector.multi_reduction <add>, %905, %cst_408 [1] : vector<16x256xf32> to vector<16xf32>
    %907 = vector.shape_cast %906 : vector<16xf32> to vector<16x1xf32>
    %cst_409 = arith.constant 3.906250e-03 : f32
    %908 = vector.broadcast %cst_409 : f32 to vector<16x1xf32>
    %909 = arith.mulf %907, %908 : vector<16x1xf32>
    %cst_410 = arith.constant 9.99999974E-6 : f32
    %910 = vector.broadcast %cst_410 : f32 to vector<16x1xf32>
    %911 = arith.addf %909, %910 : vector<16x1xf32>
    %912 = math.rsqrt %911 : vector<16x1xf32>
    %913 = arith.mulf %912, %896 : vector<16x1xf32>
    %914 = vector.broadcast %913 : vector<16x1xf32> to vector<16x256xf32>
    %915 = arith.mulf %904, %914 : vector<16x256xf32>
    %916 = vector.broadcast %898 : vector<16x1xf32> to vector<16x256xf32>
    %917 = arith.addf %915, %916 : vector<16x256xf32>
    %cst_411 = arith.constant 2.000000e-01 : f32
    %918 = vector.broadcast %cst_411 : f32 to vector<16x256xf32>
    %919 = arith.mulf %918, %917 : vector<16x256xf32>
    %920 = arith.maximumf %917, %919 : vector<16x256xf32>
    %c8_412 = arith.constant 8 : index
    %c0_413 = arith.constant 0 : index
    %c0_414 = arith.constant 0 : index
    %921 = vector.load %arg6[%c8_412, %c0_413, %c0_414] : memref<9x16x16xbf16, #tpu.memory_space<vmem>>, vector<1x16x16xbf16>
    %922 = vector.shape_cast %921 : vector<1x16x16xbf16> to vector<16x16xbf16>
    %923 = arith.truncf %920 : vector<16x256xf32> to vector<16x256xbf16>
    %cst_415 = arith.constant dense<0.000000e+00> : vector<16x256xf32>
    %924 = tpu.matmul %922, %923, %cst_415 {dimension_numbers = #tpu.dot_dimension_numbers<[1], [0], [0], [1], [0, 0, 1, 1], [], []>} : vector<16x16xbf16>, vector<16x256xbf16>, vector<16x256xf32> -> vector<16x256xf32>
    %c8_416 = arith.constant 8 : index
    %c0_417 = arith.constant 0 : index
    %c0_418 = arith.constant 0 : index
    %925 = vector.load %arg7[%c8_416, %c0_417, %c0_418] : memref<9x16x1xf32, #tpu.memory_space<vmem>>, vector<1x16x1xf32>
    %926 = vector.shape_cast %925 : vector<1x16x1xf32> to vector<16x1xf32>
    %927 = vector.broadcast %926 : vector<16x1xf32> to vector<16x256xf32>
    %928 = arith.addf %924, %927 : vector<16x256xf32>
    %929 = arith.addf %780, %928 : vector<16x256xf32>
    %c0_419 = arith.constant 0 : index
    %c0_420 = arith.constant 0 : index
    %930 = vector.load %arg8[%c0_419, %c0_420] : memref<1x16xbf16, #tpu.memory_space<vmem>>, vector<1x16xbf16>
    %931 = arith.truncf %929 : vector<16x256xf32> to vector<16x256xbf16>
    %cst_421 = arith.constant dense<0.000000e+00> : vector<1x256xf32>
    %932 = tpu.matmul %930, %931, %cst_421 {dimension_numbers = #tpu.dot_dimension_numbers<[1], [0], [0], [1], [0, 0, 1, 1], [], []>} : vector<1x16xbf16>, vector<16x256xbf16>, vector<1x256xf32> -> vector<1x256xf32>
    %c0_422 = arith.constant 0 : index
    %c0_423 = arith.constant 0 : index
    %933 = vector.load %arg9[%c0_422, %c0_423] : memref<1x256xf32, #tpu.memory_space<vmem>>, vector<1x256xf32>
    tpu.vector_store %arg9[%c0_422, %c0_423], %932 {strides = array<i32>} : memref<1x256xf32, #tpu.memory_space<vmem>>, vector<1x256xf32>,
    return
  }
}

</mosaic_0001>

<bundles_post_ra>
// kernel: net_forward.1
= control target key start
LH: loop header
LB: loop body
LE: loop exit
PB: predicated region body
PF: predicated region fallthrough
CT: control target
= control target key end

     0   :  { %v4694_v2 = vmov 1   ;;  %v6936_v3 = vmov 0   ;;  %s6912_s0 = inlined_call_operand.vmem [shape: s32[1,256], index: 0, kind: input, shape index: {}]   ;;  %s6913_s1 = inlined_call_operand.vmem [shape: f32[1,256], index: 1, kind: input, shape index: {}]   ;;  %s6914_s2 = inlined_call_operand.vmem [shape: f32[16,3], index: 2, kind: input, shape index: {}]   ;;  %s6915_s3 = inlined_call_operand.vmem [shape: f32[10,16,1], index: 3, kind: input, shape index: {}]   ;;  %s6916_s4 = inlined_call_operand.vmem [shape: f32[10,16,1], index: 4, kind: input, shape index: {}]   ;;  %s6917_s5 = inlined_call_operand.vmem [shape: bf16[9,3,16,16], index: 5, kind: input, shape index: {}]   ;;  %s6918_s6 = inlined_call_operand.vmem [shape: bf16[9,16,16], index: 6, kind: input, shape index: {}]   ;;  %s6919_s7 = inlined_call_operand.vmem [shape: f32[9,16,1], index: 7, kind: input, shape index: {}]   ;;  %s6920_s8 = inlined_call_operand.vmem [shape: bf16[1,16], index: 8, kind: input, shape index: {}]   ;;  %s6921_s9 = inlined_call_operand.hbm [shape: f32[1,256], index: 9, kind: output, shape index: {}]  }
   0x1   :  { %v35_v0 = vld [vmem:[%s6913_s1] sm:$0x3]  ;;  %4141 = vset.pattern.permute.xlu1 %v4694_v2  ;;  %4140 = vset.pattern.permute.xlu0 %v4694_v2 }
   0x2   :  { %v4761_v1 = vperm.slane %v35_v0, 0  ;;  %4139 = vset.pattern.permute.xlu2 %v6936_v3 }
   0x3   :  { %14 = vsyncpa [#allocation3], 0  ;;  %s4696_s11 = smov 127   ;;  %s4697_s12 = smov 1   ;;  %v72_v4 = vld [vmem:[%s6914_s2] sm:$0xff]  ;;  %v38_v5 = vperm.slane %v35_v0, 1  ;;  %v6934_v9 = vlaneseq }
   0x4   :  { %50 = vrot.lane.b32.xlu1 %v4761_v1, %s4696_s11  ;;  %41 = vrot.lane.b32.xlu0 %v4761_v1, %s4697_s12  ;;  %v73_v6 = vld [vmem:[%s6914_s2 + $0x8] sm:$0xff]  ;;  %v4698_v7 = vmov 2   ;;  %v4787_v14 = vld [vmem:[%s6912_s0] sm:$0x3]  ;;  %vm6922_vm2 = vcmask 1040384   ;;  %vm6923_vm11 = vcmask 130048  }
   0x5   :  { %76 = vperm.xlu2 %4139, %v72_v4   ;;  %v4780_v12 = vand.u32 127, %v6934_v9  ;;  %vm57_vm3 = vcmp.eq.s32.totalorder %v4787_v14, 0  ;;  %vm70_vm4 = vcmp.eq.s32.totalorder %v4787_v14, 127  ;;  %s4699_s24 = smov 3   ;;  %s4700_s25 = smov 125  }
   0x6   :  { %s4701_s27 = smov 9   ;;  %s4702_s28 = smov 119  }
   0x7   :  { %vm6926_vm0 = vcmp.lt.s32.totalorder %v4780_v12, 127  ;;  %vm6925_vm1 = vcmp.lt.s32.totalorder %v4780_v12, 1  ;;  %s4703_s29 = smov 121   ;;  %s4704_s30 = smov 123  }
   0x8   :  { %s4705_s10 = smov 5   ;;  %s4706_s13 = smov 7  }
   0x9   :  { %s4707_s15 = smov [#allocation2]   ;;  %s3742_s18 = sshll.u32 %s6921_s9, 4  ;;  %s3743_s18 = int_to_ptr.hbm [resolvable:$true] %s3742_s18 }
   0xa   :  { %s3740_s2 = sshll.u32 %s4707_s15, 4  ;;  %s3741_s2 = int_to_ptr.vmem [resolvable:$true] %s3740_s2 }
   0xc   :  { %52 = vrot.lane.b32.xlu1 %v38_v5, %s4696_s11  ;;  %43 = vrot.lane.b32.xlu0 %v38_v5, %s4697_s12 }
   0xd   :  { %81 = vperm.xlu2 %4139, %v73_v6  }
  0x14   :  { %98 = vperm.xlu1 %4141, %v73_v6   ;;  %94 = vperm.xlu0 %4140, %v72_v4  }
  0x15   :  { %4142 = vset.pattern.permute.xlu2 %v4698_v7 }
  0x16   :  { %110 = vperm.xlu2 %4142, %v72_v4  }
  0x1c   :  { %4143 = vset.pattern.permute.xlu1 %v4698_v7  ;;  %4145 = vset.pattern.permute.xlu0 %v6936_v3 }
  0x1d   :  { %114 = vperm.xlu1 %4143, %v73_v6  }
  0x1e   :  { %4144 = vset.pattern.permute.xlu2 %v6936_v3 }
  0x25   :  { %4146 = vset.pattern.permute.xlu1 %v6936_v3 }
  0x5f   :  { %v77_v8 = vpop.permute.xlu2 %76 }
  0x67   :  { %v82_v13 = vpop.permute.xlu2 %81 }
  0x70   :  { %v111_v29 = vpop.permute.xlu2 %110 }
  0x76   :  { %v51_v10 = vpop.permute.xlu1 %50  ;;  %v42_v11 = vpop.permute.xlu0 %41 }
  0x7e   :  { %v53_v15 = vpop.permute.xlu1 %52  ;;  %v44_v16 = vpop.permute.xlu0 %43 }
  0x7f   :  { %v56_v17 = vsel %vm6926_vm0, %v53_v15, %v51_v10  ;;  %v48_v18 = vsel %vm6925_vm1, %v42_v11, %v44_v16  ;;  %v55_v21 = vsel %vm6926_vm0, %v51_v10, %v53_v15  ;;  %v49_v22 = vsel %vm6925_vm1, %v44_v16, %v42_v11 }
  0x80   :  { %v60_v19 = vrot.slane %v56_v17, 7  ;;  %v66_v20 = vrot.slane %v48_v18, 7 }
  0x82   :  { %v62_v23 = vsel %vm6922_vm2, %v55_v21, %v60_v19  ;;  %v67_v24 = vsel %vm6922_vm2, %v49_v22, %v66_v20 }
  0x83   :  { %v69_v25 = vsel %vm57_vm3, %v62_v23, %v67_v24  ;;  %v71_v26 = vsel %vm70_vm4, %v67_v24, %v62_v23 }
  0x84   :  { %v85_v27 = vperm.slane %v69_v25, 0  ;;  %v86_v28 = vperm.slane %v69_v25, 1  ;;  %v118_v30 = vperm.slane %v71_v26, 0  ;;  %v119_v31 = vperm.slane %v71_v26, 1  ;;  %v130_v25 = vld [vmem:[%s6915_s3] sm:$0xff] }
  0x86   :  { %v99_v32 = vpop.permute.xlu1 %98  ;;  %v95_v33 = vpop.permute.xlu0 %94  ;;  %v89_v34 = vmul.f32 %v85_v27, %v77_v8  ;;  %v90_v35 = vmul.f32 %v86_v28, %v77_v8  ;;  %v122_v38 = vmul.f32 %v118_v30, %v111_v29  ;;  %v123_v39 = vmul.f32 %v119_v31, %v111_v29  ;;  %v132_v8 = vld [vmem:[%s6916_s4] sm:$0xff] }
  0x87   :  { %v101_v36 = vmul.f32 %v95_v33, %v4761_v1  ;;  %v102_v37 = vmul.f32 %v95_v33, %v38_v5  ;;  %v103_v44 = vmul.f32 %v99_v32, %v4761_v1  ;;  %v104_v45 = vmul.f32 %v99_v32, %v38_v5  ;;  %v131_v32 = vld [vmem:[%s6915_s3 + $0x8] sm:$0xff] }
  0x88   :  { %v91_v46 = vmul.f32 %v85_v27, %v82_v13  ;;  %v92_v47 = vmul.f32 %v86_v28, %v82_v13 }
  0x89   :  { %v105_v40 = vadd.f32 %v101_v36, %v89_v34  ;;  %v106_v41 = vadd.f32 %v102_v37, %v90_v35  ;;  %v133_v36 = vld [vmem:[%s6916_s4 + $0x8] sm:$0xff] }
  0x8a   :  { %v107_v52 = vadd.f32 %v103_v44, %v91_v46  ;;  %v108_v53 = vadd.f32 %v104_v45, %v92_v47 }
  0x8b   :  { %v126_v42 = vadd.f32 %v122_v38, %v105_v40  ;;  %v127_v43 = vadd.f32 %v123_v39, %v106_v41 }
  0x8d   :  { %v134_v48 = vadd.f32 %v127_v43, %v126_v42 }
  0x8f   :  { %v115_v49 = vpop.permute.xlu1 %114  ;;  %135 = vadd.xlane.f32.xlu2 %v134_v48 }
  0x90   :  { %v124_v50 = vmul.f32 %v118_v30, %v115_v49  ;;  %v125_v51 = vmul.f32 %v119_v31, %v115_v49 }
  0x92   :  { %v128_v54 = vadd.f32 %v124_v50, %v107_v52  ;;  %v129_v55 = vadd.f32 %v125_v51, %v108_v53 }
  0x94   :  { %v137_v56 = vadd.f32 %v129_v55, %v128_v54 }
  0x96   :  { %138 = vadd.xlane.f32.xlu0 %v137_v56 }
 0x102   :  { %v136_v57 = vpop.xlane.xlu2 %135 }
 0x103   :  { %v140_v58 = vmul.f32 0.00390625, %v136_v57 }
 0x105   :  { %v142_v59 = vsub.f32 %v126_v42, %v140_v58  ;;  %v143_v60 = vsub.f32 %v127_v43, %v140_v58 }
 0x107   :  { %v146_v61 = vmul.f32 %v142_v59, %v142_v59  ;;  %v147_v62 = vmul.f32 %v143_v60, %v143_v60 }
 0x109   :  { %v139_v63 = vpop.xlane.xlu0 %138  ;;  %v150_v0 = vadd.f32 %v147_v62, %v146_v61  ;;  %v4090_v61 = vld [vmem:[%s6917_s5 + $0x8] sm:$0xff] }
 0x10a   :  { %v141_v1 = vmul.f32 0.00390625, %v139_v63  ;;  %v242_v63 = vsel %vm57_vm3, 1, %v6936_v3 }
 0x10b   :  { %151 = vadd.xlane.f32.xlu1 %v150_v0 }
 0x10c   :  { %v144_v2 = vsub.f32 %v128_v54, %v141_v1  ;;  %v145_v4 = vsub.f32 %v129_v55, %v141_v1  ;;  %v251_v1 = vsel %vm70_vm4, 1, %v6936_v3 }
 0x10e   :  { %v148_v5 = vmul.f32 %v144_v2, %v144_v2  ;;  %v149_v6 = vmul.f32 %v145_v4, %v145_v4 }
 0x110   :  { %v153_v7 = vadd.f32 %v149_v6, %v148_v5  ;;  %v252_v5 = vperm.slane %v251_v1, 0  ;;  %v253_v6 = vperm.slane %v251_v1, 1 }
 0x112   :  { %154 = vadd.xlane.f32.xlu2 %v153_v7  ;;  %vm4858_vm14 = vcmp.eq.s32.totalorder %v252_v5, 1  ;;  %vm4862_vm15 = vcmp.eq.s32.totalorder %v253_v6, 1 }
 0x124   :  { %198 = vperm.xlu1 %4146, %v132_v8  }
 0x17e   :  { %v152_v10 = vpop.xlane.xlu1 %151 }
 0x17f   :  { %v156_v11 = vmul.f32 0.00390625, %v152_v10 }
 0x181   :  { %v158_v13 = vadd.f32 1e-05, %v156_v11  ;;  %v7086_v11 = vmov 0 }
 0x183   :  { %4627 = vrsqrt.f32 %v158_v13  ;;  %vm166_vm6 = vweird.f32 %v158_v13 }
 0x185   :  { %v155_v15 = vpop.xlane.xlu2 %154 }
 0x186   :  { %v157_v16 = vmul.f32 0.00390625, %v155_v15  ;;  %v7092_v15 = vmov 0 }
 0x187   :  { %v7093_v15 = vsel %vm4858_vm14, 4294967295, %v7092_v15 }
 0x188   :  { %v159_v17 = vadd.f32 1e-05, %v157_v16  ;;  %7094 = vst [vmem:[#allocation7_spill] sm:$0xff] %v7093_v15  ;;  %v7095_v16 = vmov 0 }
 0x189   :  { %v4628_v18 = vpop.eup %4627  ;;  %v7096_v16 = vsel %vm4862_vm15, 4294967295, %v7095_v16 }
 0x18a   :  { %v161_v19 = vmul.f32 %v4628_v18, %v158_v13  ;;  %4629 = vrsqrt.f32 %v159_v17  ;;  %vm167_vm5 = vweird.f32 %v4628_v18  ;;  %vm176_vm9 = vweird.f32 %v159_v17  ;;  %7097 = vst [vmem:[#allocation8_spill] sm:$0xff] %v7096_v16 }
 0x18b   :  { %vm168_vm7 = vmor %vm166_vm6, %vm167_vm5  ;;  %v7089_v13 = vmov 0 }
 0x18c   :  { %v162_v20 = vmul.f32 %v4628_v18, %v161_v19 }
 0x18e   :  { %v163_v21 = vmul.f32 0.5, %v162_v20 }
 0x190   :  { %v4630_v22 = vpop.eup %4629  ;;  %v164_v23 = vsub.f32 1.5, %v163_v21 }
 0x191   :  { %v171_v24 = vmul.f32 %v4630_v22, %v159_v17  ;;  %vm177_vm8 = vweird.f32 %v4630_v22 }
 0x192   :  { %v165_v26 = vmul.f32 %v4628_v18, %v164_v23  ;;  %vm178_vm10 = vmor %vm176_vm9, %vm177_vm8  ;;  %vm563_vm9 = vcmp.eq.s32.totalorder %v4787_v14, 125 }
 0x193   :  { %v172_v27 = vmul.f32 %v4630_v22, %v171_v24 }
 0x194   :  { %v169_v28 = vsel %vm168_vm7, %v4628_v18, %v165_v26 }
 0x195   :  { %v173_v29 = vmul.f32 0.5, %v172_v27  ;;  %v180_v30 = vmul.f32 %v169_v28, %v130_v25 }
 0x196   :  { %v199_v40 = vpop.permute.xlu1 %198 }
 0x197   :  { %v174_v31 = vsub.f32 1.5, %v173_v29  ;;  %184 = vperm.xlu2 %4144, %v180_v30  }
 0x199   :  { %v175_v33 = vmul.f32 %v4630_v22, %v174_v31 }
 0x19b   :  { %v179_v34 = vsel %vm178_vm10, %v4630_v22, %v175_v33  ;;  %vm585_vm10 = vcmp.eq.s32.totalorder %v4787_v14, 1 }
 0x19c   :  { %v181_v35 = vmul.f32 %v179_v34, %v131_v32 }
 0x19e   :  { %189 = vperm.xlu0 %4145, %v181_v35  }
 0x19f   :  { %203 = vperm.xlu2 %4144, %v133_v36  }
 0x1f1   :  { %v185_v37 = vpop.permute.xlu2 %184 }
 0x1f2   :  { %v192_v38 = vmul.f32 %v185_v37, %v142_v59  ;;  %v193_v39 = vmul.f32 %v185_v37, %v143_v60 }
 0x1f4   :  { %v206_v41 = vadd.f32 %v199_v40, %v192_v38  ;;  %v207_v42 = vadd.f32 %v199_v40, %v193_v39 }
 0x1f6   :  { %v210_v47 = vmul.f32 0.2, %v206_v41  ;;  %v211_v48 = vmul.f32 0.2, %v207_v42 }
 0x1f8   :  { %v4819_v53 = vmax.f32 %v206_v41, %v210_v47  ;;  %v4821_v54 = vmax.f32 %v207_v42, %v211_v48 }
 0x1f9   :  { %v204_v46 = vpop.permute.xlu2 %203 }
 0x210   :  { %v190_v43 = vpop.permute.xlu0 %189 }
 0x211   :  { %v194_v44 = vmul.f32 %v190_v43, %v144_v2  ;;  %v195_v45 = vmul.f32 %v190_v43, %v145_v4  ;;  %v243_v2 = vperm.slane %v242_v63, 0  ;;  %v244_v4 = vperm.slane %v242_v63, 1  ;;  %v4089_v43 = vld [vmem:[%s6917_s5] sm:$0xff] }
 0x213   :  { %v208_v49 = vadd.f32 %v204_v46, %v194_v44  ;;  %v209_v50 = vadd.f32 %v204_v46, %v195_v45  ;;  %vm4850_vm12 = vcmp.eq.s32.totalorder %v243_v2, 1  ;;  %vm4854_vm13 = vcmp.eq.s32.totalorder %v244_v4, 1  ;;  %v4091_v45 = vld [vmem:[%s6917_s5 + $0x10] sm:$0xff] }
 0x214   :  { %v7087_v11 = vsel %vm4850_vm12, 4294967295, %v7086_v11  ;;  %v7090_v13 = vsel %vm4854_vm13, 4294967295, %v7089_v13 }
 0x215   :  { %v212_v51 = vmul.f32 0.2, %v208_v49  ;;  %v213_v52 = vmul.f32 0.2, %v209_v50  ;;  %7088 = vst [vmem:[#allocation5_spill] sm:$0xff] %v7087_v11 }
 0x216   :  { %7091 = vst [vmem:[#allocation6_spill] sm:$0xff] %v7090_v13 }
 0x217   :  { %v4823_v55 = vmax.f32 %v208_v49, %v212_v51  ;;  %v4825_v56 = vmax.f32 %v209_v50, %v213_v52 }
 0x219   :  { %v4152_v57 = vpack.i.bf16 %v4825_v56, %v4821_v54  ;;  %v268_v58 = vpack.c.bf16 %v4825_v56, %v4821_v54  ;;  %v4147_v59 = vpack.i.bf16 %v4823_v55, %v4819_v53  ;;  %v267_v60 = vpack.c.bf16 %v4823_v55, %v4819_v53 }
 0x21b   :  { %4153 = vrot.lane.b32.xlu2 %v4152_v57, %s4697_s12  ;;  %299 = vmatpush.bf16.msra.mxu1 %v268_v58 }
 0x21c   :  { %4148 = vrot.lane.b32.xlu1 %v4147_v59, %s4697_s12  ;;  %285 = vmatpush.bf16.msra.mxu0 %v267_v60 }
 0x21e   :  { %3758 = vmatmul.msk.bf16.vlgmr.msra.gmra.mxu1 %vm6923_vm11, %v4090_v61 }
 0x21f   :  { %3757 = vmatmul.msk.bf16.vlgmr.msra.gmra.mxu0 %vm6923_vm11, %v4090_v61 }
 0x223   :  { %4163 = vrot.lane.b32.xlu2 %v4152_v57, %s4696_s11 }
 0x224   :  { %4158 = vrot.lane.b32.xlu1 %v4147_v59, %s4696_s11 }
 0x275   :  { %v4154_v62 = vpop.permute.xlu2 %4153 }
 0x276   :  { %v4156_v17 = vunpack.i.h.bf16 %v4154_v62  ;;  %v4155_v18 = vunpack.i.l.bf16 %v4154_v62 }
 0x27d   :  { %v4164_v7 = vpop.permute.xlu2 %4163 }
 0x27e   :  { %v4166_v20 = vunpack.i.h.bf16 %v4164_v7  ;;  %v4165_v21 = vunpack.i.l.bf16 %v4164_v7 }
 0x28e   :  { %v4149_v0 = vpop.permute.xlu1 %4148 }
 0x28f   :  { %v4151_v8 = vunpack.i.h.bf16 %v4149_v0  ;;  %v4150_v10 = vunpack.i.l.bf16 %v4149_v0 }
 0x291   :  { %v228_v24 = vsel %vm6925_vm1, %v4155_v18, %v4150_v10  ;;  %v229_v25 = vsel %vm6925_vm1, %v4156_v17, %v4151_v8  ;;  %v226_v26 = vsel %vm6925_vm1, %v4150_v10, %v4155_v18  ;;  %v227_v27 = vsel %vm6925_vm1, %v4151_v8, %v4156_v17 }
 0x296   :  { %v4159_v19 = vpop.permute.xlu1 %4158 }
 0x297   :  { %v4161_v22 = vunpack.i.h.bf16 %v4159_v19  ;;  %v4160_v23 = vunpack.i.l.bf16 %v4159_v19 }
 0x299   :  { %v238_v28 = vsel %vm6926_vm0, %v4160_v23, %v4165_v21  ;;  %v239_v29 = vsel %vm6926_vm0, %v4161_v22, %v4166_v20  ;;  %v240_v30 = vsel %vm6926_vm0, %v4165_v21, %v4160_v23  ;;  %v241_v31 = vsel %vm6926_vm0, %v4166_v20, %v4161_v22 }
 0x29a   :  { %v247_v32 = vsel %vm4850_vm12, %v238_v28, %v228_v24  ;;  %v249_v33 = vsel %vm4850_vm12, %v239_v29, %v229_v25  ;;  %v248_v34 = vsel %vm4854_vm13, %v240_v30, %v226_v26  ;;  %v250_v35 = vsel %vm4854_vm13, %v241_v31, %v227_v27 }
 0x29b   :  { %v262_v36 = vpack.c.bf16 %v249_v33, %v247_v32  ;;  %v263_v37 = vpack.c.bf16 %v250_v35, %v248_v34  ;;  %v256_v38 = vsel %vm4858_vm14, %v228_v24, %v238_v28  ;;  %v258_v39 = vsel %vm4858_vm14, %v229_v25, %v239_v29  ;;  %v301_v47 = vpop.f32.mrf.mxu1 }
 0x29c   :  { %v345_v40 = vpack.c.bf16 %v258_v39, %v256_v38  ;;  %v257_v41 = vsel %vm4862_vm15, %v226_v26, %v240_v30  ;;  %v259_v42 = vsel %vm4862_vm15, %v227_v27, %v241_v31  ;;  %v287_v46 = vpop.f32.mrf.mxu0  ;;  %v3775_v30 = vld [vmem:[%s6916_s4 + $0x10] sm:$0xff]  ;;  %v481_v31 = vld [vmem:[%s6919_s7] sm:$0xff] }
 0x29d   :  { %321 = vmatpush.bf16.msra.mxu2 %v262_v36  ;;  %335 = vmatpush.bf16.msra.mxu3 %v263_v37  ;;  %v346_v44 = vpack.c.bf16 %v259_v42, %v257_v41 }
 0x29e   :  { %362 = vmatpush.bf16.msrb.mxu0 %v345_v40 }
 0x29f   :  { %376 = vmatpush.bf16.msrb.mxu1 %v346_v44 }
 0x2a0   :  { %3763 = vmatmul.msk.bf16.vlgmr.msra.gmra.mxu2 %vm6923_vm11, %v4089_v43  ;;  %3764 = vmatmul.msk.bf16.vlgmr.msra.gmra.mxu3 %vm6923_vm11, %v4089_v43 }
 0x2a1   :  { %3771 = vmatmul.msk.bf16.vlgmr.msrb.gmra.mxu0 %vm6923_vm11, %v4091_v45 }
 0x2a2   :  { %3772 = vmatmul.msk.bf16.vlgmr.msrb.gmra.mxu1 %vm6923_vm11, %v4091_v45  ;;  %v3773_v45 = vld [vmem:[%s6915_s3 + $0x10] sm:$0xff] }
 0x2a3   :  { %v303_v49 = vpop.f32.mrf.mxu1 }
 0x2a4   :  { %v289_v48 = vpop.f32.mrf.mxu0 }
 0x31e   :  { %v364_v50 = vpop.f32.mrf.mxu0 }
 0x31f   :  { %v378_v51 = vpop.f32.mrf.mxu1 }
 0x323   :  { %v323_v52 = vpop.f32.mrf.mxu2  ;;  %v337_v57 = vpop.f32.mrf.mxu3 }
 0x324   :  { %v324_v58 = vadd.f32 %v323_v52, %v287_v46  ;;  %v338_v59 = vadd.f32 %v337_v57, %v301_v47  ;;  %v3774_v52 = vld [vmem:[%s6915_s3 + $0x18] sm:$0xff] }
 0x326   :  { %v383_v60 = vadd.f32 %v364_v50, %v324_v58  ;;  %v384_v61 = vadd.f32 %v378_v51, %v338_v59  ;;  %v366_v4 = vpop.f32.mrf.mxu0  ;;  %v3776_v58 = vld [vmem:[%s6916_s4 + $0x18] sm:$0xff] }
 0x327   :  { %v380_v5 = vpop.f32.mrf.mxu1 }
 0x328   :  { %v393_v62 = vadd.f32 %v384_v61, %v383_v60 }
 0x32a   :  { %394 = vadd.xlane.f32.xlu0 %v393_v62 }
 0x32b   :  { %v325_v63 = vpop.f32.mrf.mxu2  ;;  %v339_v0 = vpop.f32.mrf.mxu3 }
 0x32c   :  { %v326_v1 = vadd.f32 %v325_v63, %v289_v48  ;;  %v340_v2 = vadd.f32 %v339_v0, %v303_v49 }
 0x32e   :  { %v385_v6 = vadd.f32 %v366_v4, %v326_v1  ;;  %v386_v7 = vadd.f32 %v380_v5, %v340_v2 }
 0x330   :  { %v396_v8 = vadd.f32 %v386_v7, %v385_v6 }
 0x332   :  { %397 = vadd.xlane.f32.xlu1 %v396_v8 }
 0x39d   :  { %v395_v10 = vpop.xlane.xlu0 %394 }
 0x39e   :  { %v399_v17 = vmul.f32 0.00390625, %v395_v10 }
 0x3a0   :  { %v401_v18 = vsub.f32 %v383_v60, %v399_v17  ;;  %v402_v19 = vsub.f32 %v384_v61, %v399_v17  ;;  %v482_v61 = vld [vmem:[%s6919_s7 + $0x8] sm:$0xff] }
 0x3a2   :  { %v405_v20 = vmul.f32 %v401_v18, %v401_v18  ;;  %v406_v21 = vmul.f32 %v402_v19, %v402_v19 }
 0x3a4   :  { %v409_v22 = vadd.f32 %v406_v21, %v405_v20 }
 0x3a5   :  { %v398_v23 = vpop.xlane.xlu1 %397 }
 0x3a6   :  { %v400_v24 = vmul.f32 0.00390625, %v398_v23  ;;  %410 = vadd.xlane.f32.xlu2 %v409_v22 }
 0x3a8   :  { %v403_v25 = vsub.f32 %v385_v6, %v400_v24  ;;  %v404_v26 = vsub.f32 %v386_v7, %v400_v24 }
 0x3aa   :  { %v407_v27 = vmul.f32 %v403_v25, %v403_v25  ;;  %v408_v28 = vmul.f32 %v404_v26, %v404_v26 }
 0x3ac   :  { %v412_v29 = vadd.f32 %v408_v28, %v407_v27 }
 0x3ae   :  { %413 = vadd.xlane.f32.xlu0 %v412_v29 }
 0x3c2   :  { %457 = vperm.xlu0 %4145, %v3775_v30  }
 0x3ca   :  { %485 = vperm.xlu0 %4145, %v481_v31  }
 0x419   :  { %v411_v32 = vpop.xlane.xlu2 %410 }
 0x41a   :  { %v415_v33 = vmul.f32 0.00390625, %v411_v32 }
 0x41c   :  { %v417_v34 = vadd.f32 1e-05, %v415_v33 }
 0x41e   :  { %4631 = vrsqrt.f32 %v417_v34  ;;  %vm425_vm4 = vweird.f32 %v417_v34 }
 0x421   :  { %v414_v35 = vpop.xlane.xlu0 %413 }
 0x422   :  { %v416_v36 = vmul.f32 0.00390625, %v414_v35 }
 0x424   :  { %v4632_v37 = vpop.eup %4631  ;;  %v418_v38 = vadd.f32 1e-05, %v416_v36 }
 0x425   :  { %v420_v39 = vmul.f32 %v4632_v37, %v417_v34  ;;  %vm426_vm3 = vweird.f32 %v4632_v37 }
 0x426   :  { %4633 = vrsqrt.f32 %v418_v38  ;;  %vm427_vm5 = vmor %vm425_vm4, %vm426_vm3  ;;  %vm435_vm7 = vweird.f32 %v418_v38  ;;  %vm595_vm3 = vcmp.eq.s32.totalorder %v4787_v14, 126  ;;  %vm617_vm4 = vcmp.eq.s32.totalorder %v4787_v14, 2 }
 0x427   :  { %v421_v40 = vmul.f32 %v4632_v37, %v420_v39  ;;  %v7100_v14 = vmov 0 }
 0x429   :  { %v422_v41 = vmul.f32 0.5, %v421_v40 }
 0x42b   :  { %v423_v42 = vsub.f32 1.5, %v422_v41 }
 0x42c   :  { %v4634_v43 = vpop.eup %4633 }
 0x42d   :  { %v430_v44 = vmul.f32 %v4634_v43, %v418_v38  ;;  %v424_v46 = vmul.f32 %v4632_v37, %v423_v42  ;;  %vm436_vm6 = vweird.f32 %v4634_v43 }
 0x42e   :  { %vm437_vm8 = vmor %vm435_vm7, %vm436_vm6  ;;  %vm6927_vm6 = vcmp.lt.s32.totalorder %v4780_v12, 125 }
 0x42f   :  { %v431_v47 = vmul.f32 %v4634_v43, %v430_v44  ;;  %v428_v48 = vsel %vm427_vm5, %v4632_v37, %v424_v46  ;;  %v576_v46 = vsel %vm563_vm9, 1, %v6936_v3  ;;  %vm6924_vm5 = vcmp.lt.s32.totalorder %v4780_v12, 3 }
 0x430   :  { %v439_v49 = vmul.f32 %v3773_v45, %v428_v48  ;;  %v586_v48 = vsel %vm585_vm10, 1, %v6936_v3 }
 0x431   :  { %v432_v50 = vmul.f32 0.5, %v431_v47 }
 0x432   :  { %443 = vperm.xlu1 %4146, %v439_v49   ;;  %v577_v49 = vperm.slane %v576_v46, 0 }
 0x433   :  { %v433_v51 = vsub.f32 1.5, %v432_v50  ;;  %v578_v50 = vperm.slane %v576_v46, 1 }
 0x434   :  { %v458_v1 = vpop.permute.xlu0 %457  ;;  %vm4974_vm7 = vcmp.eq.s32.totalorder %v577_v49, 1 }
 0x435   :  { %v434_v57 = vmul.f32 %v4634_v43, %v433_v51  ;;  %v608_v51 = vsel %vm595_vm3, 1, %v6936_v3 }
 0x437   :  { %v438_v59 = vsel %vm437_vm8, %v4634_v43, %v434_v57  ;;  %v618_v57 = vsel %vm617_vm4, 1, %v6936_v3  ;;  %vm4978_vm8 = vcmp.eq.s32.totalorder %v578_v50, 1 }
 0x438   :  { %v440_v60 = vmul.f32 %v3774_v52, %v438_v59  ;;  %v587_v52 = vperm.slane %v586_v48, 0  ;;  %v7101_v14 = vsel %vm4978_vm8, 4294967295, %v7100_v14 }
 0x43a   :  { %462 = vperm.xlu1 %4146, %v3776_v58   ;;  %448 = vperm.xlu2 %4144, %v440_v60   ;;  %v588_v58 = vperm.slane %v586_v48, 1  ;;  %vm4982_vm9 = vcmp.eq.s32.totalorder %v587_v52, 1 }
 0x43c   :  { %v486_v31 = vpop.permute.xlu0 %485  ;;  %vm4986_vm10 = vcmp.eq.s32.totalorder %v588_v58, 1 }
 0x442   :  { %490 = vperm.xlu2 %4144, %v482_v61  }
 0x494   :  { %v449_v2 = vpop.permute.xlu2 %448 }
 0x495   :  { %v453_v6 = vmul.f32 %v449_v2, %v403_v25  ;;  %v454_v7 = vmul.f32 %v449_v2, %v404_v26  ;;  %v619_v2 = vperm.slane %v618_v57, 0 }
 0x497   :  { %vm4998_vm2 = vcmp.eq.s32.totalorder %v619_v2, 1 }
 0x49c   :  { %v491_v32 = vpop.permute.xlu2 %490 }
 0x4a4   :  { %v444_v62 = vpop.permute.xlu1 %443 }
 0x4a5   :  { %v451_v63 = vmul.f32 %v444_v62, %v401_v18  ;;  %v452_v0 = vmul.f32 %v444_v62, %v402_v19  ;;  %v4092_v19 = vld [vmem:[%s6918_s6] sm:$0xff]  ;;  %v7098_v62 = vmov 0 }
 0x4a6   :  { %v7099_v62 = vsel %vm4974_vm7, 4294967295, %v7098_v62 }
 0x4a7   :  { %v465_v4 = vadd.f32 %v458_v1, %v451_v63  ;;  %v466_v5 = vadd.f32 %v458_v1, %v452_v0  ;;  %v609_v0 = vperm.slane %v608_v51, 0  ;;  %v610_v1 = vperm.slane %v608_v51, 1 }
 0x4a9   :  { %v469_v20 = vmul.f32 0.2, %v465_v4  ;;  %v470_v21 = vmul.f32 0.2, %v466_v5  ;;  %vm4990_vm3 = vcmp.eq.s32.totalorder %v609_v0, 1  ;;  %vm4994_vm4 = vcmp.eq.s32.totalorder %v610_v1, 1 }
 0x4ab   :  { %v473_v24 = vmax.f32 %v465_v4, %v469_v20  ;;  %v474_v28 = vmax.f32 %v466_v5, %v470_v21  ;;  %v620_v4 = vperm.slane %v618_v57, 1 }
 0x4ac   :  { %v463_v8 = vpop.permute.xlu1 %462 }
 0x4ad   :  { %v467_v10 = vadd.f32 %v463_v8, %v453_v6  ;;  %v468_v17 = vadd.f32 %v463_v8, %v454_v7  ;;  %v7102_v8 = vmov 0 }
 0x4ae   :  { %v7103_v8 = vsel %vm4982_vm9, 4294967295, %v7102_v8 }
 0x4af   :  { %v471_v22 = vmul.f32 0.2, %v467_v10  ;;  %v472_v23 = vmul.f32 0.2, %v468_v17  ;;  %7104 = vst [vmem:[#allocation9_spill] sm:$0xff] %v7103_v8  ;;  %v7167_v8 = vmov 0 }
 0x4b1   :  { %v475_v27 = vmax.f32 %v467_v10, %v471_v22  ;;  %v476_v29 = vmax.f32 %v468_v17, %v472_v23  ;;  %v7105_v10 = vmov 0 }
 0x4b2   :  { %v7106_v10 = vsel %vm4986_vm10, 4294967295, %v7105_v10 }
 0x4b3   :  { %v479_v30 = vpack.c.bf16 %v475_v27, %v473_v24  ;;  %v480_v18 = vpack.c.bf16 %v476_v29, %v474_v28  ;;  %7107 = vst [vmem:[#allocation10_spill] sm:$0xff] %v7106_v10  ;;  %v7108_v29 = vmov 0 }
 0x4b4   :  { %v7109_v29 = vsel %vm4990_vm3, 4294967295, %v7108_v29 }
 0x4b5   :  { %508 = vmatpush.bf16.msrb.mxu2 %v479_v30  ;;  %522 = vmatpush.bf16.msrb.mxu3 %v480_v18  ;;  %v7110_v30 = vmov 0  ;;  %v7112_v18 = vmov 0 }
 0x4b6   :  { %v7111_v30 = vsel %vm4994_vm4, 4294967295, %v7110_v30  ;;  %v7113_v18 = vsel %vm4998_vm2, 4294967295, %v7112_v18 }
 0x4b7   :  { %7114 = vst [vmem:[#allocation11_spill] sm:$0xff] %v7113_v18 }
 0x4b8   :  { %3781 = vmatmul.msk.bf16.vlgmr.msrb.gmra.mxu2 %vm6923_vm11, %v4092_v19  ;;  %3782 = vmatmul.msk.bf16.vlgmr.msrb.gmra.mxu3 %vm6923_vm11, %v4092_v19  ;;  %v7115_v19 = vmov 0 }
 0x53b   :  { %v510_v25 = vpop.f32.mrf.mxu2  ;;  %v524_v26 = vpop.f32.mrf.mxu3 }
 0x53c   :  { %v511_v33 = vadd.f32 %v510_v25, %v486_v31  ;;  %v525_v34 = vadd.f32 %v524_v26, %v486_v31 }
 0x53e   :  { %v4932_v39 = vadd.f32 %v511_v33, %v4819_v53  ;;  %v4935_v40 = vadd.f32 %v525_v34, %v4821_v54  ;;  %v4094_v54 = vld [vmem:[%s6917_s5 + $0x20] sm:$0xff] }
 0x543   :  { %v512_v35 = vpop.f32.mrf.mxu2  ;;  %v526_v36 = vpop.f32.mrf.mxu3 }
 0x544   :  { %v513_v37 = vadd.f32 %v512_v35, %v491_v32  ;;  %v527_v38 = vadd.f32 %v526_v36, %v491_v32 }
 0x546   :  { %v4938_v41 = vadd.f32 %v513_v37, %v4823_v55  ;;  %v4941_v42 = vadd.f32 %v527_v38, %v4825_v56 }
 0x548   :  { %v4172_v43 = vpack.i.bf16 %v4941_v42, %v4935_v40  ;;  %v640_v44 = vpack.c.bf16 %v4941_v42, %v4935_v40  ;;  %v4177_v45 = vpack.i.bf16 %v4938_v41, %v4932_v39  ;;  %v639_v53 = vpack.c.bf16 %v4938_v41, %v4932_v39 }
 0x54a   :  { %4173 = vrot.lane.b32.xlu0 %v4172_v43, %s4699_s24  ;;  %670 = vmatpush.bf16.msra.mxu1 %v640_v44 }
 0x54b   :  { %4178 = vrot.lane.b32.xlu2 %v4177_v45, %s4700_s25  ;;  %4168 = vrot.lane.b32.xlu1 %v4177_v45, %s4699_s24 }
 0x54c   :  { %656 = vmatpush.bf16.msra.mxu0 %v639_v53 }
 0x54d   :  { %3792 = vmatmul.msk.bf16.vlgmr.msra.gmra.mxu1 %vm6923_vm11, %v4094_v54 }
 0x54f   :  { %3791 = vmatmul.msk.bf16.vlgmr.msra.gmra.mxu0 %vm6923_vm11, %v4094_v54  ;;  %vm5002_vm11 = vcmp.eq.s32.totalorder %v620_v4, 1 }
 0x550   :  { %v7116_v19 = vsel %vm5002_vm11, 4294967295, %v7115_v19 }
 0x551   :  { %7117 = vst [vmem:[#allocation12_spill] sm:$0xff] %v7116_v19 }
 0x552   :  { %4188 = vrot.lane.b32.xlu0 %v4177_v45, %s4696_s11 }
 0x553   :  { %4193 = vrot.lane.b32.xlu2 %v4172_v43, %s4696_s11  ;;  %4183 = vrot.lane.b32.xlu1 %v4172_v43, %s4700_s25 }
 0x55a   :  { %4203 = vrot.lane.b32.xlu0 %v4172_v43, %s4697_s12 }
 0x55b   :  { %4198 = vrot.lane.b32.xlu1 %v4177_v45, %s4697_s12 }
 0x5a5   :  { %v4179_v55 = vpop.permute.xlu2 %4178 }
 0x5a6   :  { %v4181_v59 = vunpack.i.h.bf16 %v4179_v55  ;;  %v4180_v61 = vunpack.i.l.bf16 %v4179_v55 }
 0x5ad   :  { %v4194_v60 = vpop.permute.xlu2 %4193 }
 0x5ae   :  { %v4196_v5 = vunpack.i.h.bf16 %v4194_v60  ;;  %v4195_v23 = vunpack.i.l.bf16 %v4194_v60 }
 0x5bc   :  { %v4174_v56 = vpop.permute.xlu0 %4173 }
 0x5bd   :  { %v4169_v47 = vpop.permute.xlu1 %4168  ;;  %v4176_v6 = vunpack.i.h.bf16 %v4174_v56  ;;  %v4175_v24 = vunpack.i.l.bf16 %v4174_v56 }
 0x5be   :  { %v4171_v17 = vunpack.i.h.bf16 %v4169_v47  ;;  %v4170_v27 = vunpack.i.l.bf16 %v4169_v47 }
 0x5c0   :  { %v543_v33 = vsel %vm6924_vm5, %v4171_v17, %v4176_v6  ;;  %v545_v34 = vsel %vm6924_vm5, %v4176_v6, %v4171_v17  ;;  %v542_v37 = vsel %vm6924_vm5, %v4170_v27, %v4175_v24  ;;  %v544_v38 = vsel %vm6924_vm5, %v4175_v24, %v4170_v27 }
 0x5c1   :  { %vm7118_vm5 = vcmask 130048  }
 0x5c4   :  { %v4189_v63 = vpop.permute.xlu0 %4188 }
 0x5c5   :  { %v4184_v7 = vpop.permute.xlu1 %4183  ;;  %v4191_v20 = vunpack.i.h.bf16 %v4189_v63  ;;  %v4190_v28 = vunpack.i.l.bf16 %v4189_v63 }
 0x5c6   :  { %v4186_v21 = vunpack.i.h.bf16 %v4184_v7  ;;  %v4185_v22 = vunpack.i.l.bf16 %v4184_v7 }
 0x5c7   :  { %v573_v35 = vsel %vm6926_vm0, %v4191_v20, %v4196_v5  ;;  %v575_v36 = vsel %vm6926_vm0, %v4196_v5, %v4191_v20  ;;  %v572_v43 = vsel %vm6926_vm0, %v4190_v28, %v4195_v23  ;;  %v574_v44 = vsel %vm6926_vm0, %v4195_v23, %v4190_v28 }
 0x5c8   :  { %v556_v25 = vsel %vm6927_vm6, %v4181_v59, %v4186_v21  ;;  %v558_v26 = vsel %vm6927_vm6, %v4186_v21, %v4181_v59  ;;  %v555_v31 = vsel %vm6927_vm6, %v4180_v61, %v4185_v22  ;;  %v557_v32 = vsel %vm6927_vm6, %v4185_v22, %v4180_v61 }
 0x5c9   :  { %v559_v45 = vsel %vm4850_vm12, %v555_v31, %v544_v38  ;;  %v560_v53 = vsel %vm4854_vm13, %v557_v32, %v542_v37  ;;  %v561_v54 = vsel %vm4850_vm12, %v556_v25, %v545_v34  ;;  %v562_v55 = vsel %vm4854_vm13, %v558_v26, %v543_v33 }
 0x5ca   :  { %v583_v46 = vsel %vm4974_vm7, %v573_v35, %v556_v25  ;;  %v584_v47 = vsel %vm4978_vm8, %v575_v36, %v558_v26  ;;  %v581_v51 = vsel %vm4974_vm7, %v572_v43, %v555_v31  ;;  %v582_v52 = vsel %vm4978_vm8, %v574_v44, %v557_v32 }
 0x5cb   :  { %v591_v59 = vsel %vm4982_vm9, %v572_v43, %v559_v45  ;;  %v593_v60 = vsel %vm4982_vm9, %v573_v35, %v561_v54  ;;  %v592_v61 = vsel %vm4986_vm10, %v574_v44, %v560_v53  ;;  %v594_v63 = vsel %vm4986_vm10, %v575_v36, %v562_v55  ;;  %v4093_v35 = vld [vmem:[%s6917_s5 + $0x18] sm:$0xff] }
 0x5cc   :  { %v4204_v56 = vpop.permute.xlu0 %4203  ;;  %vm7196_vm7 = vcmp.lt.s32.totalorder %v4780_v12, 125 }
 0x5cd   :  { %v4206_v48 = vunpack.i.h.bf16 %v4204_v56  ;;  %v4205_v49 = vunpack.i.l.bf16 %v4204_v56  ;;  %v4199_v50 = vpop.permute.xlu1 %4198 }
 0x5ce   :  { %v4201_v57 = vunpack.i.h.bf16 %v4199_v50  ;;  %v4200_v58 = vunpack.i.l.bf16 %v4199_v50 }
 0x5d0   :  { %v605_v0 = vsel %vm6925_vm1, %v4201_v57, %v4206_v48  ;;  %v607_v1 = vsel %vm6925_vm1, %v4206_v48, %v4201_v57  ;;  %v604_v2 = vsel %vm6925_vm1, %v4200_v58, %v4205_v49  ;;  %v606_v4 = vsel %vm6925_vm1, %v4205_v49, %v4200_v58  ;;  %vm7119_vm1 = vmmov %vm7118_vm5 }
 0x5d1   :  { %v613_v5 = vsel %vm4990_vm3, %v606_v4, %v581_v51  ;;  %v614_v6 = vsel %vm4994_vm4, %v604_v2, %v582_v52  ;;  %v615_v7 = vsel %vm4990_vm3, %v607_v1, %v583_v46  ;;  %v616_v17 = vsel %vm4994_vm4, %v605_v0, %v584_v47  ;;  %vm7120_vm0 = vmmov %vm7119_vm1 }
 0x5d2   :  { %v623_v20 = vsel %vm4998_vm2, %v606_v4, %v591_v59  ;;  %v625_v21 = vsel %vm4998_vm2, %v607_v1, %v593_v60  ;;  %v624_v22 = vsel %vm5002_vm11, %v604_v2, %v592_v61  ;;  %v626_v23 = vsel %vm5002_vm11, %v605_v0, %v594_v63  ;;  %vm7121_vm6 = vmmov %vm7120_vm0 }
 0x5d3   :  { %v634_v24 = vpack.c.bf16 %v625_v21, %v623_v20  ;;  %v635_v27 = vpack.c.bf16 %v626_v23, %v624_v22  ;;  %v627_v28 = vsel %vm4858_vm14, %v544_v38, %v613_v5  ;;  %v629_v25 = vsel %vm4858_vm14, %v545_v34, %v615_v7  ;;  %v4095_v38 = vld [vmem:[%s6917_s5 + $0x28] sm:$0xff]  ;;  %v672_v34 = vpop.f32.mrf.mxu1 }
 0x5d4   :  { %v716_v26 = vpack.c.bf16 %v629_v25, %v627_v28  ;;  %v628_v31 = vsel %vm4862_vm15, %v542_v37, %v614_v6  ;;  %v630_v32 = vsel %vm4862_vm15, %v543_v33, %v616_v17  ;;  %v658_v33 = vpop.f32.mrf.mxu0  ;;  %v3814_v28 = vld [vmem:[%s6919_s7 + $0x18] sm:$0xff] }
 0x5d5   :  { %692 = vmatpush.bf16.msra.mxu2 %v634_v24  ;;  %706 = vmatpush.bf16.msra.mxu3 %v635_v27  ;;  %v717_v36 = vpack.c.bf16 %v630_v32, %v628_v31  ;;  %v3809_v27 = vld [vmem:[%s6916_s4 + $0x20] sm:$0xff] }
 0x5d6   :  { %733 = vmatpush.bf16.msrb.mxu0 %v716_v26 }
 0x5d7   :  { %747 = vmatpush.bf16.msrb.mxu1 %v717_v36 }
 0x5d8   :  { %3797 = vmatmul.msk.bf16.vlgmr.msra.gmra.mxu2 %vm7118_vm5, %v4093_v35  ;;  %3798 = vmatmul.msk.bf16.vlgmr.msra.gmra.mxu3 %vm7119_vm1, %v4093_v35 }
 0x5d9   :  { %3805 = vmatmul.msk.bf16.vlgmr.msrb.gmra.mxu0 %vm7120_vm0, %v4095_v38 }
 0x5da   :  { %3806 = vmatmul.msk.bf16.vlgmr.msrb.gmra.mxu1 %vm7121_vm6, %v4095_v38 }
 0x5db   :  { %v674_v43 = vpop.f32.mrf.mxu1 }
 0x5dc   :  { %v660_v37 = vpop.f32.mrf.mxu0 }
 0x656   :  { %v735_v44 = vpop.f32.mrf.mxu0 }
 0x657   :  { %v749_v45 = vpop.f32.mrf.mxu1 }
 0x65b   :  { %v694_v53 = vpop.f32.mrf.mxu2  ;;  %v708_v54 = vpop.f32.mrf.mxu3 }
 0x65c   :  { %v695_v55 = vadd.f32 %v694_v53, %v658_v33  ;;  %v709_v56 = vadd.f32 %v708_v54, %v672_v34  ;;  %v3807_v53 = vld [vmem:[%s6915_s3 + $0x20] sm:$0xff] }
 0x65e   :  { %v754_v46 = vadd.f32 %v735_v44, %v695_v55  ;;  %v755_v47 = vadd.f32 %v749_v45, %v709_v56  ;;  %v737_v57 = vpop.f32.mrf.mxu0 }
 0x65f   :  { %v751_v58 = vpop.f32.mrf.mxu1 }
 0x660   :  { %v764_v48 = vadd.f32 %v755_v47, %v754_v46 }
 0x662   :  { %765 = vadd.xlane.f32.xlu2 %v764_v48 }
 0x663   :  { %v696_v49 = vpop.f32.mrf.mxu2  ;;  %v710_v50 = vpop.f32.mrf.mxu3 }
 0x664   :  { %v697_v51 = vadd.f32 %v696_v49, %v660_v37  ;;  %v711_v52 = vadd.f32 %v710_v50, %v674_v43  ;;  %v3808_v49 = vld [vmem:[%s6915_s3 + $0x28] sm:$0xff] }
 0x666   :  { %v756_v59 = vadd.f32 %v737_v57, %v697_v51  ;;  %v757_v60 = vadd.f32 %v751_v58, %v711_v52  ;;  %v3813_v51 = vld [vmem:[%s6919_s7 + $0x10] sm:$0xff]  ;;  %v3810_v58 = vld [vmem:[%s6916_s4 + $0x28] sm:$0xff] }
 0x668   :  { %v767_v61 = vadd.f32 %v757_v60, %v756_v59 }
 0x66a   :  { %768 = vadd.xlane.f32.xlu1 %v767_v61 }
 0x6d5   :  { %v766_v63 = vpop.xlane.xlu2 %765 }
 0x6d6   :  { %v770_v0 = vmul.f32 0.00390625, %v766_v63 }
 0x6d8   :  { %v772_v1 = vsub.f32 %v754_v46, %v770_v0  ;;  %v773_v2 = vsub.f32 %v755_v47, %v770_v0 }
 0x6da   :  { %v776_v4 = vmul.f32 %v772_v1, %v772_v1  ;;  %v777_v5 = vmul.f32 %v773_v2, %v773_v2 }
 0x6dc   :  { %v780_v6 = vadd.f32 %v777_v5, %v776_v4 }
 0x6dd   :  { %v769_v7 = vpop.xlane.xlu1 %768 }
 0x6de   :  { %v771_v17 = vmul.f32 0.00390625, %v769_v7  ;;  %781 = vadd.xlane.f32.xlu0 %v780_v6 }
 0x6e0   :  { %v774_v20 = vsub.f32 %v756_v59, %v771_v17  ;;  %v775_v21 = vsub.f32 %v757_v60, %v771_v17 }
 0x6e2   :  { %v778_v22 = vmul.f32 %v774_v20, %v774_v20  ;;  %v779_v23 = vmul.f32 %v775_v21, %v775_v21 }
 0x6e4   :  { %v783_v24 = vadd.f32 %v779_v23, %v778_v22 }
 0x6e6   :  { %784 = vadd.xlane.f32.xlu2 %v783_v24 }
 0x6fe   :  { %828 = vperm.xlu2 %4144, %v3809_v27  }
 0x706   :  { %863 = vperm.xlu2 %4144, %v3814_v28  }
 0x751   :  { %v782_v25 = vpop.xlane.xlu0 %781 }
 0x752   :  { %v786_v26 = vmul.f32 0.00390625, %v782_v25 }
 0x754   :  { %v788_v31 = vadd.f32 1e-05, %v786_v26 }
 0x756   :  { %4635 = vrsqrt.f32 %v788_v31  ;;  %vm796_vm1 = vweird.f32 %v788_v31 }
 0x759   :  { %v785_v32 = vpop.xlane.xlu2 %784 }
 0x75a   :  { %v787_v35 = vmul.f32 0.00390625, %v785_v32 }
 0x75c   :  { %v4636_v36 = vpop.eup %4635  ;;  %v789_v38 = vadd.f32 1e-05, %v787_v35 }
 0x75d   :  { %v791_v33 = vmul.f32 %v4636_v36, %v788_v31  ;;  %vm797_vm0 = vweird.f32 %v4636_v36 }
 0x75e   :  { %4637 = vrsqrt.f32 %v789_v38  ;;  %vm798_vm5 = vmor %vm796_vm1, %vm797_vm0  ;;  %vm806_vm15 = vweird.f32 %v789_v38 }
 0x75f   :  { %v792_v34 = vmul.f32 %v4636_v36, %v791_v33 }
 0x761   :  { %v793_v37 = vmul.f32 0.5, %v792_v34  ;;  %v829_v0 = vpop.permute.xlu2 %828 }
 0x763   :  { %v794_v43 = vsub.f32 1.5, %v793_v37 }
 0x764   :  { %v4638_v44 = vpop.eup %4637 }
 0x765   :  { %v801_v45 = vmul.f32 %v4638_v44, %v789_v38  ;;  %v795_v54 = vmul.f32 %v4636_v36, %v794_v43  ;;  %vm807_vm6 = vweird.f32 %v4638_v44 }
 0x766   :  { %vm808_vm14 = vmor %vm806_vm15, %vm807_vm6 }
 0x767   :  { %v802_v55 = vmul.f32 %v4638_v44, %v801_v45  ;;  %v799_v56 = vsel %vm798_vm5, %v4636_v36, %v795_v54 }
 0x768   :  { %v810_v46 = vmul.f32 %v3807_v53, %v799_v56 }
 0x769   :  { %v803_v47 = vmul.f32 0.5, %v802_v55  ;;  %v864_v33 = vpop.permute.xlu2 %863 }
 0x76a   :  { %814 = vperm.xlu1 %4146, %v810_v46  }
 0x76b   :  { %v804_v48 = vsub.f32 1.5, %v803_v47 }
 0x76d   :  { %v805_v50 = vmul.f32 %v4638_v44, %v804_v48 }
 0x76f   :  { %v809_v52 = vsel %vm808_vm14, %v4638_v44, %v805_v50  ;;  %vm7122_vm14 = vcmask 130048  }
 0x770   :  { %v811_v57 = vmul.f32 %v3808_v49, %v809_v52  ;;  %vm7123_vm15 = vmmov %vm7122_vm14  ;;  %v5172_v52 = vld [vmem:[%s6912_s0] sm:$0x3] }
 0x771   :  { %vm936_vm0 = vcmp.eq.s32.totalorder %v5172_v52, 119  ;;  %vm963_vm1 = vcmp.eq.s32.totalorder %v5172_v52, 120  ;;  %vm990_vm5 = vcmp.eq.s32.totalorder %v5172_v52, 121  ;;  %vm1012_vm6 = vcmp.eq.s32.totalorder %v5172_v52, 3 }
 0x772   :  { %858 = vperm.xlu1 %4146, %v3813_v51   ;;  %819 = vperm.xlu0 %4145, %v811_v57  }
 0x77a   :  { %833 = vperm.xlu0 %4145, %v3810_v58   ;;  %v950_v58 = vsel %vm936_vm0, 1, %v6936_v3  ;;  %vm1022_vm0 = vcmp.eq.s32.totalorder %v5172_v52, 122 }
 0x7dc   :  { %v815_v59 = vpop.permute.xlu1 %814 }
 0x7dd   :  { %v822_v61 = vmul.f32 %v815_v59, %v772_v1  ;;  %v823_v63 = vmul.f32 %v815_v59, %v773_v2  ;;  %v4096_v1 = vld [vmem:[%s6918_s6 + $0x8] sm:$0xff] }
 0x7df   :  { %v836_v4 = vadd.f32 %v829_v0, %v822_v61  ;;  %v837_v5 = vadd.f32 %v829_v0, %v823_v63  ;;  %v5185_v61 = vsel %vm963_vm1, 1, %v6936_v3  ;;  %v951_v63 = vperm.slane %v950_v58, 0 }
 0x7e0   :  { %v5189_v0 = vsel %vm990_vm5, 1, %v6936_v3  ;;  %vm1044_vm1 = vcmp.eq.s32.totalorder %v5172_v52, 4  ;;  %vm1054_vm5 = vcmp.eq.s32.totalorder %v5172_v52, 123 }
 0x7e1   :  { %v840_v22 = vmul.f32 0.2, %v836_v4  ;;  %v841_v23 = vmul.f32 0.2, %v837_v5 }
 0x7e3   :  { %v844_v26 = vmax.f32 %v836_v4, %v840_v22  ;;  %v845_v31 = vmax.f32 %v837_v5, %v841_v23 }
 0x7e4   :  { %v820_v60 = vpop.permute.xlu0 %819 }
 0x7e5   :  { %v824_v6 = vmul.f32 %v820_v60, %v774_v20  ;;  %v825_v7 = vmul.f32 %v820_v60, %v775_v21  ;;  %v859_v21 = vpop.permute.xlu1 %858 }
 0x7ec   :  { %v834_v17 = vpop.permute.xlu0 %833 }
 0x7ed   :  { %v838_v24 = vadd.f32 %v834_v17, %v824_v6  ;;  %v839_v27 = vadd.f32 %v834_v17, %v825_v7  ;;  %v952_v6 = vperm.slane %v950_v58, 1  ;;  %v5197_v7 = vsel %vm1012_vm6, 1, %v6936_v3 }
 0x7ee   :  { %vm5221_vm6 = vcmp.eq.s32.totalorder %v951_v63, 1 }
 0x7ef   :  { %v842_v28 = vmul.f32 0.2, %v838_v24  ;;  %v843_v25 = vmul.f32 0.2, %v839_v27 }
 0x7f1   :  { %v846_v32 = vmax.f32 %v838_v24, %v842_v28  ;;  %v847_v35 = vmax.f32 %v839_v27, %v843_v25  ;;  %v978_v24 = vperm.slane %v5185_v61, 0  ;;  %v979_v27 = vperm.slane %v5185_v61, 1 }
 0x7f2   :  { %v1004_v25 = vperm.slane %v5189_v0, 0 }
 0x7f3   :  { %v851_v36 = vpack.c.bf16 %v846_v32, %v844_v26  ;;  %v852_v38 = vpack.c.bf16 %v847_v35, %v845_v31  ;;  %v1005_v26 = vperm.slane %v5189_v0, 1  ;;  %v5208_v31 = vsel %vm1022_vm0, 1, %v6936_v3 }
 0x7f4   :  { %v1014_v35 = vperm.slane %v5197_v7, 0  ;;  %vm5225_vm0 = vcmp.eq.s32.totalorder %v952_v6, 1  ;;  %v7152_v0 = vmov 0 }
 0x7f5   :  { %881 = vmatpush.bf16.msrb.mxu2 %v851_v36  ;;  %895 = vmatpush.bf16.msrb.mxu3 %v852_v38  ;;  %v5213_v36 = vsel %vm1044_vm1, 1, %v6936_v3  ;;  %vm1076_vm1 = vcmp.eq.s32.totalorder %v5172_v52, 5 }
 0x7f6   :  { %v1047_v6 = vperm.slane %v5213_v36, 1  ;;  %v7166_v10 = vperm.slane %v5213_v36, 0 }
 0x7f8   :  { %3819 = vmatmul.msk.bf16.vlgmr.msrb.gmra.mxu2 %vm7122_vm14, %v4096_v1  ;;  %3820 = vmatmul.msk.bf16.vlgmr.msrb.gmra.mxu3 %vm7123_vm15, %v4096_v1  ;;  %vm6935_vm14 = vcmp.lt.s32.totalorder %v4780_v12, 9  ;;  %vm5413_vm3 = vcmp.eq.s32.totalorder %v7166_v10, 1 }
 0x7f9   :  { %v7168_v8 = vsel %vm5413_vm3, 4294967295, %v7167_v8 }
 0x87b   :  { %v883_v2 = vpop.f32.mrf.mxu2  ;;  %v897_v20 = vpop.f32.mrf.mxu3 }
 0x87c   :  { %v884_v34 = vadd.f32 %v883_v2, %v859_v21  ;;  %v898_v37 = vadd.f32 %v897_v20, %v859_v21  ;;  %v7125_v21 = vmov 0 }
 0x87d   :  { %v7126_v21 = vsel %vm5221_vm6, 4294967295, %v7125_v21 }
 0x87e   :  { %v5120_v54 = vadd.f32 %v884_v34, %v4932_v39  ;;  %v5123_v55 = vadd.f32 %v898_v37, %v4935_v40  ;;  %7127 = vst [vmem:[#allocation14_spill] sm:$0xff] %v7126_v21  ;;  %v1015_v37 = vperm.slane %v5197_v7, 1  ;;  %v7159_v7 = vmov 0 }
 0x87f   :  { %v7164_v21 = vmov 0 }
 0x883   :  { %v885_v43 = vpop.f32.mrf.mxu2  ;;  %v899_v44 = vpop.f32.mrf.mxu3 }
 0x884   :  { %v886_v45 = vadd.f32 %v885_v43, %v864_v33  ;;  %v900_v53 = vadd.f32 %v899_v44, %v864_v33  ;;  %v7128_v33 = vmov 0  ;;  %v7146_v43 = vmov 0 }
 0x885   :  { %v7129_v33 = vsel %vm5225_vm0, 4294967295, %v7128_v33 }
 0x886   :  { %v5126_v56 = vadd.f32 %v886_v45, %v4938_v41  ;;  %v5129_v46 = vadd.f32 %v900_v53, %v4941_v42  ;;  %7130 = vst [vmem:[#allocation15_spill] sm:$0xff] %v7129_v33  ;;  %v4098_v45 = vld [vmem:[%s6917_s5 + $0x38] sm:$0xff]  ;;  %v7163_v33 = vperm.slane %v5208_v31, 1 }
 0x888   :  { %7124 = vst [vmem:[#allocation13_spill] sm:$0xff] %v5129_v46  ;;  %v4212_v47 = vpack.i.bf16 %v5129_v46, %v5123_v55  ;;  %v1185_v48 = vpack.c.bf16 %v5129_v46, %v5123_v55  ;;  %v4217_v49 = vpack.i.bf16 %v5126_v56, %v5120_v54  ;;  %v1184_v39 = vpack.c.bf16 %v5126_v56, %v5120_v54 }
 0x889   :  { %v7199_v46 = vmov 0 }
 0x88a   :  { %4213 = vrot.lane.b32.xlu1 %v4212_v47, %s4701_s27  ;;  %1215 = vmatpush.bf16.msra.mxu1 %v1185_v48 }
 0x88b   :  { %4218 = vrot.lane.b32.xlu2 %v4217_v49, %s4702_s28  ;;  %4208 = vrot.lane.b32.xlu0 %v4217_v49, %s4701_s27 }
 0x88c   :  { %1201 = vmatpush.bf16.msra.mxu0 %v1184_v39 }
 0x88f   :  { %3829 = vmatmul.msk.bf16.vlgmr.msra.gmra.mxu0 %vm7123_vm15, %v4098_v45 }
 0x892   :  { %4228 = vrot.lane.b32.xlu1 %v4217_v49, %s4703_s29 }
 0x893   :  { %4233 = vrot.lane.b32.xlu2 %v4212_v47, %s4703_s29  ;;  %4223 = vrot.lane.b32.xlu0 %v4212_v47, %s4702_s28 }
 0x89a   :  { %4243 = vrot.lane.b32.xlu1 %v4212_v47, %s4704_s30 }
 0x89b   :  { %4248 = vrot.lane.b32.xlu2 %v4217_v49, %s4700_s25  ;;  %4238 = vrot.lane.b32.xlu0 %v4217_v49, %s4704_s30 }
 0x8a2   :  { %4258 = vrot.lane.b32.xlu1 %v4217_v49, %s4696_s11 }
 0x8a3   :  { %4263 = vrot.lane.b32.xlu2 %v4212_v47, %s4696_s11  ;;  %4253 = vrot.lane.b32.xlu0 %v4212_v47, %s4700_s25 }
 0x8aa   :  { %4273 = vrot.lane.b32.xlu1 %v4212_v47, %s4697_s12 }
 0x8ab   :  { %4278 = vrot.lane.b32.xlu2 %v4217_v49, %s4699_s24  ;;  %4268 = vrot.lane.b32.xlu0 %v4217_v49, %s4697_s12 }
 0x8b2   :  { %4288 = vrot.lane.b32.xlu1 %v4217_v49, %s4705_s10 }
 0x8b3   :  { %4293 = vrot.lane.b32.xlu2 %v4212_v47, %s4705_s10  ;;  %4283 = vrot.lane.b32.xlu0 %v4212_v47, %s4699_s24 }
 0x8ba   :  { %4303 = vrot.lane.b32.xlu1 %v4212_v47, %s4706_s13 }
 0x8bb   :  { %4298 = vrot.lane.b32.xlu0 %v4217_v49, %s4706_s13  ;;  %v5241_v49 = vsel %vm1054_vm5, 1, %v6936_v3  ;;  %vm7131_vm5 = vmmov %vm7123_vm15  ;;  %vm7132_vm15 = vcmp.lt.s32.totalorder %v4780_v12, 119 }
 0x8bc   :  { %3830 = vmatmul.msk.bf16.vlgmr.msra.gmra.mxu1 %vm7131_vm5, %v4098_v45 }
 0x8e5   :  { %v5159_v40 = vpop.permute.xlu2 %4218 }
 0x8e6   :  { %v4221_v59 = vunpack.i.h.bf16 %v5159_v40  ;;  %v4220_v60 = vunpack.i.l.bf16 %v5159_v40 }
 0x8ed   :  { %v5161_v41 = vpop.permute.xlu2 %4233 }
 0x8ee   :  { %v4236_v4 = vunpack.i.h.bf16 %v5161_v41  ;;  %v4235_v17 = vunpack.i.l.bf16 %v5161_v41 }
 0x8f5   :  { %v5163_v42 = vpop.permute.xlu2 %4248 }
 0x8fc   :  { %v5165_v50 = vpop.permute.xlu1 %4213 }
 0x8fd   :  { %v5167_v51 = vpop.permute.xlu0 %4208  ;;  %v5175_v57 = vpop.permute.xlu2 %4263  ;;  %v4216_v32 = vunpack.i.h.bf16 %v5165_v50  ;;  %v4215_v38 = vunpack.i.l.bf16 %v5165_v50 }
 0x8fe   :  { %v4211_v1 = vunpack.i.h.bf16 %v5167_v51  ;;  %v4210_v2 = vunpack.i.l.bf16 %v5167_v51  ;;  %v5248_v51 = vsel %vm1076_vm1, 1, %v6936_v3  ;;  %vm7133_vm1 = vmmov %vm7132_vm15 }
 0x8ff   :  { %vm7134_vm4 = vmmov %vm7133_vm1 }
 0x900   :  { %v5253_v58 = vsel %vm6935_vm14, %v4211_v1, %v4216_v32  ;;  %v5257_v61 = vsel %vm6935_vm14, %v4216_v32, %v4211_v1  ;;  %v5261_v63 = vsel %vm6935_vm14, %v4210_v2, %v4215_v38  ;;  %vm7135_vm5 = vmmov %vm7133_vm1 }
 0x904   :  { %v5194_v5 = vpop.permute.xlu1 %4228 }
 0x905   :  { %v4224_v23 = vpop.permute.xlu0 %4223  ;;  %v5219_v20 = vpop.permute.xlu2 %4278  ;;  %v4231_v39 = vunpack.i.h.bf16 %v5194_v5  ;;  %v4230_v40 = vunpack.i.l.bf16 %v5194_v5 }
 0x906   :  { %v4225_v34 = vunpack.i.l.bf16 %v4224_v23  ;;  %v4226_v48 = vunpack.i.h.bf16 %v4224_v23  ;;  %v5267_v23 = vsel %vm6935_vm14, %v4215_v38, %v4210_v2  ;;  %vm5285_vm14 = vcmp.eq.s32.totalorder %v978_v24, 1 }
 0x907   :  { %v7136_v2 = vmov 0 }
 0x908   :  { %v5271_v9 = vsel %vm7132_vm15, %v4220_v60, %v4225_v34  ;;  %v5277_v47 = vsel %vm7133_vm1, %v4221_v59, %v4226_v48  ;;  %v5281_v45 = vsel %vm7134_vm4, %v4226_v48, %v4221_v59  ;;  %v930_v38 = vsel %vm7135_vm5, %v4225_v34, %v4220_v60 }
 0x909   :  { %v7137_v2 = vsel %vm5285_vm14, 4294967295, %v7136_v2  ;;  %vm7139_vm15 = vcmp.lt.s32.totalorder %v4780_v12, 121  ;;  %vm5297_vm4 = vcmp.eq.s32.totalorder %v979_v27, 1  ;;  %v7141_v48 = vmov 0 }
 0x90a   :  { %7138 = vst [vmem:[#allocation16_spill] sm:$0xff] %v7137_v2  ;;  %v946_v28 = vsel %vm7139_vm15, %v4230_v40, %v4235_v17  ;;  %vm7140_vm1 = vmmov %vm7139_vm15  ;;  %v7142_v48 = vsel %vm5297_vm4, 4294967295, %v7141_v48  ;;  %v932_v22 = vsel %vm4850_vm12, %v5271_v9, %v5267_v23  ;;  %v933_v27 = vsel %vm4854_vm13, %v930_v38, %v5261_v63 }
 0x90b   :  { %v947_v1 = vsel %vm7140_vm1, %v4231_v39, %v4236_v4  ;;  %7143 = vst [vmem:[#allocation17_spill] sm:$0xff] %v7142_v48  ;;  %vm7144_vm5 = vmmov %vm7140_vm1  ;;  %v935_v41 = vsel %vm4854_vm13, %v5281_v45, %v5253_v58  ;;  %v5350_v32 = vsel %vm4982_vm9, %v946_v28, %v932_v22  ;;  %v7180_v2 = vunpack.i.h.bf16 %v5163_v42 }
 0x90c   :  { %v4244_v5 = vpop.permute.xlu1 %4243  ;;  %v948_v24 = vsel %vm7144_vm5, %v4235_v17, %v4230_v40  ;;  %vm7145_vm15 = vmmov %vm7140_vm1  ;;  %vm1086_vm1 = vcmp.eq.s32.totalorder %v5172_v52, 124  ;;  %v934_v17 = vsel %vm4850_vm12, %v5277_v47, %v5257_v61  ;;  %v957_v50 = vsel %vm5221_vm6, %v947_v1, %v5277_v47 }
 0x90d   :  { %v4239_v53 = vpop.permute.xlu0 %4238  ;;  %v949_v34 = vsel %vm7145_vm15, %v4236_v4, %v4231_v39  ;;  %v4246_v4 = vunpack.i.h.bf16 %v4244_v5  ;;  %v4245_v39 = vunpack.i.l.bf16 %v4244_v5  ;;  %v5325_v40 = vpop.permute.xlu2 %4293  ;;  %vm5336_vm15 = vcmp.eq.s32.totalorder %v1004_v25, 1 }
 0x90e   :  { %v4241_v59 = vunpack.i.h.bf16 %v4239_v53  ;;  %v4240_v60 = vunpack.i.l.bf16 %v4239_v53  ;;  %v958_v44 = vsel %vm5225_vm0, %v949_v34, %v5281_v45  ;;  %v7147_v43 = vsel %vm5336_vm15, 4294967295, %v7146_v43 }
 0x90f   :  { %v5341_v5 = vsel %vm1086_vm1, 1, %v6936_v3  ;;  %v955_v53 = vsel %vm5221_vm6, %v946_v28, %v5271_v9  ;;  %v956_v47 = vsel %vm5225_vm0, %v948_v24, %v930_v38  ;;  %v5354_v25 = vsel %vm4986_vm10, %v948_v24, %v933_v27 }
 0x910   :  { %vm5360_vm1 = vcmp.eq.s32.totalorder %v1005_v26, 1  ;;  %v7148_v3 = vmov 0  ;;  %v5367_v38 = vsel %vm4982_vm9, %v947_v1, %v934_v17  ;;  %v5371_v22 = vsel %vm4986_vm10, %v949_v34, %v935_v41 }
 0x911   :  { %v7149_v3 = vsel %vm5360_vm1, 4294967295, %v7148_v3  ;;  %vm5375_vm5 = vcmp.eq.s32.totalorder %v1014_v35, 1  ;;  %v7150_v28 = vmov 0  ;;  %vm5381_vm0 = vcmp.eq.s32.totalorder %v1015_v37, 1 }
 0x912   :  { %v7151_v28 = vsel %vm5375_vm5, 4294967295, %v7150_v28  ;;  %v7153_v0 = vsel %vm5381_vm0, 4294967295, %v7152_v0  ;;  %v7154_v24 = vmov 0   ;;  %vm7155_vm6 = vcmp.eq.s32.totalorder %v5172_v52, 6 }
 0x913   :  { %v1109_v1 = vsel %vm7155_vm6, 1, %v7154_v24  ;;  %vm7156_vm10 = vcmp.lt.s32.totalorder %v4780_v12, 123  ;;  %v7158_v17 = vperm.slane %v5208_v31, 0  ;;  %v1100_v37 = vperm.slane %v5341_v5, 0 }
 0x914   :  { %v5356_v45 = vpop.permute.xlu1 %4258  ;;  %v974_v27 = vsel %vm7156_vm10, %v4241_v59, %v4246_v4  ;;  %vm7157_vm9 = vmmov %vm7156_vm10  ;;  %vm5406_vm10 = vcmp.eq.s32.totalorder %v7163_v33, 1  ;;  %v1110_v31 = vperm.slane %v1109_v1, 0  ;;  %v1111_v33 = vperm.slane %v1109_v1, 1 }
 0x915   :  { %v4254_v26 = vpop.permute.xlu0 %4253  ;;  %v973_v35 = vsel %vm7157_vm9, %v4240_v60, %v4245_v39  ;;  %vm5395_vm13 = vcmp.eq.s32.totalorder %v7158_v17, 1  ;;  %vm7161_vm12 = vmmov %vm7157_vm9  ;;  %v7165_v21 = vsel %vm5406_vm10, 4294967295, %v7164_v21  ;;  %v984_v36 = vsel %vm5285_vm14, %v974_v27, %v957_v50 }
 0x916   :  { %v7160_v7 = vsel %vm5395_vm13, 4294967295, %v7159_v7  ;;  %v976_v41 = vsel %vm7161_vm12, %v4246_v4, %v4241_v59  ;;  %vm7162_vm6 = vmmov %vm7157_vm9  ;;  %v4255_v34 = vunpack.i.l.bf16 %v4254_v26  ;;  %v4256_v17 = vunpack.i.h.bf16 %v4254_v26 }
 0x917   :  { %v975_v9 = vsel %vm7162_vm6, %v4245_v39, %v4240_v60  ;;  %vm5417_vm12 = vcmp.eq.s32.totalorder %v1047_v6, 1  ;;  %v7169_v59 = vmov 0  ;;  %v1101_v60 = vperm.slane %v5341_v5, 1 }
 0x918   :  { %v7170_v59 = vsel %vm5417_vm12, 4294967295, %v7169_v59  ;;  %v982_v4 = vsel %vm5285_vm14, %v973_v35, %v955_v53  ;;  %v4261_v39 = vunpack.i.h.bf16 %v5356_v45  ;;  %v4260_v26 = vunpack.i.l.bf16 %v5356_v45 }
 0x919   :  { %v983_v10 = vsel %vm5297_vm4, %v975_v9, %v956_v47  ;;  %v985_v6 = vsel %vm5297_vm4, %v976_v41, %v958_v44  ;;  %v7171_v5 = vperm.slane %v5241_v49, 0  ;;  %v7172_v1 = vmov 0 }
 0x91a   :  { %v7174_v53 = vperm.slane %v5241_v49, 1  ;;  %v7175_v45 = vmov 0  ;;  %vm7177_vm6 = vcmp.eq.s32.totalorder %v5172_v52, 7  ;;  %v986_v44 = vsel %vm4998_vm2, %v973_v35, %v5350_v32 }
 0x91b   :  { %vm5435_vm9 = vcmp.eq.s32.totalorder %v7171_v5, 1  ;;  %v5448_v47 = vsel %vm7177_vm6, 1, %v7154_v24  ;;  %v987_v50 = vsel %vm5002_vm11, %v975_v9, %v5354_v25  ;;  %v988_v49 = vsel %vm4998_vm2, %v974_v27, %v5367_v38 }
 0x91c   :  { %v7173_v1 = vsel %vm5435_vm9, 4294967295, %v7172_v1  ;;  %vm5441_vm8 = vcmp.eq.s32.totalorder %v7174_v53, 1  ;;  %v7178_v5 = vunpack.i.l.bf16 %v5163_v42  ;;  %vm7179_vm4 = vcmp.lt.s32.totalorder %v4780_v12, 125  ;;  %v4274_v38 = vpop.permute.xlu1 %4273 }
 0x91d   :  { %v7176_v45 = vsel %vm5441_vm8, 4294967295, %v7175_v45  ;;  %v989_v48 = vsel %vm5002_vm11, %v976_v41, %v5371_v22  ;;  %vm7181_vm6 = vmmov %vm7179_vm4  ;;  %v7184_v27 = vperm.slane %v5248_v51, 0  ;;  %v7185_v35 = vmov 0  ;;  %v4269_v19 = vpop.permute.xlu0 %4268 }
 0x91e   :  { %v999_v53 = vsel %vm7179_vm4, %v7178_v5, %v4255_v34  ;;  %v1000_v32 = vsel %vm7181_vm6, %v7180_v2, %v4256_v17  ;;  %v7182_v25 = vmov %v7178_v5  ;;  %vm7183_vm14 = vmmov %vm7179_vm4  ;;  %v7187_v5 = vperm.slane %v5248_v51, 1 }
 0x91f   :  { %v1001_v9 = vsel %vm7183_vm14, %v4255_v34, %v7182_v25  ;;  %vm5476_vm2 = vcmp.eq.s32.totalorder %v7184_v27, 1  ;;  %v7188_v22 = vmov 0  ;;  %vm7190_vm6 = vcmp.eq.s32.totalorder %v5172_v52, 8 }
 0x920   :  { %v7186_v35 = vsel %vm5476_vm2, 4294967295, %v7185_v35  ;;  %vm5482_vm4 = vcmp.eq.s32.totalorder %v7187_v5, 1  ;;  %v1163_v2 = vsel %vm7190_vm6, 1, %v7154_v24  ;;  %v7191_v41 = vunpack.i.l.bf16 %v5175_v57 }
 0x921   :  { %v7189_v22 = vsel %vm5482_vm4, 4294967295, %v7188_v22  ;;  %vm7192_vm14 = vcmp.lt.s32.totalorder %v4780_v12, 127  ;;  %v7193_v25 = vunpack.i.h.bf16 %v5175_v57  ;;  %v7195_v51 = vunpack.i.h.bf16 %v5163_v42 }
 0x922   :  { %v1031_v34 = vsel %vm7192_vm14, %v4260_v26, %v7191_v41  ;;  %vm7194_vm11 = vmmov %vm7192_vm14  ;;  %v1137_v18 = vperm.slane %v5448_v47, 0  ;;  %v7197_v52 = vmov %v7191_v41  ;;  %v1008_v41 = vsel %vm5336_vm15, %v999_v53, %v982_v4 }
 0x923   :  { %v1032_v27 = vsel %vm7194_vm11, %v4261_v39, %v7193_v25  ;;  %v1002_v5 = vsel %vm7196_vm7, %v4256_v17, %v7195_v51  ;;  %vm7198_vm6 = vmmov %vm7194_vm11  ;;  %v4275_v13 = vunpack.i.l.bf16 %v4274_v38  ;;  %v4270_v11 = vunpack.i.l.bf16 %v4269_v19 }
 0x924   :  { %v1033_v24 = vsel %vm7198_vm6, %v7197_v52, %v4260_v26  ;;  %v1009_v25 = vsel %vm5360_vm1, %v1001_v9, %v983_v10  ;;  %v1010_v42 = vsel %vm5336_vm15, %v1000_v32, %v984_v36  ;;  %v4276_v17 = vunpack.i.h.bf16 %v4274_v38 }
 0x925   :  { %v4271_v51 = vunpack.i.h.bf16 %v4269_v19  ;;  %vm5513_vm7 = vcmp.eq.s32.totalorder %v1100_v37, 1  ;;  %vm5517_vm14 = vcmp.eq.s32.totalorder %v1101_v60, 1  ;;  %v7201_v26 = vmov 0 }
 0x926   :  { %v7200_v46 = vsel %vm5513_vm7, 4294967295, %v7199_v46  ;;  %v7202_v26 = vsel %vm5517_vm14, 4294967295, %v7201_v26  ;;  %v7203_v4 = vunpack.i.h.bf16 %v5175_v57  ;;  %v1011_v36 = vsel %vm5360_vm1, %v1002_v5, %v985_v6 }
 0x927   :  { %v1018_v19 = vsel %vm5375_vm5, %v999_v53, %v986_v44  ;;  %v1019_v37 = vsel %vm5381_vm0, %v1001_v9, %v987_v50  ;;  %v1020_v60 = vsel %vm5375_vm5, %v1000_v32, %v988_v49  ;;  %v1021_v38 = vsel %vm5381_vm0, %v1002_v5, %v989_v48 }
 0x928   :  { %v1034_v10 = vsel %vm7198_vm6, %v7203_v4, %v4261_v39  ;;  %v1040_v57 = vsel %vm5395_vm13, %v1031_v34, %v1008_v41  ;;  %vm5537_vm11 = vcmp.eq.s32.totalorder %v1110_v31, 1  ;;  %v7204_v39 = vmov 0 }
 0x929   :  { %v7205_v39 = vsel %vm5537_vm11, 4294967295, %v7204_v39  ;;  %vm5541_vm6 = vcmp.eq.s32.totalorder %v1111_v33, 1  ;;  %v7206_v6 = vmov 0  ;;  %v1164_v44 = vperm.slane %v1163_v2, 0 }
 0x92a   :  { %v7207_v6 = vsel %vm5541_vm6, 4294967295, %v7206_v6  ;;  %v1041_v50 = vsel %vm5406_vm10, %v1033_v24, %v1009_v25  ;;  %v1042_v49 = vsel %vm5395_vm13, %v1032_v27, %v1010_v42  ;;  %vm7208_vm0 = vcmp.lt.s32.totalorder %v4780_v12, 1  ;;  %v4284_v25 = vpop.permute.xlu0 %4283 }
 0x92b   :  { %v1063_v48 = vsel %vm7208_vm0, %v4270_v11, %v4275_v13  ;;  %vm7209_vm5 = vmmov %vm7208_vm0  ;;  %v1043_v33 = vsel %vm5406_vm10, %v1034_v10, %v1011_v36  ;;  %v1050_v32 = vsel %vm5413_vm3, %v1031_v34, %v1018_v19  ;;  %v1051_v9 = vsel %vm5417_vm12, %v1033_v24, %v1019_v37 }
 0x92c   :  { %v1065_v31 = vsel %vm7209_vm5, %v4275_v13, %v4270_v11  ;;  %vm7210_vm1 = vmmov %vm7208_vm0  ;;  %v1052_v52 = vsel %vm5413_vm3, %v1032_v27, %v1020_v60  ;;  %v1053_v11 = vsel %vm5417_vm12, %v1034_v10, %v1021_v38  ;;  %v4289_v13 = vpop.permute.xlu1 %4288  ;;  %v7212_v41 = vmov 0 }
 0x92d   :  { %v1066_v53 = vsel %vm7210_vm1, %v4276_v17, %v4271_v51  ;;  %vm7211_vm13 = vmmov %vm7208_vm0  ;;  %vm5567_vm0 = vcmp.eq.s32.totalorder %v1137_v18, 1  ;;  %v1072_v34 = vsel %vm5435_vm9, %v1065_v31, %v1040_v57  ;;  %v1073_v24 = vsel %vm5441_vm8, %v1063_v48, %v1041_v50 }
 0x92e   :  { %v1064_v5 = vsel %vm7211_vm13, %v4271_v51, %v4276_v17  ;;  %v7213_v41 = vsel %vm5567_vm0, 4294967295, %v7212_v41  ;;  %v1138_v42 = vperm.slane %v5448_v47, 1  ;;  %v1165_v27 = vperm.slane %v1163_v2, 1 }
 0x92f   :  { %v1074_v17 = vsel %vm5435_vm9, %v1066_v53, %v1042_v49  ;;  %v4290_v51 = vunpack.i.l.bf16 %v4289_v13  ;;  %v4286_v18 = vunpack.i.h.bf16 %v4284_v25  ;;  %v4285_v4 = vunpack.i.l.bf16 %v4284_v25 }
 0x930   :  { %v1075_v10 = vsel %vm5441_vm8, %v1064_v5, %v1043_v33  ;;  %v1082_v36 = vsel %vm5476_vm2, %v1065_v31, %v1050_v32  ;;  %v1083_v19 = vsel %vm5482_vm4, %v1063_v48, %v1051_v9  ;;  %v4291_v37 = vunpack.i.h.bf16 %v4289_v13 }
 0x931   :  { %vm5585_vm5 = vcmp.eq.s32.totalorder %v1164_v44, 1  ;;  %v7214_v60 = vmov 0  ;;  %v7216_v47 = vunpack.i.h.bf16 %v5219_v20  ;;  %vm7217_vm1 = vcmp.lt.s32.totalorder %v4780_v12, 3 }
 0x932   :  { %v7215_v60 = vsel %vm5585_vm5, 4294967295, %v7214_v60  ;;  %vm7219_vm13 = vmmov %vm7217_vm1  ;;  %v7220_v50 = vunpack.i.l.bf16 %v5219_v20  ;;  %v1084_v31 = vsel %vm5476_vm2, %v1066_v53, %v1052_v52  ;;  %v1085_v33 = vsel %vm5482_vm4, %v1064_v5, %v1053_v11 }
 0x933   :  { %v1096_v2 = vsel %vm7217_vm1, %v7216_v47, %v4286_v18  ;;  %v7218_v38 = vmov %v7216_v47  ;;  %vm7221_vm8 = vmmov %vm7217_vm1  ;;  %v7224_v32 = vmov 0  ;;  %v7226_v9 = vmov 0 }
 0x934   :  { %v1098_v57 = vsel %vm7219_vm13, %v4286_v18, %v7218_v38  ;;  %v1095_v49 = vsel %vm7221_vm8, %v7220_v50, %v4285_v4  ;;  %v7222_v44 = vmov %v7220_v50  ;;  %vm7223_vm9 = vmmov %vm7217_vm1  ;;  %vm5609_vm1 = vcmp.eq.s32.totalorder %v1138_v42, 1  ;;  %v4304_v38 = vpop.permute.xlu1 %4303 }
 0x935   :  { %v1097_v48 = vsel %vm7223_vm9, %v4285_v4, %v7222_v44  ;;  %v7225_v32 = vsel %vm5609_vm1, 4294967295, %v7224_v32  ;;  %vm5613_vm13 = vcmp.eq.s32.totalorder %v1165_v27, 1  ;;  %v7229_v13 = vunpack.i.l.bf16 %v5325_v40  ;;  %v4299_v44 = vpop.permute.xlu0 %4298 }
 0x936   :  { %v7227_v9 = vsel %vm5613_vm13, 4294967295, %v7226_v9  ;;  %vm7230_vm8 = vcmp.lt.s32.totalorder %v4780_v12, 5  ;;  %v1104_v5 = vsel %vm5513_vm7, %v1097_v48, %v1072_v34  ;;  %v1105_v52 = vsel %vm5517_vm14, %v1095_v49, %v1073_v24 }
 0x937   :  { %7228 = vst [vmem:[#allocation18_spill] sm:$0xff] %v7227_v9  ;;  %v1127_v20 = vsel %vm7230_vm8, %v4290_v51, %v7229_v13  ;;  %v7231_v25 = vmov %v7229_v13  ;;  %vm7232_vm9 = vmmov %vm7230_vm8  ;;  %v7233_v11 = vunpack.i.h.bf16 %v5325_v40  ;;  %v1106_v4 = vsel %vm5513_vm7, %v1098_v57, %v1074_v17 }
 0x938   :  { %v1129_v53 = vsel %vm7232_vm9, %v7231_v25, %v4290_v51  ;;  %vm7234_vm4 = vmmov %vm7230_vm8  ;;  %v1107_v51 = vsel %vm5517_vm14, %v1096_v2, %v1075_v10  ;;  %v1114_v34 = vsel %vm5537_vm11, %v1097_v48, %v1082_v36  ;;  %v1115_v24 = vsel %vm5541_vm6, %v1095_v49, %v1083_v19 }
 0x939   :  { %v1128_v42 = vsel %vm7234_vm4, %v4291_v37, %v7233_v11  ;;  %v7235_v27 = vmov %v7233_v11  ;;  %vm7236_vm8 = vmmov %vm7234_vm4  ;;  %v1116_v47 = vsel %vm5537_vm11, %v1098_v57, %v1084_v31  ;;  %v1117_v40 = vsel %vm5541_vm6, %v1096_v2, %v1085_v33 }
 0x93a   :  { %v1130_v18 = vsel %vm7236_vm8, %v7235_v27, %v4291_v37  ;;  %v4306_v37 = vunpack.i.h.bf16 %v4304_v38  ;;  %v4305_v50 = vunpack.i.l.bf16 %v4304_v38  ;;  %vm7237_vm4 = vnez %v7099_v62 }
 0x93b   :  { %v1131_v17 = vsel %vm7237_vm4, %v1129_v53, %v1104_v5  ;;  %vm7238_vm9 = vnez %v7101_v14  ;;  %v4301_v36 = vunpack.i.h.bf16 %v4299_v44  ;;  %v4300_v48 = vunpack.i.l.bf16 %v4299_v44  ;;  %v4097_v44 = vld [vmem:[%s6917_s5 + $0x30] sm:$0xff] }
 0x93c   :  { %v1132_v10 = vsel %vm7238_vm9, %v1127_v20, %v1105_v52  ;;  %v1133_v19 = vsel %vm7237_vm4, %v1130_v18, %v1106_v4  ;;  %v1134_v57 = vsel %vm7238_vm9, %v1128_v42, %v1107_v51  ;;  %v1141_v2 = vsel %vm5567_vm0, %v1129_v53, %v1114_v34 }
 0x93d   :  { %v1143_v49 = vsel %vm5567_vm0, %v1130_v18, %v1116_v47  ;;  %v1142_v31 = vsel %vm5609_vm1, %v1127_v20, %v1115_v24  ;;  %v1144_v33 = vsel %vm5609_vm1, %v1128_v42, %v1117_v40  ;;  %vm7239_vm8 = vcmp.lt.s32.totalorder %v4780_v12, 7 }
 0x93e   :  { %v1155_v13 = vsel %vm7239_vm8, %v4301_v36, %v4306_v37  ;;  %vm7240_vm6 = vmmov %vm7239_vm8  ;;  %vm7243_vm0 = vnez %v7109_v29  ;;  %vm7244_vm7 = vnez %v7111_v30  ;;  %v7524_v29 = vld [vmem:[#allocation7_spill] sm:$0xff] }
 0x93f   :  { %v1157_v25 = vsel %vm7240_vm6, %v4306_v37, %v4301_v36  ;;  %vm7241_vm11 = vmmov %vm7240_vm6  ;;  %v1161_v42 = vsel %vm7244_vm7, %v1155_v13, %v1134_v57  ;;  %v1171_v51 = vsel %vm5613_vm13, %v1155_v13, %v1144_v33 }
 0x940   :  { %v1154_v5 = vsel %vm7241_vm11, %v4300_v48, %v4305_v50  ;;  %vm7242_vm14 = vmmov %vm7240_vm6  ;;  %v1160_v11 = vsel %vm7243_vm0, %v1157_v25, %v1133_v19  ;;  %v1170_v18 = vsel %vm5585_vm5, %v1157_v25, %v1143_v49  ;;  %vm7245_vm11 = vnez %v7093_v15  ;;  %v7329_v15 = vld [vmem:[#allocation14_spill] sm:$0xff] }
 0x941   :  { %v1156_v53 = vsel %vm7242_vm14, %v4305_v50, %v4300_v48  ;;  %v1159_v20 = vsel %vm7244_vm7, %v1154_v5, %v1132_v10  ;;  %v1169_v4 = vsel %vm5613_vm13, %v1154_v5, %v1142_v31  ;;  %v1174_v40 = vsel %vm7245_vm11, %v5257_v61, %v1160_v11  ;;  %v4099_v61 = vld [vmem:[%s6917_s5 + $0x40] sm:$0xff] }
 0x942   :  { %v1158_v52 = vsel %vm7243_vm0, %v1156_v53, %v1131_v17  ;;  %v1168_v27 = vsel %vm5585_vm5, %v1156_v53, %v1141_v2  ;;  %v1180_v24 = vpack.c.bf16 %v1171_v51, %v1169_v4  ;;  %vm7246_vm14 = vnez %v7096_v16 }
 0x943   :  { %v1179_v34 = vpack.c.bf16 %v1170_v18, %v1168_v27  ;;  %v1172_v47 = vsel %vm7245_vm11, %v5267_v23, %v1158_v52  ;;  %v1173_v37 = vsel %vm7246_vm14, %v5261_v63, %v1159_v20  ;;  %v1175_v50 = vsel %vm7246_vm14, %v5253_v58, %v1161_v42  ;;  %v1203_v58 = vpop.f32.mrf.mxu0  ;;  %v1217_v63 = vpop.f32.mrf.mxu1 }
 0x944   :  { %v1261_v38 = vpack.c.bf16 %v1174_v40, %v1172_v47  ;;  %1251 = vmatpush.bf16.msra.mxu3 %v1180_v24  ;;  %v1262_v23 = vpack.c.bf16 %v1175_v50, %v1173_v37  ;;  %vm7247_vm6 = vcmask 130048  }
 0x945   :  { %1237 = vmatpush.bf16.msra.mxu2 %v1179_v34  ;;  %vm7248_vm8 = vmmov %vm7247_vm6 }
 0x946   :  { %1278 = vmatpush.bf16.msrb.mxu0 %v1261_v38  ;;  %1292 = vmatpush.bf16.msrb.mxu1 %v1262_v23  ;;  %vm7249_vm13 = vmmov %vm7247_vm6 }
 0x947   :  { %3836 = vmatmul.msk.bf16.vlgmr.msra.gmra.mxu3 %vm7248_vm8, %v4097_v44  ;;  %vm7250_vm5 = vmmov %vm7247_vm6 }
 0x948   :  { %3835 = vmatmul.msk.bf16.vlgmr.msra.gmra.mxu2 %vm7247_vm6, %v4097_v44 }
 0x949   :  { %3843 = vmatmul.msk.bf16.vlgmr.msrb.gmra.mxu0 %vm7249_vm13, %v4099_v61  ;;  %3844 = vmatmul.msk.bf16.vlgmr.msrb.gmra.mxu1 %vm7250_vm5, %v4099_v61 }
 0x94b   :  { %v1205_v17 = vpop.f32.mrf.mxu0  ;;  %v1219_v10 = vpop.f32.mrf.mxu1 }
 0x9c6   :  { %v1280_v36 = vpop.f32.mrf.mxu0  ;;  %v1294_v48 = vpop.f32.mrf.mxu1 }
 0x9ca   :  { %v1253_v57 = vpop.f32.mrf.mxu3 }
 0x9cb   :  { %v1239_v19 = vpop.f32.mrf.mxu2  ;;  %v1254_v49 = vadd.f32 %v1253_v57, %v1217_v63 }
 0x9cc   :  { %v1240_v2 = vadd.f32 %v1239_v19, %v1203_v58 }
 0x9cd   :  { %v1300_v33 = vadd.f32 %v1294_v48, %v1254_v49 }
 0x9ce   :  { %v1299_v31 = vadd.f32 %v1280_v36, %v1240_v2  ;;  %v1282_v20 = vpop.f32.mrf.mxu0  ;;  %v1296_v11 = vpop.f32.mrf.mxu1 }
 0x9d0   :  { %v1309_v13 = vadd.f32 %v1300_v33, %v1299_v31 }
 0x9d2   :  { %1310 = vadd.xlane.f32.xlu2 %v1309_v13  ;;  %v1255_v5 = vpop.f32.mrf.mxu3 }
 0x9d3   :  { %v1241_v25 = vpop.f32.mrf.mxu2  ;;  %v1256_v52 = vadd.f32 %v1255_v5, %v1219_v10 }
 0x9d4   :  { %v1242_v53 = vadd.f32 %v1241_v25, %v1205_v17  ;;  %v3847_v17 = vld [vmem:[%s6916_s4 + $0x30] sm:$0xff] }
 0x9d5   :  { %v1302_v27 = vadd.f32 %v1296_v11, %v1256_v52  ;;  %v3845_v52 = vld [vmem:[%s6915_s3 + $0x30] sm:$0xff] }
 0x9d6   :  { %v1301_v42 = vadd.f32 %v1282_v20, %v1242_v53 }
 0x9d8   :  { %v1312_v18 = vadd.f32 %v1302_v27, %v1301_v42 }
 0x9da   :  { %1313 = vadd.xlane.f32.xlu0 %v1312_v18 }
 0xa45   :  { %v1311_v4 = vpop.xlane.xlu2 %1310 }
 0xa46   :  { %v1315_v51 = vmul.f32 0.00390625, %v1311_v4 }
 0xa48   :  { %v1317_v34 = vsub.f32 %v1299_v31, %v1315_v51  ;;  %v1318_v24 = vsub.f32 %v1300_v33, %v1315_v51  ;;  %v3846_v51 = vld [vmem:[%s6915_s3 + $0x38] sm:$0xff] }
 0xa4a   :  { %v1321_v47 = vmul.f32 %v1317_v34, %v1317_v34  ;;  %v1322_v40 = vmul.f32 %v1318_v24, %v1318_v24 }
 0xa4c   :  { %v1325_v38 = vadd.f32 %v1322_v40, %v1321_v47  ;;  %v3848_v40 = vld [vmem:[%s6916_s4 + $0x38] sm:$0xff] }
 0xa4d   :  { %v1314_v37 = vpop.xlane.xlu0 %1313 }
 0xa4e   :  { %v1316_v50 = vmul.f32 0.00390625, %v1314_v37  ;;  %1326 = vadd.xlane.f32.xlu1 %v1325_v38 }
 0xa50   :  { %v1319_v44 = vsub.f32 %v1301_v42, %v1316_v50  ;;  %v1320_v23 = vsub.f32 %v1302_v27, %v1316_v50  ;;  %v3851_v50 = vld [vmem:[%s6919_s7 + $0x20] sm:$0xff] }
 0xa52   :  { %v1323_v61 = vmul.f32 %v1319_v44, %v1319_v44  ;;  %v1324_v58 = vmul.f32 %v1320_v23, %v1320_v23 }
 0xa54   :  { %v1328_v63 = vadd.f32 %v1324_v58, %v1323_v61  ;;  %v3852_v61 = vld [vmem:[%s6919_s7 + $0x28] sm:$0xff] }
 0xa56   :  { %1329 = vadd.xlane.f32.xlu2 %v1328_v63 }
 0xa6e   :  { %1373 = vperm.xlu2 %4144, %v3847_v17  }
 0xac1   :  { %v1327_v10 = vpop.xlane.xlu1 %1326 }
 0xac2   :  { %v1331_v36 = vmul.f32 0.00390625, %v1327_v10 }
 0xac4   :  { %v1333_v48 = vadd.f32 1e-05, %v1331_v36 }
 0xac6   :  { %4639 = vrsqrt.f32 %v1333_v48  ;;  %vm1341_vm13 = vweird.f32 %v1333_v48 }
 0xac9   :  { %v1330_v19 = vpop.xlane.xlu2 %1329 }
 0xaca   :  { %v1332_v57 = vmul.f32 0.00390625, %v1330_v19 }
 0xacc   :  { %v4640_v2 = vpop.eup %4639  ;;  %v1334_v49 = vadd.f32 1e-05, %v1332_v57 }
 0xacd   :  { %v1336_v31 = vmul.f32 %v4640_v2, %v1333_v48  ;;  %vm1342_vm5 = vweird.f32 %v4640_v2 }
 0xace   :  { %4641 = vrsqrt.f32 %v1334_v49  ;;  %vm1343_vm6 = vmor %vm1341_vm13, %vm1342_vm5  ;;  %vm1351_vm1 = vweird.f32 %v1334_v49 }
 0xacf   :  { %v1337_v33 = vmul.f32 %v4640_v2, %v1336_v31 }
 0xad1   :  { %v1338_v13 = vmul.f32 0.5, %v1337_v33  ;;  %v1374_v10 = vpop.permute.xlu2 %1373 }
 0xad3   :  { %v1339_v25 = vsub.f32 1.5, %v1338_v13 }
 0xad4   :  { %v4642_v5 = vpop.eup %4641 }
 0xad5   :  { %v1346_v53 = vmul.f32 %v4642_v5, %v1334_v49  ;;  %v1340_v20 = vmul.f32 %v4640_v2, %v1339_v25  ;;  %vm1352_vm8 = vweird.f32 %v4642_v5 }
 0xad6   :  { %vm1353_vm2 = vmor %vm1351_vm1, %vm1352_vm8 }
 0xad7   :  { %v1347_v11 = vmul.f32 %v4642_v5, %v1346_v53  ;;  %v1344_v42 = vsel %vm1343_vm6, %v4640_v2, %v1340_v20  ;;  %vm7256_vm6 = vcmp.lt.s32.totalorder %v4780_v12, 1 }
 0xad8   :  { %v1355_v27 = vmul.f32 %v3845_v52, %v1344_v42  ;;  %vm7257_vm8 = vmmov %vm7256_vm6 }
 0xad9   :  { %v1348_v18 = vmul.f32 0.5, %v1347_v11 }
 0xada   :  { %1359 = vperm.xlu0 %4145, %v1355_v27  }
 0xadb   :  { %v1349_v4 = vsub.f32 1.5, %v1348_v18 }
 0xadd   :  { %v1350_v47 = vmul.f32 %v4642_v5, %v1349_v4 }
 0xadf   :  { %v1354_v38 = vsel %vm1353_vm2, %v4642_v5, %v1350_v47  ;;  %vm7251_vm2 = vcmask 130048  }
 0xae0   :  { %v1356_v37 = vmul.f32 %v3846_v51, %v1354_v38  ;;  %vm7252_vm1 = vmmov %vm7251_vm2 }
 0xae1   :  { %vm7254_vm5 = vmmov %vm7252_vm1 }
 0xae2   :  { %1378 = vperm.xlu0 %4145, %v3848_v40   ;;  %1364 = vperm.xlu1 %4146, %v1356_v37   ;;  %vm7255_vm13 = vmmov %vm7252_vm1 }
 0xaea   :  { %1403 = vperm.xlu0 %4145, %v3851_v50   ;;  %1408 = vperm.xlu1 %4146, %v3852_v61  }
 0xb4c   :  { %v1360_v58 = vpop.permute.xlu0 %1359 }
 0xb4d   :  { %v1367_v63 = vmul.f32 %v1360_v58, %v1317_v34  ;;  %v1368_v17 = vmul.f32 %v1360_v58, %v1318_v24  ;;  %v4100_v24 = vld [vmem:[%s6918_s6 + $0x10] sm:$0xff] }
 0xb4f   :  { %v1381_v36 = vadd.f32 %v1374_v10, %v1367_v63  ;;  %v1382_v48 = vadd.f32 %v1374_v10, %v1368_v17  ;;  %v7253_v17 = vld [vmem:[#allocation13_spill] sm:$0xff] }
 0xb51   :  { %v1385_v31 = vmul.f32 0.2, %v1381_v36  ;;  %v1386_v33 = vmul.f32 0.2, %v1382_v48 }
 0xb53   :  { %v1389_v52 = vmax.f32 %v1381_v36, %v1385_v31  ;;  %v1390_v20 = vmax.f32 %v1382_v48, %v1386_v33 }
 0xb54   :  { %v1365_v19 = vpop.permute.xlu1 %1364  ;;  %v1379_v49 = vpop.permute.xlu0 %1378 }
 0xb55   :  { %v1369_v57 = vmul.f32 %v1365_v19, %v1319_v44  ;;  %v1370_v2 = vmul.f32 %v1365_v19, %v1320_v23 }
 0xb57   :  { %v1383_v13 = vadd.f32 %v1379_v49, %v1369_v57  ;;  %v1384_v25 = vadd.f32 %v1379_v49, %v1370_v2 }
 0xb59   :  { %v1387_v5 = vmul.f32 0.2, %v1383_v13  ;;  %v1388_v53 = vmul.f32 0.2, %v1384_v25 }
 0xb5b   :  { %v1391_v11 = vmax.f32 %v1383_v13, %v1387_v5  ;;  %v1392_v42 = vmax.f32 %v1384_v25, %v1388_v53 }
 0xb5c   :  { %v1404_v18 = vpop.permute.xlu0 %1403  ;;  %v1409_v4 = vpop.permute.xlu1 %1408 }
 0xb5d   :  { %v1396_v27 = vpack.c.bf16 %v1391_v11, %v1389_v52  ;;  %v1397_v34 = vpack.c.bf16 %v1392_v42, %v1390_v20 }
 0xb5f   :  { %1426 = vmatpush.bf16.msrb.mxu2 %v1396_v27  ;;  %1440 = vmatpush.bf16.msrb.mxu3 %v1397_v34 }
 0xb62   :  { %3857 = vmatmul.msk.bf16.vlgmr.msrb.gmra.mxu2 %vm7251_vm2, %v4100_v24  ;;  %3858 = vmatmul.msk.bf16.vlgmr.msrb.gmra.mxu3 %vm7252_vm1, %v4100_v24  ;;  %vm7258_vm2 = vmmov %vm7256_vm6 }
 0xb63   :  { %vm7259_vm1 = vmmov %vm7258_vm2 }
 0xbe5   :  { %v1428_v44 = vpop.f32.mrf.mxu2  ;;  %v1442_v23 = vpop.f32.mrf.mxu3 }
 0xbe6   :  { %v1429_v51 = vadd.f32 %v1428_v44, %v1404_v18  ;;  %v1443_v47 = vadd.f32 %v1442_v23, %v1404_v18 }
 0xbe8   :  { %v5735_v61 = vadd.f32 %v1429_v51, %v5120_v54  ;;  %v5738_v58 = vadd.f32 %v1443_v47, %v5123_v55  ;;  %v4102_v55 = vld [vmem:[%s6917_s5 + $0x50] sm:$0xff] }
 0xbed   :  { %v1430_v40 = vpop.f32.mrf.mxu2  ;;  %v1444_v38 = vpop.f32.mrf.mxu3 }
 0xbee   :  { %v1431_v37 = vadd.f32 %v1430_v40, %v1409_v4  ;;  %v1445_v50 = vadd.f32 %v1444_v38, %v1409_v4  ;;  %v7264_v4 = vld [vmem:[#allocation5_spill] sm:$0xff]  ;;  %v7266_v40 = vld [vmem:[#allocation6_spill] sm:$0xff] }
 0xbf0   :  { %v5741_v63 = vadd.f32 %v1431_v37, %v5126_v56  ;;  %v5744_v10 = vadd.f32 %v1445_v50, %v7253_v17 }
 0xbf2   :  { %v4312_v36 = vpack.i.bf16 %v5744_v10, %v5738_v58  ;;  %v1492_v48 = vpack.c.bf16 %v5744_v10, %v5738_v58  ;;  %v4317_v19 = vpack.i.bf16 %v5741_v63, %v5735_v61  ;;  %v1491_v54 = vpack.c.bf16 %v5741_v63, %v5735_v61 }
 0xbf4   :  { %4313 = vrot.lane.b32.xlu0 %v4312_v36, %s4697_s12  ;;  %1522 = vmatpush.bf16.msra.mxu1 %v1492_v48 }
 0xbf5   :  { %4318 = vrot.lane.b32.xlu1 %v4317_v19, %s4696_s11  ;;  %4308 = vrot.lane.b32.xlu2 %v4317_v19, %s4697_s12 }
 0xbf6   :  { %1508 = vmatpush.bf16.msra.mxu0 %v1491_v54 }
 0xbf7   :  { %3868 = vmatmul.msk.bf16.vlgmr.msra.gmra.mxu1 %vm7255_vm13, %v4102_v55 }
 0xbf9   :  { %3867 = vmatmul.msk.bf16.vlgmr.msra.gmra.mxu0 %vm7254_vm5, %v4102_v55  ;;  %vm7260_vm5 = vcmp.lt.s32.totalorder %v4780_v12, 127 }
 0xbfa   :  { %vm7261_vm13 = vmmov %vm7260_vm5 }
 0xbfb   :  { %vm7262_vm12 = vmmov %vm7260_vm5 }
 0xbfd   :  { %4323 = vrot.lane.b32.xlu2 %v4312_v36, %s4696_s11 }
 0xc4f   :  { %v4309_v56 = vpop.permute.xlu2 %4308 }
 0xc50   :  { %v4311_v49 = vunpack.i.h.bf16 %v4309_v56  ;;  %v4310_v31 = vunpack.i.l.bf16 %v4309_v56  ;;  %v4101_v56 = vld [vmem:[%s6917_s5 + $0x48] sm:$0xff] }
 0xc57   :  { %v4324_v57 = vpop.permute.xlu2 %4323 }
 0xc58   :  { %v4326_v5 = vunpack.i.h.bf16 %v4324_v57  ;;  %v4325_v53 = vunpack.i.l.bf16 %v4324_v57 }
 0xc66   :  { %v4314_v2 = vpop.permute.xlu0 %4313 }
 0xc67   :  { %v4316_v33 = vunpack.i.h.bf16 %v4314_v2  ;;  %v4315_v13 = vunpack.i.l.bf16 %v4314_v2  ;;  %v4319_v25 = vpop.permute.xlu1 %4318  ;;  %v4103_v2 = vld [vmem:[%s6917_s5 + $0x58] sm:$0xff] }
 0xc68   :  { %v4321_v52 = vunpack.i.h.bf16 %v4319_v25  ;;  %v4320_v20 = vunpack.i.l.bf16 %v4319_v25 }
 0xc69   :  { %v1459_v11 = vsel %vm7256_vm6, %v4310_v31, %v4315_v13  ;;  %v1460_v42 = vsel %vm7257_vm8, %v4311_v49, %v4316_v33  ;;  %v1461_v27 = vsel %vm7258_vm2, %v4315_v13, %v4310_v31  ;;  %v1462_v34 = vsel %vm7259_vm1, %v4316_v33, %v4311_v49  ;;  %vm7263_vm6 = vmmov %vm7260_vm5 }
 0xc6a   :  { %v1471_v24 = vsel %vm7260_vm5, %v4320_v20, %v4325_v53  ;;  %v1472_v44 = vsel %vm7261_vm13, %v4321_v52, %v4326_v5  ;;  %v1473_v23 = vsel %vm7262_vm12, %v4325_v53, %v4320_v20  ;;  %v1474_v18 = vsel %vm7263_vm6, %v4326_v5, %v4321_v52 }
 0xc6b   :  { %vm7265_vm8 = vnez %v7264_v4  ;;  %vm7267_vm2 = vnez %v7266_v40  ;;  %v1479_v36 = vsel %vm7245_vm11, %v1461_v27, %v1471_v24  ;;  %v1481_v48 = vsel %vm7245_vm11, %v1462_v34, %v1472_v44 }
 0xc6c   :  { %v1475_v51 = vsel %vm7265_vm8, %v1471_v24, %v1461_v27  ;;  %v1477_v47 = vsel %vm7265_vm8, %v1472_v44, %v1462_v34  ;;  %v1476_v38 = vsel %vm7267_vm2, %v1473_v23, %v1459_v11  ;;  %v1478_v37 = vsel %vm7267_vm2, %v1474_v18, %v1460_v42 }
 0xc6d   :  { %v1486_v50 = vpack.c.bf16 %v1477_v47, %v1475_v51  ;;  %v1487_v17 = vpack.c.bf16 %v1478_v37, %v1476_v38  ;;  %v1568_v19 = vpack.c.bf16 %v1481_v48, %v1479_v36  ;;  %v1480_v54 = vsel %vm7246_vm14, %v1459_v11, %v1473_v23 }
 0xc6e   :  { %v1482_v55 = vsel %vm7246_vm14, %v1460_v42, %v1474_v18  ;;  %vm7268_vm12 = vcmask 130048  }
 0xc6f   :  { %1544 = vmatpush.bf16.msra.mxu2 %v1486_v50  ;;  %1558 = vmatpush.bf16.msra.mxu3 %v1487_v17  ;;  %v1569_v57 = vpack.c.bf16 %v1482_v55, %v1480_v54  ;;  %vm7269_vm1 = vmmov %vm7268_vm12 }
 0xc70   :  { %1585 = vmatpush.bf16.msrb.mxu0 %v1568_v19  ;;  %vm7270_vm5 = vmmov %vm7269_vm1 }
 0xc71   :  { %1599 = vmatpush.bf16.msrb.mxu1 %v1569_v57  ;;  %vm7271_vm13 = vmmov %vm7269_vm1 }
 0xc72   :  { %3873 = vmatmul.msk.bf16.vlgmr.msra.gmra.mxu2 %vm7268_vm12, %v4101_v56  ;;  %3874 = vmatmul.msk.bf16.vlgmr.msra.gmra.mxu3 %vm7269_vm1, %v4101_v56 }
 0xc73   :  { %3881 = vmatmul.msk.bf16.vlgmr.msrb.gmra.mxu0 %vm7270_vm5, %v4103_v2 }
 0xc74   :  { %3882 = vmatmul.msk.bf16.vlgmr.msrb.gmra.mxu1 %vm7271_vm13, %v4103_v2  ;;  %v1524_v31 = vpop.f32.mrf.mxu1 }
 0xc76   :  { %v1510_v49 = vpop.f32.mrf.mxu0 }
 0xc7c   :  { %v1526_v13 = vpop.f32.mrf.mxu1 }
 0xc7e   :  { %v1512_v33 = vpop.f32.mrf.mxu0 }
 0xcf0   :  { %v1587_v25 = vpop.f32.mrf.mxu0 }
 0xcf1   :  { %v1601_v5 = vpop.f32.mrf.mxu1 }
 0xcf5   :  { %v1546_v53 = vpop.f32.mrf.mxu2  ;;  %v1560_v52 = vpop.f32.mrf.mxu3 }
 0xcf6   :  { %v1547_v20 = vadd.f32 %v1546_v53, %v1510_v49  ;;  %v1561_v11 = vadd.f32 %v1560_v52, %v1524_v31 }
 0xcf8   :  { %v1606_v42 = vadd.f32 %v1587_v25, %v1547_v20  ;;  %v1607_v27 = vadd.f32 %v1601_v5, %v1561_v11  ;;  %v1589_v51 = vpop.f32.mrf.mxu0  ;;  %v3885_v5 = vld [vmem:[%s6916_s4 + $0x40] sm:$0xff] }
 0xcf9   :  { %v1603_v47 = vpop.f32.mrf.mxu1 }
 0xcfa   :  { %v1616_v34 = vadd.f32 %v1607_v27, %v1606_v42 }
 0xcfc   :  { %1617 = vadd.xlane.f32.xlu0 %v1616_v34 }
 0xcfd   :  { %v1548_v24 = vpop.f32.mrf.mxu2  ;;  %v1562_v44 = vpop.f32.mrf.mxu3 }
 0xcfe   :  { %v1549_v23 = vadd.f32 %v1548_v24, %v1512_v33  ;;  %v1563_v18 = vadd.f32 %v1562_v44, %v1526_v13 }
 0xd00   :  { %v1608_v38 = vadd.f32 %v1589_v51, %v1549_v23  ;;  %v1609_v37 = vadd.f32 %v1603_v47, %v1563_v18 }
 0xd02   :  { %v1619_v50 = vadd.f32 %v1609_v37, %v1608_v38 }
 0xd04   :  { %1620 = vadd.xlane.f32.xlu1 %v1619_v50 }
 0xd6f   :  { %v1618_v17 = vpop.xlane.xlu0 %1617 }
 0xd70   :  { %v1622_v36 = vmul.f32 0.00390625, %v1618_v17 }
 0xd72   :  { %v1624_v48 = vsub.f32 %v1606_v42, %v1622_v36  ;;  %v1625_v19 = vsub.f32 %v1607_v27, %v1622_v36 }
 0xd74   :  { %v1628_v54 = vmul.f32 %v1624_v48, %v1624_v48  ;;  %v1629_v55 = vmul.f32 %v1625_v19, %v1625_v19 }
 0xd76   :  { %v1632_v56 = vadd.f32 %v1629_v55, %v1628_v54 }
 0xd77   :  { %v1621_v57 = vpop.xlane.xlu1 %1620 }
 0xd78   :  { %v1623_v2 = vmul.f32 0.00390625, %v1621_v57  ;;  %1633 = vadd.xlane.f32.xlu2 %v1632_v56  ;;  %v3884_v56 = vld [vmem:[%s6915_s3 + $0x48] sm:$0xff] }
 0xd7a   :  { %v1626_v49 = vsub.f32 %v1608_v38, %v1623_v2  ;;  %v1627_v31 = vsub.f32 %v1609_v37, %v1623_v2  ;;  %v3883_v38 = vld [vmem:[%s6915_s3 + $0x40] sm:$0xff]  ;;  %v3886_v2 = vld [vmem:[%s6916_s4 + $0x48] sm:$0xff] }
 0xd7c   :  { %v1630_v33 = vmul.f32 %v1626_v49, %v1626_v49  ;;  %v1631_v13 = vmul.f32 %v1627_v31, %v1627_v31 }
 0xd7e   :  { %v1635_v25 = vadd.f32 %v1631_v13, %v1630_v33 }
 0xd80   :  { %1636 = vadd.xlane.f32.xlu2 %v1635_v25  ;;  %v3890_v25 = vld [vmem:[%s6919_s7 + $0x38] sm:$0xff] }
 0xd98   :  { %1680 = vperm.xlu2 %4144, %v3885_v5   ;;  %v3889_v5 = vld [vmem:[%s6919_s7 + $0x30] sm:$0xff] }
 0xdeb   :  { %v1634_v53 = vpop.xlane.xlu2 %1633 }
 0xdec   :  { %v1638_v52 = vmul.f32 0.00390625, %v1634_v53 }
 0xdee   :  { %v1640_v20 = vadd.f32 1e-05, %v1638_v52 }
 0xdf0   :  { %4643 = vrsqrt.f32 %v1640_v20  ;;  %vm1648_vm12 = vweird.f32 %v1640_v20 }
 0xdf3   :  { %v1637_v11 = vpop.xlane.xlu2 %1636 }
 0xdf4   :  { %v1639_v42 = vmul.f32 0.00390625, %v1637_v11 }
 0xdf6   :  { %v4644_v27 = vpop.eup %4643  ;;  %v1641_v34 = vadd.f32 1e-05, %v1639_v42 }
 0xdf7   :  { %v1643_v24 = vmul.f32 %v4644_v27, %v1640_v20  ;;  %vm1649_vm6 = vweird.f32 %v4644_v27 }
 0xdf8   :  { %4645 = vrsqrt.f32 %v1641_v34  ;;  %vm1650_vm1 = vmor %vm1648_vm12, %vm1649_vm6  ;;  %vm1658_vm13 = vweird.f32 %v1641_v34 }
 0xdf9   :  { %v1644_v44 = vmul.f32 %v4644_v27, %v1643_v24 }
 0xdfb   :  { %v1645_v23 = vmul.f32 0.5, %v1644_v44  ;;  %v1681_v11 = vpop.permute.xlu2 %1680 }
 0xdfd   :  { %v1646_v18 = vsub.f32 1.5, %v1645_v23 }
 0xdfe   :  { %v4646_v51 = vpop.eup %4645 }
 0xdff   :  { %v1653_v47 = vmul.f32 %v4646_v51, %v1641_v34  ;;  %v1647_v37 = vmul.f32 %v4644_v27, %v1646_v18  ;;  %vm1659_vm5 = vweird.f32 %v4646_v51 }
 0xe00   :  { %vm1660_vm3 = vmor %vm1658_vm13, %vm1659_vm5  ;;  %vm7276_vm5 = vcmp.lt.s32.totalorder %v4780_v12, 3 }
 0xe01   :  { %v1654_v50 = vmul.f32 %v4646_v51, %v1653_v47  ;;  %v1651_v17 = vsel %vm1650_vm1, %v4644_v27, %v1647_v37  ;;  %vm7277_vm13 = vmmov %vm7276_vm5 }
 0xe02   :  { %v1662_v36 = vmul.f32 %v3883_v38, %v1651_v17 }
 0xe03   :  { %v1655_v54 = vmul.f32 0.5, %v1654_v50 }
 0xe04   :  { %1666 = vperm.xlu0 %4145, %v1662_v36  }
 0xe05   :  { %v1656_v55 = vsub.f32 1.5, %v1655_v54 }
 0xe07   :  { %v1657_v57 = vmul.f32 %v4646_v51, %v1656_v55 }
 0xe09   :  { %v1661_v33 = vsel %vm1660_vm3, %v4646_v51, %v1657_v57  ;;  %vm7272_vm3 = vcmask 130048  }
 0xe0a   :  { %v1663_v13 = vmul.f32 %v3884_v56, %v1661_v33  ;;  %vm7273_vm6 = vmmov %vm7272_vm3 }
 0xe0b   :  { %vm7274_vm12 = vmmov %vm7272_vm3 }
 0xe0c   :  { %1685 = vperm.xlu0 %4145, %v3886_v2   ;;  %1671 = vperm.xlu1 %4146, %v1663_v13   ;;  %vm7275_vm1 = vmmov %vm7272_vm3 }
 0xe14   :  { %1715 = vperm.xlu0 %4145, %v3890_v25   ;;  %1710 = vperm.xlu1 %4146, %v3889_v5  }
 0xe76   :  { %v1667_v53 = vpop.permute.xlu0 %1666 }
 0xe77   :  { %v1674_v52 = vmul.f32 %v1667_v53, %v1624_v48  ;;  %v1675_v20 = vmul.f32 %v1667_v53, %v1625_v19  ;;  %v4104_v19 = vld [vmem:[%s6918_s6 + $0x18] sm:$0xff] }
 0xe79   :  { %v1688_v42 = vadd.f32 %v1681_v11, %v1674_v52  ;;  %v1689_v27 = vadd.f32 %v1681_v11, %v1675_v20 }
 0xe7b   :  { %v1692_v18 = vmul.f32 0.2, %v1688_v42  ;;  %v1693_v51 = vmul.f32 0.2, %v1689_v27 }
 0xe7d   :  { %v1696_v17 = vmax.f32 %v1688_v42, %v1692_v18  ;;  %v1697_v36 = vmax.f32 %v1689_v27, %v1693_v51 }
 0xe7e   :  { %v1672_v34 = vpop.permute.xlu1 %1671  ;;  %v1686_v23 = vpop.permute.xlu0 %1685 }
 0xe7f   :  { %v1676_v24 = vmul.f32 %v1672_v34, %v1626_v49  ;;  %v1677_v44 = vmul.f32 %v1672_v34, %v1627_v31 }
 0xe81   :  { %v1690_v47 = vadd.f32 %v1686_v23, %v1676_v24  ;;  %v1691_v38 = vadd.f32 %v1686_v23, %v1677_v44 }
 0xe83   :  { %v1694_v37 = vmul.f32 0.2, %v1690_v47  ;;  %v1695_v50 = vmul.f32 0.2, %v1691_v38 }
 0xe85   :  { %v1698_v54 = vmax.f32 %v1690_v47, %v1694_v37  ;;  %v1699_v55 = vmax.f32 %v1691_v38, %v1695_v50 }
 0xe86   :  { %v1711_v57 = vpop.permute.xlu1 %1710  ;;  %v1716_v2 = vpop.permute.xlu0 %1715 }
 0xe87   :  { %v1703_v56 = vpack.c.bf16 %v1698_v54, %v1696_v17  ;;  %v1704_v48 = vpack.c.bf16 %v1699_v55, %v1697_v36 }
 0xe89   :  { %1733 = vmatpush.bf16.msrb.mxu2 %v1703_v56  ;;  %1747 = vmatpush.bf16.msrb.mxu3 %v1704_v48 }
 0xe8c   :  { %3895 = vmatmul.msk.bf16.vlgmr.msrb.gmra.mxu2 %vm7272_vm3, %v4104_v19  ;;  %3896 = vmatmul.msk.bf16.vlgmr.msrb.gmra.mxu3 %vm7273_vm6, %v4104_v19  ;;  %vm7278_vm3 = vmmov %vm7276_vm5 }
 0xe8d   :  { %vm7279_vm6 = vmmov %vm7278_vm3 }
 0xf0f   :  { %v1735_v49 = vpop.f32.mrf.mxu2  ;;  %v1749_v31 = vpop.f32.mrf.mxu3 }
 0xf10   :  { %v1736_v33 = vadd.f32 %v1735_v49, %v1711_v57  ;;  %v1750_v13 = vadd.f32 %v1749_v31, %v1711_v57 }
 0xf12   :  { %v5829_v20 = vadd.f32 %v1736_v33, %v5735_v61  ;;  %v5832_v11 = vadd.f32 %v1750_v13, %v5738_v58  ;;  %v4106_v58 = vld [vmem:[%s6917_s5 + $0x68] sm:$0xff] }
 0xf17   :  { %v1737_v25 = vpop.f32.mrf.mxu2  ;;  %v1751_v5 = vpop.f32.mrf.mxu3 }
 0xf18   :  { %v1738_v53 = vadd.f32 %v1737_v25, %v1716_v2  ;;  %v1752_v52 = vadd.f32 %v1751_v5, %v1716_v2 }
 0xf1a   :  { %v5835_v42 = vadd.f32 %v1738_v53, %v5741_v63  ;;  %v5838_v27 = vadd.f32 %v1752_v52, %v5744_v10 }
 0xf1c   :  { %v4332_v34 = vpack.i.bf16 %v5838_v27, %v5832_v11  ;;  %v1839_v24 = vpack.c.bf16 %v5838_v27, %v5832_v11  ;;  %v4337_v44 = vpack.i.bf16 %v5835_v42, %v5829_v20  ;;  %v1838_v61 = vpack.c.bf16 %v5835_v42, %v5829_v20 }
 0xf1e   :  { %4333 = vrot.lane.b32.xlu1 %v4332_v34, %s4699_s24  ;;  %1869 = vmatpush.bf16.msra.mxu1 %v1839_v24 }
 0xf1f   :  { %4338 = vrot.lane.b32.xlu0 %v4337_v44, %s4700_s25  ;;  %4328 = vrot.lane.b32.xlu2 %v4337_v44, %s4699_s24 }
 0xf20   :  { %1855 = vmatpush.bf16.msra.mxu0 %v1838_v61 }
 0xf21   :  { %3906 = vmatmul.msk.bf16.vlgmr.msra.gmra.mxu1 %vm7275_vm1, %v4106_v58 }
 0xf23   :  { %3905 = vmatmul.msk.bf16.vlgmr.msra.gmra.mxu0 %vm7274_vm12, %v4106_v58  ;;  %vm7280_vm12 = vcmp.lt.s32.totalorder %v4780_v12, 125 }
 0xf24   :  { %vm7281_vm1 = vmmov %vm7280_vm12 }
 0xf25   :  { %vm7282_vm10 = vmmov %vm7281_vm1 }
 0xf26   :  { %4348 = vrot.lane.b32.xlu1 %v4337_v44, %s4696_s11 }
 0xf27   :  { %4353 = vrot.lane.b32.xlu0 %v4332_v34, %s4696_s11  ;;  %4343 = vrot.lane.b32.xlu2 %v4332_v34, %s4700_s25 }
 0xf2e   :  { %4363 = vrot.lane.b32.xlu1 %v4332_v34, %s4697_s12 }
 0xf2f   :  { %4358 = vrot.lane.b32.xlu2 %v4337_v44, %s4697_s12 }
 0xf79   :  { %v4329_v63 = vpop.permute.xlu2 %4328 }
 0xf7a   :  { %v4331_v50 = vunpack.i.h.bf16 %v4329_v63  ;;  %v4330_v17 = vunpack.i.l.bf16 %v4329_v63 }
 0xf81   :  { %v4344_v18 = vpop.permute.xlu2 %4343 }
 0xf82   :  { %v4345_v56 = vunpack.i.l.bf16 %v4344_v18  ;;  %v4346_v31 = vunpack.i.h.bf16 %v4344_v18 }
 0xf89   :  { %v4359_v33 = vpop.permute.xlu2 %4358 }
 0xf8a   :  { %v4361_v63 = vunpack.i.h.bf16 %v4359_v33 }
 0xf90   :  { %v4334_v10 = vpop.permute.xlu1 %4333 }
 0xf91   :  { %v4339_v23 = vpop.permute.xlu0 %4338  ;;  %v4336_v51 = vunpack.i.h.bf16 %v4334_v10  ;;  %v4335_v47 = vunpack.i.l.bf16 %v4334_v10  ;;  %v4360_v10 = vunpack.i.l.bf16 %v4359_v33 }
 0xf92   :  { %v4340_v38 = vunpack.i.l.bf16 %v4339_v23  ;;  %v4341_v36 = vunpack.i.h.bf16 %v4339_v23 }
 0xf93   :  { %v1766_v57 = vsel %vm7276_vm5, %v4330_v17, %v4335_v47  ;;  %v1767_v2 = vsel %vm7277_vm13, %v4331_v50, %v4336_v51  ;;  %v1768_v13 = vsel %vm7278_vm3, %v4335_v47, %v4330_v17  ;;  %v1769_v25 = vsel %vm7279_vm6, %v4336_v51, %v4331_v50  ;;  %vm7283_vm5 = vmmov %vm7281_vm1 }
 0xf94   :  { %v1778_v5 = vsel %vm7280_vm12, %v4340_v38, %v4345_v56  ;;  %v1780_v53 = vsel %vm7281_vm1, %v4345_v56, %v4340_v38  ;;  %v1779_v52 = vsel %vm7282_vm10, %v4341_v36, %v4346_v31  ;;  %v1781_v34 = vsel %vm7283_vm5, %v4346_v31, %v4341_v36  ;;  %v7288_v56 = vld [vmem:[#allocation9_spill] sm:$0xff] }
 0xf95   :  { %vm7284_vm13 = vcmp.lt.s32.totalorder %v4780_v12, 127  ;;  %v1782_v23 = vsel %vm7265_vm8, %v1778_v5, %v1768_v13  ;;  %v1783_v18 = vsel %vm7267_vm2, %v1780_v53, %v1766_v57  ;;  %v1784_v51 = vsel %vm7265_vm8, %v1779_v52, %v1769_v25 }
 0xf96   :  { %vm7285_vm3 = vmmov %vm7284_vm13  ;;  %v1785_v47 = vsel %vm7267_vm2, %v1781_v34, %v1767_v2  ;;  %vm7289_vm10 = vnez %v7288_v56  ;;  %vm7292_vm5 = vcmp.lt.s32.totalorder %v4780_v12, 1  ;;  %v7474_v56 = vld [vmem:[#allocation16_spill] sm:$0xff] }
 0xf97   :  { %vm7286_vm6 = vmmov %vm7285_vm3 }
 0xf98   :  { %v4349_v37 = vpop.permute.xlu1 %4348  ;;  %vm7287_vm12 = vmmov %vm7285_vm3 }
 0xf99   :  { %v4350_v54 = vunpack.i.l.bf16 %v4349_v37  ;;  %v4354_v55 = vpop.permute.xlu0 %4353  ;;  %v4351_v48 = vunpack.i.h.bf16 %v4349_v37 }
 0xf9a   :  { %v4356_v19 = vunpack.i.h.bf16 %v4354_v55  ;;  %v4355_v49 = vunpack.i.l.bf16 %v4354_v55 }
 0xf9c   :  { %v1794_v24 = vsel %vm7284_vm13, %v4350_v54, %v4355_v49  ;;  %v1796_v44 = vsel %vm7285_vm3, %v4355_v49, %v4350_v54  ;;  %v1795_v61 = vsel %vm7286_vm6, %v4351_v48, %v4356_v19  ;;  %v1797_v58 = vsel %vm7287_vm12, %v4356_v19, %v4351_v48  ;;  %v7290_v19 = vld [vmem:[#allocation10_spill] sm:$0xff]  ;;  %vm7293_vm13 = vmmov %vm7292_vm5 }
 0xf9d   :  { %v1798_v38 = vsel %vm7237_vm4, %v1794_v24, %v1778_v5  ;;  %v1799_v37 = vsel %vm7238_vm9, %v1796_v44, %v1780_v53  ;;  %v1800_v17 = vsel %vm7237_vm4, %v1795_v61, %v1779_v52  ;;  %v1801_v36 = vsel %vm7238_vm9, %v1797_v58, %v1781_v34  ;;  %vm7294_vm3 = vmmov %vm7292_vm5 }
 0xf9e   :  { %v1802_v48 = vsel %vm7289_vm10, %v1794_v24, %v1782_v23  ;;  %vm7291_vm1 = vnez %v7290_v19  ;;  %v1804_v31 = vsel %vm7289_vm10, %v1795_v61, %v1784_v51  ;;  %vm7295_vm6 = vmmov %vm7294_vm3  ;;  %v7296_v23 = vld [vmem:[#allocation11_spill] sm:$0xff]  ;;  %v7298_v51 = vld [vmem:[#allocation12_spill] sm:$0xff] }
 0xf9f   :  { %v1803_v49 = vsel %vm7291_vm1, %v1796_v44, %v1783_v18  ;;  %v1805_v33 = vsel %vm7291_vm1, %v1797_v58, %v1785_v47  ;;  %vm7297_vm12 = vnez %v7296_v23 }
 0xfa0   :  { %v4364_v50 = vpop.permute.xlu1 %4363 }
 0xfa1   :  { %v4366_v54 = vunpack.i.h.bf16 %v4364_v50  ;;  %v4365_v55 = vunpack.i.l.bf16 %v4364_v50 }
 0xfa3   :  { %v1814_v5 = vsel %vm7292_vm5, %v4360_v10, %v4365_v55  ;;  %v1815_v53 = vsel %vm7293_vm13, %v4361_v63, %v4366_v54  ;;  %v1816_v52 = vsel %vm7294_vm3, %v4365_v55, %v4360_v10  ;;  %v1817_v34 = vsel %vm7295_vm6, %v4366_v54, %v4361_v63 }
 0xfa4   :  { %v1818_v24 = vsel %vm7243_vm0, %v1816_v52, %v1798_v38  ;;  %v1819_v44 = vsel %vm7244_vm7, %v1814_v5, %v1799_v37  ;;  %v1820_v61 = vsel %vm7243_vm0, %v1817_v34, %v1800_v17  ;;  %v1821_v58 = vsel %vm7244_vm7, %v1815_v53, %v1801_v36 }
 0xfa5   :  { %v1822_v18 = vsel %vm7297_vm12, %v1816_v52, %v1802_v48  ;;  %v1824_v10 = vsel %vm7297_vm12, %v1817_v34, %v1804_v31  ;;  %vm7299_vm5 = vnez %v7298_v51  ;;  %v1826_v50 = vsel %vm7245_vm11, %v1768_v13, %v1818_v24  ;;  %v4105_v48 = vld [vmem:[%s6917_s5 + $0x60] sm:$0xff]  ;;  %v4107_v13 = vld [vmem:[%s6917_s5 + $0x70] sm:$0xff] }
 0xfa6   :  { %v1823_v63 = vsel %vm7299_vm5, %v1814_v5, %v1803_v49  ;;  %v1825_v47 = vsel %vm7299_vm5, %v1815_v53, %v1805_v33  ;;  %v1833_v38 = vpack.c.bf16 %v1824_v10, %v1822_v18  ;;  %v1828_v17 = vsel %vm7245_vm11, %v1769_v25, %v1820_v61 }
 0xfa7   :  { %v1834_v37 = vpack.c.bf16 %v1825_v47, %v1823_v63  ;;  %v1915_v36 = vpack.c.bf16 %v1828_v17, %v1826_v50  ;;  %v1827_v54 = vsel %vm7246_vm14, %v1766_v57, %v1819_v44  ;;  %v1829_v55 = vsel %vm7246_vm14, %v1767_v2, %v1821_v58  ;;  %v1857_v57 = vpop.f32.mrf.mxu0  ;;  %v1871_v2 = vpop.f32.mrf.mxu1 }
 0xfa8   :  { %1891 = vmatpush.bf16.msra.mxu2 %v1833_v38  ;;  %v1916_v49 = vpack.c.bf16 %v1829_v55, %v1827_v54  ;;  %vm7300_vm13 = vcmask 130048  }
 0xfa9   :  { %1905 = vmatpush.bf16.msra.mxu3 %v1834_v37  ;;  %1932 = vmatpush.bf16.msrb.mxu0 %v1915_v36  ;;  %vm7301_vm3 = vmmov %vm7300_vm13 }
 0xfaa   :  { %1946 = vmatpush.bf16.msrb.mxu1 %v1916_v49  ;;  %vm7302_vm6 = vmmov %vm7301_vm3 }
 0xfab   :  { %3911 = vmatmul.msk.bf16.vlgmr.msra.gmra.mxu2 %vm7300_vm13, %v4105_v48  ;;  %vm7303_vm14 = vmmov %vm7301_vm3 }
 0xfac   :  { %3912 = vmatmul.msk.bf16.vlgmr.msra.gmra.mxu3 %vm7301_vm3, %v4105_v48  ;;  %3919 = vmatmul.msk.bf16.vlgmr.msrb.gmra.mxu0 %vm7302_vm6, %v4107_v13 }
 0xfad   :  { %3920 = vmatmul.msk.bf16.vlgmr.msrb.gmra.mxu1 %vm7303_vm14, %v4107_v13 }
 0xfaf   :  { %v1859_v25 = vpop.f32.mrf.mxu0  ;;  %v1873_v31 = vpop.f32.mrf.mxu1 }
0x1029   :  { %v1934_v33 = vpop.f32.mrf.mxu0 }
0x102a   :  { %v1948_v5 = vpop.f32.mrf.mxu1 }
0x102e   :  { %v1893_v53 = vpop.f32.mrf.mxu2 }
0x102f   :  { %v1907_v52 = vpop.f32.mrf.mxu3  ;;  %v1894_v34 = vadd.f32 %v1893_v53, %v1857_v57 }
0x1030   :  { %v1908_v24 = vadd.f32 %v1907_v52, %v1871_v2 }
0x1031   :  { %v1953_v44 = vadd.f32 %v1934_v33, %v1894_v34  ;;  %v1936_v38 = vpop.f32.mrf.mxu0 }
0x1032   :  { %v1954_v61 = vadd.f32 %v1948_v5, %v1908_v24  ;;  %v1950_v37 = vpop.f32.mrf.mxu1  ;;  %v3923_v24 = vld [vmem:[%s6916_s4 + $0x50] sm:$0xff] }
0x1034   :  { %v1963_v58 = vadd.f32 %v1954_v61, %v1953_v44 }
0x1036   :  { %1964 = vadd.xlane.f32.xlu0 %v1963_v58  ;;  %v1895_v18 = vpop.f32.mrf.mxu2 }
0x1037   :  { %v1909_v10 = vpop.f32.mrf.mxu3  ;;  %v1896_v63 = vadd.f32 %v1895_v18, %v1859_v25 }
0x1038   :  { %v1910_v47 = vadd.f32 %v1909_v10, %v1873_v31 }
0x1039   :  { %v1955_v50 = vadd.f32 %v1936_v38, %v1896_v63 }
0x103a   :  { %v1956_v17 = vadd.f32 %v1950_v37, %v1910_v47 }
0x103c   :  { %v1966_v36 = vadd.f32 %v1956_v17, %v1955_v50 }
0x103e   :  { %1967 = vadd.xlane.f32.xlu2 %v1966_v36 }
0x10a9   :  { %v1965_v54 = vpop.xlane.xlu0 %1964 }
0x10aa   :  { %v1969_v55 = vmul.f32 0.00390625, %v1965_v54 }
0x10ac   :  { %v1971_v48 = vsub.f32 %v1953_v44, %v1969_v55  ;;  %v1972_v49 = vsub.f32 %v1954_v61, %v1969_v55  ;;  %v3927_v44 = vld [vmem:[%s6919_s7 + $0x40] sm:$0xff] }
0x10ae   :  { %v1975_v13 = vmul.f32 %v1971_v48, %v1971_v48  ;;  %v1976_v57 = vmul.f32 %v1972_v49, %v1972_v49 }
0x10b0   :  { %v1979_v2 = vadd.f32 %v1976_v57, %v1975_v13  ;;  %v3921_v13 = vld [vmem:[%s6915_s3 + $0x50] sm:$0xff] }
0x10b1   :  { %v1968_v33 = vpop.xlane.xlu2 %1967 }
0x10b2   :  { %v1970_v5 = vmul.f32 0.00390625, %v1968_v33  ;;  %1980 = vadd.xlane.f32.xlu1 %v1979_v2 }
0x10b4   :  { %v1973_v53 = vsub.f32 %v1955_v50, %v1970_v5  ;;  %v1974_v52 = vsub.f32 %v1956_v17, %v1970_v5 }
0x10b6   :  { %v1977_v25 = vmul.f32 %v1973_v53, %v1973_v53  ;;  %v1978_v31 = vmul.f32 %v1974_v52, %v1974_v52 }
0x10b8   :  { %v1982_v34 = vadd.f32 %v1978_v31, %v1977_v25 }
0x10ba   :  { %1983 = vadd.xlane.f32.xlu0 %v1982_v34  ;;  %v3922_v34 = vld [vmem:[%s6915_s3 + $0x58] sm:$0xff] }
0x10ce   :  { %2027 = vperm.xlu0 %4145, %v3923_v24  }
0x10d6   :  { %2057 = vperm.xlu0 %4145, %v3927_v44   ;;  %v3924_v44 = vld [vmem:[%s6916_s4 + $0x58] sm:$0xff] }
0x1125   :  { %v1981_v61 = vpop.xlane.xlu1 %1980 }
0x1126   :  { %v1985_v58 = vmul.f32 0.00390625, %v1981_v61 }
0x1128   :  { %v1987_v18 = vadd.f32 1e-05, %v1985_v58 }
0x112a   :  { %4647 = vrsqrt.f32 %v1987_v18  ;;  %vm1995_vm13 = vweird.f32 %v1987_v18 }
0x112d   :  { %v1984_v10 = vpop.xlane.xlu0 %1983 }
0x112e   :  { %v1986_v63 = vmul.f32 0.00390625, %v1984_v10 }
0x1130   :  { %v4648_v47 = vpop.eup %4647  ;;  %v1988_v38 = vadd.f32 1e-05, %v1986_v63 }
0x1131   :  { %v1990_v37 = vmul.f32 %v4648_v47, %v1987_v18  ;;  %vm1996_vm14 = vweird.f32 %v4648_v47  ;;  %v3928_v18 = vld [vmem:[%s6919_s7 + $0x48] sm:$0xff] }
0x1132   :  { %4649 = vrsqrt.f32 %v1988_v38  ;;  %vm1997_vm3 = vmor %vm1995_vm13, %vm1996_vm14  ;;  %vm2005_vm11 = vweird.f32 %v1988_v38 }
0x1133   :  { %v1991_v50 = vmul.f32 %v4648_v47, %v1990_v37 }
0x1135   :  { %v1992_v17 = vmul.f32 0.5, %v1991_v50 }
0x1137   :  { %v1993_v36 = vsub.f32 1.5, %v1992_v17 }
0x1138   :  { %v4650_v54 = vpop.eup %4649 }
0x1139   :  { %v2000_v55 = vmul.f32 %v4650_v54, %v1988_v38  ;;  %v1994_v57 = vmul.f32 %v4648_v47, %v1993_v36  ;;  %vm2006_vm6 = vweird.f32 %v4650_v54 }
0x113a   :  { %vm2007_vm7 = vmor %vm2005_vm11, %vm2006_vm6 }
0x113b   :  { %v2001_v2 = vmul.f32 %v4650_v54, %v2000_v55  ;;  %v1998_v33 = vsel %vm1997_vm3, %v4648_v47, %v1994_v57  ;;  %vm7312_vm3 = vcmp.lt.s32.totalorder %v4780_v12, 9 }
0x113c   :  { %v2009_v5 = vmul.f32 %v3921_v13, %v1998_v33  ;;  %vm7314_vm6 = vmmov %vm7312_vm3 }
0x113d   :  { %v2002_v25 = vmul.f32 0.5, %v2001_v2 }
0x113e   :  { %2013 = vperm.xlu2 %4144, %v2009_v5  }
0x113f   :  { %v2003_v31 = vsub.f32 1.5, %v2002_v25 }
0x1140   :  { %v2028_v38 = vpop.permute.xlu0 %2027 }
0x1141   :  { %v2004_v24 = vmul.f32 %v4650_v54, %v2003_v31 }
0x1143   :  { %v2008_v61 = vsel %vm2007_vm7, %v4650_v54, %v2004_v24  ;;  %vm7304_vm7 = vcmask 130048  }
0x1144   :  { %v2010_v58 = vmul.f32 %v3922_v34, %v2008_v61  ;;  %vm7305_vm11 = vmmov %vm7304_vm7 }
0x1145   :  { %vm7310_vm14 = vmmov %vm7304_vm7 }
0x1146   :  { %2032 = vperm.xlu2 %4144, %v3924_v44   ;;  %2018 = vperm.xlu1 %4146, %v2010_v58   ;;  %vm7311_vm13 = vmmov %vm7304_vm7 }
0x1148   :  { %v2058_v58 = vpop.permute.xlu0 %2057 }
0x114e   :  { %2062 = vperm.xlu1 %4146, %v3928_v18  }
0x1198   :  { %v2014_v10 = vpop.permute.xlu2 %2013 }
0x1199   :  { %v2021_v63 = vmul.f32 %v2014_v10, %v1971_v48  ;;  %v2022_v47 = vmul.f32 %v2014_v10, %v1972_v49  ;;  %v4108_v49 = vld [vmem:[%s6918_s6 + $0x20] sm:$0xff] }
0x119b   :  { %v2035_v37 = vadd.f32 %v2028_v38, %v2021_v63  ;;  %v2036_v50 = vadd.f32 %v2028_v38, %v2022_v47 }
0x119d   :  { %v2039_v57 = vmul.f32 0.2, %v2035_v37  ;;  %v2040_v54 = vmul.f32 0.2, %v2036_v50 }
0x119f   :  { %v2043_v31 = vmax.f32 %v2035_v37, %v2039_v57  ;;  %v2044_v34 = vmax.f32 %v2036_v50, %v2040_v54 }
0x11a0   :  { %v2033_v13 = vpop.permute.xlu2 %2032 }
0x11b8   :  { %v2019_v17 = vpop.permute.xlu1 %2018 }
0x11b9   :  { %v2023_v36 = vmul.f32 %v2019_v17, %v1973_v53  ;;  %v2024_v55 = vmul.f32 %v2019_v17, %v1974_v52 }
0x11bb   :  { %v2037_v2 = vadd.f32 %v2033_v13, %v2023_v36  ;;  %v2038_v33 = vadd.f32 %v2033_v13, %v2024_v55 }
0x11bd   :  { %v2041_v5 = vmul.f32 0.2, %v2037_v2  ;;  %v2042_v25 = vmul.f32 0.2, %v2038_v33 }
0x11bf   :  { %v2045_v24 = vmax.f32 %v2037_v2, %v2041_v5  ;;  %v2046_v44 = vmax.f32 %v2038_v33, %v2042_v25 }
0x11c0   :  { %v2063_v18 = vpop.permute.xlu1 %2062 }
0x11c1   :  { %v2050_v61 = vpack.c.bf16 %v2045_v24, %v2043_v31  ;;  %v2051_v48 = vpack.c.bf16 %v2046_v44, %v2044_v34  ;;  %v4110_v24 = vld [vmem:[%s6917_s5 + $0x80] sm:$0xff] }
0x11c3   :  { %2080 = vmatpush.bf16.msrb.mxu2 %v2050_v61  ;;  %2094 = vmatpush.bf16.msrb.mxu3 %v2051_v48 }
0x11c6   :  { %3933 = vmatmul.msk.bf16.vlgmr.msrb.gmra.mxu2 %vm7304_vm7, %v4108_v49  ;;  %3934 = vmatmul.msk.bf16.vlgmr.msrb.gmra.mxu3 %vm7305_vm11, %v4108_v49  ;;  %vm7316_vm7 = vcmp.lt.s32.totalorder %v4780_v12, 119 }
0x11c7   :  { %vm7317_vm11 = vmmov %vm7316_vm7 }
0x1249   :  { %v2082_v53 = vpop.f32.mrf.mxu2  ;;  %v2096_v52 = vpop.f32.mrf.mxu3 }
0x124a   :  { %v2083_v10 = vadd.f32 %v2082_v53, %v2058_v58  ;;  %v2097_v63 = vadd.f32 %v2096_v52, %v2058_v58 }
0x124c   :  { %v5975_v17 = vadd.f32 %v2083_v10, %v5829_v20  ;;  %v5978_v36 = vadd.f32 %v2097_v63, %v5832_v11 }
0x124e   :  { %7306 = vst [vmem:[#allocation13_spill] sm:$0xff] %v5975_v17 }
0x124f   :  { %7307 = vst [vmem:[#allocation9_spill] sm:$0xff] %v5978_v36 }
0x1251   :  { %v2084_v47 = vpop.f32.mrf.mxu2  ;;  %v2098_v38 = vpop.f32.mrf.mxu3 }
0x1252   :  { %v2085_v37 = vadd.f32 %v2084_v47, %v2063_v18  ;;  %v2099_v50 = vadd.f32 %v2098_v38, %v2063_v18 }
0x1254   :  { %v5981_v55 = vadd.f32 %v2085_v37, %v5835_v42  ;;  %v5984_v13 = vadd.f32 %v2099_v50, %v5838_v27 }
0x1256   :  { %7308 = vst [vmem:[#allocation10_spill] sm:$0xff] %v5981_v55  ;;  %v4372_v57 = vpack.i.bf16 %v5984_v13, %v5978_v36  ;;  %v2306_v54 = vpack.c.bf16 %v5984_v13, %v5978_v36  ;;  %v4377_v2 = vpack.i.bf16 %v5981_v55, %v5975_v17  ;;  %v2305_v20 = vpack.c.bf16 %v5981_v55, %v5975_v17 }
0x1257   :  { %7309 = vst [vmem:[#allocation11_spill] sm:$0xff] %v5984_v13 }
0x1258   :  { %4373 = vrot.lane.b32.xlu0 %v4372_v57, %s4701_s27  ;;  %2336 = vmatpush.bf16.msra.mxu1 %v2306_v54 }
0x1259   :  { %4378 = vrot.lane.b32.xlu1 %v4377_v2, %s4702_s28  ;;  %4368 = vrot.lane.b32.xlu2 %v4377_v2, %s4701_s27 }
0x125a   :  { %2322 = vmatpush.bf16.msra.mxu0 %v2305_v20 }
0x125b   :  { %3944 = vmatmul.msk.bf16.vlgmr.msra.gmra.mxu1 %vm7311_vm13, %v4110_v24  ;;  %vm7320_vm13 = vmmov %vm7316_vm7 }
0x125d   :  { %3943 = vmatmul.msk.bf16.vlgmr.msra.gmra.mxu0 %vm7310_vm14, %v4110_v24  ;;  %vm7318_vm14 = vmmov %vm7312_vm3 }
0x1260   :  { %4388 = vrot.lane.b32.xlu0 %v4377_v2, %s4703_s29 }
0x1261   :  { %4393 = vrot.lane.b32.xlu1 %v4372_v57, %s4703_s29  ;;  %4383 = vrot.lane.b32.xlu2 %v4372_v57, %s4702_s28 }
0x1268   :  { %4403 = vrot.lane.b32.xlu0 %v4372_v57, %s4704_s30 }
0x1269   :  { %4408 = vrot.lane.b32.xlu1 %v4377_v2, %s4700_s25  ;;  %4398 = vrot.lane.b32.xlu2 %v4377_v2, %s4704_s30 }
0x1270   :  { %4418 = vrot.lane.b32.xlu0 %v4377_v2, %s4696_s11 }
0x1271   :  { %4423 = vrot.lane.b32.xlu1 %v4372_v57, %s4696_s11  ;;  %4413 = vrot.lane.b32.xlu2 %v4372_v57, %s4700_s25 }
0x1278   :  { %4433 = vrot.lane.b32.xlu0 %v4372_v57, %s4697_s12 }
0x1279   :  { %4438 = vrot.lane.b32.xlu1 %v4377_v2, %s4699_s24  ;;  %4428 = vrot.lane.b32.xlu2 %v4377_v2, %s4697_s12 }
0x1280   :  { %4448 = vrot.lane.b32.xlu0 %v4377_v2, %s4705_s10 }
0x1281   :  { %4453 = vrot.lane.b32.xlu1 %v4372_v57, %s4705_s10  ;;  %4443 = vrot.lane.b32.xlu2 %v4372_v57, %s4699_s24 }
0x1288   :  { %4463 = vrot.lane.b32.xlu0 %v4372_v57, %s4706_s13 }
0x1289   :  { %4458 = vrot.lane.b32.xlu2 %v4377_v2, %s4706_s13 }
0x12b3   :  { %v4369_v11 = vpop.permute.xlu2 %4368 }
0x12b4   :  { %v4370_v53 = vunpack.i.l.bf16 %v4369_v11  ;;  %v4371_v63 = vunpack.i.h.bf16 %v4369_v11 }
0x12bb   :  { %v4384_v42 = vpop.permute.xlu2 %4383 }
0x12bc   :  { %v4385_v52 = vunpack.i.l.bf16 %v4384_v42  ;;  %v4386_v47 = vunpack.i.h.bf16 %v4384_v42 }
0x12c3   :  { %v6014_v27 = vpop.permute.xlu2 %4398 }
0x12c4   :  { %v4401_v11 = vunpack.i.h.bf16 %v6014_v27  ;;  %v4400_v42 = vunpack.i.l.bf16 %v6014_v27 }
0x12ca   :  { %v4374_v33 = vpop.permute.xlu0 %4373 }
0x12cb   :  { %v4379_v5 = vpop.permute.xlu1 %4378  ;;  %v6016_v25 = vpop.permute.xlu2 %4413  ;;  %v4375_v61 = vunpack.i.l.bf16 %v4374_v33  ;;  %v4376_v58 = vunpack.i.h.bf16 %v4374_v33 }
0x12cc   :  { %v4380_v48 = vunpack.i.l.bf16 %v4379_v5  ;;  %v4381_v18 = vunpack.i.h.bf16 %v4379_v5 }
0x12cd   :  { %v6027_v38 = vsel %vm7312_vm3, %v4370_v53, %v4375_v61  ;;  %v6031_v37 = vsel %vm7314_vm6, %v4375_v61, %v4370_v53  ;;  %v6041_v5 = vsel %vm7318_vm14, %v4376_v58, %v4371_v63  ;;  %v6047_v61 = vsel %vm7312_vm3, %v4371_v63, %v4376_v58  ;;  %vm7322_vm6 = vmmov %vm7316_vm7 }
0x12ce   :  { %7313 = vst [vmem:[#allocation12_spill] sm:$0xff] %v6027_v38  ;;  %v2125_v50 = vsel %vm7316_vm7, %v4380_v48, %v4385_v52  ;;  %v2127_v57 = vsel %vm7317_vm11, %v4385_v52, %v4380_v48  ;;  %v2126_v24 = vsel %vm7320_vm13, %v4381_v18, %v4386_v47  ;;  %v4415_v52 = vunpack.i.l.bf16 %v6016_v25 }
0x12cf   :  { %7315 = vst [vmem:[#allocation19_spill] sm:$0xff] %v6031_v37  ;;  %v2129_v27 = vsel %vm7265_vm8, %v2125_v50, %v6031_v37  ;;  %v2130_v53 = vsel %vm7267_vm2, %v2127_v57, %v6027_v38  ;;  %v2131_v58 = vsel %vm7265_vm8, %v2126_v24, %v6041_v5  ;;  %vm7323_vm7 = vcmp.lt.s32.totalorder %v4780_v12, 121 }
0x12d0   :  { %7319 = vst [vmem:[#allocation20_spill] sm:$0xff] %v6041_v5  ;;  %vm7324_vm11 = vmmov %vm7323_vm7  ;;  %vm7327_vm3 = vcmp.lt.s32.totalorder %v4780_v12, 123 }
0x12d1   :  { %7321 = vst [vmem:[#allocation21_spill] sm:$0xff] %v6047_v61  ;;  %vm7325_vm14 = vmmov %vm7323_vm7 }
0x12d2   :  { %v4389_v31 = vpop.permute.xlu0 %4388  ;;  %vm7326_vm13 = vmmov %vm7323_vm7 }
0x12d3   :  { %v4394_v34 = vpop.permute.xlu1 %4393  ;;  %v6021_v44 = vpop.permute.xlu2 %4428  ;;  %v4391_v54 = vunpack.i.h.bf16 %v4389_v31  ;;  %v4390_v2 = vunpack.i.l.bf16 %v4389_v31  ;;  %v2128_v31 = vsel %vm7322_vm6, %v4386_v47, %v4381_v18  ;;  %vm7328_vm6 = vmmov %vm7327_vm3 }
0x12d4   :  { %v4396_v20 = vunpack.i.h.bf16 %v4394_v34  ;;  %v4395_v33 = vunpack.i.l.bf16 %v4394_v34  ;;  %v4416_v34 = vunpack.i.h.bf16 %v6016_v25  ;;  %v2132_v25 = vsel %vm7267_vm2, %v2128_v31, %v6047_v61  ;;  %v7331_v61 = vld [vmem:[#allocation15_spill] sm:$0xff] }
0x12d5   :  { %v4430_v17 = vunpack.i.l.bf16 %v6021_v44 }
0x12d6   :  { %v2142_v18 = vsel %vm7323_vm7, %v4391_v54, %v4396_v20  ;;  %v2141_v63 = vsel %vm7324_vm11, %v4390_v2, %v4395_v33  ;;  %v2143_v47 = vsel %vm7325_vm14, %v4395_v33, %v4390_v2  ;;  %vm7330_vm7 = vnez %v7329_v15  ;;  %vm7333_vm14 = vmmov %vm7327_vm3 }
0x12d7   :  { %v2145_v40 = vsel %vm7330_vm7, %v2141_v63, %v2125_v50  ;;  %vm7332_vm11 = vnez %v7331_v61  ;;  %v2151_v50 = vsel %vm7289_vm10, %v2142_v18, %v2131_v58  ;;  %v7337_v61 = vld [vmem:[#allocation17_spill] sm:$0xff] }
0x12d8   :  { %v2146_v37 = vsel %vm7332_vm11, %v2143_v47, %v2127_v57 }
0x12da   :  { %v4404_v49 = vpop.permute.xlu0 %4403 }
0x12db   :  { %v4409_v10 = vpop.permute.xlu1 %4408  ;;  %v4405_v48 = vunpack.i.l.bf16 %v4404_v49  ;;  %v4406_v13 = vunpack.i.h.bf16 %v4404_v49  ;;  %v6068_v55 = vpop.permute.xlu2 %4443  ;;  %v2144_v49 = vsel %vm7326_vm13, %v4396_v20, %v4391_v54  ;;  %v2147_v54 = vsel %vm7330_vm7, %v2142_v18, %v2126_v24  ;;  %vm7334_vm13 = vmmov %vm7327_vm3 }
0x12dc   :  { %v4411_v33 = vunpack.i.h.bf16 %v4409_v10  ;;  %v4410_v5 = vunpack.i.l.bf16 %v4409_v10  ;;  %v2148_v4 = vsel %vm7332_vm11, %v2144_v49, %v2128_v31  ;;  %v2150_v10 = vsel %vm7291_vm1, %v2143_v47, %v2130_v53 }
0x12dd   :  { %v2161_v38 = vsel %vm7327_vm3, %v4400_v42, %v4405_v48  ;;  %v2163_v2 = vsel %vm7328_vm6, %v4405_v48, %v4400_v42  ;;  %v2162_v20 = vsel %vm7333_vm14, %v4401_v11, %v4406_v13  ;;  %v2149_v42 = vsel %vm7289_vm10, %v2141_v63, %v2129_v27  ;;  %v7335_v48 = vld [vmem:[#allocation16_spill] sm:$0xff] }
0x12de   :  { %v2152_v57 = vsel %vm7291_vm1, %v2144_v49, %v2132_v25  ;;  %v2164_v24 = vsel %vm7334_vm13, %v4406_v13, %v4401_v11  ;;  %vm7336_vm3 = vnez %v7335_v48  ;;  %vm7338_vm6 = vnez %v7337_v61 }
0x12df   :  { %v2165_v15 = vsel %vm7336_vm3, %v2161_v38, %v2145_v40  ;;  %v2166_v31 = vsel %vm7338_vm6, %v2163_v2, %v2146_v37  ;;  %v2167_v27 = vsel %vm7336_vm3, %v2162_v20, %v2147_v54  ;;  %vm7339_vm14 = vcmp.lt.s32.totalorder %v4780_v12, 125 }
0x12e0   :  { %v2181_v53 = vsel %vm7339_vm14, %v4410_v5, %v4415_v52  ;;  %vm7340_vm11 = vmmov %vm7339_vm14  ;;  %v2168_v40 = vsel %vm7338_vm6, %v2164_v24, %v2148_v4  ;;  %v4446_v25 = vunpack.i.h.bf16 %v6068_v55  ;;  %v4445_v49 = vunpack.i.l.bf16 %v6068_v55 }
0x12e1   :  { %v2182_v58 = vsel %vm7340_vm11, %v4411_v33, %v4416_v34  ;;  %vm7341_vm7 = vmmov %vm7340_vm11  ;;  %v2169_v48 = vsel %vm7297_vm12, %v2161_v38, %v2149_v42  ;;  %v2172_v4 = vsel %vm7299_vm5, %v2164_v24, %v2152_v57  ;;  %vm7344_vm11 = vcmp.lt.s32.totalorder %v4780_v12, 127 }
0x12e2   :  { %v4419_v36 = vpop.permute.xlu0 %4418  ;;  %v2183_v18 = vsel %vm7341_vm7, %v4415_v52, %v4410_v5  ;;  %vm7342_vm13 = vmmov %vm7341_vm7  ;;  %v2170_v5 = vsel %vm7299_vm5, %v2163_v2, %v2150_v10  ;;  %vm7343_vm7 = vnez %v7149_v3  ;;  %v2187_v52 = vsel %vm5336_vm15, %v2182_v58, %v2167_v27 }
0x12e3   :  { %v4424_v16 = vpop.permute.xlu1 %4423  ;;  %v4421_v63 = vunpack.i.h.bf16 %v4419_v36  ;;  %v4420_v13 = vunpack.i.l.bf16 %v4419_v36  ;;  %v2184_v37 = vsel %vm7342_vm13, %v4416_v34, %v4411_v33  ;;  %v2185_v34 = vsel %vm5336_vm15, %v2181_v53, %v2165_v15  ;;  %v6133_v38 = vpop.permute.xlu2 %4458  ;;  %vm7345_vm14 = vmmov %vm7344_vm11 }
0x12e4   :  { %v4426_v11 = vunpack.i.h.bf16 %v4424_v16  ;;  %v4425_v47 = vunpack.i.l.bf16 %v4424_v16  ;;  %v2171_v16 = vsel %vm7297_vm12, %v2162_v20, %v2151_v50  ;;  %v2186_v55 = vsel %vm7343_vm7, %v2183_v18, %v2166_v31  ;;  %vm7346_vm13 = vmmov %vm7344_vm11 }
0x12e5   :  { %v2188_v2 = vsel %vm7343_vm7, %v2184_v37, %v2168_v40  ;;  %vm7347_vm6 = vnez %v7151_v28  ;;  %vm7348_vm15 = vnez %v7153_v0  ;;  %vm7349_vm3 = vmmov %vm7344_vm11  ;;  %v4461_v40 = vunpack.i.h.bf16 %v6133_v38 }
0x12e6   :  { %v2202_v20 = vsel %vm7344_vm11, %v4421_v63, %v4426_v11  ;;  %v2201_v42 = vsel %vm7345_vm14, %v4420_v13, %v4425_v47  ;;  %v2203_v15 = vsel %vm7346_vm13, %v4425_v47, %v4420_v13  ;;  %v2189_v10 = vsel %vm7347_vm6, %v2181_v53, %v2169_v48 }
0x12e7   :  { %v2190_v50 = vsel %vm7348_vm15, %v2183_v18, %v2170_v5  ;;  %v2204_v57 = vsel %vm7349_vm3, %v4426_v11, %v4421_v63  ;;  %v2191_v31 = vsel %vm7347_vm6, %v2182_v58, %v2171_v16  ;;  %v2192_v27 = vsel %vm7348_vm15, %v2184_v37, %v2172_v4 }
0x12e8   :  { %v4460_v13 = vunpack.i.l.bf16 %v6133_v38  ;;  %vm7350_vm11 = vnez %v7160_v7  ;;  %vm7351_vm14 = vnez %v7165_v21  ;;  %vm7352_vm3 = vcmp.lt.s32.totalorder %v4780_v12, 1 }
0x12e9   :  { %v2205_v48 = vsel %vm7350_vm11, %v2201_v42, %v2185_v34  ;;  %v2206_v53 = vsel %vm7351_vm14, %v2203_v15, %v2186_v55  ;;  %v2207_v18 = vsel %vm7350_vm11, %v2202_v20, %v2187_v52  ;;  %v2208_v58 = vsel %vm7351_vm14, %v2204_v57, %v2188_v2  ;;  %vm7354_vm15 = vmmov %vm7352_vm3 }
0x12ea   :  { %v4434_v54 = vpop.permute.xlu0 %4433  ;;  %vm7353_vm13 = vnez %v7168_v8  ;;  %vm7355_vm6 = vnez %v7170_v59  ;;  %v7356_v5 = vunpack.i.h.bf16 %v6021_v44  ;;  %vm7357_vm11 = vmmov %vm7352_vm3  ;;  %vm7364_vm14 = vnez %v7189_v22 }
0x12eb   :  { %v4439_v36 = vpop.permute.xlu1 %4438  ;;  %v4435_v33 = vunpack.i.l.bf16 %v4434_v54  ;;  %v4436_v24 = vunpack.i.h.bf16 %v4434_v54  ;;  %v2209_v11 = vsel %vm7353_vm13, %v2201_v42, %v2189_v10  ;;  %v2210_v54 = vsel %vm7355_vm6, %v2203_v15, %v2190_v50 }
0x12ec   :  { %v4440_v37 = vunpack.i.l.bf16 %v4439_v36  ;;  %v7358_v4 = vmov %v7356_v5  ;;  %v4441_v55 = vunpack.i.h.bf16 %v4439_v36  ;;  %v2211_v38 = vsel %vm7353_vm13, %v2202_v20, %v2191_v31 }
0x12ed   :  { %v2223_v63 = vsel %vm7352_vm3, %v4435_v33, %v4430_v17  ;;  %v2221_v47 = vsel %vm7354_vm15, %v4430_v17, %v4435_v33  ;;  %v2222_v16 = vsel %vm7357_vm11, %v7356_v5, %v4436_v24  ;;  %v2224_v34 = vsel %vm7352_vm3, %v4436_v24, %v7358_v4 }
0x12ee   :  { %v2212_v17 = vsel %vm7355_vm6, %v2204_v57, %v2192_v27  ;;  %vm7359_vm15 = vnez %v7173_v1  ;;  %vm7360_vm11 = vnez %v7176_v45  ;;  %vm7361_vm3 = vcmp.lt.s32.totalorder %v4780_v12, 3 }
0x12ef   :  { %v2225_v33 = vsel %vm7359_vm15, %v2223_v63, %v2205_v48  ;;  %v2226_v15 = vsel %vm7360_vm11, %v2221_v47, %v2206_v53  ;;  %v2227_v36 = vsel %vm7359_vm15, %v2224_v34, %v2207_v18  ;;  %v2228_v20 = vsel %vm7360_vm11, %v2222_v16, %v2208_v58  ;;  %vm7362_vm6 = vmmov %vm7361_vm3 }
0x12f0   :  { %v2241_v57 = vsel %vm7361_vm3, %v4440_v37, %v4445_v49  ;;  %v2243_v24 = vsel %vm7362_vm6, %v4445_v49, %v4440_v37  ;;  %vm7363_vm13 = vnez %v7186_v35  ;;  %v2230_v27 = vsel %vm7364_vm14, %v2221_v47, %v2210_v54  ;;  %vm7365_vm7 = vmmov %vm7361_vm3 }
0x12f1   :  { %v2229_v31 = vsel %vm7363_vm13, %v2223_v63, %v2209_v11  ;;  %v2242_v48 = vsel %vm7365_vm7, %v4441_v55, %v4446_v25  ;;  %vm7366_vm15 = vmmov %vm7361_vm3  ;;  %v2231_v18 = vsel %vm7363_vm13, %v2224_v34, %v2211_v38  ;;  %v2232_v58 = vsel %vm7364_vm14, %v2222_v16, %v2212_v17 }
0x12f2   :  { %v4449_v52 = vpop.permute.xlu0 %4448  ;;  %v2244_v53 = vsel %vm7366_vm15, %v4446_v25, %v4441_v55  ;;  %vm7367_vm6 = vcmp.lt.s32.totalorder %v4780_v12, 5  ;;  %vm7369_vm11 = vnez %v7200_v46  ;;  %vm7370_vm7 = vnez %v7202_v26 }
0x12f3   :  { %v4450_v2 = vunpack.i.l.bf16 %v4449_v52  ;;  %v4454_v42 = vpop.permute.xlu1 %4453  ;;  %v4451_v44 = vunpack.i.h.bf16 %v4449_v52  ;;  %vm7368_vm3 = vmmov %vm7367_vm6  ;;  %v2245_v11 = vsel %vm7369_vm11, %v2243_v24, %v2225_v33  ;;  %v2246_v47 = vsel %vm7370_vm7, %v2241_v57, %v2226_v15 }
0x12f4   :  { %v4456_v10 = vunpack.i.h.bf16 %v4454_v42  ;;  %v4455_v50 = vunpack.i.l.bf16 %v4454_v42  ;;  %vm7371_vm15 = vmmov %vm7368_vm3  ;;  %v2247_v54 = vsel %vm7369_vm11, %v2244_v53, %v2227_v36  ;;  %v2248_v5 = vsel %vm7370_vm7, %v2242_v48, %v2228_v20 }
0x12f5   :  { %vm7372_vm13 = vmmov %vm7368_vm3 }
0x12f6   :  { %v2261_v49 = vsel %vm7367_vm6, %v4450_v2, %v4455_v50  ;;  %v2263_v63 = vsel %vm7368_vm3, %v4455_v50, %v4450_v2  ;;  %v2262_v25 = vsel %vm7371_vm15, %v4451_v44, %v4456_v10  ;;  %v2264_v37 = vsel %vm7372_vm13, %v4456_v10, %v4451_v44 }
0x12f7   :  { %vm7373_vm6 = vnez %v7205_v39  ;;  %vm7374_vm3 = vnez %v7207_v6  ;;  %v2265_v52 = vsel %vm7237_vm4, %v2263_v63, %v2245_v11  ;;  %v2266_v38 = vsel %vm7238_vm9, %v2261_v49, %v2246_v47  ;;  %v7384_v47 = vld [vmem:[#allocation19_spill] sm:$0xff] }
0x12f8   :  { %v2249_v16 = vsel %vm7373_vm6, %v2243_v24, %v2229_v31  ;;  %v2250_v4 = vsel %vm7374_vm3, %v2241_v57, %v2230_v27  ;;  %v2251_v34 = vsel %vm7373_vm6, %v2244_v53, %v2231_v18  ;;  %v2252_v55 = vsel %vm7374_vm3, %v2242_v48, %v2232_v58 }
0x12f9   :  { %v2267_v33 = vsel %vm7237_vm4, %v2264_v37, %v2247_v54  ;;  %v2268_v2 = vsel %vm7238_vm9, %v2262_v25, %v2248_v5  ;;  %vm7375_vm13 = vnez %v7213_v41  ;;  %vm7376_vm15 = vnez %v7225_v32  ;;  %v7387_v54 = vld [vmem:[#allocation20_spill] sm:$0xff] }
0x12fa   :  { %v4464_v17 = vpop.permute.xlu0 %4463  ;;  %v2269_v44 = vsel %vm7375_vm13, %v2263_v63, %v2249_v16  ;;  %v2270_v10 = vsel %vm7376_vm15, %v2261_v49, %v2250_v4  ;;  %v2271_v50 = vsel %vm7375_vm13, %v2264_v37, %v2251_v34  ;;  %v2272_v36 = vsel %vm7376_vm15, %v2262_v25, %v2252_v55  ;;  %v7385_v25 = vld [vmem:[#allocation7_spill] sm:$0xff]  ;;  %v7388_v4 = vld [vmem:[#allocation12_spill] sm:$0xff] }
0x12fb   :  { %v4466_v42 = vunpack.i.h.bf16 %v4464_v17  ;;  %v4465_v15 = vunpack.i.l.bf16 %v4464_v17  ;;  %vm7377_vm3 = vcmp.lt.s32.totalorder %v4780_v12, 7  ;;  %vm7381_vm13 = vnez %v7111_v30  ;;  %v7389_v34 = vld [vmem:[#allocation8_spill] sm:$0xff] }
0x12fc   :  { %vm7378_vm6 = vmmov %vm7377_vm3  ;;  %v4109_v17 = vld [vmem:[%s6917_s5 + $0x78] sm:$0xff] }
0x12fd   :  { %v2281_v20 = vsel %vm7377_vm3, %v4460_v13, %v4465_v15  ;;  %v2282_v57 = vsel %vm7378_vm6, %v4461_v40, %v4466_v42  ;;  %vm7379_vm7 = vmmov %vm7377_vm3  ;;  %vm7382_vm6 = vnez %v7215_v60 }
0x12fe   :  { %v2283_v24 = vsel %vm7379_vm7, %v4465_v15, %v4460_v13  ;;  %vm7380_vm11 = vmmov %vm7377_vm3  ;;  %v2286_v48 = vsel %vm7381_vm13, %v2281_v20, %v2266_v38  ;;  %v2288_v18 = vsel %vm7381_vm13, %v2282_v57, %v2268_v2  ;;  %vm7386_vm7 = vnez %v7385_v25  ;;  %v4111_v2 = vld [vmem:[%s6917_s5 + $0x88] sm:$0xff]  ;;  %v2338_v15 = vpop.f32.mrf.mxu1 }
0x12ff   :  { %v2284_v31 = vsel %vm7380_vm11, %v4466_v42, %v4461_v40  ;;  %v2285_v27 = vsel %vm7243_vm0, %v2283_v24, %v2265_v52  ;;  %v2289_v58 = vsel %vm7382_vm6, %v2283_v24, %v2269_v44  ;;  %vm7383_vm11 = vnez %v7227_v9  ;;  %v7391_v52 = vld [vmem:[#allocation21_spill] sm:$0xff]  ;;  %v2324_v42 = vpop.f32.mrf.mxu0 }
0x1300   :  { %v2287_v53 = vsel %vm7243_vm0, %v2284_v31, %v2267_v33  ;;  %v2291_v13 = vsel %vm7382_vm6, %v2284_v31, %v2271_v50  ;;  %v2290_v40 = vsel %vm7383_vm11, %v2281_v20, %v2270_v10  ;;  %v2292_v49 = vsel %vm7383_vm11, %v2282_v57, %v2272_v36 }
0x1301   :  { %v2300_v63 = vpack.c.bf16 %v2291_v13, %v2289_v58  ;;  %v2301_v11 = vpack.c.bf16 %v2292_v49, %v2290_v40  ;;  %v2293_v37 = vsel %vm7386_vm7, %v7384_v47, %v2285_v27  ;;  %v2295_v5 = vsel %vm7386_vm7, %v7387_v54, %v2287_v53 }
0x1302   :  { %v2382_v16 = vpack.c.bf16 %v2295_v5, %v2293_v37  ;;  %vm7390_vm3 = vnez %v7389_v34  ;;  %vm7392_vm11 = vcmask 130048  }
0x1303   :  { %v2294_v55 = vsel %vm7390_vm3, %v7388_v4, %v2286_v48  ;;  %v2296_v38 = vsel %vm7390_vm3, %v7391_v52, %v2288_v18  ;;  %2358 = vmatpush.bf16.msra.mxu2 %v2300_v63  ;;  %2372 = vmatpush.bf16.msra.mxu3 %v2301_v11  ;;  %vm7393_vm6 = vmmov %vm7392_vm11 }
0x1304   :  { %v2383_v33 = vpack.c.bf16 %v2296_v38, %v2294_v55  ;;  %2399 = vmatpush.bf16.msrb.mxu0 %v2382_v16  ;;  %vm7394_vm15 = vmmov %vm7393_vm6 }
0x1305   :  { %vm7395_vm14 = vmmov %vm7393_vm6 }
0x1306   :  { %2413 = vmatpush.bf16.msrb.mxu1 %v2383_v33  ;;  %3949 = vmatmul.msk.bf16.vlgmr.msra.gmra.mxu2 %vm7392_vm11, %v4109_v17  ;;  %v2340_v10 = vpop.f32.mrf.mxu1 }
0x1307   :  { %3950 = vmatmul.msk.bf16.vlgmr.msra.gmra.mxu3 %vm7393_vm6, %v4109_v17  ;;  %3957 = vmatmul.msk.bf16.vlgmr.msrb.gmra.mxu0 %vm7394_vm15, %v4111_v2  ;;  %v2326_v44 = vpop.f32.mrf.mxu0 }
0x1309   :  { %3958 = vmatmul.msk.bf16.vlgmr.msrb.gmra.mxu1 %vm7395_vm14, %v4111_v2 }
0x1384   :  { %v2401_v50 = vpop.f32.mrf.mxu0 }
0x1386   :  { %v2415_v36 = vpop.f32.mrf.mxu1 }
0x1389   :  { %v2360_v20 = vpop.f32.mrf.mxu2 }
0x138a   :  { %v2374_v57 = vpop.f32.mrf.mxu3  ;;  %v2361_v24 = vadd.f32 %v2360_v20, %v2324_v42 }
0x138b   :  { %v2375_v31 = vadd.f32 %v2374_v57, %v2338_v15 }
0x138c   :  { %v2420_v27 = vadd.f32 %v2401_v50, %v2361_v24  ;;  %v2403_v49 = vpop.f32.mrf.mxu0  ;;  %v3961_v50 = vld [vmem:[%s6916_s4 + $0x60] sm:$0xff] }
0x138d   :  { %v2421_v48 = vadd.f32 %v2415_v36, %v2375_v31  ;;  %v3966_v36 = vld [vmem:[%s6919_s7 + $0x58] sm:$0xff] }
0x138e   :  { %v2417_v63 = vpop.f32.mrf.mxu1 }
0x138f   :  { %v2430_v53 = vadd.f32 %v2421_v48, %v2420_v27 }
0x1391   :  { %2431 = vadd.xlane.f32.xlu1 %v2430_v53  ;;  %v2362_v18 = vpop.f32.mrf.mxu2 }
0x1392   :  { %v2376_v58 = vpop.f32.mrf.mxu3  ;;  %v2363_v13 = vadd.f32 %v2362_v18, %v2326_v44 }
0x1393   :  { %v2377_v40 = vadd.f32 %v2376_v58, %v2340_v10 }
0x1394   :  { %v2422_v11 = vadd.f32 %v2403_v49, %v2363_v13 }
0x1395   :  { %v2423_v47 = vadd.f32 %v2417_v63, %v2377_v40 }
0x1397   :  { %v2433_v37 = vadd.f32 %v2423_v47, %v2422_v11 }
0x1399   :  { %2434 = vadd.xlane.f32.xlu2 %v2433_v37 }
0x1404   :  { %v2432_v54 = vpop.xlane.xlu1 %2431 }
0x1405   :  { %v2436_v5 = vmul.f32 0.00390625, %v2432_v54 }
0x1407   :  { %v2438_v16 = vsub.f32 %v2420_v27, %v2436_v5  ;;  %v2439_v4 = vsub.f32 %v2421_v48, %v2436_v5 }
0x1409   :  { %v2442_v55 = vmul.f32 %v2438_v16, %v2438_v16  ;;  %v2443_v52 = vmul.f32 %v2439_v4, %v2439_v4 }
0x140b   :  { %v2446_v38 = vadd.f32 %v2443_v52, %v2442_v55 }
0x140c   :  { %v2435_v17 = vpop.xlane.xlu2 %2434 }
0x140d   :  { %v2437_v33 = vmul.f32 0.00390625, %v2435_v17  ;;  %2447 = vadd.xlane.f32.xlu0 %v2446_v38  ;;  %v3960_v38 = vld [vmem:[%s6915_s3 + $0x68] sm:$0xff] }
0x140f   :  { %v2440_v2 = vsub.f32 %v2422_v11, %v2437_v33  ;;  %v2441_v42 = vsub.f32 %v2423_v47, %v2437_v33  ;;  %v3959_v11 = vld [vmem:[%s6915_s3 + $0x60] sm:$0xff]  ;;  %v3965_v33 = vld [vmem:[%s6919_s7 + $0x50] sm:$0xff] }
0x1411   :  { %v2444_v15 = vmul.f32 %v2440_v2, %v2440_v2  ;;  %v2445_v44 = vmul.f32 %v2441_v42, %v2441_v42 }
0x1413   :  { %v2449_v10 = vadd.f32 %v2445_v44, %v2444_v15 }
0x1415   :  { %2450 = vadd.xlane.f32.xlu1 %v2449_v10  ;;  %v3962_v10 = vld [vmem:[%s6916_s4 + $0x68] sm:$0xff] }
0x142e   :  { %2494 = vperm.xlu1 %4146, %v3961_v50  }
0x1436   :  { %2529 = vperm.xlu1 %4146, %v3966_v36  }
0x1480   :  { %v2448_v20 = vpop.xlane.xlu0 %2447 }
0x1481   :  { %v2452_v57 = vmul.f32 0.00390625, %v2448_v20 }
0x1483   :  { %v2454_v24 = vadd.f32 1e-05, %v2452_v57 }
0x1485   :  { %4651 = vrsqrt.f32 %v2454_v24  ;;  %vm2462_vm15 = vweird.f32 %v2454_v24 }
0x1488   :  { %v2451_v31 = vpop.xlane.xlu1 %2450 }
0x1489   :  { %v2453_v27 = vmul.f32 0.00390625, %v2451_v31 }
0x148b   :  { %v4652_v48 = vpop.eup %4651  ;;  %v2455_v53 = vadd.f32 1e-05, %v2453_v27 }
0x148c   :  { %v2457_v18 = vmul.f32 %v4652_v48, %v2454_v24  ;;  %vm2463_vm14 = vweird.f32 %v4652_v48 }
0x148d   :  { %4653 = vrsqrt.f32 %v2455_v53  ;;  %vm2464_vm6 = vmor %vm2462_vm15, %vm2463_vm14  ;;  %vm2472_vm5 = vweird.f32 %v2455_v53 }
0x148e   :  { %v2458_v58 = vmul.f32 %v4652_v48, %v2457_v18 }
0x1490   :  { %v2459_v13 = vmul.f32 0.5, %v2458_v58 }
0x1492   :  { %v2460_v40 = vsub.f32 1.5, %v2459_v13 }
0x1493   :  { %v4654_v49 = vpop.eup %4653 }
0x1494   :  { %v2467_v63 = vmul.f32 %v4654_v49, %v2455_v53  ;;  %v2461_v47 = vmul.f32 %v4652_v48, %v2460_v40  ;;  %vm2473_vm11 = vweird.f32 %v4654_v49 }
0x1495   :  { %vm2474_vm12 = vmor %vm2472_vm5, %vm2473_vm11 }
0x1496   :  { %v2468_v37 = vmul.f32 %v4654_v49, %v2467_v63  ;;  %v2465_v54 = vsel %vm2464_vm6, %v4652_v48, %v2461_v47  ;;  %vm7404_vm6 = vcmp.lt.s32.totalorder %v4780_v12, 1 }
0x1497   :  { %v2476_v5 = vmul.f32 %v3959_v11, %v2465_v54  ;;  %vm7405_vm11 = vmmov %vm7404_vm6 }
0x1498   :  { %v2469_v55 = vmul.f32 0.5, %v2468_v37 }
0x1499   :  { %2480 = vperm.xlu2 %4144, %v2476_v5  }
0x149a   :  { %v2470_v52 = vsub.f32 1.5, %v2469_v55 }
0x149c   :  { %v2471_v17 = vmul.f32 %v4654_v49, %v2470_v52 }
0x149e   :  { %v2475_v15 = vsel %vm2474_vm12, %v4654_v49, %v2471_v17  ;;  %vm7396_vm12 = vcmask 130048  }
0x149f   :  { %v2477_v44 = vmul.f32 %v3960_v38, %v2475_v15  ;;  %vm7397_vm5 = vmmov %vm7396_vm12 }
0x14a0   :  { %v2495_v24 = vpop.permute.xlu1 %2494  ;;  %vm7402_vm14 = vmmov %vm7397_vm5 }
0x14a1   :  { %2524 = vperm.xlu2 %4144, %v3965_v33   ;;  %2485 = vperm.xlu0 %4145, %v2477_v44   ;;  %vm7403_vm15 = vmmov %vm7397_vm5 }
0x14a8   :  { %v2530_v38 = vpop.permute.xlu1 %2529 }
0x14a9   :  { %2499 = vperm.xlu0 %4145, %v3962_v10  }
0x14f3   :  { %v2481_v50 = vpop.permute.xlu2 %2480 }
0x14f4   :  { %v2488_v20 = vmul.f32 %v2481_v50, %v2438_v16  ;;  %v2489_v57 = vmul.f32 %v2481_v50, %v2439_v4  ;;  %v4112_v16 = vld [vmem:[%s6918_s6 + $0x28] sm:$0xff] }
0x14f6   :  { %v2502_v31 = vadd.f32 %v2495_v24, %v2488_v20  ;;  %v2503_v27 = vadd.f32 %v2495_v24, %v2489_v57  ;;  %v7399_v57 = vld [vmem:[#allocation9_spill] sm:$0xff] }
0x14f8   :  { %v2506_v58 = vmul.f32 0.2, %v2502_v31  ;;  %v2507_v13 = vmul.f32 0.2, %v2503_v27 }
0x14fa   :  { %v2510_v47 = vmax.f32 %v2502_v31, %v2506_v58  ;;  %v2511_v37 = vmax.f32 %v2503_v27, %v2507_v13  ;;  %v7400_v31 = vld [vmem:[#allocation10_spill] sm:$0xff] }
0x1513   :  { %v2486_v36 = vpop.permute.xlu0 %2485 }
0x1514   :  { %v2490_v48 = vmul.f32 %v2486_v36, %v2440_v2  ;;  %v2491_v53 = vmul.f32 %v2486_v36, %v2441_v42  ;;  %v2525_v42 = vpop.permute.xlu2 %2524  ;;  %v7398_v36 = vld [vmem:[#allocation13_spill] sm:$0xff] }
0x151b   :  { %v2500_v18 = vpop.permute.xlu0 %2499 }
0x151c   :  { %v2504_v40 = vadd.f32 %v2500_v18, %v2490_v48  ;;  %v2505_v49 = vadd.f32 %v2500_v18, %v2491_v53  ;;  %v7401_v48 = vld [vmem:[#allocation11_spill] sm:$0xff] }
0x151e   :  { %v2508_v63 = vmul.f32 0.2, %v2504_v40  ;;  %v2509_v11 = vmul.f32 0.2, %v2505_v49 }
0x1520   :  { %v2512_v54 = vmax.f32 %v2504_v40, %v2508_v63  ;;  %v2513_v5 = vmax.f32 %v2505_v49, %v2509_v11  ;;  %v4114_v49 = vld [vmem:[%s6917_s5 + $0x98] sm:$0xff] }
0x1522   :  { %v2517_v55 = vpack.c.bf16 %v2512_v54, %v2510_v47  ;;  %v2518_v52 = vpack.c.bf16 %v2513_v5, %v2511_v37 }
0x1524   :  { %2547 = vmatpush.bf16.msrb.mxu2 %v2517_v55  ;;  %2561 = vmatpush.bf16.msrb.mxu3 %v2518_v52 }
0x1527   :  { %3971 = vmatmul.msk.bf16.vlgmr.msrb.gmra.mxu2 %vm7396_vm12, %v4112_v16  ;;  %3972 = vmatmul.msk.bf16.vlgmr.msrb.gmra.mxu3 %vm7397_vm5, %v4112_v16  ;;  %vm7406_vm12 = vmmov %vm7404_vm6 }
0x1528   :  { %vm7407_vm5 = vmmov %vm7404_vm6 }
0x15aa   :  { %v2549_v4 = vpop.f32.mrf.mxu2  ;;  %v2563_v2 = vpop.f32.mrf.mxu3 }
0x15ab   :  { %v2550_v17 = vadd.f32 %v2549_v4, %v2525_v42  ;;  %v2564_v33 = vadd.f32 %v2563_v2, %v2525_v42 }
0x15ad   :  { %v6317_v20 = vadd.f32 %v2550_v17, %v7398_v36  ;;  %v6320_v24 = vadd.f32 %v2564_v33, %v7399_v57 }
0x15b2   :  { %v2551_v15 = vpop.f32.mrf.mxu2  ;;  %v2565_v44 = vpop.f32.mrf.mxu3 }
0x15b3   :  { %v2552_v10 = vadd.f32 %v2551_v15, %v2530_v38  ;;  %v2566_v50 = vadd.f32 %v2565_v44, %v2530_v38 }
0x15b5   :  { %v6323_v27 = vadd.f32 %v2552_v10, %v7400_v31  ;;  %v6326_v53 = vadd.f32 %v2566_v50, %v7401_v48 }
0x15b7   :  { %v4472_v18 = vpack.i.bf16 %v6326_v53, %v6320_v24  ;;  %v2613_v58 = vpack.c.bf16 %v6326_v53, %v6320_v24  ;;  %v4477_v13 = vpack.i.bf16 %v6323_v27, %v6317_v20  ;;  %v2612_v40 = vpack.c.bf16 %v6323_v27, %v6317_v20 }
0x15b9   :  { %4473 = vrot.lane.b32.xlu2 %v4472_v18, %s4697_s12  ;;  %2643 = vmatpush.bf16.msra.mxu1 %v2613_v58 }
0x15ba   :  { %4478 = vrot.lane.b32.xlu1 %v4477_v13, %s4696_s11  ;;  %4468 = vrot.lane.b32.xlu0 %v4477_v13, %s4697_s12 }
0x15bb   :  { %2629 = vmatpush.bf16.msra.mxu0 %v2612_v40 }
0x15bc   :  { %3982 = vmatmul.msk.bf16.vlgmr.msra.gmra.mxu1 %vm7403_vm15, %v4114_v49 }
0x15be   :  { %3981 = vmatmul.msk.bf16.vlgmr.msra.gmra.mxu0 %vm7402_vm14, %v4114_v49  ;;  %vm7408_vm14 = vcmp.lt.s32.totalorder %v4780_v12, 127 }
0x15bf   :  { %vm7409_vm15 = vmmov %vm7408_vm14 }
0x15c0   :  { %vm7410_vm13 = vmmov %vm7408_vm14 }
0x15c2   :  { %4483 = vrot.lane.b32.xlu0 %v4472_v18, %s4696_s11 }
0x1613   :  { %v4474_v11 = vpop.permute.xlu2 %4473 }
0x1614   :  { %v4476_v5 = vunpack.i.h.bf16 %v4474_v11  ;;  %v4475_v55 = vunpack.i.l.bf16 %v4474_v11 }
0x162c   :  { %v4469_v63 = vpop.permute.xlu0 %4468  ;;  %v4479_v47 = vpop.permute.xlu1 %4478 }
0x162d   :  { %v4471_v37 = vunpack.i.h.bf16 %v4469_v63  ;;  %v4470_v54 = vunpack.i.l.bf16 %v4469_v63  ;;  %v4481_v16 = vunpack.i.h.bf16 %v4479_v47  ;;  %v4480_v4 = vunpack.i.l.bf16 %v4479_v47 }
0x162f   :  { %v2581_v38 = vsel %vm7404_vm6, %v4471_v37, %v4476_v5  ;;  %v2583_v17 = vsel %vm7405_vm11, %v4476_v5, %v4471_v37  ;;  %v2580_v33 = vsel %vm7406_vm12, %v4470_v54, %v4475_v55  ;;  %v2582_v15 = vsel %vm7407_vm5, %v4475_v55, %v4470_v54  ;;  %vm7411_vm6 = vmmov %vm7410_vm13  ;;  %v4113_v5 = vld [vmem:[%s6917_s5 + $0x90] sm:$0xff] }
0x1634   :  { %v4484_v52 = vpop.permute.xlu0 %4483 }
0x1635   :  { %v4486_v2 = vunpack.i.h.bf16 %v4484_v52  ;;  %v4485_v42 = vunpack.i.l.bf16 %v4484_v52  ;;  %v4115_v52 = vld [vmem:[%s6917_s5 + $0xa0] sm:$0xff] }
0x1637   :  { %v2593_v44 = vsel %vm7408_vm14, %v4481_v16, %v4486_v2  ;;  %v2595_v10 = vsel %vm7409_vm15, %v4486_v2, %v4481_v16  ;;  %v2592_v50 = vsel %vm7410_vm13, %v4480_v4, %v4485_v42  ;;  %v2594_v36 = vsel %vm7411_vm6, %v4485_v42, %v4480_v4 }
0x1638   :  { %v2596_v31 = vsel %vm7265_vm8, %v2592_v50, %v2582_v15  ;;  %v2598_v48 = vsel %vm7265_vm8, %v2593_v44, %v2583_v17  ;;  %v2597_v58 = vsel %vm7267_vm2, %v2594_v36, %v2580_v33  ;;  %v2599_v13 = vsel %vm7267_vm2, %v2595_v10, %v2581_v38 }
0x1639   :  { %v2607_v40 = vpack.c.bf16 %v2598_v48, %v2596_v31  ;;  %v2608_v49 = vpack.c.bf16 %v2599_v13, %v2597_v58  ;;  %v2600_v63 = vsel %vm7386_vm7, %v2582_v15, %v2592_v50  ;;  %v2602_v11 = vsel %vm7386_vm7, %v2583_v17, %v2593_v44  ;;  %v2645_v4 = vpop.f32.mrf.mxu1 }
0x163a   :  { %v2689_v47 = vpack.c.bf16 %v2602_v11, %v2600_v63  ;;  %v2601_v37 = vsel %vm7390_vm3, %v2580_v33, %v2594_v36  ;;  %v2603_v54 = vsel %vm7390_vm3, %v2581_v38, %v2595_v10  ;;  %vm7414_vm13 = vcmask 130048  }
0x163b   :  { %2665 = vmatpush.bf16.msra.mxu2 %v2607_v40  ;;  %2679 = vmatpush.bf16.msra.mxu3 %v2608_v49  ;;  %v2690_v55 = vpack.c.bf16 %v2603_v54, %v2601_v37  ;;  %vm7415_vm11 = vmmov %vm7414_vm13  ;;  %v2631_v16 = vpop.f32.mrf.mxu0 }
0x163c   :  { %2706 = vmatpush.bf16.msrb.mxu0 %v2689_v47  ;;  %vm7416_vm12 = vmmov %vm7415_vm11 }
0x163d   :  { %2720 = vmatpush.bf16.msrb.mxu1 %v2690_v55  ;;  %vm7417_vm5 = vmmov %vm7415_vm11 }
0x163e   :  { %3987 = vmatmul.msk.bf16.vlgmr.msra.gmra.mxu2 %vm7414_vm13, %v4113_v5  ;;  %3988 = vmatmul.msk.bf16.vlgmr.msra.gmra.mxu3 %vm7415_vm11, %v4113_v5 }
0x163f   :  { %3995 = vmatmul.msk.bf16.vlgmr.msrb.gmra.mxu0 %vm7416_vm12, %v4115_v52 }
0x1640   :  { %3996 = vmatmul.msk.bf16.vlgmr.msrb.gmra.mxu1 %vm7417_vm5, %v4115_v52 }
0x1641   :  { %v2647_v42 = vpop.f32.mrf.mxu1 }
0x1643   :  { %v2633_v2 = vpop.f32.mrf.mxu0 }
0x16bc   :  { %v2708_v38 = vpop.f32.mrf.mxu0 }
0x16bd   :  { %v2722_v17 = vpop.f32.mrf.mxu1 }
0x16c1   :  { %v2667_v33 = vpop.f32.mrf.mxu2  ;;  %v2681_v15 = vpop.f32.mrf.mxu3 }
0x16c2   :  { %v2668_v44 = vadd.f32 %v2667_v33, %v2631_v16  ;;  %v2682_v10 = vadd.f32 %v2681_v15, %v2645_v4 }
0x16c4   :  { %v2727_v50 = vadd.f32 %v2708_v38, %v2668_v44  ;;  %v2728_v36 = vadd.f32 %v2722_v17, %v2682_v10  ;;  %v2710_v49 = vpop.f32.mrf.mxu0 }
0x16c5   :  { %v2724_v63 = vpop.f32.mrf.mxu1 }
0x16c6   :  { %v2737_v31 = vadd.f32 %v2728_v36, %v2727_v50 }
0x16c8   :  { %2738 = vadd.xlane.f32.xlu2 %v2737_v31  ;;  %v3999_v31 = vld [vmem:[%s6916_s4 + $0x70] sm:$0xff] }
0x16c9   :  { %v2669_v48 = vpop.f32.mrf.mxu2  ;;  %v2683_v58 = vpop.f32.mrf.mxu3 }
0x16ca   :  { %v2670_v13 = vadd.f32 %v2669_v48, %v2633_v2  ;;  %v2684_v40 = vadd.f32 %v2683_v58, %v2647_v42 }
0x16cc   :  { %v2729_v11 = vadd.f32 %v2710_v49, %v2670_v13  ;;  %v2730_v47 = vadd.f32 %v2724_v63, %v2684_v40 }
0x16ce   :  { %v2740_v37 = vadd.f32 %v2730_v47, %v2729_v11 }
0x16d0   :  { %2741 = vadd.xlane.f32.xlu1 %v2740_v37 }
0x173b   :  { %v2739_v54 = vpop.xlane.xlu2 %2738 }
0x173c   :  { %v2743_v5 = vmul.f32 0.00390625, %v2739_v54 }
0x173e   :  { %v2745_v55 = vsub.f32 %v2727_v50, %v2743_v5  ;;  %v2746_v52 = vsub.f32 %v2728_v36, %v2743_v5  ;;  %v4004_v50 = vld [vmem:[%s6919_s7 + $0x68] sm:$0xff] }
0x1740   :  { %v2749_v16 = vmul.f32 %v2745_v55, %v2745_v55  ;;  %v2750_v4 = vmul.f32 %v2746_v52, %v2746_v52 }
0x1742   :  { %v2753_v38 = vadd.f32 %v2750_v4, %v2749_v16 }
0x1743   :  { %v2742_v17 = vpop.xlane.xlu1 %2741 }
0x1744   :  { %v2744_v33 = vmul.f32 0.00390625, %v2742_v17  ;;  %2754 = vadd.xlane.f32.xlu0 %v2753_v38  ;;  %v3997_v38 = vld [vmem:[%s6915_s3 + $0x70] sm:$0xff] }
0x1746   :  { %v2747_v15 = vsub.f32 %v2729_v11, %v2744_v33  ;;  %v2748_v44 = vsub.f32 %v2730_v47, %v2744_v33 }
0x1748   :  { %v2751_v2 = vmul.f32 %v2747_v15, %v2747_v15  ;;  %v2752_v42 = vmul.f32 %v2748_v44, %v2748_v44 }
0x174a   :  { %v2756_v10 = vadd.f32 %v2752_v42, %v2751_v2 }
0x174c   :  { %2757 = vadd.xlane.f32.xlu2 %v2756_v10 }
0x1764   :  { %2801 = vperm.xlu2 %4144, %v3999_v31  }
0x176c   :  { %2836 = vperm.xlu2 %4144, %v4004_v50   ;;  %v3998_v50 = vld [vmem:[%s6915_s3 + $0x78] sm:$0xff] }
0x17b7   :  { %v2755_v36 = vpop.xlane.xlu0 %2754 }
0x17b8   :  { %v2759_v48 = vmul.f32 0.00390625, %v2755_v36  ;;  %v4003_v36 = vld [vmem:[%s6919_s7 + $0x60] sm:$0xff] }
0x17ba   :  { %v2761_v58 = vadd.f32 1e-05, %v2759_v48 }
0x17bc   :  { %4655 = vrsqrt.f32 %v2761_v58  ;;  %vm2769_vm15 = vweird.f32 %v2761_v58 }
0x17bf   :  { %v2758_v13 = vpop.xlane.xlu2 %2757 }
0x17c0   :  { %v2760_v40 = vmul.f32 0.00390625, %v2758_v13  ;;  %v4000_v13 = vld [vmem:[%s6916_s4 + $0x78] sm:$0xff] }
0x17c2   :  { %v4656_v49 = vpop.eup %4655  ;;  %v2762_v63 = vadd.f32 1e-05, %v2760_v40 }
0x17c3   :  { %v2764_v11 = vmul.f32 %v4656_v49, %v2761_v58  ;;  %vm2770_vm14 = vweird.f32 %v4656_v49 }
0x17c4   :  { %4657 = vrsqrt.f32 %v2762_v63  ;;  %vm2771_vm6 = vmor %vm2769_vm15, %vm2770_vm14  ;;  %vm2779_vm11 = vweird.f32 %v2762_v63 }
0x17c5   :  { %v2765_v47 = vmul.f32 %v4656_v49, %v2764_v11  ;;  %vm7418_vm14 = vmmov %vm7417_vm5 }
0x17c6   :  { %vm7419_vm15 = vmmov %vm7417_vm5 }
0x17c7   :  { %v2766_v37 = vmul.f32 0.5, %v2765_v47  ;;  %v2802_v47 = vpop.permute.xlu2 %2801 }
0x17c9   :  { %v2767_v54 = vsub.f32 1.5, %v2766_v37 }
0x17ca   :  { %v4658_v5 = vpop.eup %4657 }
0x17cb   :  { %v2768_v16 = vmul.f32 %v4656_v49, %v2767_v54  ;;  %v2774_v4 = vmul.f32 %v4658_v5, %v2762_v63  ;;  %vm2780_vm13 = vweird.f32 %v4658_v5 }
0x17cc   :  { %vm2781_vm12 = vmor %vm2779_vm11, %vm2780_vm13  ;;  %vm7421_vm13 = vcmp.lt.s32.totalorder %v4780_v12, 125 }
0x17cd   :  { %v2775_v17 = vmul.f32 %v4658_v5, %v2774_v4  ;;  %v2772_v33 = vsel %vm2771_vm6, %v4656_v49, %v2768_v16  ;;  %vm7420_vm6 = vmmov %vm7417_vm5 }
0x17ce   :  { %v2783_v2 = vmul.f32 %v3997_v38, %v2772_v33  ;;  %vm7422_vm11 = vmmov %vm7421_vm13 }
0x17cf   :  { %v2776_v42 = vmul.f32 0.5, %v2775_v17 }
0x17d0   :  { %2787 = vperm.xlu1 %4146, %v2783_v2  }
0x17d1   :  { %v2777_v10 = vsub.f32 1.5, %v2776_v42 }
0x17d3   :  { %v2778_v31 = vmul.f32 %v4658_v5, %v2777_v10 }
0x17d5   :  { %v2782_v48 = vsel %vm2781_vm12, %v4658_v5, %v2778_v31  ;;  %vm7423_vm12 = vmmov %vm7422_vm11 }
0x17d6   :  { %v2784_v58 = vmul.f32 %v3998_v50, %v2782_v48 }
0x17d8   :  { %2831 = vperm.xlu1 %4146, %v4003_v36   ;;  %2792 = vperm.xlu0 %4145, %v2784_v58  }
0x17e0   :  { %2806 = vperm.xlu0 %4145, %v4000_v13  }
0x1842   :  { %v2788_v40 = vpop.permute.xlu1 %2787 }
0x1843   :  { %v2795_v63 = vmul.f32 %v2788_v40, %v2745_v55  ;;  %v2796_v11 = vmul.f32 %v2788_v40, %v2746_v52  ;;  %v4116_v55 = vld [vmem:[%s6918_s6 + $0x30] sm:$0xff]  ;;  %v2837_v40 = vpop.permute.xlu2 %2836 }
0x1845   :  { %v2809_v37 = vadd.f32 %v2802_v47, %v2795_v63  ;;  %v2810_v54 = vadd.f32 %v2802_v47, %v2796_v11 }
0x1847   :  { %v2813_v17 = vmul.f32 0.2, %v2809_v37  ;;  %v2814_v5 = vmul.f32 0.2, %v2810_v54 }
0x1849   :  { %v2817_v31 = vmax.f32 %v2809_v37, %v2813_v17  ;;  %v2818_v50 = vmax.f32 %v2810_v54, %v2814_v5 }
0x184a   :  { %v2793_v49 = vpop.permute.xlu0 %2792 }
0x184b   :  { %v2797_v16 = vmul.f32 %v2793_v49, %v2747_v15  ;;  %v2798_v4 = vmul.f32 %v2793_v49, %v2748_v44  ;;  %v2832_v44 = vpop.permute.xlu1 %2831 }
0x1852   :  { %v2807_v38 = vpop.permute.xlu0 %2806 }
0x1853   :  { %v2811_v33 = vadd.f32 %v2807_v38, %v2797_v16  ;;  %v2812_v2 = vadd.f32 %v2807_v38, %v2798_v4 }
0x1855   :  { %v2815_v42 = vmul.f32 0.2, %v2811_v33  ;;  %v2816_v10 = vmul.f32 0.2, %v2812_v2 }
0x1857   :  { %v2819_v36 = vmax.f32 %v2811_v33, %v2815_v42  ;;  %v2820_v48 = vmax.f32 %v2812_v2, %v2816_v10 }
0x1859   :  { %v2824_v58 = vpack.c.bf16 %v2819_v36, %v2817_v31  ;;  %v2825_v13 = vpack.c.bf16 %v2820_v48, %v2818_v50 }
0x185b   :  { %2854 = vmatpush.bf16.msrb.mxu2 %v2824_v58  ;;  %2868 = vmatpush.bf16.msrb.mxu3 %v2825_v13 }
0x185e   :  { %4009 = vmatmul.msk.bf16.vlgmr.msrb.gmra.mxu2 %vm7417_vm5, %v4116_v55  ;;  %4010 = vmatmul.msk.bf16.vlgmr.msrb.gmra.mxu3 %vm7418_vm14, %v4116_v55  ;;  %vm7424_vm5 = vmmov %vm7422_vm11  ;;  %vm7425_vm14 = vcmp.lt.s32.totalorder %v4780_v12, 3 }
0x18e1   :  { %v2856_v52 = vpop.f32.mrf.mxu2  ;;  %v2870_v15 = vpop.f32.mrf.mxu3 }
0x18e2   :  { %v2857_v49 = vadd.f32 %v2856_v52, %v2832_v44  ;;  %v2871_v63 = vadd.f32 %v2870_v15, %v2832_v44 }
0x18e4   :  { %v6411_v16 = vadd.f32 %v2857_v49, %v6317_v20  ;;  %v6414_v4 = vadd.f32 %v2871_v63, %v6320_v24  ;;  %v4118_v24 = vld [vmem:[%s6917_s5 + $0xb0] sm:$0xff] }
0x18e9   :  { %v2858_v11 = vpop.f32.mrf.mxu2  ;;  %v2872_v47 = vpop.f32.mrf.mxu3 }
0x18ea   :  { %v2859_v37 = vadd.f32 %v2858_v11, %v2837_v40  ;;  %v2873_v54 = vadd.f32 %v2872_v47, %v2837_v40 }
0x18ec   :  { %v6417_v38 = vadd.f32 %v2859_v37, %v6323_v27  ;;  %v6420_v17 = vadd.f32 %v2873_v54, %v6326_v53 }
0x18ee   :  { %v4492_v5 = vpack.i.bf16 %v6420_v17, %v6414_v4  ;;  %v2960_v33 = vpack.c.bf16 %v6420_v17, %v6414_v4  ;;  %v4497_v2 = vpack.i.bf16 %v6417_v38, %v6411_v16  ;;  %v2959_v20 = vpack.c.bf16 %v6417_v38, %v6411_v16 }
0x18f0   :  { %4493 = vrot.lane.b32.xlu1 %v4492_v5, %s4699_s24  ;;  %2990 = vmatpush.bf16.msra.mxu1 %v2960_v33 }
0x18f1   :  { %4498 = vrot.lane.b32.xlu2 %v4497_v2, %s4700_s25  ;;  %4488 = vrot.lane.b32.xlu0 %v4497_v2, %s4699_s24 }
0x18f2   :  { %2976 = vmatpush.bf16.msra.mxu0 %v2959_v20 }
0x18f3   :  { %4020 = vmatmul.msk.bf16.vlgmr.msra.gmra.mxu1 %vm7420_vm6, %v4118_v24  ;;  %vm7427_vm6 = vcmp.lt.s32.totalorder %v4780_v12, 127 }
0x18f5   :  { %4019 = vmatmul.msk.bf16.vlgmr.msra.gmra.mxu0 %vm7419_vm15, %v4118_v24  ;;  %vm7426_vm15 = vmmov %vm7425_vm14 }
0x18f8   :  { %4508 = vrot.lane.b32.xlu1 %v4497_v2, %s4696_s11 }
0x18f9   :  { %4513 = vrot.lane.b32.xlu2 %v4492_v5, %s4696_s11  ;;  %4503 = vrot.lane.b32.xlu0 %v4492_v5, %s4700_s25 }
0x1900   :  { %4523 = vrot.lane.b32.xlu1 %v4492_v5, %s4697_s12 }
0x1901   :  { %4518 = vrot.lane.b32.xlu0 %v4497_v2, %s4697_s12 }
0x194b   :  { %v4499_v27 = vpop.permute.xlu2 %4498 }
0x194c   :  { %v4501_v31 = vunpack.i.h.bf16 %v4499_v27  ;;  %v4500_v15 = vunpack.i.l.bf16 %v4499_v27 }
0x1953   :  { %v4514_v50 = vpop.permute.xlu2 %4513 }
0x1954   :  { %v4516_v63 = vunpack.i.h.bf16 %v4514_v50  ;;  %v4515_v11 = vunpack.i.l.bf16 %v4514_v50 }
0x1962   :  { %v4494_v53 = vpop.permute.xlu1 %4493 }
0x1963   :  { %v4489_v42 = vpop.permute.xlu0 %4488  ;;  %v4496_v36 = vunpack.i.h.bf16 %v4494_v53  ;;  %v4495_v44 = vunpack.i.l.bf16 %v4494_v53 }
0x1964   :  { %v4491_v58 = vunpack.i.h.bf16 %v4489_v42  ;;  %v4490_v40 = vunpack.i.l.bf16 %v4489_v42 }
0x1966   :  { %v2888_v33 = vsel %vm7425_vm14, %v4491_v58, %v4496_v36  ;;  %v2890_v2 = vsel %vm7426_vm15, %v4496_v36, %v4491_v58  ;;  %vm7433_vm15 = vcmp.lt.s32.totalorder %v4780_v12, 1 }
0x196a   :  { %v4509_v10 = vpop.permute.xlu1 %4508 }
0x196b   :  { %v4504_v48 = vpop.permute.xlu0 %4503  ;;  %v4511_v13 = vunpack.i.h.bf16 %v4509_v10  ;;  %v4510_v49 = vunpack.i.l.bf16 %v4509_v10 }
0x196c   :  { %v4506_v55 = vunpack.i.h.bf16 %v4504_v48  ;;  %v4505_v52 = vunpack.i.l.bf16 %v4504_v48 }
0x196d   :  { %v2916_v20 = vsel %vm7427_vm6, %v4511_v13, %v4516_v63 }
0x196e   :  { %v2900_v47 = vsel %vm7421_vm13, %v4501_v31, %v4506_v55  ;;  %v2902_v37 = vsel %vm7422_vm11, %v4506_v55, %v4501_v31  ;;  %v2899_v54 = vsel %vm7423_vm12, %v4500_v15, %v4505_v52  ;;  %v2901_v5 = vsel %vm7424_vm5, %v4505_v52, %v4500_v15  ;;  %vm7428_vm13 = vmmov %vm7427_vm6 }
0x196f   :  { %v2918_v24 = vsel %vm7428_vm13, %v4516_v63, %v4511_v13  ;;  %vm7429_vm11 = vmmov %vm7425_vm14  ;;  %v2905_v36 = vsel %vm7265_vm8, %v2900_v47, %v2890_v2  ;;  %v2906_v48 = vsel %vm7267_vm2, %v2902_v37, %v2888_v33  ;;  %v2921_v13 = vsel %vm7237_vm4, %v2916_v20, %v2900_v47 }
0x1970   :  { %v2887_v27 = vsel %vm7429_vm11, %v4490_v40, %v4495_v44  ;;  %vm7430_vm12 = vmmov %vm7429_vm11  ;;  %v2922_v55 = vsel %vm7238_vm9, %v2918_v24, %v2902_v37  ;;  %v2925_v47 = vsel %vm7289_vm10, %v2916_v20, %v2905_v36 }
0x1971   :  { %v2889_v53 = vsel %vm7430_vm12, %v4495_v44, %v4490_v40  ;;  %vm7431_vm5 = vmmov %vm7427_vm6  ;;  %v2904_v50 = vsel %vm7267_vm2, %v2901_v5, %v2887_v27  ;;  %vm7437_vm12 = vnez %v7111_v30 }
0x1972   :  { %v2915_v42 = vsel %vm7431_vm5, %v4510_v49, %v4515_v11  ;;  %vm7432_vm14 = vmmov %vm7431_vm5  ;;  %v2903_v31 = vsel %vm7265_vm8, %v2899_v54, %v2889_v53  ;;  %v4524_v58 = vpop.permute.xlu1 %4523  ;;  %vm7438_vm5 = vnez %v7296_v23 }
0x1973   :  { %v2917_v10 = vsel %vm7432_vm14, %v4515_v11, %v4510_v49  ;;  %v4526_v52 = vunpack.i.h.bf16 %v4524_v58  ;;  %v4525_v15 = vunpack.i.l.bf16 %v4524_v58  ;;  %v4519_v44 = vpop.permute.xlu0 %4518  ;;  %v2919_v40 = vsel %vm7237_vm4, %v2915_v42, %v2899_v54  ;;  %vm7434_vm6 = vmmov %vm7433_vm15 }
0x1974   :  { %v2920_v49 = vsel %vm7238_vm9, %v2917_v10, %v2901_v5  ;;  %v4521_v63 = vunpack.i.h.bf16 %v4519_v44  ;;  %v4520_v11 = vunpack.i.l.bf16 %v4519_v44  ;;  %v2923_v9 = vsel %vm7289_vm10, %v2915_v42, %v2903_v31  ;;  %vm7435_vm13 = vmmov %vm7434_vm6 }
0x1975   :  { %v2924_v37 = vsel %vm7291_vm1, %v2917_v10, %v2904_v50  ;;  %v2926_v58 = vsel %vm7291_vm1, %v2918_v24, %v2906_v48  ;;  %vm7436_vm11 = vmmov %vm7434_vm6  ;;  %vm7439_vm14 = vnez %v7298_v51 }
0x1976   :  { %v2936_v54 = vsel %vm7433_vm15, %v4521_v63, %v4526_v52  ;;  %v2938_v5 = vsel %vm7434_vm6, %v4526_v52, %v4521_v63  ;;  %v2935_v44 = vsel %vm7435_vm13, %v4520_v11, %v4525_v15  ;;  %v2937_v42 = vsel %vm7436_vm11, %v4525_v15, %v4520_v11  ;;  %v4117_v11 = vld [vmem:[%s6917_s5 + $0xa8] sm:$0xff] }
0x1977   :  { %v2939_v20 = vsel %vm7243_vm0, %v2937_v42, %v2919_v40  ;;  %v2940_v10 = vsel %vm7437_vm12, %v2935_v44, %v2920_v49  ;;  %v2941_v24 = vsel %vm7243_vm0, %v2938_v5, %v2921_v13  ;;  %v2942_v31 = vsel %vm7437_vm12, %v2936_v54, %v2922_v55 }
0x1978   :  { %v2943_v50 = vsel %vm7438_vm5, %v2937_v42, %v2923_v9  ;;  %v2945_v36 = vsel %vm7438_vm5, %v2938_v5, %v2925_v47  ;;  %v2944_v48 = vsel %vm7439_vm14, %v2935_v44, %v2924_v37  ;;  %v2946_v52 = vsel %vm7439_vm14, %v2936_v54, %v2926_v58 }
0x1979   :  { %v2954_v15 = vpack.c.bf16 %v2945_v36, %v2943_v50  ;;  %v2955_v40 = vpack.c.bf16 %v2946_v52, %v2944_v48  ;;  %v2947_v13 = vsel %vm7386_vm7, %v2889_v53, %v2939_v20  ;;  %v2949_v55 = vsel %vm7386_vm7, %v2890_v2, %v2941_v24  ;;  %v4119_v53 = vld [vmem:[%s6917_s5 + $0xb8] sm:$0xff]  ;;  %v2992_v2 = vpop.f32.mrf.mxu1 }
0x197a   :  { %v3036_v49 = vpack.c.bf16 %v2949_v55, %v2947_v13  ;;  %v2948_v9 = vsel %vm7390_vm3, %v2887_v27, %v2940_v10  ;;  %v2950_v63 = vsel %vm7390_vm3, %v2888_v33, %v2942_v31  ;;  %vm7440_vm15 = vcmask 130048   ;;  %v2978_v33 = vpop.f32.mrf.mxu0 }
0x197b   :  { %3012 = vmatpush.bf16.msra.mxu2 %v2954_v15  ;;  %3026 = vmatpush.bf16.msra.mxu3 %v2955_v40  ;;  %v3037_v47 = vpack.c.bf16 %v2950_v63, %v2948_v9  ;;  %vm7441_vm6 = vmmov %vm7440_vm15 }
0x197c   :  { %3053 = vmatpush.bf16.msrb.mxu0 %v3036_v49  ;;  %vm7442_vm13 = vmmov %vm7441_vm6 }
0x197d   :  { %3067 = vmatpush.bf16.msrb.mxu1 %v3037_v47  ;;  %vm7443_vm11 = vmmov %vm7441_vm6 }
0x197e   :  { %4025 = vmatmul.msk.bf16.vlgmr.msra.gmra.mxu2 %vm7440_vm15, %v4117_v11  ;;  %4026 = vmatmul.msk.bf16.vlgmr.msra.gmra.mxu3 %vm7441_vm6, %v4117_v11 }
0x197f   :  { %4033 = vmatmul.msk.bf16.vlgmr.msrb.gmra.mxu0 %vm7442_vm13, %v4119_v53 }
0x1980   :  { %4034 = vmatmul.msk.bf16.vlgmr.msrb.gmra.mxu1 %vm7443_vm11, %v4119_v53 }
0x1981   :  { %v2994_v37 = vpop.f32.mrf.mxu1 }
0x1982   :  { %v2980_v27 = vpop.f32.mrf.mxu0 }
0x19fc   :  { %v3055_v58 = vpop.f32.mrf.mxu0 }
0x19fd   :  { %v3069_v54 = vpop.f32.mrf.mxu1 }
0x1a01   :  { %v3014_v5 = vpop.f32.mrf.mxu2  ;;  %v3028_v44 = vpop.f32.mrf.mxu3 }
0x1a02   :  { %v3015_v42 = vadd.f32 %v3014_v5, %v2978_v33  ;;  %v3029_v20 = vadd.f32 %v3028_v44, %v2992_v2 }
0x1a04   :  { %v3074_v10 = vadd.f32 %v3055_v58, %v3015_v42  ;;  %v3075_v24 = vadd.f32 %v3069_v54, %v3029_v20  ;;  %v3057_v15 = vpop.f32.mrf.mxu0  ;;  %v4037_v20 = vld [vmem:[%s6916_s4 + $0x80] sm:$0xff] }
0x1a05   :  { %v3071_v40 = vpop.f32.mrf.mxu1 }
0x1a06   :  { %v3084_v31 = vadd.f32 %v3075_v24, %v3074_v10 }
0x1a08   :  { %3085 = vadd.xlane.f32.xlu2 %v3084_v31 }
0x1a09   :  { %v3016_v50 = vpop.f32.mrf.mxu2  ;;  %v3030_v36 = vpop.f32.mrf.mxu3 }
0x1a0a   :  { %v3017_v48 = vadd.f32 %v3016_v50, %v2980_v27  ;;  %v3031_v52 = vadd.f32 %v3030_v36, %v2994_v37 }
0x1a0c   :  { %v3076_v13 = vadd.f32 %v3057_v15, %v3017_v48  ;;  %v3077_v55 = vadd.f32 %v3071_v40, %v3031_v52 }
0x1a0e   :  { %v3087_v49 = vadd.f32 %v3077_v55, %v3076_v13 }
0x1a10   :  { %3088 = vadd.xlane.f32.xlu0 %v3087_v49 }
0x1a7b   :  { %v3086_v9 = vpop.xlane.xlu2 %3085 }
0x1a7c   :  { %v3090_v63 = vmul.f32 0.00390625, %v3086_v9 }
0x1a7e   :  { %v3092_v11 = vsub.f32 %v3074_v10, %v3090_v63  ;;  %v3093_v47 = vsub.f32 %v3075_v24, %v3090_v63 }
0x1a80   :  { %v3096_v53 = vmul.f32 %v3092_v11, %v3092_v11  ;;  %v3097_v33 = vmul.f32 %v3093_v47, %v3093_v47 }
0x1a82   :  { %v3100_v2 = vadd.f32 %v3097_v33, %v3096_v53  ;;  %v4035_v53 = vld [vmem:[%s6915_s3 + $0x80] sm:$0xff] }
0x1a83   :  { %v3089_v58 = vpop.xlane.xlu0 %3088 }
0x1a84   :  { %v3091_v54 = vmul.f32 0.00390625, %v3089_v58  ;;  %3101 = vadd.xlane.f32.xlu1 %v3100_v2 }
0x1a86   :  { %v3094_v5 = vsub.f32 %v3076_v13, %v3091_v54  ;;  %v3095_v44 = vsub.f32 %v3077_v55, %v3091_v54 }
0x1a88   :  { %v3098_v27 = vmul.f32 %v3094_v5, %v3094_v5  ;;  %v3099_v37 = vmul.f32 %v3095_v44, %v3095_v44 }
0x1a8a   :  { %v3103_v42 = vadd.f32 %v3099_v37, %v3098_v27 }
0x1a8c   :  { %3104 = vadd.xlane.f32.xlu2 %v3103_v42  ;;  %v4036_v42 = vld [vmem:[%s6915_s3 + $0x88] sm:$0xff] }
0x1a9d   :  { %3148 = vperm.xlu1 %4146, %v4037_v20   ;;  %v4038_v20 = vld [vmem:[%s6916_s4 + $0x88] sm:$0xff] }
0x1af7   :  { %v3102_v31 = vpop.xlane.xlu1 %3101 }
0x1af8   :  { %v3106_v10 = vmul.f32 0.00390625, %v3102_v31 }
0x1afa   :  { %v3108_v24 = vadd.f32 1e-05, %v3106_v10 }
0x1afc   :  { %4659 = vrsqrt.f32 %v3108_v24  ;;  %vm3116_vm6 = vweird.f32 %v3108_v24 }
0x1aff   :  { %v3105_v50 = vpop.xlane.xlu2 %3104 }
0x1b00   :  { %v3107_v36 = vmul.f32 0.00390625, %v3105_v50  ;;  %v4041_v50 = vld [vmem:[%s6919_s7 + $0x70] sm:$0xff] }
0x1b02   :  { %v4660_v48 = vpop.eup %4659  ;;  %v3109_v52 = vadd.f32 1e-05, %v3107_v36 }
0x1b03   :  { %v3111_v15 = vmul.f32 %v4660_v48, %v3108_v24  ;;  %vm3117_vm15 = vweird.f32 %v4660_v48  ;;  %v4042_v24 = vld [vmem:[%s6919_s7 + $0x78] sm:$0xff] }
0x1b04   :  { %4661 = vrsqrt.f32 %v3109_v52  ;;  %vm3118_vm13 = vmor %vm3116_vm6, %vm3117_vm15  ;;  %vm3126_vm3 = vweird.f32 %v3109_v52 }
0x1b05   :  { %v3112_v40 = vmul.f32 %v4660_v48, %v3111_v15 }
0x1b07   :  { %v3113_v13 = vmul.f32 0.5, %v3112_v40 }
0x1b09   :  { %v3114_v55 = vsub.f32 1.5, %v3113_v13 }
0x1b0a   :  { %v4662_v49 = vpop.eup %4661 }
0x1b0b   :  { %v3115_v9 = vmul.f32 %v4660_v48, %v3114_v55  ;;  %v3121_v63 = vmul.f32 %v4662_v49, %v3109_v52  ;;  %vm3127_vm11 = vweird.f32 %v4662_v49 }
0x1b0c   :  { %vm3128_vm7 = vmor %vm3126_vm3, %vm3127_vm11 }
0x1b0d   :  { %v3122_v33 = vmul.f32 %v4662_v49, %v3121_v63  ;;  %v3119_v2 = vsel %vm3118_vm13, %v4660_v48, %v3115_v9  ;;  %vm7452_vm13 = vcmp.lt.s32.totalorder %v4780_v12, 9 }
0x1b0e   :  { %v3130_v58 = vmul.f32 %v4035_v53, %v3119_v2  ;;  %vm7454_vm11 = vmmov %vm7452_vm13 }
0x1b0f   :  { %v3123_v54 = vmul.f32 0.5, %v3122_v33  ;;  %v3149_v15 = vpop.permute.xlu1 %3148 }
0x1b10   :  { %3134 = vperm.xlu0 %4145, %v3130_v58  }
0x1b11   :  { %v3124_v27 = vsub.f32 1.5, %v3123_v54 }
0x1b13   :  { %v3125_v37 = vmul.f32 %v4662_v49, %v3124_v27 }
0x1b15   :  { %v3129_v31 = vsel %vm3128_vm7, %v4662_v49, %v3125_v37  ;;  %vm7444_vm7 = vcmask 130048  }
0x1b16   :  { %v3131_v10 = vmul.f32 %v4036_v42, %v3129_v31  ;;  %vm7445_vm3 = vmmov %vm7444_vm7 }
0x1b17   :  { %vm7450_vm15 = vmmov %vm7445_vm3 }
0x1b18   :  { %3153 = vperm.xlu0 %4145, %v4038_v20   ;;  %3139 = vperm.xlu2 %4144, %v3131_v10   ;;  %vm7451_vm6 = vmmov %vm7445_vm3 }
0x1b20   :  { %3183 = vperm.xlu0 %4145, %v4042_v24   ;;  %3178 = vperm.xlu2 %4144, %v4041_v50  }
0x1b72   :  { %v3140_v40 = vpop.permute.xlu2 %3139 }
0x1b73   :  { %v3144_v49 = vmul.f32 %v3140_v40, %v3094_v5  ;;  %v3145_v9 = vmul.f32 %v3140_v40, %v3095_v44 }
0x1b7a   :  { %v3179_v24 = vpop.permute.xlu2 %3178 }
0x1b82   :  { %v3135_v36 = vpop.permute.xlu0 %3134 }
0x1b83   :  { %v3142_v48 = vmul.f32 %v3135_v36, %v3092_v11  ;;  %v3143_v52 = vmul.f32 %v3135_v36, %v3093_v47  ;;  %v4120_v47 = vld [vmem:[%s6918_s6 + $0x38] sm:$0xff] }
0x1b85   :  { %v3156_v13 = vadd.f32 %v3149_v15, %v3142_v48  ;;  %v3157_v55 = vadd.f32 %v3149_v15, %v3143_v52 }
0x1b87   :  { %v3160_v53 = vmul.f32 0.2, %v3156_v13  ;;  %v3161_v33 = vmul.f32 0.2, %v3157_v55 }
0x1b89   :  { %v3164_v37 = vmax.f32 %v3156_v13, %v3160_v53  ;;  %v3165_v42 = vmax.f32 %v3157_v55, %v3161_v33 }
0x1b8a   :  { %v3154_v63 = vpop.permute.xlu0 %3153 }
0x1b8b   :  { %v3158_v2 = vadd.f32 %v3154_v63, %v3144_v49  ;;  %v3159_v58 = vadd.f32 %v3154_v63, %v3145_v9 }
0x1b8d   :  { %v3162_v54 = vmul.f32 0.2, %v3158_v2  ;;  %v3163_v27 = vmul.f32 0.2, %v3159_v58 }
0x1b8f   :  { %v3166_v20 = vmax.f32 %v3158_v2, %v3162_v54  ;;  %v3167_v31 = vmax.f32 %v3159_v58, %v3163_v27 }
0x1b91   :  { %v3171_v10 = vpack.c.bf16 %v3166_v20, %v3164_v37  ;;  %v3172_v11 = vpack.c.bf16 %v3167_v31, %v3165_v42  ;;  %v4122_v20 = vld [vmem:[%s6917_s5 + $0xc8] sm:$0xff] }
0x1b92   :  { %v3184_v50 = vpop.permute.xlu0 %3183 }
0x1b93   :  { %3201 = vmatpush.bf16.msrb.mxu2 %v3171_v10  ;;  %3215 = vmatpush.bf16.msrb.mxu3 %v3172_v11 }
0x1b96   :  { %4047 = vmatmul.msk.bf16.vlgmr.msrb.gmra.mxu2 %vm7444_vm7, %v4120_v47  ;;  %4048 = vmatmul.msk.bf16.vlgmr.msrb.gmra.mxu3 %vm7445_vm3, %v4120_v47  ;;  %vm7456_vm7 = vcmp.lt.s32.totalorder %v4780_v12, 119 }
0x1b97   :  { %vm7457_vm3 = vmmov %vm7456_vm7 }
0x1b98   :  { %vm7462_vm12 = vmmov %vm7457_vm3 }
0x1c19   :  { %v3203_v5 = vpop.f32.mrf.mxu2  ;;  %v3217_v44 = vpop.f32.mrf.mxu3 }
0x1c1a   :  { %v3204_v36 = vadd.f32 %v3203_v5, %v3179_v24  ;;  %v3218_v48 = vadd.f32 %v3217_v44, %v3179_v24 }
0x1c1c   :  { %v6557_v55 = vadd.f32 %v3204_v36, %v6411_v16  ;;  %v6560_v49 = vadd.f32 %v3218_v48, %v6414_v4 }
0x1c1e   :  { %7446 = vst [vmem:[#allocation17_spill] sm:$0xff] %v6557_v55 }
0x1c1f   :  { %7447 = vst [vmem:[#allocation19_spill] sm:$0xff] %v6560_v49 }
0x1c21   :  { %v3205_v52 = vpop.f32.mrf.mxu2  ;;  %v3219_v15 = vpop.f32.mrf.mxu3 }
0x1c22   :  { %v3206_v40 = vadd.f32 %v3205_v52, %v3184_v50  ;;  %v3220_v13 = vadd.f32 %v3219_v15, %v3184_v50 }
0x1c24   :  { %v6563_v9 = vadd.f32 %v3206_v40, %v6417_v38  ;;  %v6566_v63 = vadd.f32 %v3220_v13, %v6420_v17 }
0x1c26   :  { %7448 = vst [vmem:[#allocation20_spill] sm:$0xff] %v6563_v9  ;;  %v4532_v53 = vpack.i.bf16 %v6566_v63, %v6560_v49  ;;  %v3427_v33 = vpack.c.bf16 %v6566_v63, %v6560_v49  ;;  %v4537_v2 = vpack.i.bf16 %v6563_v9, %v6557_v55  ;;  %v3426_v16 = vpack.c.bf16 %v6563_v9, %v6557_v55 }
0x1c27   :  { %7449 = vst [vmem:[#allocation12_spill] sm:$0xff] %v6566_v63 }
0x1c28   :  { %4533 = vrot.lane.b32.xlu2 %v4532_v53, %s4701_s27  ;;  %3457 = vmatpush.bf16.msra.mxu1 %v3427_v33 }
0x1c29   :  { %4538 = vrot.lane.b32.xlu0 %v4537_v2, %s4702_s28  ;;  %4528 = vrot.lane.b32.xlu1 %v4537_v2, %s4701_s27 }
0x1c2a   :  { %3443 = vmatpush.bf16.msra.mxu0 %v3426_v16 }
0x1c2b   :  { %4058 = vmatmul.msk.bf16.vlgmr.msra.gmra.mxu1 %vm7451_vm6, %v4122_v20  ;;  %vm7460_vm6 = vcmp.lt.s32.totalorder %v4780_v12, 121 }
0x1c2d   :  { %4057 = vmatmul.msk.bf16.vlgmr.msra.gmra.mxu0 %vm7450_vm15, %v4122_v20  ;;  %vm7458_vm15 = vmmov %vm7454_vm11 }
0x1c30   :  { %4548 = vrot.lane.b32.xlu2 %v4537_v2, %s4703_s29 }
0x1c31   :  { %4553 = vrot.lane.b32.xlu0 %v4532_v53, %s4703_s29  ;;  %4543 = vrot.lane.b32.xlu1 %v4532_v53, %s4702_s28 }
0x1c38   :  { %4563 = vrot.lane.b32.xlu2 %v4532_v53, %s4704_s30 }
0x1c39   :  { %4568 = vrot.lane.b32.xlu0 %v4537_v2, %s4700_s25  ;;  %4558 = vrot.lane.b32.xlu1 %v4537_v2, %s4704_s30 }
0x1c40   :  { %4578 = vrot.lane.b32.xlu2 %v4537_v2, %s4696_s11 }
0x1c41   :  { %4583 = vrot.lane.b32.xlu0 %v4532_v53, %s4696_s11  ;;  %4573 = vrot.lane.b32.xlu1 %v4532_v53, %s4700_s25 }
0x1c48   :  { %4593 = vrot.lane.b32.xlu2 %v4532_v53, %s4697_s12 }
0x1c49   :  { %4598 = vrot.lane.b32.xlu0 %v4537_v2, %s4699_s24  ;;  %4588 = vrot.lane.b32.xlu1 %v4537_v2, %s4697_s12 }
0x1c50   :  { %4608 = vrot.lane.b32.xlu2 %v4537_v2, %s4705_s10 }
0x1c51   :  { %4613 = vrot.lane.b32.xlu0 %v4532_v53, %s4705_s10  ;;  %4603 = vrot.lane.b32.xlu1 %v4532_v53, %s4699_s24 }
0x1c58   :  { %4623 = vrot.lane.b32.xlu2 %v4532_v53, %s4706_s13 }
0x1c59   :  { %4618 = vrot.lane.b32.xlu1 %v4537_v2, %s4706_s13 }
0x1c82   :  { %v4534_v4 = vpop.permute.xlu2 %4533 }
0x1c83   :  { %v4536_v11 = vunpack.i.h.bf16 %v4534_v4  ;;  %v4535_v50 = vunpack.i.l.bf16 %v4534_v4 }
0x1c8a   :  { %v4549_v38 = vpop.permute.xlu2 %4548 }
0x1c8b   :  { %v4551_v36 = vunpack.i.h.bf16 %v4549_v38  ;;  %v4550_v15 = vunpack.i.l.bf16 %v4549_v38 }
0x1c92   :  { %v6596_v17 = vpop.permute.xlu2 %4563 }
0x1c93   :  { %v4566_v40 = vunpack.i.h.bf16 %v6596_v17  ;;  %v4565_v33 = vunpack.i.l.bf16 %v6596_v17 }
0x1c9a   :  { %v6598_v27 = vpop.permute.xlu2 %4578 }
0x1c9b   :  { %v4539_v58 = vpop.permute.xlu0 %4538  ;;  %v4529_v54 = vpop.permute.xlu1 %4528  ;;  %v4581_v2 = vunpack.i.h.bf16 %v6598_v27  ;;  %v4580_v16 = vunpack.i.l.bf16 %v6598_v27 }
0x1c9c   :  { %v4531_v47 = vunpack.i.h.bf16 %v4529_v54  ;;  %v4530_v5 = vunpack.i.l.bf16 %v4529_v54  ;;  %v4540_v13 = vunpack.i.l.bf16 %v4539_v58  ;;  %v4541_v20 = vunpack.i.h.bf16 %v4539_v58 }
0x1c9e   :  { %v6615_v54 = vsel %vm7452_vm13, %v4531_v47, %v4536_v11  ;;  %v6619_v4 = vsel %vm7454_vm11, %v4530_v5, %v4535_v50  ;;  %v6627_v17 = vsel %vm7458_vm15, %v4535_v50, %v4530_v5  ;;  %vm7461_vm13 = vmmov %vm7460_vm6  ;;  %v6643_v50 = vsel %vm7458_vm15, %v4536_v11, %v4531_v47  ;;  %v7468_v47 = vld [vmem:[#allocation15_spill] sm:$0xff] }
0x1c9f   :  { %7453 = vst [vmem:[#allocation21_spill] sm:$0xff] %v6615_v54  ;;  %vm7463_vm11 = vmmov %vm7460_vm6 }
0x1ca0   :  { %7455 = vst [vmem:[#allocation13_spill] sm:$0xff] %v6619_v4 }
0x1ca1   :  { %7459 = vst [vmem:[#allocation9_spill] sm:$0xff] %v6627_v17 }
0x1ca2   :  { %v6607_v44 = vpop.permute.xlu2 %4593  ;;  %7465 = vst [vmem:[#allocation10_spill] sm:$0xff] %v6643_v50 }
0x1ca3   :  { %v4554_v37 = vpop.permute.xlu0 %4553  ;;  %v4544_v42 = vpop.permute.xlu1 %4543 }
0x1ca4   :  { %v4545_v24 = vunpack.i.l.bf16 %v4544_v42  ;;  %v4556_v48 = vunpack.i.h.bf16 %v4554_v37  ;;  %v4546_v52 = vunpack.i.h.bf16 %v4544_v42  ;;  %v4555_v53 = vunpack.i.l.bf16 %v4554_v37 }
0x1ca6   :  { %v3246_v38 = vsel %vm7456_vm7, %v4540_v13, %v4545_v24  ;;  %v3248_v37 = vsel %vm7457_vm3, %v4545_v24, %v4540_v13  ;;  %v3263_v58 = vsel %vm7460_vm6, %v4551_v36, %v4556_v48  ;;  %v3265_v27 = vsel %vm7461_vm13, %v4556_v48, %v4551_v36  ;;  %vm7464_vm7 = vmmov %vm7460_vm6 }
0x1ca7   :  { %v3247_v42 = vsel %vm7462_vm12, %v4541_v20, %v4546_v52  ;;  %v3262_v63 = vsel %vm7463_vm11, %v4550_v15, %v4555_v53  ;;  %v3264_v9 = vsel %vm7464_vm7, %v4555_v53, %v4550_v15  ;;  %v3249_v24 = vsel %vm7457_vm3, %v4546_v52, %v4541_v20  ;;  %v7466_v53 = vld [vmem:[#allocation14_spill] sm:$0xff] }
0x1ca8   :  { %v3250_v36 = vsel %vm7265_vm8, %v3246_v38, %v6627_v17  ;;  %v3251_v48 = vsel %vm7267_vm2, %v3248_v37, %v6619_v4  ;;  %v4596_v15 = vunpack.i.h.bf16 %v6607_v44  ;;  %v4595_v52 = vunpack.i.l.bf16 %v6607_v44 }
0x1ca9   :  { %vm7467_vm12 = vnez %v7466_v53  ;;  %v3252_v11 = vsel %vm7265_vm8, %v3247_v42, %v6643_v50  ;;  %vm7469_vm6 = vnez %v7468_v47  ;;  %v3270_v17 = vsel %vm7289_vm10, %v3262_v63, %v3250_v36 }
0x1caa   :  { %v3268_v20 = vsel %vm7467_vm12, %v3263_v58, %v3247_v42  ;;  %v3269_v34 = vsel %vm7469_vm6, %v3265_v27, %v3249_v24  ;;  %v3266_v4 = vsel %vm7467_vm12, %v3262_v63, %v3246_v38  ;;  %v3267_v44 = vsel %vm7469_vm6, %v3264_v9, %v3248_v37  ;;  %v6667_v25 = vpop.permute.xlu2 %4608 }
0x1cab   :  { %v6605_v31 = vpop.permute.xlu0 %4568  ;;  %v4559_v10 = vpop.permute.xlu1 %4558  ;;  %v3271_v57 = vsel %vm7291_vm1, %v3264_v9, %v3251_v48  ;;  %vm7470_vm8 = vcmp.lt.s32.totalorder %v4780_v12, 123  ;;  %v3272_v38 = vsel %vm7289_vm10, %v3263_v58, %v3252_v11  ;;  %v4611_v48 = vunpack.i.h.bf16 %v6667_v25 }
0x1cac   :  { %v4560_v5 = vunpack.i.l.bf16 %v4559_v10  ;;  %v4561_v13 = vunpack.i.h.bf16 %v4559_v10  ;;  %v3253_v10 = vsel %vm7267_vm2, %v3249_v24, %v6615_v54  ;;  %vm7471_vm2 = vmmov %vm7470_vm8  ;;  %v4570_v53 = vunpack.i.l.bf16 %v6605_v31 }
0x1cad   :  { %vm7472_vm13 = vmmov %vm7471_vm2  ;;  %v4571_v47 = vunpack.i.h.bf16 %v6605_v31  ;;  %v3273_v54 = vsel %vm7291_vm1, %v3265_v27, %v3253_v10  ;;  %vm7475_vm10 = vnez %v7474_v56  ;;  %vm7476_vm7 = vnez %v7337_v61 }
0x1cae   :  { %v3282_v42 = vsel %vm7470_vm8, %v4560_v5, %v4565_v33  ;;  %v3283_v18 = vsel %vm7471_vm2, %v4561_v13, %v4566_v40  ;;  %v3284_v37 = vsel %vm7472_vm13, %v4565_v33, %v4560_v5  ;;  %vm7473_vm11 = vmmov %vm7471_vm2  ;;  %vm7477_vm3 = vcmp.lt.s32.totalorder %v4780_v12, 125 }
0x1caf   :  { %v3285_v63 = vsel %vm7473_vm11, %v4566_v40, %v4561_v13  ;;  %v3286_v58 = vsel %vm7475_vm10, %v3282_v42, %v3266_v4  ;;  %v3288_v33 = vsel %vm7475_vm10, %v3283_v18, %v3268_v20  ;;  %vm7478_vm15 = vmmov %vm7477_vm3  ;;  %v3290_v19 = vsel %vm7438_vm5, %v3282_v42, %v3270_v17 }
0x1cb0   :  { %v3289_v31 = vsel %vm7476_vm7, %v3285_v63, %v3269_v34  ;;  %vm7479_vm1 = vmmov %vm7477_vm3  ;;  %v3291_v20 = vsel %vm7439_vm14, %v3284_v37, %v3271_v57  ;;  %vm7481_vm6 = vcmp.lt.s32.totalorder %v4780_v12, 127  ;;  %vm7485_vm11 = vnez %v7147_v43 }
0x1cb1   :  { %vm7480_vm12 = vmmov %vm7479_vm1  ;;  %vm7486_vm10 = vnez %v7149_v3 }
0x1cb2   :  { %vm7482_vm8 = vmmov %vm7481_vm6 }
0x1cb3   :  { %v4584_v49 = vpop.permute.xlu0 %4583  ;;  %v4574_v55 = vpop.permute.xlu1 %4573  ;;  %vm7483_vm2 = vmmov %vm7481_vm6 }
0x1cb4   :  { %v4575_v50 = vunpack.i.l.bf16 %v4574_v55  ;;  %v4576_v24 = vunpack.i.h.bf16 %v4574_v55  ;;  %v4586_v9 = vunpack.i.h.bf16 %v4584_v49  ;;  %v4585_v36 = vunpack.i.l.bf16 %v4584_v49  ;;  %vm7484_vm13 = vmmov %vm7483_vm2 }
0x1cb5   :  { %v3287_v55 = vsel %vm7476_vm7, %v3284_v37, %v3267_v44  ;;  %vm7487_vm7 = vnez %v7151_v28 }
0x1cb6   :  { %v3302_v40 = vsel %vm7477_vm3, %v4570_v53, %v4575_v50  ;;  %v3304_v49 = vsel %vm7478_vm15, %v4575_v50, %v4570_v53  ;;  %v3303_v4 = vsel %vm7479_vm1, %v4571_v47, %v4576_v24  ;;  %v3305_v27 = vsel %vm7480_vm12, %v4576_v24, %v4571_v47 }
0x1cb7   :  { %v3323_v50 = vsel %vm7481_vm6, %v4581_v2, %v4586_v9  ;;  %v3325_v61 = vsel %vm7482_vm8, %v4586_v9, %v4581_v2  ;;  %v3322_v34 = vsel %vm7483_vm2, %v4580_v16, %v4585_v36  ;;  %v3324_v17 = vsel %vm7484_vm13, %v4585_v36, %v4580_v16 }
0x1cb8   :  { %v3306_v11 = vsel %vm7485_vm11, %v3302_v40, %v3286_v58  ;;  %v3307_v10 = vsel %vm7486_vm10, %v3304_v49, %v3287_v55  ;;  %v3308_v57 = vsel %vm7485_vm11, %v3303_v4, %v3288_v33  ;;  %v3309_v42 = vsel %vm7486_vm10, %v3305_v27, %v3289_v31 }
0x1cb9   :  { %v3310_v2 = vsel %vm7487_vm7, %v3302_v40, %v3290_v19  ;;  %v4610_v24 = vunpack.i.l.bf16 %v6667_v25  ;;  %v3292_v16 = vsel %vm7438_vm5, %v3283_v18, %v3272_v38  ;;  %v3293_v53 = vsel %vm7439_vm14, %v3285_v63, %v3273_v54 }
0x1cba   :  { %vm7488_vm3 = vnez %v7153_v0  ;;  %v3312_v43 = vsel %vm7487_vm7, %v3303_v4, %v3292_v16  ;;  %vm7489_vm15 = vnez %v7160_v7  ;;  %vm7490_vm1 = vnez %v7165_v21 }
0x1cbb   :  { %v4599_v5 = vpop.permute.xlu0 %4598  ;;  %v4589_v13 = vpop.permute.xlu1 %4588  ;;  %v3311_v9 = vsel %vm7488_vm3, %v3304_v49, %v3291_v20  ;;  %v3313_v3 = vsel %vm7488_vm3, %v3305_v27, %v3293_v53  ;;  %v3326_v36 = vsel %vm7489_vm15, %v3322_v34, %v3306_v11  ;;  %v3327_v47 = vsel %vm7490_vm1, %v3324_v17, %v3307_v10 }
0x1cbc   :  { %v4590_v44 = vunpack.i.l.bf16 %v4589_v13  ;;  %v4591_v37 = vunpack.i.h.bf16 %v4589_v13  ;;  %v3328_v23 = vsel %vm7489_vm15, %v3323_v50, %v3308_v57  ;;  %v3329_v51 = vsel %vm7490_vm1, %v3325_v61, %v3309_v42 }
0x1cbd   :  { %vm7491_vm5 = vnez %v7168_v8  ;;  %vm7492_vm14 = vcmp.lt.s32.totalorder %v4780_v12, 1  ;;  %vm7495_vm8 = vnez %v7170_v59  ;;  %v4601_v21 = vunpack.i.h.bf16 %v4599_v5 }
0x1cbe   :  { %v3330_v54 = vsel %vm7491_vm5, %v3322_v34, %v3310_v2  ;;  %v3344_v28 = vsel %vm7492_vm14, %v4595_v52, %v4590_v44  ;;  %vm7493_vm12 = vmmov %vm7492_vm14  ;;  %v3331_v38 = vsel %vm7495_vm8, %v3324_v17, %v3311_v9  ;;  %v4600_v63 = vunpack.i.l.bf16 %v4599_v5 }
0x1cbf   :  { %v3343_v0 = vsel %vm7493_vm12, %v4591_v37, %v4596_v15  ;;  %vm7494_vm6 = vmmov %vm7493_vm12  ;;  %v3332_v56 = vsel %vm7491_vm5, %v3323_v50, %v3312_v43  ;;  %v3333_v58 = vsel %vm7495_vm8, %v3325_v61, %v3313_v3  ;;  %vm7497_vm13 = vnez %v7173_v1  ;;  %v4624_v61 = vpop.permute.xlu2 %4623 }
0x1cc0   :  { %v3345_v18 = vsel %vm7494_vm6, %v4596_v15, %v4591_v37  ;;  %vm7496_vm2 = vmmov %vm7494_vm6  ;;  %v3346_v40 = vsel %vm7497_vm13, %v3344_v28, %v3326_v36  ;;  %vm7498_vm11 = vnez %v7176_v45  ;;  %vm7499_vm10 = vnez %v7186_v35 }
0x1cc1   :  { %v3342_v7 = vsel %vm7496_vm2, %v4590_v44, %v4595_v52  ;;  %v3348_v52 = vsel %vm7497_vm13, %v3345_v18, %v3328_v23  ;;  %v3349_v8 = vsel %vm7498_vm11, %v3343_v0, %v3329_v51  ;;  %v3350_v59 = vsel %vm7499_vm10, %v3344_v28, %v3330_v54 }
0x1cc2   :  { %v3347_v19 = vsel %vm7498_vm11, %v3342_v7, %v3327_v47  ;;  %vm7500_vm7 = vnez %v7189_v22  ;;  %v3352_v5 = vsel %vm7499_vm10, %v3345_v18, %v3332_v56  ;;  %vm7501_vm3 = vcmp.lt.s32.totalorder %v4780_v12, 3  ;;  %v7523_v56 = vld [vmem:[#allocation9_spill] sm:$0xff] }
0x1cc3   :  { %v4614_v55 = vpop.permute.xlu0 %4613  ;;  %v4604_v33 = vpop.permute.xlu1 %4603  ;;  %v3351_v27 = vsel %vm7500_vm7, %v3342_v7, %v3331_v38  ;;  %v3353_v13 = vsel %vm7500_vm7, %v3343_v0, %v3333_v58  ;;  %vm7502_vm15 = vmmov %vm7501_vm3  ;;  %vm7505_vm14 = vcmp.lt.s32.totalorder %v4780_v12, 5  ;;  %vm7507_vm6 = vnez %v7200_v46 }
0x1cc4   :  { %v4615_v15 = vunpack.i.l.bf16 %v4614_v55  ;;  %v4606_v49 = vunpack.i.h.bf16 %v4604_v33  ;;  %v4605_v31 = vunpack.i.l.bf16 %v4604_v33  ;;  %v4616_v4 = vunpack.i.h.bf16 %v4614_v55  ;;  %vm7503_vm1 = vmmov %vm7501_vm3 }
0x1cc5   :  { %vm7504_vm5 = vmmov %vm7503_vm1  ;;  %vm7508_vm8 = vnez %v7202_v26  ;;  %vm7511_vm11 = vnez %v7205_v39  ;;  %vm7512_vm10 = vnez %v7207_v6  ;;  %vm7513_vm7 = vnez %v7213_v41 }
0x1cc6   :  { %v3363_v1 = vsel %vm7501_vm3, %v4601_v21, %v4606_v49  ;;  %v3365_v45 = vsel %vm7502_vm15, %v4606_v49, %v4601_v21  ;;  %v3362_v20 = vsel %vm7503_vm1, %v4600_v63, %v4605_v31  ;;  %v3364_v50 = vsel %vm7504_vm5, %v4605_v31, %v4600_v63  ;;  %vm7506_vm12 = vmmov %vm7505_vm14  ;;  %v7530_v49 = vld [vmem:[#allocation21_spill] sm:$0xff] }
0x1cc7   :  { %v3382_v35 = vsel %vm7505_vm14, %v4610_v24, %v4615_v15  ;;  %v3384_v22 = vsel %vm7506_vm12, %v4615_v15, %v4610_v24  ;;  %v3366_v34 = vsel %vm7507_vm6, %v3364_v50, %v3346_v40  ;;  %v3367_v17 = vsel %vm7508_vm8, %v3362_v20, %v3347_v19  ;;  %vm7509_vm2 = vmmov %vm7506_vm12  ;;  %v7527_v40 = vld [vmem:[#allocation13_spill] sm:$0xff] }
0x1cc8   :  { %v3383_v11 = vsel %vm7509_vm2, %v4611_v48, %v4616_v4  ;;  %vm7510_vm13 = vmmov %vm7509_vm2  ;;  %v3368_v44 = vsel %vm7507_vm6, %v3365_v45, %v3348_v52  ;;  %v3369_v57 = vsel %vm7508_vm8, %v3363_v1, %v3349_v8  ;;  %v3370_v42 = vsel %vm7511_vm11, %v3364_v50, %v3350_v59  ;;  %v4121_v19 = vld [vmem:[%s6917_s5 + $0xc0] sm:$0xff]  ;;  %v4123_v8 = vld [vmem:[%s6917_s5 + $0xd0] sm:$0xff]  ;;  %v3459_v59 = vpop.f32.mrf.mxu1 }
0x1cc9   :  { %v3385_v10 = vsel %vm7510_vm13, %v4616_v4, %v4611_v48  ;;  %v3371_v2 = vsel %vm7512_vm10, %v3362_v20, %v3351_v27  ;;  %v3372_v37 = vsel %vm7511_vm11, %v3365_v45, %v3352_v5  ;;  %v3373_v25 = vsel %vm7512_vm10, %v3363_v1, %v3353_v13  ;;  %v3445_v4 = vpop.f32.mrf.mxu0 }
0x1cca   :  { %v4626_v24 = vunpack.i.h.bf16 %v4624_v61  ;;  %v4625_v48 = vunpack.i.l.bf16 %v4624_v61  ;;  %v3386_v46 = vsel %vm7237_vm4, %v3384_v22, %v3366_v34  ;;  %v3387_v26 = vsel %vm7238_vm9, %v3382_v35, %v3367_v17 }
0x1ccb   :  { %v4619_v16 = vpop.permute.xlu1 %4618  ;;  %v3388_v43 = vsel %vm7237_vm4, %v3385_v10, %v3368_v44  ;;  %v3389_v39 = vsel %vm7238_vm9, %v3383_v11, %v3369_v57  ;;  %v3390_v6 = vsel %vm7513_vm7, %v3384_v22, %v3370_v42  ;;  %v3392_v3 = vsel %vm7513_vm7, %v3385_v10, %v3372_v37 }
0x1ccc   :  { %v4621_v53 = vunpack.i.h.bf16 %v4619_v16  ;;  %v4620_v9 = vunpack.i.l.bf16 %v4619_v16  ;;  %vm7514_vm3 = vnez %v7225_v32  ;;  %vm7515_vm15 = vcmp.lt.s32.totalorder %v4780_v12, 7  ;;  %v7521_v12 = vld [vmem:[#allocation18_spill] sm:$0xff] }
0x1ccd   :  { %v3391_v36 = vsel %vm7514_vm3, %v3382_v35, %v3371_v2  ;;  %v3393_v47 = vsel %vm7514_vm3, %v3383_v11, %v3373_v25  ;;  %vm7516_vm4 = vmmov %vm7515_vm15  ;;  %vm7519_vm5 = vnez %v7111_v30  ;;  %vm7520_vm14 = vnez %v7215_v60  ;;  %v7526_v30 = vld [vmem:[#allocation10_spill] sm:$0xff]  ;;  %v7528_v60 = vld [vmem:[#allocation8_spill] sm:$0xff] }
0x1cce   :  { %v3403_v23 = vsel %vm7515_vm15, %v4621_v53, %v4626_v24  ;;  %v3405_v62 = vsel %vm7516_vm4, %v4626_v24, %v4621_v53  ;;  %vm7517_vm9 = vmmov %vm7516_vm4  ;;  %vm7522_vm12 = vnez %v7521_v12  ;;  %vm7529_vm6 = vnez %v7528_v60 }
0x1ccf   :  { %v3402_v14 = vsel %vm7517_vm9, %v4620_v9, %v4625_v48  ;;  %vm7518_vm1 = vmmov %vm7516_vm4  ;;  %v3408_v32 = vsel %vm7243_vm0, %v3405_v62, %v3388_v43  ;;  %v3409_v28 = vsel %vm7519_vm5, %v3403_v23, %v3389_v39  ;;  %v3412_v18 = vsel %vm7520_vm14, %v3405_v62, %v3392_v3  ;;  %v4075_v62 = vld [vmem:[%s6916_s4 + $0x90] sm:$0xff] }
0x1cd0   :  { %v3404_v51 = vsel %vm7518_vm1, %v4625_v48, %v4620_v9  ;;  %v3407_v54 = vsel %vm7519_vm5, %v3402_v14, %v3387_v26  ;;  %v3411_v38 = vsel %vm7522_vm12, %v3402_v14, %v3391_v36  ;;  %v3413_v7 = vsel %vm7522_vm12, %v3403_v23, %v3393_v47  ;;  %v3461_v5 = vpop.f32.mrf.mxu1  ;;  %v4079_v14 = vld [vmem:[%s6919_s7 + $0x80] sm:$0xff] }
0x1cd1   :  { %v3406_v41 = vsel %vm7243_vm0, %v3404_v51, %v3386_v46  ;;  %v3410_v0 = vsel %vm7520_vm14, %v3404_v51, %v3390_v6  ;;  %v3422_v63 = vpack.c.bf16 %v3413_v7, %v3411_v38  ;;  %vm7525_vm0 = vnez %v7524_v29  ;;  %v3447_v27 = vpop.f32.mrf.mxu0 }
0x1cd2   :  { %v3421_v21 = vpack.c.bf16 %v3412_v18, %v3410_v0  ;;  %v3414_v58 = vsel %vm7525_vm0, %v7523_v56, %v3406_v41  ;;  %v3416_v55 = vsel %vm7525_vm0, %v7526_v30, %v3408_v32  ;;  %v3415_v15 = vsel %vm7529_vm6, %v7527_v40, %v3407_v54 }
0x1cd3   :  { %v3503_v33 = vpack.c.bf16 %v3416_v55, %v3414_v58  ;;  %v3417_v31 = vsel %vm7529_vm6, %v7530_v49, %v3409_v28  ;;  %3493 = vmatpush.bf16.msra.mxu3 %v3422_v63  ;;  %vm7531_vm8 = vcmask 130048   ;;  %v4073_v58 = vld [vmem:[%s6915_s3 + $0x90] sm:$0xff]  ;;  %v4074_v49 = vld [vmem:[%s6915_s3 + $0x98] sm:$0xff]  ;;  %vm7544_vm6 = vcmask 1040384  }
0x1cd4   :  { %3479 = vmatpush.bf16.msra.mxu2 %v3421_v21  ;;  %v3504_v52 = vpack.c.bf16 %v3417_v31, %v3415_v15  ;;  %vm7532_vm2 = vmmov %vm7531_vm8  ;;  %v4076_v31 = vld [vmem:[%s6916_s4 + $0x98] sm:$0xff] }
0x1cd5   :  { %3520 = vmatpush.bf16.msrb.mxu0 %v3503_v33  ;;  %vm7533_vm13 = vmmov %vm7532_vm2 }
0x1cd6   :  { %3534 = vmatpush.bf16.msrb.mxu1 %v3504_v52  ;;  %4064 = vmatmul.msk.bf16.vlgmr.msra.gmra.mxu3 %vm7532_vm2, %v4121_v19  ;;  %vm7534_vm11 = vmmov %vm7532_vm2 }
0x1cd7   :  { %4063 = vmatmul.msk.bf16.vlgmr.msra.gmra.mxu2 %vm7531_vm8, %v4121_v19  ;;  %vm7535_vm1 = vmmov %vm7532_vm2 }
0x1cd8   :  { %4071 = vmatmul.msk.bf16.vlgmr.msrb.gmra.mxu0 %vm7533_vm13, %v4123_v8  ;;  %vm7536_vm5 = vmmov %vm7535_vm1 }
0x1cd9   :  { %4072 = vmatmul.msk.bf16.vlgmr.msrb.gmra.mxu1 %vm7534_vm11, %v4123_v8  ;;  %v4080_v8 = vld [vmem:[%s6919_s7 + $0x88] sm:$0xff]  ;;  %vm7541_vm14 = vmmov %vm7535_vm1 }
0x1cda   :  { %vm7542_vm12 = vmmov %vm7535_vm1 }
0x1d55   :  { %v3522_v13 = vpop.f32.mrf.mxu0 }
0x1d56   :  { %v3536_v1 = vpop.f32.mrf.mxu1 }
0x1d59   :  { %v3495_v20 = vpop.f32.mrf.mxu3 }
0x1d5a   :  { %v3481_v45 = vpop.f32.mrf.mxu2  ;;  %v3496_v61 = vadd.f32 %v3495_v20, %v3459_v59 }
0x1d5b   :  { %v3482_v50 = vadd.f32 %v3481_v45, %v3445_v4 }
0x1d5c   :  { %v3542_v22 = vadd.f32 %v3536_v1, %v3496_v61 }
0x1d5d   :  { %v3541_v35 = vadd.f32 %v3522_v13, %v3482_v50  ;;  %v3524_v57 = vpop.f32.mrf.mxu0 }
0x1d5e   :  { %v3538_v42 = vpop.f32.mrf.mxu1 }
0x1d5f   :  { %v3551_v34 = vadd.f32 %v3542_v22, %v3541_v35 }
0x1d61   :  { %3552 = vadd.xlane.f32.xlu0 %v3551_v34  ;;  %v3497_v11 = vpop.f32.mrf.mxu3 }
0x1d62   :  { %v3483_v17 = vpop.f32.mrf.mxu2  ;;  %v3498_v44 = vadd.f32 %v3497_v11, %v3461_v5 }
0x1d63   :  { %v3484_v10 = vadd.f32 %v3483_v17, %v3447_v27 }
0x1d64   :  { %v3544_v37 = vadd.f32 %v3538_v42, %v3498_v44 }
0x1d65   :  { %v3543_v2 = vadd.f32 %v3524_v57, %v3484_v10 }
0x1d67   :  { %v3554_v25 = vadd.f32 %v3544_v37, %v3543_v2 }
0x1d69   :  { %3555 = vadd.xlane.f32.xlu1 %v3554_v25 }
0x1dd4   :  { %v3553_v24 = vpop.xlane.xlu0 %3552 }
0x1dd5   :  { %v3557_v48 = vmul.f32 0.00390625, %v3553_v24  ;;  %v4124_v24 = vld [vmem:[%s6918_s6 + $0x40] sm:$0xff] }
0x1dd7   :  { %v3559_v16 = vsub.f32 %v3541_v35, %v3557_v48  ;;  %v3560_v46 = vsub.f32 %v3542_v22, %v3557_v48 }
0x1dd9   :  { %v3563_v26 = vmul.f32 %v3559_v16, %v3559_v16  ;;  %v3564_v53 = vmul.f32 %v3560_v46, %v3560_v46 }
0x1ddb   :  { %v3567_v9 = vadd.f32 %v3564_v53, %v3563_v26 }
0x1ddc   :  { %v3556_v43 = vpop.xlane.xlu1 %3555 }
0x1ddd   :  { %v3558_v39 = vmul.f32 0.00390625, %v3556_v43  ;;  %3568 = vadd.xlane.f32.xlu2 %v3567_v9 }
0x1ddf   :  { %v3561_v6 = vsub.f32 %v3543_v2, %v3558_v39  ;;  %v3562_v3 = vsub.f32 %v3544_v37, %v3558_v39 }
0x1de1   :  { %v3565_v36 = vmul.f32 %v3561_v6, %v3561_v6  ;;  %v3566_v47 = vmul.f32 %v3562_v3, %v3562_v3 }
0x1de3   :  { %v3570_v23 = vadd.f32 %v3566_v47, %v3565_v36  ;;  %v7537_v36 = vld [vmem:[#allocation17_spill] sm:$0xff] }
0x1de5   :  { %3571 = vadd.xlane.f32.xlu0 %v3570_v23  ;;  %v7538_v23 = vld [vmem:[#allocation19_spill] sm:$0xff] }
0x1df9   :  { %3615 = vperm.xlu0 %4145, %v4075_v62  }
0x1e01   :  { %3645 = vperm.xlu0 %4145, %v4079_v14   ;;  %v7539_v14 = vld [vmem:[#allocation20_spill] sm:$0xff] }
0x1e50   :  { %v3569_v51 = vpop.xlane.xlu2 %3568 }
0x1e51   :  { %v3573_v41 = vmul.f32 0.00390625, %v3569_v51 }
0x1e53   :  { %v3575_v54 = vadd.f32 1e-05, %v3573_v41  ;;  %v7540_v41 = vld [vmem:[#allocation12_spill] sm:$0xff] }
0x1e55   :  { %4663 = vrsqrt.f32 %v3575_v54  ;;  %vm3583_vm7 = vweird.f32 %v3575_v54 }
0x1e58   :  { %v3572_v32 = vpop.xlane.xlu0 %3571 }
0x1e59   :  { %v3574_v28 = vmul.f32 0.00390625, %v3572_v32 }
0x1e5b   :  { %v4664_v0 = vpop.eup %4663  ;;  %v3576_v18 = vadd.f32 1e-05, %v3574_v28 }
0x1e5c   :  { %v3578_v12 = vmul.f32 %v4664_v0, %v3575_v54  ;;  %vm3584_vm10 = vweird.f32 %v4664_v0 }
0x1e5d   :  { %4665 = vrsqrt.f32 %v3576_v18  ;;  %vm3585_vm3 = vmor %vm3583_vm7, %vm3584_vm10  ;;  %vm3593_vm4 = vweird.f32 %v3576_v18 }
0x1e5e   :  { %v3579_v38 = vmul.f32 %v4664_v0, %v3578_v12 }
0x1e60   :  { %v3580_v7 = vmul.f32 0.5, %v3579_v38 }
0x1e62   :  { %v3581_v21 = vsub.f32 1.5, %v3580_v7  ;;  %v7543_v7 = vlaneseq }
0x1e63   :  { %v4666_v63 = vpop.eup %4665 }
0x1e64   :  { %v3582_v56 = vmul.f32 %v4664_v0, %v3581_v21  ;;  %v3588_v29 = vmul.f32 %v4666_v63, %v3576_v18  ;;  %vm3594_vm15 = vweird.f32 %v4666_v63  ;;  %vm3732_vm0 = vcmp.lt.s32.totalorder %v7543_v7, 256 }
0x1e65   :  { %vm3595_vm9 = vmor %vm3593_vm4, %vm3594_vm15 }
0x1e66   :  { %v3589_v30 = vmul.f32 %v4666_v63, %v3588_v29  ;;  %v3586_v55 = vsel %vm3585_vm3, %v4664_v0, %v3582_v56  ;;  %v3693_v0 = vld [vmem:[%s6920_s8] sm:$0x1] }
0x1e67   :  { %v3597_v33 = vmul.f32 %v4073_v58, %v3586_v55 }
0x1e68   :  { %v3590_v40 = vmul.f32 0.5, %v3589_v30 }
0x1e69   :  { %3601 = vperm.xlu1 %4146, %v3597_v33  }
0x1e6a   :  { %v3591_v60 = vsub.f32 1.5, %v3590_v40 }
0x1e6b   :  { %v3616_v5 = vpop.permute.xlu0 %3615 }
0x1e6c   :  { %v3592_v15 = vmul.f32 %v4666_v63, %v3591_v60 }
0x1e6e   :  { %v3596_v19 = vsel %vm3595_vm9, %v4666_v63, %v3592_v15 }
0x1e6f   :  { %v3598_v52 = vmul.f32 %v4074_v49, %v3596_v19 }
0x1e71   :  { %3620 = vperm.xlu1 %4146, %v4076_v31   ;;  %3606 = vperm.xlu2 %4144, %v3598_v52  }
0x1e79   :  { %3650 = vperm.xlu2 %4144, %v4080_v8  }
0x1ecb   :  { %v3607_v13 = vpop.permute.xlu2 %3606 }
0x1ecc   :  { %v3611_v20 = vmul.f32 %v3607_v13, %v3561_v6  ;;  %v3612_v50 = vmul.f32 %v3607_v13, %v3562_v3 }
0x1ed3   :  { %v3651_v26 = vpop.permute.xlu2 %3650 }
0x1edb   :  { %v3602_v4 = vpop.permute.xlu1 %3601 }
0x1edc   :  { %v3609_v59 = vmul.f32 %v3602_v4, %v3559_v16  ;;  %v3610_v27 = vmul.f32 %v3602_v4, %v3560_v46  ;;  %v3646_v46 = vpop.permute.xlu0 %3645 }
0x1ede   :  { %v3623_v1 = vadd.f32 %v3616_v5, %v3609_v59  ;;  %v3624_v45 = vadd.f32 %v3616_v5, %v3610_v27 }
0x1ee0   :  { %v3627_v35 = vmul.f32 0.2, %v3623_v1  ;;  %v3628_v22 = vmul.f32 0.2, %v3624_v45 }
0x1ee2   :  { %v3631_v44 = vmax.f32 %v3623_v1, %v3627_v35  ;;  %v3632_v57 = vmax.f32 %v3624_v45, %v3628_v22 }
0x1ee3   :  { %v3621_v61 = vpop.permute.xlu1 %3620 }
0x1ee4   :  { %v3625_v34 = vadd.f32 %v3621_v61, %v3611_v20  ;;  %v3626_v17 = vadd.f32 %v3621_v61, %v3612_v50 }
0x1ee6   :  { %v3629_v11 = vmul.f32 0.2, %v3625_v34  ;;  %v3630_v10 = vmul.f32 0.2, %v3626_v17 }
0x1ee8   :  { %v3633_v42 = vmax.f32 %v3625_v34, %v3629_v11  ;;  %v3634_v2 = vmax.f32 %v3626_v17, %v3630_v10 }
0x1eea   :  { %v3638_v37 = vpack.c.bf16 %v3633_v42, %v3631_v44  ;;  %v3639_v25 = vpack.c.bf16 %v3634_v2, %v3632_v57 }
0x1eec   :  { %3668 = vmatpush.bf16.msrb.mxu2 %v3638_v37  ;;  %3682 = vmatpush.bf16.msrb.mxu3 %v3639_v25 }
0x1eef   :  { %4085 = vmatmul.msk.bf16.vlgmr.msrb.gmra.mxu2 %vm7535_vm1, %v4124_v24  ;;  %4086 = vmatmul.msk.bf16.vlgmr.msrb.gmra.mxu3 %vm7536_vm5, %v4124_v24 }
0x1f72   :  { %v3670_v48 = vpop.f32.mrf.mxu2  ;;  %v3684_v16 = vpop.f32.mrf.mxu3 }
0x1f73   :  { %v3671_v53 = vadd.f32 %v3670_v48, %v3646_v46  ;;  %v3685_v9 = vadd.f32 %v3684_v16, %v3646_v46 }
0x1f75   :  { %v3689_v47 = vadd.f32 %v3671_v53, %v7537_v36  ;;  %v3690_v62 = vadd.f32 %v3685_v9, %v7538_v23 }
0x1f7a   :  { %v3672_v43 = vpop.f32.mrf.mxu2  ;;  %v3686_v39 = vpop.f32.mrf.mxu3 }
0x1f7b   :  { %v3673_v6 = vadd.f32 %v3672_v43, %v3651_v26  ;;  %v3687_v3 = vadd.f32 %v3686_v39, %v3651_v26 }
0x1f7d   :  { %v3691_v51 = vadd.f32 %v3673_v6, %v7539_v14  ;;  %v3692_v54 = vadd.f32 %v3687_v3, %v7540_v41 }
0x1f7f   :  { %v3694_v32 = vpack.c.bf16 %v3691_v51, %v3689_v47  ;;  %v3695_v28 = vpack.c.bf16 %v3692_v54, %v3690_v62 }
0x1f81   :  { %3706 = vmatpush.bf16.msra.mxu0 %v3694_v32  ;;  %3719 = vmatpush.bf16.msra.mxu1 %v3695_v28 }
0x1f84   :  { %4087 = vmatmul.msk.bf16.vlgmr.msra.gmra.mxu0 %vm7541_vm14, %v3693_v0  ;;  %4088 = vmatmul.msk.bf16.vlgmr.msra.gmra.mxu1 %vm7542_vm12, %v3693_v0 }
0x2001   :  { %v3708_v18 = vpop.f32.mrf.mxu0  ;;  %v3721_v12 = vpop.f32.mrf.mxu1 }
0x2002   :  { %v3727_v38 = vrot.slane %v3721_v12, 7 }
0x2004   :  { %v3728_v21 = vsel %vm7544_vm6, %v3708_v18, %v3727_v38 }
0x2005   :  { %3734 = vst.msk [vmem:[#allocation2] sm:$0x3] %vm3732_vm0, %v3728_v21 }
0x2006   :  { %3745 = dma.vmem_to_hbm [thread:$0]  %s3741_s2, 32, %s3743_s18, [#allocation3]  }
0x2009   :  { %v3710_v63 = vpop.f32.mrf.mxu0  ;;  %v3723_v56 = vpop.f32.mrf.mxu1 }
0x200a   :  { %4692 = dma.done.wait [#allocation3], 32  }
0x200b   :  { %4693 = vsyncadd [#allocation3], 4294967264 }
0x200c   :  { %3750 = vsyncpa [#allocation3], 1 }

</bundles_post_ra>
